<compile_context>
chip_gen: v7x
topology: tpu7x:2x2x1
jax: 0.10.0
libtpu: 0.0.40
codegen_flags: <defaults>
</compile_context>

<pallas_src>
import jax
import jax.numpy as jnp
from jax.experimental import pallas as pl
from jax.experimental.pallas import tpu as pltpu

_MXU_DTYPE = jnp.bfloat16   # dtype fed to the MXU; accumulation stays f32
_BN_EPS = 1e-5
_LANES = 128                # pad channels to a multiple of the vreg lane width


def _fused_residual_block_kernel(x_ref, w1_ref, b1_ref, w2_ref, b2_ref, o_ref,
                                 acc_ref, mid_ref, y_ref):
    """Fused ResidualBlock forward for one batch element (NHWC, padded C).

    x_ref:   (1, H, W, Cp)  f32 input (channels zero-padded); also the residual
    w1_ref:  (Cp, 9*Cp)     bf16 conv1 taps, BN1 scale folded in:
                            w1_ref[ci, (dh*3+dw)*Cp + co] = w1[co,ci,dh,dw]*scale1[co]
    b1_ref:  (1, 1, Cp)     f32 BN1 shift (beta - mean*scale; 0 in padded lanes)
    w2_ref:  (Cp, 9*Cp)     bf16 conv2 taps, BN2 scale folded in
    b2_ref:  (1, 1, Cp)     f32 BN2 shift
    o_ref:   (1, H, W, Cp)  f32 output
    acc_ref: (H, W, Cp)     f32 VMEM accumulator (reused by both stages)
    mid_ref: (H, W, Cp)     bf16 VMEM intermediate activation
    y_ref:   (H, W, 9*Cp)   f32 VMEM matmul result (all 9 taps)
    """
    H, W, Cp = o_ref.shape[1], o_ref.shape[2], o_ref.shape[3]

    def conv3x3_accum(lhs_bf16, w_ref):
        # One MXU matmul per stage: (H*W, Cp) x (Cp, 9*Cp) -> f32 (H*W, 9*Cp).
        y_ref[...] = jnp.dot(
            lhs_bf16, w_ref[...], preferred_element_type=jnp.float32
        ).reshape(H, W, 9 * Cp)
        # Accumulate the 9 taps.  Borders are handled by clipping the slice
        # ranges (a tap whose input would come from the zero halo contributes
        # nothing), so no padded scratch / halo copy is needed.  Lane slices
        # (tap*Cp) are 128-aligned; only the dw=+-1 taps need a sublane shift,
        # which is inherent to the convolution.
        for dh in range(3):
            for dw in range(3):
                oh, ow = dh - 1, dw - 1
                lh, lw = H - abs(oh), W - abs(ow)
                src_h, dst_h = max(0, oh), max(0, -oh)
                src_w, dst_w = max(0, ow), max(0, -ow)
                tap = dh * 3 + dw
                contrib = y_ref[pl.ds(src_h, lh), pl.ds(src_w, lw),
                                pl.ds(tap * Cp, Cp)]
                acc_ref[pl.ds(dst_h, lh), pl.ds(dst_w, lw), :] = (
                    acc_ref[pl.ds(dst_h, lh), pl.ds(dst_w, lw), :] + contrib)

    # ---- stage 1: conv3x3 + folded BN1 (scale in weights, shift here) + ReLU
    # The BN shift initialises the accumulator (replaces the zero fill).
    acc_ref[...] = jnp.broadcast_to(b1_ref[...], (H, W, Cp))
    conv3x3_accum(x_ref[0].reshape(H * W, Cp).astype(w1_ref.dtype), w1_ref)
    mid_ref[...] = jnp.maximum(acc_ref[...], 0.0).astype(mid_ref.dtype)

    # ---- stage 2: conv3x3 + folded BN2 + residual(x) + ReLU -----------------
    # Residual (x already resident in VMEM) and shift initialise the
    # accumulator; the bf16 intermediate feeds the MXU directly.
    acc_ref[...] = x_ref[0] + b2_ref[...]
    conv3x3_accum(mid_ref[...].reshape(H * W, Cp), w2_ref)
    o_ref[0] = jnp.maximum(acc_ref[...], 0.0).astype(o_ref.dtype)


def _fold_bn(bn):
    scale = bn["gamma"] / jnp.sqrt(bn["var"] + _BN_EPS)
    shift = bn["beta"] - bn["mean"] * scale
    return scale, shift


def _round_up(x, m):
    return ((x + m - 1) // m) * m


def _pack_folded_weights(w_oihw, scale, cp):
    """(Cout, Cin, 3, 3) torch conv weight + per-Cout BN scale ->
       (Cp, 9*Cp) bf16 taps (BN scale folded in, channels zero-padded):
       packed[ci, (dh*3+dw)*Cp + co] = w[co, ci, dh, dw] * scale[co]."""
    cout, cin = w_oihw.shape[0], w_oihw.shape[1]
    w = w_oihw * scale[:, None, None, None]            # fold BN scale (in f32)
    w = jnp.transpose(w, (1, 2, 3, 0))                 # (Cin, kh, kw, Cout)
    w = jnp.pad(w, ((0, cp - cin), (0, 0), (0, 0), (0, cp - cout)))
    return w.reshape(cp, 9 * cp).astype(_MXU_DTYPE)


def _residual_block_pallas(x_nhwc, w1p, b1, w2p, b2):
    N, H, W, Cp = x_nhwc.shape
    flops = 2 * 2 * N * (H * W) * Cp * (9 * Cp)        # two MXU matmuls / image
    bytes_accessed = ((x_nhwc.size + N * H * W * Cp + b1.size + b2.size) * 4
                      + (w1p.size + w2p.size) * 2)
    return pl.pallas_call(
        _fused_residual_block_kernel,
        out_shape=jax.ShapeDtypeStruct((N, H, W, Cp), jnp.float32),
        grid_spec=pltpu.PrefetchScalarGridSpec(
            num_scalar_prefetch=0,
            grid=(N,),
            in_specs=[
                pl.BlockSpec((1, H, W, Cp), lambda n: (n, 0, 0, 0)),
                pl.BlockSpec((Cp, 9 * Cp), lambda n: (0, 0)),
                pl.BlockSpec((1, 1, Cp), lambda n: (0, 0, 0)),
                pl.BlockSpec((Cp, 9 * Cp), lambda n: (0, 0)),
                pl.BlockSpec((1, 1, Cp), lambda n: (0, 0, 0)),
            ],
            out_specs=pl.BlockSpec((1, H, W, Cp), lambda n: (n, 0, 0, 0)),
            scratch_shapes=[
                pltpu.VMEM((H, W, Cp), jnp.float32),       # f32 accumulator
                pltpu.VMEM((H, W, Cp), _MXU_DTYPE),        # bf16 intermediate
                pltpu.VMEM((H, W, 9 * Cp), jnp.float32),   # f32 matmul result
            ],
        ),
        compiler_params=pltpu.CompilerParams(
            dimension_semantics=("parallel",),
        ),
        cost_estimate=pl.CostEstimate(
            flops=flops, transcendentals=0, bytes_accessed=bytes_accessed),
    )(x_nhwc, w1p, b1, w2p, b2)


@jax.jit
def residual_block_forward(x_nchw, params):
    # TODO(synk): stride>1 / downsample not supported; requires Cin == Cout.
    N, C, H, W = x_nchw.shape
    cp = _round_up(C, _LANES)                          # lane-dense channel pad
    x = jnp.transpose(x_nchw, (0, 2, 3, 1)).astype(jnp.float32)   # NCHW -> NHWC
    x = jnp.pad(x, ((0, 0), (0, 0), (0, 0), (0, cp - C)))
    s1, b1 = _fold_bn(params["bn1"])
    s2, b2 = _fold_bn(params["bn2"])
    w1p = _pack_folded_weights(params["w1"], s1, cp)
    w2p = _pack_folded_weights(params["w2"], s2, cp)
    b1p = jnp.pad(b1, (0, cp - C)).reshape(1, 1, cp)
    b2p = jnp.pad(b2, (0, cp - C)).reshape(1, 1, cp)
    out = _residual_block_pallas(x, w1p, b1p, w2p, b2p)
    return jnp.transpose(out[..., :C], (0, 3, 1, 2))   # NHWC -> NCHW, unpad C


def init_params(key, in_channels, out_channels):
    """Deterministic synthetic parameters matching the PyTorch module shapes."""
    ks = jax.random.split(key, 10)
    w1 = jax.random.normal(ks[0], (out_channels, in_channels, 3, 3), jnp.float32) * 0.1
    w2 = jax.random.normal(ks[1], (out_channels, out_channels, 3, 3), jnp.float32) * 0.1
    bn1 = dict(
        gamma=1.0 + 0.1 * jax.random.normal(ks[2], (out_channels,), jnp.float32),
        beta=0.1 * jax.random.normal(ks[3], (out_channels,), jnp.float32),
        mean=0.1 * jax.random.normal(ks[4], (out_channels,), jnp.float32),
        var=jnp.abs(jax.random.normal(ks[5], (out_channels,), jnp.float32)) + 0.5,
    )
    bn2 = dict(
        gamma=1.0 + 0.1 * jax.random.normal(ks[6], (out_channels,), jnp.float32),
        beta=0.1 * jax.random.normal(ks[7], (out_channels,), jnp.float32),
        mean=0.1 * jax.random.normal(ks[8], (out_channels,), jnp.float32),
        var=jnp.abs(jax.random.normal(ks[9], (out_channels,), jnp.float32)) + 0.5,
    )
    return dict(w1=w1, w2=w2, bn1=bn1, bn2=bn2)


def _reference_forward(x_nchw, params, conv_dtype=jnp.float32):
    """Pure-JAX reference. conv_dtype=bf16 mirrors the kernel's MXU feeding."""
    def conv(x, w):  # NCHW, OIHW
        return jax.lax.conv_general_dilated(
            x.astype(conv_dtype), w.astype(conv_dtype),
            window_strides=(1, 1), padding=((1, 1), (1, 1)),
            dimension_numbers=("NCHW", "OIHW", "NCHW"),
            preferred_element_type=jnp.float32)

    s1, b1 = _fold_bn(params["bn1"])
    s2, b2 = _fold_bn(params["bn2"])
    w1 = params["w1"] * s1[:, None, None, None]
    w2 = params["w2"] * s2[:, None, None, None]
    out = jax.nn.relu(conv(x_nchw, w1) + b1[None, :, None, None])
    out = conv(out, w2) + b2[None, :, None, None]
    return jax.nn.relu(out + x_nchw)


if __name__ == "__main__":
    key = jax.random.PRNGKey(0)
    k_x, k_p = jax.random.split(key)

    N, C, H, W = 2, 4, 16, 16          # in_channels == out_channels, stride=1
    x = jax.random.normal(k_x, (N, C, H, W), jnp.float32)
    params = init_params(k_p, C, C)

    out = jax.block_until_ready(residual_block_forward(x, params))
    assert out.shape == (N, C, H, W)

    # Tight check vs a lax reference with the same bf16 MXU feeding.
    ref_bf16 = _reference_forward(x, params, conv_dtype=_MXU_DTYPE)
    assert jnp.allclose(out, ref_bf16, rtol=1e-3, atol=1e-3), \
        "mismatch vs bf16-matched reference"
    # Loose sanity check vs the full-f32 reference (difference = bf16 rounding only).
    ref_f32 = _reference_forward(x, params, conv_dtype=jnp.float32)
    assert jnp.allclose(out, ref_f32, rtol=3e-2, atol=3e-2), \
        "mismatch vs f32 reference"

    print("KERNEL_OK")
</pallas_src>

<mosaic_0001>
module attributes {stable_mosaic.version = 11 : i64} {
  func.func @_fused_residual_block_kernel(%arg0: i32, %arg1: memref<1x16x16x128xf32, #tpu.memory_space<vmem>>, %arg2: memref<128x1152xbf16, #tpu.memory_space<vmem>>, %arg3: memref<1x1x128xf32, #tpu.memory_space<vmem>>, %arg4: memref<128x1152xbf16, #tpu.memory_space<vmem>>, %arg5: memref<1x1x128xf32, #tpu.memory_space<vmem>>, %arg6: memref<1x16x16x128xf32, #tpu.memory_space<vmem>>, %arg7: memref<16x16x128xf32, #tpu.memory_space<vmem>>, %arg8: memref<16x16x128xbf16, #tpu.memory_space<vmem>>, %arg9: memref<16x16x1152xf32, #tpu.memory_space<vmem>>) attributes {dimension_semantics = [#tpu.dimension_semantics<parallel>], iteration_bounds = array<i64: 2>, scalar_prefetch = 0 : i64, scratch_operands = 3 : i64, tpu.core_type = #tpu.core_type<tc>, window_params = [{transform_indices = @transform_0, window_bounds = array<i64: 1, 16, 16, 128>}, {pipeline_mode = #tpu.pipeline_mode<synchronous>, transform_indices = @transform_1, window_bounds = array<i64: 128, 1152>}, {pipeline_mode = #tpu.pipeline_mode<synchronous>, transform_indices = @transform_2, window_bounds = array<i64: 1, 1, 128>}, {pipeline_mode = #tpu.pipeline_mode<synchronous>, transform_indices = @transform_3, window_bounds = array<i64: 128, 1152>}, {pipeline_mode = #tpu.pipeline_mode<synchronous>, transform_indices = @transform_4, window_bounds = array<i64: 1, 1, 128>}, {transform_indices = @transform_5, window_bounds = array<i64: 1, 16, 16, 128>}]} {
    %c0 = arith.constant 0 : index
    %c0_0 = arith.constant 0 : index
    %c0_1 = arith.constant 0 : index
    %0 = vector.load %arg3[%c0, %c0_0, %c0_1] : memref<1x1x128xf32, #tpu.memory_space<vmem>>, vector<1x1x128xf32>
    %1 = vector.shape_cast %0 : vector<1x1x128xf32> to vector<1x1x128xf32>
    %2 = vector.broadcast %1 : vector<1x1x128xf32> to vector<16x16x128xf32>
    %c0_2 = arith.constant 0 : index
    %c0_3 = arith.constant 0 : index
    %c0_4 = arith.constant 0 : index
    %3 = vector.load %arg7[%c0_2, %c0_3, %c0_4] : memref<16x16x128xf32, #tpu.memory_space<vmem>>, vector<16x16x128xf32>
    tpu.vector_store %arg7[%c0_2, %c0_3, %c0_4], %2 {strides = array<i32>} : memref<16x16x128xf32, #tpu.memory_space<vmem>>, vector<16x16x128xf32>,
    %c0_5 = arith.constant 0 : index
    %c0_6 = arith.constant 0 : index
    %c0_7 = arith.constant 0 : index
    %c0_8 = arith.constant 0 : index
    %4 = vector.load %arg1[%c0_5, %c0_6, %c0_7, %c0_8] : memref<1x16x16x128xf32, #tpu.memory_space<vmem>>, vector<1x16x16x128xf32>
    %5 = vector.shape_cast %4 : vector<1x16x16x128xf32> to vector<16x16x128xf32>
    %6 = vector.shape_cast %5 : vector<16x16x128xf32> to vector<256x128xf32>
    %7 = arith.truncf %6 : vector<256x128xf32> to vector<256x128xbf16>
    %c0_9 = arith.constant 0 : index
    %c0_10 = arith.constant 0 : index
    %8 = vector.load %arg2[%c0_9, %c0_10] : memref<128x1152xbf16, #tpu.memory_space<vmem>>, vector<128x1152xbf16>
    %cst = arith.constant dense<0.000000e+00> : vector<256x1152xf32>
    %9 = tpu.matmul %7, %8, %cst {dimension_numbers = #tpu.dot_dimension_numbers<[1], [0], [0], [1], [0, 0, 1, 1], [], []>} : vector<256x128xbf16>, vector<128x1152xbf16>, vector<256x1152xf32> -> vector<256x1152xf32>
    %10 = vector.shape_cast %9 : vector<256x1152xf32> to vector<16x16x1152xf32>
    %c0_11 = arith.constant 0 : index
    %c0_12 = arith.constant 0 : index
    %c0_13 = arith.constant 0 : index
    %11 = vector.load %arg9[%c0_11, %c0_12, %c0_13] : memref<16x16x1152xf32, #tpu.memory_space<vmem>>, vector<16x16x1152xf32>
    tpu.vector_store %arg9[%c0_11, %c0_12, %c0_13], %10 {strides = array<i32>} : memref<16x16x1152xf32, #tpu.memory_space<vmem>>, vector<16x16x1152xf32>,
    %c0_14 = arith.constant 0 : index
    %c0_15 = arith.constant 0 : index
    %c0_16 = arith.constant 0 : index
    %12 = vector.load %arg9[%c0_14, %c0_15, %c0_16] : memref<16x16x1152xf32, #tpu.memory_space<vmem>>, vector<15x15x128xf32>
    %c1 = arith.constant 1 : index
    %c1_17 = arith.constant 1 : index
    %c0_18 = arith.constant 0 : index
    %13 = vector.load %arg7[%c1, %c1_17, %c0_18] : memref<16x16x128xf32, #tpu.memory_space<vmem>>, vector<15x15x128xf32>
    %14 = arith.addf %13, %12 : vector<15x15x128xf32>
    %c1_19 = arith.constant 1 : index
    %c1_20 = arith.constant 1 : index
    %c0_21 = arith.constant 0 : index
    %15 = vector.load %arg7[%c1_19, %c1_20, %c0_21] : memref<16x16x128xf32, #tpu.memory_space<vmem>>, vector<15x15x128xf32>
    tpu.vector_store %arg7[%c1_19, %c1_20, %c0_21], %14 {strides = array<i32>} : memref<16x16x128xf32, #tpu.memory_space<vmem>>, vector<15x15x128xf32>,
    %c0_22 = arith.constant 0 : index
    %c0_23 = arith.constant 0 : index
    %c128 = arith.constant 128 : index
    %16 = vector.load %arg9[%c0_22, %c0_23, %c128] : memref<16x16x1152xf32, #tpu.memory_space<vmem>>, vector<15x16x128xf32>
    %c1_24 = arith.constant 1 : index
    %c0_25 = arith.constant 0 : index
    %c0_26 = arith.constant 0 : index
    %17 = vector.load %arg7[%c1_24, %c0_25, %c0_26] : memref<16x16x128xf32, #tpu.memory_space<vmem>>, vector<15x16x128xf32>
    %18 = arith.addf %17, %16 : vector<15x16x128xf32>
    %c1_27 = arith.constant 1 : index
    %c0_28 = arith.constant 0 : index
    %c0_29 = arith.constant 0 : index
    %19 = vector.load %arg7[%c1_27, %c0_28, %c0_29] : memref<16x16x128xf32, #tpu.memory_space<vmem>>, vector<15x16x128xf32>
    tpu.vector_store %arg7[%c1_27, %c0_28, %c0_29], %18 {strides = array<i32>} : memref<16x16x128xf32, #tpu.memory_space<vmem>>, vector<15x16x128xf32>,
    %c0_30 = arith.constant 0 : index
    %c1_31 = arith.constant 1 : index
    %c256 = arith.constant 256 : index
    %20 = vector.load %arg9[%c0_30, %c1_31, %c256] : memref<16x16x1152xf32, #tpu.memory_space<vmem>>, vector<15x15x128xf32>
    %c1_32 = arith.constant 1 : index
    %c0_33 = arith.constant 0 : index
    %c0_34 = arith.constant 0 : index
    %21 = vector.load %arg7[%c1_32, %c0_33, %c0_34] : memref<16x16x128xf32, #tpu.memory_space<vmem>>, vector<15x15x128xf32>
    %22 = arith.addf %21, %20 : vector<15x15x128xf32>
    %c1_35 = arith.constant 1 : index
    %c0_36 = arith.constant 0 : index
    %c0_37 = arith.constant 0 : index
    %23 = vector.load %arg7[%c1_35, %c0_36, %c0_37] : memref<16x16x128xf32, #tpu.memory_space<vmem>>, vector<15x15x128xf32>
    tpu.vector_store %arg7[%c1_35, %c0_36, %c0_37], %22 {strides = array<i32>} : memref<16x16x128xf32, #tpu.memory_space<vmem>>, vector<15x15x128xf32>,
    %c0_38 = arith.constant 0 : index
    %c0_39 = arith.constant 0 : index
    %c384 = arith.constant 384 : index
    %24 = vector.load %arg9[%c0_38, %c0_39, %c384] : memref<16x16x1152xf32, #tpu.memory_space<vmem>>, vector<16x15x128xf32>
    %c0_40 = arith.constant 0 : index
    %c1_41 = arith.constant 1 : index
    %c0_42 = arith.constant 0 : index
    %25 = vector.load %arg7[%c0_40, %c1_41, %c0_42] : memref<16x16x128xf32, #tpu.memory_space<vmem>>, vector<16x15x128xf32>
    %26 = arith.addf %25, %24 : vector<16x15x128xf32>
    %c0_43 = arith.constant 0 : index
    %c1_44 = arith.constant 1 : index
    %c0_45 = arith.constant 0 : index
    %27 = vector.load %arg7[%c0_43, %c1_44, %c0_45] : memref<16x16x128xf32, #tpu.memory_space<vmem>>, vector<16x15x128xf32>
    tpu.vector_store %arg7[%c0_43, %c1_44, %c0_45], %26 {strides = array<i32>} : memref<16x16x128xf32, #tpu.memory_space<vmem>>, vector<16x15x128xf32>,
    %c0_46 = arith.constant 0 : index
    %c0_47 = arith.constant 0 : index
    %c512 = arith.constant 512 : index
    %28 = vector.load %arg9[%c0_46, %c0_47, %c512] : memref<16x16x1152xf32, #tpu.memory_space<vmem>>, vector<16x16x128xf32>
    %c0_48 = arith.constant 0 : index
    %c0_49 = arith.constant 0 : index
    %c0_50 = arith.constant 0 : index
    %29 = vector.load %arg7[%c0_48, %c0_49, %c0_50] : memref<16x16x128xf32, #tpu.memory_space<vmem>>, vector<16x16x128xf32>
    %30 = arith.addf %29, %28 : vector<16x16x128xf32>
    %c0_51 = arith.constant 0 : index
    %c0_52 = arith.constant 0 : index
    %c0_53 = arith.constant 0 : index
    %31 = vector.load %arg7[%c0_51, %c0_52, %c0_53] : memref<16x16x128xf32, #tpu.memory_space<vmem>>, vector<16x16x128xf32>
    tpu.vector_store %arg7[%c0_51, %c0_52, %c0_53], %30 {strides = array<i32>} : memref<16x16x128xf32, #tpu.memory_space<vmem>>, vector<16x16x128xf32>,
    %c0_54 = arith.constant 0 : index
    %c1_55 = arith.constant 1 : index
    %c640 = arith.constant 640 : index
    %32 = vector.load %arg9[%c0_54, %c1_55, %c640] : memref<16x16x1152xf32, #tpu.memory_space<vmem>>, vector<16x15x128xf32>
    %c0_56 = arith.constant 0 : index
    %c0_57 = arith.constant 0 : index
    %c0_58 = arith.constant 0 : index
    %33 = vector.load %arg7[%c0_56, %c0_57, %c0_58] : memref<16x16x128xf32, #tpu.memory_space<vmem>>, vector<16x15x128xf32>
    %34 = arith.addf %33, %32 : vector<16x15x128xf32>
    %c0_59 = arith.constant 0 : index
    %c0_60 = arith.constant 0 : index
    %c0_61 = arith.constant 0 : index
    %35 = vector.load %arg7[%c0_59, %c0_60, %c0_61] : memref<16x16x128xf32, #tpu.memory_space<vmem>>, vector<16x15x128xf32>
    tpu.vector_store %arg7[%c0_59, %c0_60, %c0_61], %34 {strides = array<i32>} : memref<16x16x128xf32, #tpu.memory_space<vmem>>, vector<16x15x128xf32>,
    %c1_62 = arith.constant 1 : index
    %c0_63 = arith.constant 0 : index
    %c768 = arith.constant 768 : index
    %36 = vector.load %arg9[%c1_62, %c0_63, %c768] : memref<16x16x1152xf32, #tpu.memory_space<vmem>>, vector<15x15x128xf32>
    %c0_64 = arith.constant 0 : index
    %c1_65 = arith.constant 1 : index
    %c0_66 = arith.constant 0 : index
    %37 = vector.load %arg7[%c0_64, %c1_65, %c0_66] : memref<16x16x128xf32, #tpu.memory_space<vmem>>, vector<15x15x128xf32>
    %38 = arith.addf %37, %36 : vector<15x15x128xf32>
    %c0_67 = arith.constant 0 : index
    %c1_68 = arith.constant 1 : index
    %c0_69 = arith.constant 0 : index
    %39 = vector.load %arg7[%c0_67, %c1_68, %c0_69] : memref<16x16x128xf32, #tpu.memory_space<vmem>>, vector<15x15x128xf32>
    tpu.vector_store %arg7[%c0_67, %c1_68, %c0_69], %38 {strides = array<i32>} : memref<16x16x128xf32, #tpu.memory_space<vmem>>, vector<15x15x128xf32>,
    %c1_70 = arith.constant 1 : index
    %c0_71 = arith.constant 0 : index
    %c896 = arith.constant 896 : index
    %40 = vector.load %arg9[%c1_70, %c0_71, %c896] : memref<16x16x1152xf32, #tpu.memory_space<vmem>>, vector<15x16x128xf32>
    %c0_72 = arith.constant 0 : index
    %c0_73 = arith.constant 0 : index
    %c0_74 = arith.constant 0 : index
    %41 = vector.load %arg7[%c0_72, %c0_73, %c0_74] : memref<16x16x128xf32, #tpu.memory_space<vmem>>, vector<15x16x128xf32>
    %42 = arith.addf %41, %40 : vector<15x16x128xf32>
    %c0_75 = arith.constant 0 : index
    %c0_76 = arith.constant 0 : index
    %c0_77 = arith.constant 0 : index
    %43 = vector.load %arg7[%c0_75, %c0_76, %c0_77] : memref<16x16x128xf32, #tpu.memory_space<vmem>>, vector<15x16x128xf32>
    tpu.vector_store %arg7[%c0_75, %c0_76, %c0_77], %42 {strides = array<i32>} : memref<16x16x128xf32, #tpu.memory_space<vmem>>, vector<15x16x128xf32>,
    %c1_78 = arith.constant 1 : index
    %c1_79 = arith.constant 1 : index
    %c1024 = arith.constant 1024 : index
    %44 = vector.load %arg9[%c1_78, %c1_79, %c1024] : memref<16x16x1152xf32, #tpu.memory_space<vmem>>, vector<15x15x128xf32>
    %c0_80 = arith.constant 0 : index
    %c0_81 = arith.constant 0 : index
    %c0_82 = arith.constant 0 : index
    %45 = vector.load %arg7[%c0_80, %c0_81, %c0_82] : memref<16x16x128xf32, #tpu.memory_space<vmem>>, vector<15x15x128xf32>
    %46 = arith.addf %45, %44 : vector<15x15x128xf32>
    %c0_83 = arith.constant 0 : index
    %c0_84 = arith.constant 0 : index
    %c0_85 = arith.constant 0 : index
    %47 = vector.load %arg7[%c0_83, %c0_84, %c0_85] : memref<16x16x128xf32, #tpu.memory_space<vmem>>, vector<15x15x128xf32>
    tpu.vector_store %arg7[%c0_83, %c0_84, %c0_85], %46 {strides = array<i32>} : memref<16x16x128xf32, #tpu.memory_space<vmem>>, vector<15x15x128xf32>,
    %c0_86 = arith.constant 0 : index
    %c0_87 = arith.constant 0 : index
    %c0_88 = arith.constant 0 : index
    %48 = vector.load %arg7[%c0_86, %c0_87, %c0_88] : memref<16x16x128xf32, #tpu.memory_space<vmem>>, vector<16x16x128xf32>
    %cst_89 = arith.constant 0.000000e+00 : f32
    %49 = vector.broadcast %cst_89 : f32 to vector<16x16x128xf32>
    %50 = arith.maximumf %48, %49 : vector<16x16x128xf32>
    %51 = arith.truncf %50 : vector<16x16x128xf32> to vector<16x16x128xbf16>
    %c0_90 = arith.constant 0 : index
    %c0_91 = arith.constant 0 : index
    %c0_92 = arith.constant 0 : index
    %52 = vector.load %arg8[%c0_90, %c0_91, %c0_92] : memref<16x16x128xbf16, #tpu.memory_space<vmem>>, vector<16x16x128xbf16>
    tpu.vector_store %arg8[%c0_90, %c0_91, %c0_92], %51 {strides = array<i32>} : memref<16x16x128xbf16, #tpu.memory_space<vmem>>, vector<16x16x128xbf16>,
    %c0_93 = arith.constant 0 : index
    %c0_94 = arith.constant 0 : index
    %c0_95 = arith.constant 0 : index
    %c0_96 = arith.constant 0 : index
    %53 = vector.load %arg1[%c0_93, %c0_94, %c0_95, %c0_96] : memref<1x16x16x128xf32, #tpu.memory_space<vmem>>, vector<1x16x16x128xf32>
    %54 = vector.shape_cast %53 : vector<1x16x16x128xf32> to vector<16x16x128xf32>
    %c0_97 = arith.constant 0 : index
    %c0_98 = arith.constant 0 : index
    %c0_99 = arith.constant 0 : index
    %55 = vector.load %arg5[%c0_97, %c0_98, %c0_99] : memref<1x1x128xf32, #tpu.memory_space<vmem>>, vector<1x1x128xf32>
    %56 = vector.broadcast %55 : vector<1x1x128xf32> to vector<16x16x128xf32>
    %57 = arith.addf %54, %56 : vector<16x16x128xf32>
    %c0_100 = arith.constant 0 : index
    %c0_101 = arith.constant 0 : index
    %c0_102 = arith.constant 0 : index
    %58 = vector.load %arg7[%c0_100, %c0_101, %c0_102] : memref<16x16x128xf32, #tpu.memory_space<vmem>>, vector<16x16x128xf32>
    tpu.vector_store %arg7[%c0_100, %c0_101, %c0_102], %57 {strides = array<i32>} : memref<16x16x128xf32, #tpu.memory_space<vmem>>, vector<16x16x128xf32>,
    %c0_103 = arith.constant 0 : index
    %c0_104 = arith.constant 0 : index
    %c0_105 = arith.constant 0 : index
    %59 = vector.load %arg8[%c0_103, %c0_104, %c0_105] : memref<16x16x128xbf16, #tpu.memory_space<vmem>>, vector<16x16x128xbf16>
    %60 = vector.shape_cast %59 : vector<16x16x128xbf16> to vector<256x128xbf16>
    %c0_106 = arith.constant 0 : index
    %c0_107 = arith.constant 0 : index
    %61 = vector.load %arg4[%c0_106, %c0_107] : memref<128x1152xbf16, #tpu.memory_space<vmem>>, vector<128x1152xbf16>
    %cst_108 = arith.constant dense<0.000000e+00> : vector<256x1152xf32>
    %62 = tpu.matmul %60, %61, %cst_108 {dimension_numbers = #tpu.dot_dimension_numbers<[1], [0], [0], [1], [0, 0, 1, 1], [], []>} : vector<256x128xbf16>, vector<128x1152xbf16>, vector<256x1152xf32> -> vector<256x1152xf32>
    %63 = vector.shape_cast %62 : vector<256x1152xf32> to vector<16x16x1152xf32>
    %c0_109 = arith.constant 0 : index
    %c0_110 = arith.constant 0 : index
    %c0_111 = arith.constant 0 : index
    %64 = vector.load %arg9[%c0_109, %c0_110, %c0_111] : memref<16x16x1152xf32, #tpu.memory_space<vmem>>, vector<16x16x1152xf32>
    tpu.vector_store %arg9[%c0_109, %c0_110, %c0_111], %63 {strides = array<i32>} : memref<16x16x1152xf32, #tpu.memory_space<vmem>>, vector<16x16x1152xf32>,
    %c0_112 = arith.constant 0 : index
    %c0_113 = arith.constant 0 : index
    %c0_114 = arith.constant 0 : index
    %65 = vector.load %arg9[%c0_112, %c0_113, %c0_114] : memref<16x16x1152xf32, #tpu.memory_space<vmem>>, vector<15x15x128xf32>
    %c1_115 = arith.constant 1 : index
    %c1_116 = arith.constant 1 : index
    %c0_117 = arith.constant 0 : index
    %66 = vector.load %arg7[%c1_115, %c1_116, %c0_117] : memref<16x16x128xf32, #tpu.memory_space<vmem>>, vector<15x15x128xf32>
    %67 = arith.addf %66, %65 : vector<15x15x128xf32>
    %c1_118 = arith.constant 1 : index
    %c1_119 = arith.constant 1 : index
    %c0_120 = arith.constant 0 : index
    %68 = vector.load %arg7[%c1_118, %c1_119, %c0_120] : memref<16x16x128xf32, #tpu.memory_space<vmem>>, vector<15x15x128xf32>
    tpu.vector_store %arg7[%c1_118, %c1_119, %c0_120], %67 {strides = array<i32>} : memref<16x16x128xf32, #tpu.memory_space<vmem>>, vector<15x15x128xf32>,
    %c0_121 = arith.constant 0 : index
    %c0_122 = arith.constant 0 : index
    %c128_123 = arith.constant 128 : index
    %69 = vector.load %arg9[%c0_121, %c0_122, %c128_123] : memref<16x16x1152xf32, #tpu.memory_space<vmem>>, vector<15x16x128xf32>
    %c1_124 = arith.constant 1 : index
    %c0_125 = arith.constant 0 : index
    %c0_126 = arith.constant 0 : index
    %70 = vector.load %arg7[%c1_124, %c0_125, %c0_126] : memref<16x16x128xf32, #tpu.memory_space<vmem>>, vector<15x16x128xf32>
    %71 = arith.addf %70, %69 : vector<15x16x128xf32>
    %c1_127 = arith.constant 1 : index
    %c0_128 = arith.constant 0 : index
    %c0_129 = arith.constant 0 : index
    %72 = vector.load %arg7[%c1_127, %c0_128, %c0_129] : memref<16x16x128xf32, #tpu.memory_space<vmem>>, vector<15x16x128xf32>
    tpu.vector_store %arg7[%c1_127, %c0_128, %c0_129], %71 {strides = array<i32>} : memref<16x16x128xf32, #tpu.memory_space<vmem>>, vector<15x16x128xf32>,
    %c0_130 = arith.constant 0 : index
    %c1_131 = arith.constant 1 : index
    %c256_132 = arith.constant 256 : index
    %73 = vector.load %arg9[%c0_130, %c1_131, %c256_132] : memref<16x16x1152xf32, #tpu.memory_space<vmem>>, vector<15x15x128xf32>
    %c1_133 = arith.constant 1 : index
    %c0_134 = arith.constant 0 : index
    %c0_135 = arith.constant 0 : index
    %74 = vector.load %arg7[%c1_133, %c0_134, %c0_135] : memref<16x16x128xf32, #tpu.memory_space<vmem>>, vector<15x15x128xf32>
    %75 = arith.addf %74, %73 : vector<15x15x128xf32>
    %c1_136 = arith.constant 1 : index
    %c0_137 = arith.constant 0 : index
    %c0_138 = arith.constant 0 : index
    %76 = vector.load %arg7[%c1_136, %c0_137, %c0_138] : memref<16x16x128xf32, #tpu.memory_space<vmem>>, vector<15x15x128xf32>
    tpu.vector_store %arg7[%c1_136, %c0_137, %c0_138], %75 {strides = array<i32>} : memref<16x16x128xf32, #tpu.memory_space<vmem>>, vector<15x15x128xf32>,
    %c0_139 = arith.constant 0 : index
    %c0_140 = arith.constant 0 : index
    %c384_141 = arith.constant 384 : index
    %77 = vector.load %arg9[%c0_139, %c0_140, %c384_141] : memref<16x16x1152xf32, #tpu.memory_space<vmem>>, vector<16x15x128xf32>
    %c0_142 = arith.constant 0 : index
    %c1_143 = arith.constant 1 : index
    %c0_144 = arith.constant 0 : index
    %78 = vector.load %arg7[%c0_142, %c1_143, %c0_144] : memref<16x16x128xf32, #tpu.memory_space<vmem>>, vector<16x15x128xf32>
    %79 = arith.addf %78, %77 : vector<16x15x128xf32>
    %c0_145 = arith.constant 0 : index
    %c1_146 = arith.constant 1 : index
    %c0_147 = arith.constant 0 : index
    %80 = vector.load %arg7[%c0_145, %c1_146, %c0_147] : memref<16x16x128xf32, #tpu.memory_space<vmem>>, vector<16x15x128xf32>
    tpu.vector_store %arg7[%c0_145, %c1_146, %c0_147], %79 {strides = array<i32>} : memref<16x16x128xf32, #tpu.memory_space<vmem>>, vector<16x15x128xf32>,
    %c0_148 = arith.constant 0 : index
    %c0_149 = arith.constant 0 : index
    %c512_150 = arith.constant 512 : index
    %81 = vector.load %arg9[%c0_148, %c0_149, %c512_150] : memref<16x16x1152xf32, #tpu.memory_space<vmem>>, vector<16x16x128xf32>
    %c0_151 = arith.constant 0 : index
    %c0_152 = arith.constant 0 : index
    %c0_153 = arith.constant 0 : index
    %82 = vector.load %arg7[%c0_151, %c0_152, %c0_153] : memref<16x16x128xf32, #tpu.memory_space<vmem>>, vector<16x16x128xf32>
    %83 = arith.addf %82, %81 : vector<16x16x128xf32>
    %c0_154 = arith.constant 0 : index
    %c0_155 = arith.constant 0 : index
    %c0_156 = arith.constant 0 : index
    %84 = vector.load %arg7[%c0_154, %c0_155, %c0_156] : memref<16x16x128xf32, #tpu.memory_space<vmem>>, vector<16x16x128xf32>
    tpu.vector_store %arg7[%c0_154, %c0_155, %c0_156], %83 {strides = array<i32>} : memref<16x16x128xf32, #tpu.memory_space<vmem>>, vector<16x16x128xf32>,
    %c0_157 = arith.constant 0 : index
    %c1_158 = arith.constant 1 : index
    %c640_159 = arith.constant 640 : index
    %85 = vector.load %arg9[%c0_157, %c1_158, %c640_159] : memref<16x16x1152xf32, #tpu.memory_space<vmem>>, vector<16x15x128xf32>
    %c0_160 = arith.constant 0 : index
    %c0_161 = arith.constant 0 : index
    %c0_162 = arith.constant 0 : index
    %86 = vector.load %arg7[%c0_160, %c0_161, %c0_162] : memref<16x16x128xf32, #tpu.memory_space<vmem>>, vector<16x15x128xf32>
    %87 = arith.addf %86, %85 : vector<16x15x128xf32>
    %c0_163 = arith.constant 0 : index
    %c0_164 = arith.constant 0 : index
    %c0_165 = arith.constant 0 : index
    %88 = vector.load %arg7[%c0_163, %c0_164, %c0_165] : memref<16x16x128xf32, #tpu.memory_space<vmem>>, vector<16x15x128xf32>
    tpu.vector_store %arg7[%c0_163, %c0_164, %c0_165], %87 {strides = array<i32>} : memref<16x16x128xf32, #tpu.memory_space<vmem>>, vector<16x15x128xf32>,
    %c1_166 = arith.constant 1 : index
    %c0_167 = arith.constant 0 : index
    %c768_168 = arith.constant 768 : index
    %89 = vector.load %arg9[%c1_166, %c0_167, %c768_168] : memref<16x16x1152xf32, #tpu.memory_space<vmem>>, vector<15x15x128xf32>
    %c0_169 = arith.constant 0 : index
    %c1_170 = arith.constant 1 : index
    %c0_171 = arith.constant 0 : index
    %90 = vector.load %arg7[%c0_169, %c1_170, %c0_171] : memref<16x16x128xf32, #tpu.memory_space<vmem>>, vector<15x15x128xf32>
    %91 = arith.addf %90, %89 : vector<15x15x128xf32>
    %c0_172 = arith.constant 0 : index
    %c1_173 = arith.constant 1 : index
    %c0_174 = arith.constant 0 : index
    %92 = vector.load %arg7[%c0_172, %c1_173, %c0_174] : memref<16x16x128xf32, #tpu.memory_space<vmem>>, vector<15x15x128xf32>
    tpu.vector_store %arg7[%c0_172, %c1_173, %c0_174], %91 {strides = array<i32>} : memref<16x16x128xf32, #tpu.memory_space<vmem>>, vector<15x15x128xf32>,
    %c1_175 = arith.constant 1 : index
    %c0_176 = arith.constant 0 : index
    %c896_177 = arith.constant 896 : index
    %93 = vector.load %arg9[%c1_175, %c0_176, %c896_177] : memref<16x16x1152xf32, #tpu.memory_space<vmem>>, vector<15x16x128xf32>
    %c0_178 = arith.constant 0 : index
    %c0_179 = arith.constant 0 : index
    %c0_180 = arith.constant 0 : index
    %94 = vector.load %arg7[%c0_178, %c0_179, %c0_180] : memref<16x16x128xf32, #tpu.memory_space<vmem>>, vector<15x16x128xf32>
    %95 = arith.addf %94, %93 : vector<15x16x128xf32>
    %c0_181 = arith.constant 0 : index
    %c0_182 = arith.constant 0 : index
    %c0_183 = arith.constant 0 : index
    %96 = vector.load %arg7[%c0_181, %c0_182, %c0_183] : memref<16x16x128xf32, #tpu.memory_space<vmem>>, vector<15x16x128xf32>
    tpu.vector_store %arg7[%c0_181, %c0_182, %c0_183], %95 {strides = array<i32>} : memref<16x16x128xf32, #tpu.memory_space<vmem>>, vector<15x16x128xf32>,
    %c1_184 = arith.constant 1 : index
    %c1_185 = arith.constant 1 : index
    %c1024_186 = arith.constant 1024 : index
    %97 = vector.load %arg9[%c1_184, %c1_185, %c1024_186] : memref<16x16x1152xf32, #tpu.memory_space<vmem>>, vector<15x15x128xf32>
    %c0_187 = arith.constant 0 : index
    %c0_188 = arith.constant 0 : index
    %c0_189 = arith.constant 0 : index
    %98 = vector.load %arg7[%c0_187, %c0_188, %c0_189] : memref<16x16x128xf32, #tpu.memory_space<vmem>>, vector<15x15x128xf32>
    %99 = arith.addf %98, %97 : vector<15x15x128xf32>
    %c0_190 = arith.constant 0 : index
    %c0_191 = arith.constant 0 : index
    %c0_192 = arith.constant 0 : index
    %100 = vector.load %arg7[%c0_190, %c0_191, %c0_192] : memref<16x16x128xf32, #tpu.memory_space<vmem>>, vector<15x15x128xf32>
    tpu.vector_store %arg7[%c0_190, %c0_191, %c0_192], %99 {strides = array<i32>} : memref<16x16x128xf32, #tpu.memory_space<vmem>>, vector<15x15x128xf32>,
    %c0_193 = arith.constant 0 : index
    %c0_194 = arith.constant 0 : index
    %c0_195 = arith.constant 0 : index
    %101 = vector.load %arg7[%c0_193, %c0_194, %c0_195] : memref<16x16x128xf32, #tpu.memory_space<vmem>>, vector<16x16x128xf32>
    %cst_196 = arith.constant 0.000000e+00 : f32
    %102 = vector.broadcast %cst_196 : f32 to vector<16x16x128xf32>
    %103 = arith.maximumf %101, %102 : vector<16x16x128xf32>
    %c0_197 = arith.constant 0 : index
    %c0_198 = arith.constant 0 : index
    %c0_199 = arith.constant 0 : index
    %c0_200 = arith.constant 0 : index
    %104 = vector.load %arg6[%c0_197, %c0_198, %c0_199, %c0_200] : memref<1x16x16x128xf32, #tpu.memory_space<vmem>>, vector<1x16x16x128xf32>
    %105 = vector.shape_cast %104 : vector<1x16x16x128xf32> to vector<16x16x128xf32>
    %106 = vector.shape_cast %103 : vector<16x16x128xf32> to vector<1x16x16x128xf32>
    tpu.vector_store %arg6[%c0_197, %c0_198, %c0_199, %c0_200], %106 {strides = array<i32>} : memref<1x16x16x128xf32, #tpu.memory_space<vmem>>, vector<1x16x16x128xf32>,
    return
  }
  func.func @transform_0(%arg0: i32) -> (i32, i32, i32, i32) {
    %c0_i32 = arith.constant 0 : i32
    %c0_i32_0 = arith.constant 0 : i32
    %c0_i32_1 = arith.constant 0 : i32
    %c0_i32_2 = arith.constant 0 : i32
    return %arg0, %c0_i32, %c0_i32_0, %c0_i32_1 : i32, i32, i32, i32
  }
  func.func @transform_1(%arg0: i32) -> (i32, i32) {
    %c0_i32 = arith.constant 0 : i32
    %c0_i32_0 = arith.constant 0 : i32
    %c0_i32_1 = arith.constant 0 : i32
    return %c0_i32, %c0_i32_0 : i32, i32
  }
  func.func @transform_2(%arg0: i32) -> (i32, i32, i32) {
    %c0_i32 = arith.constant 0 : i32
    %c0_i32_0 = arith.constant 0 : i32
    %c0_i32_1 = arith.constant 0 : i32
    %c0_i32_2 = arith.constant 0 : i32
    return %c0_i32, %c0_i32_0, %c0_i32_1 : i32, i32, i32
  }
  func.func @transform_3(%arg0: i32) -> (i32, i32) {
    %c0_i32 = arith.constant 0 : i32
    %c0_i32_0 = arith.constant 0 : i32
    %c0_i32_1 = arith.constant 0 : i32
    return %c0_i32, %c0_i32_0 : i32, i32
  }
  func.func @transform_4(%arg0: i32) -> (i32, i32, i32) {
    %c0_i32 = arith.constant 0 : i32
    %c0_i32_0 = arith.constant 0 : i32
    %c0_i32_1 = arith.constant 0 : i32
    %c0_i32_2 = arith.constant 0 : i32
    return %c0_i32, %c0_i32_0, %c0_i32_1 : i32, i32, i32
  }
  func.func @transform_5(%arg0: i32) -> (i32, i32, i32, i32) {
    %c0_i32 = arith.constant 0 : i32
    %c0_i32_0 = arith.constant 0 : i32
    %c0_i32_1 = arith.constant 0 : i32
    %c0_i32_2 = arith.constant 0 : i32
    return %arg0, %c0_i32, %c0_i32_0, %c0_i32_1 : i32, i32, i32, i32
  }
}

</mosaic_0001>

<bundles_post_ra>
// kernel: residual_block_forward.1
= control target key start
LH: loop header
LB: loop body
LE: loop exit
PB: predicated region body
PF: predicated region fallthrough
CT: control target
= control target key end

     0   :  { %s7432_s18 = smov 0   ;;  %s9273_s0 = inlined_call_operand.vmem [shape: f32[2,16,16,128], index: 0, kind: input, shape index: {}]   ;;  %s9274_s1 = inlined_call_operand.vmem [shape: bf16[128,1152], index: 1, kind: input, shape index: {}]   ;;  %s9275_s2 = inlined_call_operand.vmem [shape: f32[1,1,128], index: 2, kind: input, shape index: {}]   ;;  %s9276_s3 = inlined_call_operand.vmem [shape: bf16[128,1152], index: 3, kind: input, shape index: {}]   ;;  %s9277_s4 = inlined_call_operand.vmem [shape: f32[1,1,128], index: 4, kind: input, shape index: {}]   ;;  %s9278_s5 = inlined_call_operand.vmem [shape: f32[2,16,16,128], index: 5, kind: output, shape index: {}]  }
   0x1 LB: > { %s6872_s19 = sadd.s32 4294967295, %s7399_s18   ;;  %p6876_p0 = scmp.ge.s32.totalorder %s7399_s18, 1  ;;  %s7399_s18 = sphi %s7432_s18, %s15_s18  }
   0x2   : > { %p187_p1 = scmp.lt.s32.totalorder %s7399_s18, 3 }
   0x4   : > { %p188_p2 = pnand %p6876_p0, %p187_p1 }
   0x5   : > { %v7184_v0 = vld [vmem:[%s9274_s1 + $0x4] ss:$36 sps:$4 sm:$0xff] (!%p188_p2)   ;;  %v7401_v2 = vmov (!%p188_p2), 0   ;;  %v7187_v3 = vld [vmem:[%s9274_s1 + $0x4c] ss:$36 sps:$4 sm:$0xff] (!%p188_p2)   ;;  %p215_p3 = scmp.lt.s32.totalorder (!%p188_p2), %s6872_s19, 1 }
   0x6   : > { %191 = sbr.rel (%p188_p2) target bundleno = 1068 (0x42c), region = 40  ;;  %v7186_v1 = vld [vmem:[%s9274_s1] ss:$36 sps:$4 sm:$0xff] (!%p188_p2)   ;;  %793 = vmatprep.mubr.bf16.mxu0 (!%p188_p2), %v7401_v2  ;;  %986 = vmatprep.mubr.bf16.mxu1 (!%p188_p2), %v7401_v2  ;;  %v7189_v4 = vld [vmem:[%s9274_s1 + $0x48] ss:$36 sps:$4 sm:$0xff] (!%p188_p2)   ;;  %vm2313_vm0 = vcmask (!%p188_p2), 1046528  }
   0x7   : > { %761 = vmatprep.subr.bf16.mxu0 (!%p188_p2), %v7184_v0  ;;  %v7190_v5 = vld [vmem:[%s9274_s1 + $0x94] ss:$36 sps:$4 sm:$0xff] (!%p188_p2)   ;;  %v7195_v6 = vld [vmem:[%s9274_s1 + $0xc] ss:$36 sps:$4 sm:$0xff] (!%p188_p2)   ;;  %v7193_v9 = vld [vmem:[%s9274_s1 + $0xdc] ss:$36 sps:$4 sm:$0xff] (!%p188_p2)  }
   0x8   : > { %762 = vmatpush1.bf16.msra.mxu0 (!%p188_p2), %v7186_v1  ;;  %v7198_v7 = vld [vmem:[%s9274_s1 + $0x8] ss:$36 sps:$4 sm:$0xff] (!%p188_p2)   ;;  %v7192_v8 = vld [vmem:[%s9274_s1 + $0x90] ss:$36 sps:$4 sm:$0xff] (!%p188_p2)   ;;  %954 = vmatprep.subr.bf16.mxu1 (!%p188_p2), %v7195_v6  ;;  %v7197_v12 = vld [vmem:[%s9274_s1 + $0xd8] ss:$36 sps:$4 sm:$0xff] (!%p188_p2)  }
   0x9   : > { %763 = vmatprep.subr.bf16.mxu0 (!%p188_p2), %v7187_v3  ;;  %955 = vmatpush1.bf16.msra.mxu1 (!%p188_p2), %v7198_v7  ;;  %v7201_v10 = vld [vmem:[%s9274_s1 + $0x54] ss:$36 sps:$4 sm:$0xff] (!%p188_p2)   ;;  %v7199_v13 = vld [vmem:[%s9274_s1 + $0x124] ss:$36 sps:$4 sm:$0xff] (!%p188_p2)   ;;  %v7207_v14 = vld [vmem:[%s9274_s1 + $0x9c] ss:$36 sps:$4 sm:$0xff] (!%p188_p2)  }
   0xa   : > { %v7204_v11 = vld [vmem:[%s9274_s1 + $0x50] ss:$36 sps:$4 sm:$0xff] (!%p188_p2)   ;;  %956 = vmatprep.subr.bf16.mxu1 (!%p188_p2), %v7201_v10  ;;  %v7210_v15 = vld [vmem:[%s9274_s1 + $0x98] ss:$36 sps:$4 sm:$0xff] (!%p188_p2)   ;;  %v7213_v16 = vld [vmem:[%s9274_s1 + $0xe4] ss:$36 sps:$4 sm:$0xff] (!%p188_p2)  }
   0xb   : > { %v7203_v17 = vld [vmem:[%s9274_s1 + $0x120] ss:$36 sps:$4 sm:$0xff] (!%p188_p2)   ;;  %v7205_v18 = vld [vmem:[%s9274_s1 + $0x16c] ss:$36 sps:$4 sm:$0xff] (!%p188_p2)   ;;  %v7211_v22 = vld [vmem:[%s9274_s1 + $0x1b4] ss:$36 sps:$4 sm:$0xff] (!%p188_p2)  }
   0xc   : > { %764 = vmatpush1.bf16.msra.mxu0 (!%p188_p2), %v7189_v4  ;;  %v7216_v19 = vld [vmem:[%s9274_s1 + $0xe0] ss:$36 sps:$4 sm:$0xff] (!%p188_p2)   ;;  %v7219_v20 = vld [vmem:[%s9274_s1 + $0x12c] ss:$36 sps:$4 sm:$0xff] (!%p188_p2)   ;;  %v7223_v24 = vld [vmem:[%s9274_s1 + $0x174] ss:$36 sps:$4 sm:$0xff] (!%p188_p2)  }
   0xd   : > { %765 = vmatprep.subr.bf16.mxu0 %v7190_v5  ;;  %957 = vmatpush1.bf16.msra.mxu1 %v7204_v11  ;;  %s9280_s19 = smov (!%p215_p3, %s6872_s19), 1  ;;  %v7209_v21 = vld [vmem:[%s9274_s1 + $0x168] ss:$36 sps:$4 sm:$0xff]   ;;  %v7215_v25 = vld [vmem:[%s9274_s1 + $0x1b0] ss:$36 sps:$4 sm:$0xff]  }
   0xe   : > { %958 = vmatprep.subr.bf16.mxu1 %v7207_v14  ;;  %v7222_v23 = vld [vmem:[%s9274_s1 + $0x128] ss:$36 sps:$4 sm:$0xff]   ;;  %s7029_s20 = sshll.u32 %s9280_s19, 8  ;;  %v7217_v26 = vld [vmem:[%s9274_s1 + $0x1fc] ss:$36 sps:$4 sm:$0xff]  }
   0xf   : > { %s7529_s27 = scalar_lea.vmem %s9273_s0, %s7029_s20  ;;  %v7228_v27 = vld [vmem:[%s9274_s1 + $0x170] ss:$36 sps:$4 sm:$0xff]   ;;  %v7229_v28 = vld [vmem:[%s9274_s1 + $0x1bc] ss:$36 sps:$4 sm:$0xff]   ;;  %v7232_v34 = vld [vmem:[%s9274_s1 + $0x204] ss:$36 sps:$4 sm:$0xff]   ;;  %s9213_s17 = scalar_lea.vmem %s9278_s5, %s7029_s20 }
  0x10   : > { %766 = vmatpush1.bf16.msra.mxu0 %v7192_v8  ;;  %v7221_v29 = vld [vmem:[%s9274_s1 + $0x1f8] ss:$36 sps:$4 sm:$0xff]   ;;  %v265_v30 = vld [vmem:[%s7529_s27] sm:$0xff]  ;;  %v266_v31 = vld [vmem:[%s7529_s27 + $0x8] sm:$0xff] }
  0x11   : > { %767 = vmatprep.subr.bf16.mxu0 %v7193_v9  ;;  %959 = vmatpush1.bf16.msra.mxu1 %v7210_v15  ;;  %v7227_v32 = vld [vmem:[%s9274_s1 + $0x14] ss:$36 sps:$4 sm:$0xff]   ;;  %v7554_v35 = vpack.c.bf16 %v266_v31, %v265_v30  ;;  %v7234_v37 = vld [vmem:[%s9274_s1 + $0x200] ss:$36 sps:$4 sm:$0xff]   ;;  %v7243_v45 = vld [vmem:[%s9274_s1 + $0xec] ss:$36 sps:$4 sm:$0xff]  }
  0x12   : > { %960 = vmatprep.subr.bf16.mxu1 %v7213_v16  ;;  %v7231_v33 = vld [vmem:[%s9274_s1 + $0x1b8] ss:$36 sps:$4 sm:$0xff]   ;;  %v7225_v36 = vld [vmem:[%s9274_s1 + $0x10] ss:$36 sps:$4 sm:$0xff]   ;;  %v7240_v42 = vld [vmem:[%s9274_s1 + $0xa4] ss:$36 sps:$4 sm:$0xff]  }
  0x13   : > { %v7237_v38 = vld [vmem:[%s9274_s1 + $0x5c] ss:$36 sps:$4 sm:$0xff]   ;;  %v267_v39 = vld [vmem:[%s7529_s27 + $0x10] sm:$0xff]  ;;  %v270_v49 = vld [vmem:[%s7529_s27 + $0x28] sm:$0xff] }
  0x14   : > { %768 = vmatpush1.bf16.msra.mxu0 %v7197_v12  ;;  %v268_v40 = vld [vmem:[%s7529_s27 + $0x18] sm:$0xff]  ;;  %v7238_v44 = vld [vmem:[%s9274_s1 + $0xa0] ss:$36 sps:$4 sm:$0xff]   ;;  %v7241_v50 = vld [vmem:[%s9274_s1 + $0xe8] ss:$36 sps:$4 sm:$0xff]  }
  0x15   : > { %769 = vmatprep.subr.bf16.mxu0 %v7199_v13  ;;  %961 = vmatpush1.bf16.msra.mxu1 %v7216_v19  ;;  %v7235_v41 = vld [vmem:[%s9274_s1 + $0x58] ss:$36 sps:$4 sm:$0xff]   ;;  %v7575_v43 = vpack.c.bf16 %v268_v40, %v267_v39  ;;  %v269_v46 = vld [vmem:[%s7529_s27 + $0x20] sm:$0xff]  ;;  %v7264_v55 = vld [vmem:[%s9274_s1 + $0xac] ss:$36 sps:$4 sm:$0xff]  }
  0x16   : > { %962 = vmatprep.subr.bf16.mxu1 %v7219_v20  ;;  %v7253_v47 = vld [vmem:[%s9274_s1 + $0x18] ss:$36 sps:$4 sm:$0xff]   ;;  %v7261_v52 = vld [vmem:[%s9274_s1 + $0x64] ss:$36 sps:$4 sm:$0xff]   ;;  %v7607_v54 = vpack.c.bf16 %v270_v49, %v269_v46  ;;  %v7244_v56 = vld [vmem:[%s9274_s1 + $0x130] ss:$36 sps:$4 sm:$0xff]  }
  0x17   : > { %v7255_v48 = vld [vmem:[%s9274_s1 + $0x1c] ss:$36 sps:$4 sm:$0xff]   ;;  %v7246_v51 = vld [vmem:[%s9274_s1 + $0x134] ss:$36 sps:$4 sm:$0xff]   ;;  %v7262_v59 = vld [vmem:[%s9274_s1 + $0xa8] ss:$36 sps:$4 sm:$0xff]  }
  0x18   : > { %770 = vmatpush1.bf16.msra.mxu0 %v7203_v17  ;;  %v7259_v53 = vld [vmem:[%s9274_s1 + $0x60] ss:$36 sps:$4 sm:$0xff]   ;;  %v271_v58 = vld [vmem:[%s7529_s27 + $0x30] sm:$0xff]  ;;  %v272_v60 = vld [vmem:[%s7529_s27 + $0x38] sm:$0xff] }
  0x19   : > { %771 = vmatprep.subr.bf16.mxu0 %v7205_v18  ;;  %963 = vmatpush1.bf16.msra.mxu1 %v7222_v23  ;;  %v7249_v57 = vld [vmem:[%s9274_s1 + $0x17c] ss:$36 sps:$4 sm:$0xff]   ;;  %v7267_v61 = vld [vmem:[%s9274_s1 + $0xf4] ss:$36 sps:$4 sm:$0xff]   ;;  %v7252_v63 = vld [vmem:[%s9274_s1 + $0x1c4] ss:$36 sps:$4 sm:$0xff]   ;;  %v7642_v3 = vpack.c.bf16 %v272_v60, %v271_v58 }
  0x1a   : > { %964 = vmatprep.subr.bf16.mxu1 %v7223_v24  ;;  %v7247_v62 = vld [vmem:[%s9274_s1 + $0x178] ss:$36 sps:$4 sm:$0xff]   ;;  %v7250_v0 = vld [vmem:[%s9274_s1 + $0x1c0] ss:$36 sps:$4 sm:$0xff]   ;;  %v7265_v1 = vld [vmem:[%s9274_s1 + $0xf0] ss:$36 sps:$4 sm:$0xff]  }
  0x1b   : > { %v7258_v4 = vld [vmem:[%s9274_s1 + $0x20c] ss:$36 sps:$4 sm:$0xff]   ;;  %v7270_v5 = vld [vmem:[%s9274_s1 + $0x13c] ss:$36 sps:$4 sm:$0xff]   ;;  %v7273_v7 = vld [vmem:[%s9274_s1 + $0x184] ss:$36 sps:$4 sm:$0xff]  }
  0x1c   : > { %772 = vmatpush1.bf16.msra.mxu0 %v7209_v21  ;;  %v7268_v6 = vld [vmem:[%s9274_s1 + $0x138] ss:$36 sps:$4 sm:$0xff]   ;;  %v273_v8 = vld [vmem:[%s7529_s27 + $0x40] sm:$0xff]  ;;  %v274_v9 = vld [vmem:[%s7529_s27 + $0x48] sm:$0xff] }
  0x1d   : > { %773 = vmatprep.subr.bf16.mxu0 %v7211_v22  ;;  %965 = vmatpush1.bf16.msra.mxu1 %v7228_v27  ;;  %v7256_v10 = vld [vmem:[%s9274_s1 + $0x208] ss:$36 sps:$4 sm:$0xff]   ;;  %v7667_v11 = vld [vmem:[%s9274_s1 + $0x20] ss:$36 sps:$4 sm:$0xff]   ;;  %v7676_v14 = vpack.c.bf16 %v274_v9, %v273_v8  ;;  %v275_v16 = vld [vmem:[%s7529_s27 + $0x50] sm:$0xff] }
  0x1e   : > { %966 = vmatprep.subr.bf16.mxu1 %v7229_v28  ;;  %v7271_v12 = vld [vmem:[%s9274_s1 + $0x180] ss:$36 sps:$4 sm:$0xff]   ;;  %v7277_v13 = vld [vmem:[%s9274_s1 + $0x1cc] ss:$36 sps:$4 sm:$0xff]   ;;  %v276_v17 = vld [vmem:[%s7529_s27 + $0x58] sm:$0xff] }
  0x1f   : > { %v7275_v15 = vld [vmem:[%s9274_s1 + $0x1c8] ss:$36 sps:$4 sm:$0xff]   ;;  %v7280_v18 = vld [vmem:[%s9274_s1 + $0x214] ss:$36 sps:$4 sm:$0xff]   ;;  %v7694_v20 = vpack.c.bf16 %v276_v17, %v275_v16  ;;  %v277_v21 = vld [vmem:[%s7529_s27 + $0x60] sm:$0xff] }
  0x20   : > { %774 = vmatpush1.bf16.msra.mxu0 %v7215_v25  ;;  %v7278_v19 = vld [vmem:[%s9274_s1 + $0x210] ss:$36 sps:$4 sm:$0xff]   ;;  %v278_v22 = vld [vmem:[%s7529_s27 + $0x68] sm:$0xff]  ;;  %v280_v25 = vld [vmem:[%s7529_s27 + $0x78] sm:$0xff] }
  0x21   : > { %775 = vmatprep.subr.bf16.mxu0 %v7217_v26  ;;  %967 = vmatpush1.bf16.msra.mxu1 %v7231_v33  ;;  %v7702_v23 = vpack.c.bf16 %v278_v22, %v277_v21  ;;  %v279_v24 = vld [vmem:[%s7529_s27 + $0x70] sm:$0xff]  ;;  %v281_v27 = vld [vmem:[%s7529_s27 + $0x80] sm:$0xff]  ;;  %v282_v28 = vld [vmem:[%s7529_s27 + $0x88] sm:$0xff] }
  0x22   : > { %968 = vmatprep.subr.bf16.mxu1 %v7232_v34  ;;  %v7710_v26 = vpack.c.bf16 %v280_v25, %v279_v24  ;;  %v283_v30 = vld [vmem:[%s7529_s27 + $0x90] sm:$0xff]  ;;  %v284_v31 = vld [vmem:[%s7529_s27 + $0x98] sm:$0xff]  ;;  %v285_v33 = vld [vmem:[%s7529_s27 + $0xa0] sm:$0xff] }
  0x23   : > { %v286_v34 = vld [vmem:[%s7529_s27 + $0xa8] sm:$0xff]  ;;  %v288_v39 = vld [vmem:[%s7529_s27 + $0xb8] sm:$0xff]  ;;  %v7284_v58 = vld [vmem:[%s9274_s1 + $0x140] ss:$36 sps:$4 sm:$0xff]  }
  0x24   : > { %776 = vmatpush1.bf16.msra.mxu0 %v7221_v29  ;;  %v7718_v29 = vpack.c.bf16 %v282_v28, %v281_v27  ;;  %v292_v46 = vld [vmem:[%s7529_s27 + $0xd8] sm:$0xff]  ;;  %v294_v49 = vld [vmem:[%s7529_s27 + $0xe8] sm:$0xff]  ;;  %v7286_v60 = vld [vmem:[%s9274_s1 + $0x1d0] ss:$36 sps:$4 sm:$0xff]  }
  0x25   : > { %1147 = vmatprep.subr.bf16.mxu0 %v7227_v32  ;;  %969 = vmatpush1.bf16.msra.mxu1 %v7234_v37  ;;  %v7726_v32 = vpack.c.bf16 %v284_v31, %v283_v30  ;;  %v6881_v37 = vld [vmem:[%s9275_s2] ss:$0 sm:$0xff] }
  0x26   : > { %1340 = vmatprep.subr.bf16.mxu1 %v7255_v48  ;;  %235 = vst [vmem:[#allocation2 + $0x10] sm:$0xff] %v6881_v37  ;;  %236 = vst [vmem:[#allocation2 + $0x18] sm:$0xff] %v6881_v37  ;;  %v293_v48 = vld [vmem:[%s7529_s27 + $0xe0] sm:$0xff] }
  0x27   : > { %794 = vmatmul.mubr.bf16.vlgmr.msra.gmra.mrb[0].mxu0 %v7554_v35  ;;  %233 = vst [vmem:[#allocation2] sm:$0xff] %v6881_v37  ;;  %234 = vst [vmem:[#allocation2 + $0x8] sm:$0xff] %v6881_v37 }
  0x28   : > { %1148 = vmatpush1.bf16.msra.mxu0 %v7225_v36  ;;  %803 = vmatprep.mubr.bf16.mxu0 %v7401_v2  ;;  %v7734_v36 = vpack.c.bf16 %v286_v34, %v285_v33  ;;  %237 = vst [vmem:[#allocation2 + $0x20] sm:$0xff] %v6881_v37  ;;  %238 = vst [vmem:[#allocation2 + $0x28] sm:$0xff] %v6881_v37 }
  0x29   : > { %1149 = vmatprep.subr.bf16.mxu0 %v7237_v38  ;;  %987 = vmatmul.mubr.bf16.vlgmr.msra.gmra.mrb[0].mxu1 %v7554_v35  ;;  %239 = vst [vmem:[#allocation2 + $0x30] sm:$0xff] %v6881_v37  ;;  %240 = vst [vmem:[#allocation2 + $0x38] sm:$0xff] %v6881_v37  ;;  %v287_v38 = vld [vmem:[%s7529_s27 + $0xb0] sm:$0xff] }
  0x2a   : > { %996 = vmatprep.mubr.bf16.mxu1 %v7401_v2  ;;  %1341 = vmatpush1.bf16.msra.mxu1 %v7253_v47  ;;  %241 = vst [vmem:[#allocation2 + $0x40] sm:$0xff] %v6881_v37  ;;  %242 = vst [vmem:[#allocation2 + $0x48] sm:$0xff] %v6881_v37  ;;  %v7745_v40 = vpack.c.bf16 %v288_v39, %v287_v38 }
  0x2b   : > { %1342 = vmatprep.subr.bf16.mxu1 %v7261_v52  ;;  %243 = vst [vmem:[#allocation2 + $0x50] sm:$0xff] %v6881_v37  ;;  %244 = vst [vmem:[#allocation2 + $0x58] sm:$0xff] %v6881_v37  ;;  %v296_v52 = vld [vmem:[%s7529_s27 + $0xf8] sm:$0xff] }
  0x2c   : > { %1150 = vmatpush1.bf16.msra.mxu0 %v7235_v41  ;;  %245 = vst [vmem:[#allocation2 + $0x60] sm:$0xff] %v6881_v37  ;;  %246 = vst [vmem:[#allocation2 + $0x68] sm:$0xff] %v6881_v37  ;;  %v289_v41 = vld [vmem:[%s7529_s27 + $0xc0] sm:$0xff] }
  0x2d   : > { %1151 = vmatprep.subr.bf16.mxu0 %v7240_v42  ;;  %247 = vst [vmem:[#allocation2 + $0x70] sm:$0xff] %v6881_v37  ;;  %248 = vst [vmem:[#allocation2 + $0x78] sm:$0xff] %v6881_v37  ;;  %v290_v42 = vld [vmem:[%s7529_s27 + $0xc8] sm:$0xff] }
  0x2e   : > { %1343 = vmatpush1.bf16.msra.mxu1 %v7259_v53  ;;  %249 = vst [vmem:[#allocation2 + $0x80] sm:$0xff] %v6881_v37  ;;  %250 = vst [vmem:[#allocation2 + $0x88] sm:$0xff] %v6881_v37 }
  0x2f   : > { %804 = vmatmul.mubr.bf16.gmra.mrb[4].mxu0 %v7575_v43  ;;  %1344 = vmatprep.subr.bf16.mxu1 %v7264_v55  ;;  %251 = vst [vmem:[#allocation2 + $0x90] sm:$0xff] %v6881_v37  ;;  %252 = vst [vmem:[#allocation2 + $0x98] sm:$0xff] %v6881_v37  ;;  %v7281_v55 = vld [vmem:[%s9274_s1 + $0x68] ss:$36 sps:$4 sm:$0xff]  }
  0x30   : > { %813 = vmatprep.mubr.bf16.mxu0 %v7401_v2  ;;  %1152 = vmatpush1.bf16.msra.mxu0 %v7238_v44  ;;  %253 = vst [vmem:[#allocation2 + $0xa0] sm:$0xff] %v6881_v37  ;;  %254 = vst [vmem:[#allocation2 + $0xa8] sm:$0xff] %v6881_v37  ;;  %v7753_v44 = vpack.c.bf16 %v290_v42, %v289_v41  ;;  %v2015_v8 = vld [vmem:[#allocation2 + $0x21] sm:$0xff]  ;;  %v2017_v31 = vld [vmem:[#allocation2 + $0x31] sm:$0xff] }
  0x31   : > { %1153 = vmatprep.subr.bf16.mxu0 %v7243_v45  ;;  %997 = vmatmul.mubr.bf16.gmra.mrb[4].mxu1 %v7575_v43  ;;  %255 = vst [vmem:[#allocation2 + $0xb0] sm:$0xff] %v6881_v37  ;;  %256 = vst [vmem:[#allocation2 + $0xb8] sm:$0xff] %v6881_v37  ;;  %v291_v45 = vld [vmem:[%s7529_s27 + $0xd0] sm:$0xff]  ;;  %v2016_v39 = vld [vmem:[#allocation2 + $0x29] sm:$0x7f] }
  0x32   : > { %1006 = vmatprep.mubr.bf16.mxu1 %v7401_v2  ;;  %1345 = vmatpush1.bf16.msra.mxu1 %v7262_v59  ;;  %257 = vst [vmem:[#allocation2 + $0xc0] sm:$0xff] %v6881_v37  ;;  %258 = vst [vmem:[#allocation2 + $0xc8] sm:$0xff] %v6881_v37  ;;  %v7761_v47 = vpack.c.bf16 %v292_v46, %v291_v45  ;;  %v7285_v59 = vld [vmem:[%s9274_s1 + $0x188] ss:$36 sps:$4 sm:$0xff]  }
  0x33   : > { %1346 = vmatprep.subr.bf16.mxu1 %v7267_v61  ;;  %259 = vst [vmem:[#allocation2 + $0xd0] sm:$0xff] %v6881_v37  ;;  %260 = vst [vmem:[#allocation2 + $0xd8] sm:$0xff] %v6881_v37  ;;  %v7287_v61 = vld [vmem:[%s9274_s1 + $0x218] ss:$36 sps:$4 sm:$0xff]  }
  0x34   : > { %1154 = vmatpush1.bf16.msra.mxu0 %v7241_v50  ;;  %261 = vst [vmem:[#allocation2 + $0xe0] sm:$0xff] %v6881_v37  ;;  %262 = vst [vmem:[#allocation2 + $0xe8] sm:$0xff] %v6881_v37  ;;  %v7769_v50 = vpack.c.bf16 %v294_v49, %v293_v48 }
  0x35   : > { %1155 = vmatprep.subr.bf16.mxu0 %v7246_v51  ;;  %263 = vst [vmem:[#allocation2 + $0xf0] sm:$0xff] %v6881_v37  ;;  %264 = vst [vmem:[#allocation2 + $0xf8] sm:$0xff] %v6881_v37  ;;  %v295_v51 = vld [vmem:[%s7529_s27 + $0xf0] sm:$0xff]  ;;  %v2482_v37 = vld [vmem:[#allocation2 + $0x9] sm:$0x7f] }
  0x36   : > { %1347 = vmatpush1.bf16.msra.mxu1 %v7265_v1  ;;  %v7777_v53 = vpack.c.bf16 %v296_v52, %v295_v51 }
  0x37   : > { %814 = vmatmul.mubr.bf16.gmra.mrb[8].mxu0 %v7607_v54  ;;  %1348 = vmatprep.subr.bf16.mxu1 %v7270_v5 }
  0x38   : > { %823 = vmatprep.mubr.bf16.mxu0 %v7401_v2  ;;  %1156 = vmatpush1.bf16.msra.mxu0 %v7244_v56  ;;  %v7282_v56 = vld [vmem:[%s9274_s1 + $0xb0] ss:$36 sps:$4 sm:$0xff]  }
  0x39   : > { %1157 = vmatprep.subr.bf16.mxu0 %v7249_v57  ;;  %1007 = vmatmul.mubr.bf16.gmra.mrb[8].mxu1 %v7607_v54  ;;  %v7283_v57 = vld [vmem:[%s9274_s1 + $0xf8] ss:$36 sps:$4 sm:$0xff]  }
  0x3a   : > { %1016 = vmatprep.mubr.bf16.mxu1 %v7401_v2  ;;  %1349 = vmatpush1.bf16.msra.mxu1 %v7268_v6  ;;  %v2481_v6 = vld [vmem:[#allocation2 + $0x1] sm:$0xff] }
  0x3b   : > { %1350 = vmatprep.subr.bf16.mxu1 %v7273_v7 }
  0x3c   : > { %1158 = vmatpush1.bf16.msra.mxu0 %v7247_v62  ;;  %v2013_v62 = vld [vmem:[#allocation2 + $0x11] sm:$0xff] }
  0x3d   : > { %1159 = vmatprep.subr.bf16.mxu0 %v7252_v63 }
  0x3e   : > { %1351 = vmatpush1.bf16.msra.mxu1 %v7271_v12  ;;  %v2014_v12 = vld [vmem:[#allocation2 + $0x19] sm:$0x7f] }
  0x3f   : > { %824 = vmatmul.mubr.bf16.gmra.mrb[12].mxu0 %v7642_v3  ;;  %1352 = vmatprep.subr.bf16.mxu1 %v7277_v13 }
  0x40   : > { %833 = vmatprep.mubr.bf16.mxu0 %v7401_v2  ;;  %1160 = vmatpush1.bf16.msra.mxu0 %v7250_v0 }
  0x41   : > { %1161 = vmatprep.subr.bf16.mxu0 %v7258_v4  ;;  %1017 = vmatmul.mubr.bf16.gmra.mrb[12].mxu1 %v7642_v3 }
  0x42   : > { %1026 = vmatprep.mubr.bf16.mxu1 %v7401_v2  ;;  %1353 = vmatpush1.bf16.msra.mxu1 %v7275_v15 }
  0x43   : > { %1354 = vmatprep.subr.bf16.mxu1 %v7280_v18 }
  0x44   : > { %1162 = vmatpush1.bf16.msra.mxu0 %v7256_v10 }
  0x45   : > { %7079 = vmatprep.subr.bf16.mxu0 %v7667_v11 }
  0x46   : > { %1355 = vmatpush1.bf16.msra.mxu1 %v7278_v19 }
  0x47   : > { %834 = vmatmul.mubr.bf16.gmra.mrb[16].mxu0 %v7676_v14 }
  0x48   : > { %843 = vmatprep.mubr.bf16.mxu0 %v7401_v2 }
  0x49   : > { %1027 = vmatmul.mubr.bf16.gmra.mrb[16].mxu1 %v7676_v14 }
  0x4a   : > { %1036 = vmatprep.mubr.bf16.mxu1 %v7401_v2 }
  0x4f   : > { %844 = vmatmul.mubr.bf16.gmra.mrb[20].mxu0 %v7694_v20 }
  0x50   : > { %853 = vmatprep.mubr.bf16.mxu0 %v7401_v2 }
  0x51   : > { %1037 = vmatmul.mubr.bf16.gmra.mrb[20].mxu1 %v7694_v20 }
  0x52   : > { %1046 = vmatprep.mubr.bf16.mxu1 %v7401_v2 }
  0x57   : > { %854 = vmatmul.mubr.bf16.gmra.mrb[24].mxu0 %v7702_v23 }
  0x58   : > { %863 = vmatprep.mubr.bf16.mxu0 %v7401_v2 }
  0x59   : > { %1047 = vmatmul.mubr.bf16.gmra.mrb[24].mxu1 %v7702_v23 }
  0x5a   : > { %1056 = vmatprep.mubr.bf16.mxu1 %v7401_v2 }
  0x5f   : > { %864 = vmatmul.mubr.bf16.gmra.mrb[28].mxu0 %v7710_v26 }
  0x60   : > { %873 = vmatprep.mubr.bf16.mxu0 %v7401_v2 }
  0x61   : > { %1057 = vmatmul.mubr.bf16.gmra.mrb[28].mxu1 %v7710_v26 }
  0x62   : > { %1066 = vmatprep.mubr.bf16.mxu1 %v7401_v2 }
  0x67   : > { %874 = vmatmul.mubr.bf16.gmra.mrb[32].mxu0 %v7718_v29 }
  0x68   : > { %883 = vmatprep.mubr.bf16.mxu0 %v7401_v2 }
  0x69   : > { %1067 = vmatmul.mubr.bf16.gmra.mrb[32].mxu1 %v7718_v29 }
  0x6a   : > { %1076 = vmatprep.mubr.bf16.mxu1 %v7401_v2 }
  0x6f   : > { %884 = vmatmul.mubr.bf16.gmra.mrb[36].mxu0 %v7726_v32 }
  0x70   : > { %893 = vmatprep.mubr.bf16.mxu0 %v7401_v2 }
  0x71   : > { %1077 = vmatmul.mubr.bf16.gmra.mrb[36].mxu1 %v7726_v32 }
  0x72   : > { %1086 = vmatprep.mubr.bf16.mxu1 %v7401_v2 }
  0x77   : > { %894 = vmatmul.mubr.bf16.gmra.mrb[40].mxu0 %v7734_v36 }
  0x78   : > { %903 = vmatprep.mubr.bf16.mxu0 %v7401_v2 }
  0x79   : > { %1087 = vmatmul.mubr.bf16.gmra.mrb[40].mxu1 %v7734_v36 }
  0x7a   : > { %1096 = vmatprep.mubr.bf16.mxu1 %v7401_v2 }
  0x7f   : > { %904 = vmatmul.mubr.bf16.gmra.mrb[44].mxu0 %v7745_v40 }
  0x80   : > { %913 = vmatprep.mubr.bf16.mxu0 %v7401_v2 }
  0x81   : > { %1097 = vmatmul.mubr.bf16.gmra.mrb[44].mxu1 %v7745_v40 }
  0x82   : > { %1106 = vmatprep.mubr.bf16.mxu1 %v7401_v2 }
  0x87   : > { %914 = vmatmul.mubr.bf16.gmra.mrb[48].mxu0 %v7753_v44 }
  0x88   : > { %923 = vmatprep.mubr.bf16.mxu0 %v7401_v2 }
  0x89   : > { %1107 = vmatmul.mubr.bf16.gmra.mrb[48].mxu1 %v7753_v44 }
  0x8a   : > { %1116 = vmatprep.mubr.bf16.mxu1 %v7401_v2 }
  0x8f   : > { %924 = vmatmul.mubr.bf16.gmra.mrb[52].mxu0 %v7761_v47 }
  0x90   : > { %933 = vmatprep.mubr.bf16.mxu0 %v7401_v2 }
  0x91   : > { %1117 = vmatmul.mubr.bf16.gmra.mrb[52].mxu1 %v7761_v47 }
  0x92   : > { %1126 = vmatprep.mubr.bf16.mxu1 %v7401_v2 }
  0x97   : > { %934 = vmatmul.mubr.bf16.gmra.mrb[56].mxu0 %v7769_v50 }
  0x98   : > { %943 = vmatprep.mubr.bf16.mxu0 %v7401_v2 }
  0x99   : > { %1127 = vmatmul.mubr.bf16.gmra.mrb[56].mxu1 %v7769_v50 }
  0x9a   : > { %1136 = vmatprep.mubr.bf16.mxu1 %v7401_v2 }
  0x9f   : > { %944 = vmatmul.mubr.bf16.gmra.mrb[60].mxu0 %v7777_v53 }
  0xa0   : > { %1179 = vmatprep.mubr.bf16.mxu0 %v7401_v2 }
  0xa1   : > { %1137 = vmatmul.mubr.bf16.gmra.mrb[60].mxu1 %v7777_v53 }
  0xa2   : > { %1372 = vmatprep.mubr.bf16.mxu1 %v7401_v2 }
  0xa7   : > { %1180 = vmatmul.mubr.bf16.vlgmr.msra.gmra.mrb[64].mxu0 %v7554_v35 }
  0xa8   : > { %7080 = vmatpush3.bf16.msra.mxu0 %v7667_v11  ;;  %1189 = vmatprep.mubr.bf16.mxu0 %v7401_v2 }
  0xa9   : > { %7081 = vmatprep.subr.bf16.mxu0 %v7281_v55  ;;  %1373 = vmatmul.mubr.bf16.vlgmr.msra.gmra.mrb[64].mxu1 %v7554_v35 }
  0xaa   : > { %1382 = vmatprep.mubr.bf16.mxu1 %v7401_v2 }
  0xac   : > { %7082 = vmatpush3.bf16.msra.mxu0 %v7281_v55 }
  0xad   : > { %7083 = vmatprep.subr.bf16.mxu0 %v7282_v56 }
  0xaf   : > { %1190 = vmatmul.mubr.bf16.gmra.mrb[68].mxu0 %v7575_v43 }
  0xb0   : > { %1199 = vmatprep.mubr.bf16.mxu0 %v7401_v2  ;;  %7084 = vmatpush3.bf16.msra.mxu0 %v7282_v56 }
  0xb1   : > { %7085 = vmatprep.subr.bf16.mxu0 %v7283_v57  ;;  %1383 = vmatmul.mubr.bf16.gmra.mrb[68].mxu1 %v7575_v43 }
  0xb2   : > { %1392 = vmatprep.mubr.bf16.mxu1 %v7401_v2 }
  0xb4   : > { %7086 = vmatpush3.bf16.msra.mxu0 %v7283_v57 }
  0xb5   : > { %7087 = vmatprep.subr.bf16.mxu0 %v7284_v58 }
  0xb7   : > { %1200 = vmatmul.mubr.bf16.gmra.mrb[72].mxu0 %v7607_v54 }
  0xb8   : > { %1209 = vmatprep.mubr.bf16.mxu0 %v7401_v2  ;;  %7088 = vmatpush3.bf16.msra.mxu0 %v7284_v58 }
  0xb9   : > { %7089 = vmatprep.subr.bf16.mxu0 %v7285_v59  ;;  %1393 = vmatmul.mubr.bf16.gmra.mrb[72].mxu1 %v7607_v54 }
  0xba   : > { %1402 = vmatprep.mubr.bf16.mxu1 %v7401_v2 }
  0xbc   : > { %7090 = vmatpush3.bf16.msra.mxu0 %v7285_v59 }
  0xbd   : > { %7091 = vmatprep.subr.bf16.mxu0 %v7286_v60 }
  0xbf   : > { %1210 = vmatmul.mubr.bf16.gmra.mrb[76].mxu0 %v7642_v3 }
  0xc0   : > { %1219 = vmatprep.mubr.bf16.mxu0 %v7401_v2  ;;  %7092 = vmatpush3.bf16.msra.mxu0 %v7286_v60 }
  0xc1   : > { %7093 = vmatprep.subr.bf16.mxu0 %v7287_v61  ;;  %1403 = vmatmul.mubr.bf16.gmra.mrb[76].mxu1 %v7642_v3 }
  0xc2   : > { %1412 = vmatprep.mubr.bf16.mxu1 %v7401_v2 }
  0xc4   : > { %7094 = vmatpush3.bf16.msra.mxu0 %v7287_v61 }
  0xc7   : > { %1220 = vmatmul.mubr.bf16.gmra.mrb[80].mxu0 %v7676_v14 }
  0xc8   : > { %1229 = vmatprep.mubr.bf16.mxu0 %v7401_v2 }
  0xc9   : > { %1413 = vmatmul.mubr.bf16.gmra.mrb[80].mxu1 %v7676_v14 }
  0xca   : > { %1422 = vmatprep.mubr.bf16.mxu1 %v7401_v2 }
  0xcf   : > { %1230 = vmatmul.mubr.bf16.gmra.mrb[84].mxu0 %v7694_v20 }
  0xd0   : > { %1239 = vmatprep.mubr.bf16.mxu0 %v7401_v2 }
  0xd1   : > { %1423 = vmatmul.mubr.bf16.gmra.mrb[84].mxu1 %v7694_v20 }
  0xd2   : > { %1432 = vmatprep.mubr.bf16.mxu1 %v7401_v2 }
  0xd7   : > { %1240 = vmatmul.mubr.bf16.gmra.mrb[88].mxu0 %v7702_v23 }
  0xd8   : > { %1249 = vmatprep.mubr.bf16.mxu0 %v7401_v2 }
  0xd9   : > { %1433 = vmatmul.mubr.bf16.gmra.mrb[88].mxu1 %v7702_v23 }
  0xda   : > { %1442 = vmatprep.mubr.bf16.mxu1 %v7401_v2 }
  0xdf   : > { %1250 = vmatmul.mubr.bf16.gmra.mrb[92].mxu0 %v7710_v26 }
  0xe0   : > { %1259 = vmatprep.mubr.bf16.mxu0 %v7401_v2 }
  0xe1   : > { %1443 = vmatmul.mubr.bf16.gmra.mrb[92].mxu1 %v7710_v26 }
  0xe2   : > { %1452 = vmatprep.mubr.bf16.mxu1 %v7401_v2 }
  0xe7   : > { %1260 = vmatmul.mubr.bf16.gmra.mrb[96].mxu0 %v7718_v29 }
  0xe8   : > { %1269 = vmatprep.mubr.bf16.mxu0 %v7401_v2 }
  0xe9   : > { %1453 = vmatmul.mubr.bf16.gmra.mrb[96].mxu1 %v7718_v29 }
  0xea   : > { %1462 = vmatprep.mubr.bf16.mxu1 %v7401_v2 }
  0xef   : > { %1270 = vmatmul.mubr.bf16.gmra.mrb[100].mxu0 %v7726_v32 }
  0xf0   : > { %1279 = vmatprep.mubr.bf16.mxu0 %v7401_v2 }
  0xf1   : > { %1463 = vmatmul.mubr.bf16.gmra.mrb[100].mxu1 %v7726_v32 }
  0xf2   : > { %1472 = vmatprep.mubr.bf16.mxu1 %v7401_v2 }
  0xf7   : > { %1280 = vmatmul.mubr.bf16.gmra.mrb[104].mxu0 %v7734_v36 }
  0xf8   : > { %1289 = vmatprep.mubr.bf16.mxu0 %v7401_v2 }
  0xf9   : > { %1473 = vmatmul.mubr.bf16.gmra.mrb[104].mxu1 %v7734_v36 }
  0xfa   : > { %v795_v63 = vpop.f32.mrb[0].mxu0  ;;  %1482 = vmatprep.mubr.bf16.mxu1 %v7401_v2 }
  0xfb   : > { %v2043_v0 = vadd.f32 %v2013_v62, %v795_v63  ;;  %v797_v1 = vpop.f32.mrb[1].mxu0 }
  0xfc   : > { %v799_v4 = vpop.f32.mrb[2].mxu0  ;;  %v988_v7 = vpop.f32.mrb[0].mxu1 }
  0xfd   : > { %2073 = vst [vmem:[#allocation2 + $0x11] sm:$0xff] %v2043_v0  ;;  %1703 = vst [vmem:[#allocation4 + $0x48] sm:$0xff] %v799_v4  ;;  %v7850_v5 = vpop.f32.mrb[3].mxu0  ;;  %v990_v9 = vpop.f32.mrb[1].mxu1 }
  0xfe   : > { %1696 = vst [vmem:[#allocation4 + $0x10] sm:$0xff] %v988_v7  ;;  %v7855_v10 = vpop.f32.mrb[2].mxu1  ;;  %v2513_v11 = vadd.f32 %v2481_v6, %v990_v9  ;;  %v2019_v6 = vld [vmem:[#allocation2 + $0x41] sm:$0xff] }
  0xff   : > { %1290 = vmatmul.mubr.bf16.gmra.mrb[108].mxu0 %v7745_v40  ;;  %v994_v15 = vpop.f32.mrb[3].mxu1  ;;  %v2315_v33 = vrot.slane %v7855_v10, 1  ;;  %v7288_v10 = vld [vmem:[%s9276_s3] ss:$36 sps:$4 sm:$0xff]  }
 0x100   : > { %1299 = vmatprep.mubr.bf16.mxu0 %v7401_v2  ;;  %1706 = vst [vmem:[#allocation4 + $0x60] sm:$0xff] %v994_v15  ;;  %2545 = vst [vmem:[#allocation2 + $0x1] sm:$0xff] %v2513_v11 }
 0x101   : > { %1483 = vmatmul.mubr.bf16.gmra.mrb[108].mxu1 %v7745_v40 }
 0x102   : > { %v805_v13 = vpop.f32.mrb[4].mxu0  ;;  %1492 = vmatprep.mubr.bf16.mxu1 %v7401_v2 }
 0x103   : > { %v2045_v16 = vadd.f32 %v2015_v8, %v805_v13  ;;  %v807_v17 = vpop.f32.mrb[5].mxu0 }
 0x104   : > { %v2133_v18 = vld [vmem:[#allocation2 + $0x10] sm:$0xff]  ;;  %v1983_v19 = vld [vmem:[#allocation4 + $0x48] sm:$0x7f]  ;;  %v809_v21 = vpop.f32.mrb[6].mxu0  ;;  %v998_v28 = vpop.f32.mrb[4].mxu1 }
 0x105   : > { %v2163_v22 = vadd.f32 %v2133_v18, %v797_v1  ;;  %v2044_v24 = vadd.f32 %v2014_v12, %v1983_v19  ;;  %2075 = vst [vmem:[#allocation2 + $0x21] sm:$0xff] %v2045_v16  ;;  %1721 = vst [vmem:[#allocation4 + $0xd8] sm:$0xff] %v809_v21  ;;  %v7858_v25 = vpop.f32.mrb[7].mxu0  ;;  %v2223_v27 = vld [vmem:[#allocation4 + $0x10] sm:$0xfe]  ;;  %v7864_v34 = vpop.f32.mrb[5].mxu1 }
 0x106   : > { %v2314_v30 = vrot.slane %v2223_v27, 1  ;;  %1714 = vst [vmem:[#allocation4 + $0xa0] sm:$0xff] %v998_v28  ;;  %v7866_v38 = vpop.f32.mrb[6].mxu1 }
 0x107   : > { %2193 = vst [vmem:[#allocation2 + $0x10] sm:$0xff] %v2163_v22  ;;  %2074 = vst [vmem:[#allocation2 + $0x19] sm:$0x7f] %v2044_v24  ;;  %1300 = vmatmul.mubr.bf16.gmra.mrb[112].mxu0 %v7753_v44  ;;  %v2450_v42 = vld [vmem:[#allocation4 + $0x60] sm:$0x7f]  ;;  %v1004_v45 = vpop.f32.mrb[7].mxu1 }
 0x108   : > { %1309 = vmatprep.mubr.bf16.mxu0 %v7401_v2  ;;  %1724 = vst [vmem:[#allocation4 + $0xf0] sm:$0xff] %v1004_v45  ;;  %v2514_v49 = vadd.f32 %v2482_v37, %v2450_v42  ;;  %v2316_v56 = vsel %vm2313_vm0, %v2314_v30, %v2315_v33  ;;  %v2318_v7 = vrot.slane %v7866_v38, 1  ;;  %v2021_v45 = vld [vmem:[#allocation2 + $0x51] sm:$0xff] }
 0x109   : > { %1493 = vmatmul.mubr.bf16.gmra.mrb[112].mxu1 %v7753_v44 }
 0x10a   : > { %v815_v41 = vpop.f32.mrb[8].mxu0  ;;  %1502 = vmatprep.mubr.bf16.mxu1 %v7401_v2  ;;  %2546 = vst [vmem:[#allocation2 + $0x9] sm:$0x7f] %v2514_v49 }
 0x10b   : > { %v2047_v46 = vadd.f32 %v2017_v31, %v815_v41  ;;  %v817_v48 = vpop.f32.mrb[9].mxu0 }
 0x10c   : > { %v2135_v51 = vld [vmem:[#allocation2 + $0x20] sm:$0xff]  ;;  %v1985_v52 = vld [vmem:[#allocation4 + $0xd8] sm:$0x7f]  ;;  %v819_v55 = vpop.f32.mrb[10].mxu0  ;;  %v1008_v0 = vpop.f32.mrb[8].mxu1 }
 0x10d   : > { %v2165_v57 = vadd.f32 %v2135_v51, %v807_v17  ;;  %v2046_v58 = vadd.f32 %v2016_v39, %v1985_v52  ;;  %2077 = vst [vmem:[#allocation2 + $0x31] sm:$0xff] %v2047_v46  ;;  %1739 = vst [vmem:[#allocation4 + $0x168] sm:$0xff] %v819_v55  ;;  %v7872_v59 = vpop.f32.mrb[11].mxu0  ;;  %v2225_v63 = vld [vmem:[#allocation4 + $0xa0] sm:$0xfe]  ;;  %v7879_v8 = vpop.f32.mrb[9].mxu1 }
 0x10e   : > { %v2134_v60 = vld [vmem:[#allocation2 + $0x18] sm:$0xff]  ;;  %v2253_v61 = vld [vmem:[#allocation2 + $0x10] sm:$0xff]  ;;  %v2317_v4 = vrot.slane %v2225_v63, 1  ;;  %1732 = vst [vmem:[#allocation4 + $0x130] sm:$0xff] %v1008_v0  ;;  %v7881_v9 = vpop.f32.mrb[10].mxu1 }
 0x10f   : > { %v2164_v62 = vadd.f32 %v2134_v60, %v7850_v5  ;;  %2195 = vst [vmem:[#allocation2 + $0x20] sm:$0xff] %v2165_v57  ;;  %2076 = vst [vmem:[#allocation2 + $0x29] sm:$0x7f] %v2046_v58  ;;  %1310 = vmatmul.mubr.bf16.gmra.mrb[116].mxu0 %v7761_v47  ;;  %v2389_v1 = vadd.f32 %v2316_v56, %v2253_v61  ;;  %v2018_v5 = vld [vmem:[#allocation2 + $0x39] sm:$0x7f]  ;;  %v1014_v12 = vpop.f32.mrb[11].mxu1 }
 0x110   : > { %1319 = vmatprep.mubr.bf16.mxu0 %v7401_v2  ;;  %1742 = vst [vmem:[#allocation4 + $0x180] sm:$0xff] %v1014_v12  ;;  %v2319_v19 = vsel %vm2313_vm0, %v2317_v4, %v2318_v7  ;;  %v2321_v46 = vrot.slane %v7881_v9, 1  ;;  %v2020_v51 = vld [vmem:[#allocation2 + $0x49] sm:$0x7f] }
 0x111   : > { %2194 = vst [vmem:[#allocation2 + $0x18] sm:$0xff] %v2164_v62  ;;  %2419 = vst [vmem:[#allocation2 + $0x10] sm:$0xff] %v2389_v1  ;;  %1503 = vmatmul.mubr.bf16.gmra.mrb[116].mxu1 %v7761_v47  ;;  %v7290_v1 = vld [vmem:[%s9276_s3 + $0x4] ss:$36 sps:$4 sm:$0xff]  }
 0x112   : > { %v825_v11 = vpop.f32.mrb[12].mxu0  ;;  %1512 = vmatprep.mubr.bf16.mxu1 %v7401_v2  ;;  %4074 = vmatprep.subr.bf16.mxu1 %v7290_v1  ;;  %v7291_v9 = vld [vmem:[%s9276_s3 + $0x48] ss:$36 sps:$4 sm:$0xff]  }
 0x113   : > { %v2049_v13 = vadd.f32 %v2019_v6, %v825_v11  ;;  %v827_v15 = vpop.f32.mrb[13].mxu0  ;;  %v2452_v11 = vld [vmem:[#allocation4 + $0xf0] sm:$0x7f]  ;;  %4075 = vmatpush1.bf16.msra.mxu1 %v7288_v10 }
 0x114   : > { %v2137_v16 = vld [vmem:[#allocation2 + $0x30] sm:$0xff]  ;;  %v1987_v17 = vld [vmem:[#allocation4 + $0x168] sm:$0x7f]  ;;  %v829_v18 = vpop.f32.mrb[14].mxu0  ;;  %v1018_v37 = vpop.f32.mrb[12].mxu1 }
 0x115   : > { %v2167_v21 = vadd.f32 %v2137_v16, %v817_v48  ;;  %v2048_v22 = vadd.f32 %v2018_v5, %v1987_v17  ;;  %2079 = vst [vmem:[#allocation2 + $0x41] sm:$0xff] %v2049_v13  ;;  %1757 = vst [vmem:[#allocation4 + $0x1f8] sm:$0xff] %v829_v18  ;;  %v7887_v24 = vpop.f32.mrb[15].mxu0  ;;  %v2227_v31 = vld [vmem:[#allocation4 + $0x130] sm:$0xfe]  ;;  %v7894_v48 = vpop.f32.mrb[13].mxu1 }
 0x116   : > { %v2136_v27 = vld [vmem:[#allocation2 + $0x28] sm:$0xff]  ;;  %v2255_v28 = vld [vmem:[#allocation2 + $0x20] sm:$0xff]  ;;  %v2320_v42 = vrot.slane %v2227_v31, 1  ;;  %1750 = vst [vmem:[#allocation4 + $0x1c0] sm:$0xff] %v1018_v37  ;;  %v7898_v49 = vpop.f32.mrb[14].mxu1 }
 0x117   : > { %v2166_v30 = vadd.f32 %v2136_v27, %v7858_v25  ;;  %2197 = vst [vmem:[#allocation2 + $0x30] sm:$0xff] %v2167_v21  ;;  %2078 = vst [vmem:[#allocation2 + $0x39] sm:$0x7f] %v2048_v22  ;;  %1320 = vmatmul.mubr.bf16.gmra.mrb[120].mxu0 %v7769_v50  ;;  %v2391_v39 = vadd.f32 %v2319_v19, %v2255_v28  ;;  %v1024_v55 = vpop.f32.mrb[15].mxu1  ;;  %v2023_v18 = vld [vmem:[#allocation2 + $0x61] sm:$0xff]  ;;  %v2324_v19 = vrot.slane %v7898_v49, 1 }
 0x118   : > { %v2254_v41 = vld [vmem:[#allocation2 + $0x18] sm:$0x7f]  ;;  %1329 = vmatprep.mubr.bf16.mxu0 %v7401_v2  ;;  %1760 = vst [vmem:[#allocation4 + $0x210] sm:$0xff] %v1024_v55 }
 0x119   : > { %2196 = vst [vmem:[#allocation2 + $0x28] sm:$0xff] %v2166_v30  ;;  %v2390_v25 = vadd.f32 %v2315_v33, %v2254_v41  ;;  %2421 = vst [vmem:[#allocation2 + $0x20] sm:$0xff] %v2391_v39  ;;  %1513 = vmatmul.mubr.bf16.gmra.mrb[120].mxu1 %v7769_v50  ;;  %v2322_v33 = vsel %vm2313_vm0, %v2320_v42, %v2321_v46  ;;  %v2022_v28 = vld [vmem:[#allocation2 + $0x59] sm:$0x7f] }
 0x11a   : > { %v835_v52 = vpop.f32.mrb[16].mxu0  ;;  %1522 = vmatprep.mubr.bf16.mxu1 %v7401_v2 }
 0x11b   : > { %2420 = vst [vmem:[#allocation2 + $0x18] sm:$0x7f] %v2390_v25  ;;  %v2051_v56 = vadd.f32 %v2021_v45, %v835_v52  ;;  %v837_v57 = vpop.f32.mrb[17].mxu0 }
 0x11c   : > { %v2139_v58 = vld [vmem:[#allocation2 + $0x40] sm:$0xff]  ;;  %v1989_v60 = vld [vmem:[#allocation4 + $0x1f8] sm:$0x7f]  ;;  %v839_v61 = vpop.f32.mrb[18].mxu0  ;;  %v1028_v13 = vpop.f32.mrb[16].mxu1 }
 0x11d   : > { %v2169_v62 = vadd.f32 %v2139_v58, %v827_v15  ;;  %v2050_v63 = vadd.f32 %v2020_v51, %v1989_v60  ;;  %2081 = vst [vmem:[#allocation2 + $0x51] sm:$0xff] %v2051_v56  ;;  %1775 = vst [vmem:[#allocation4 + $0x288] sm:$0xff] %v839_v61  ;;  %v7907_v0 = vpop.f32.mrb[19].mxu0  ;;  %v2229_v12 = vld [vmem:[#allocation4 + $0x1c0] sm:$0xfe]  ;;  %v7917_v21 = vpop.f32.mrb[17].mxu1 }
 0x11e   : > { %v2138_v4 = vld [vmem:[#allocation2 + $0x38] sm:$0xff]  ;;  %v2257_v6 = vld [vmem:[#allocation2 + $0x30] sm:$0xff]  ;;  %v2323_v17 = vrot.slane %v2229_v12, 1  ;;  %1768 = vst [vmem:[#allocation4 + $0x250] sm:$0xff] %v1028_v13  ;;  %v7921_v22 = vpop.f32.mrb[18].mxu1 }
 0x11f   : > { %v2168_v5 = vadd.f32 %v2138_v4, %v7872_v59  ;;  %2199 = vst [vmem:[#allocation2 + $0x40] sm:$0xff] %v2169_v62  ;;  %2080 = vst [vmem:[#allocation2 + $0x49] sm:$0x7f] %v2050_v63  ;;  %1330 = vmatmul.mubr.bf16.gmra.mrb[124].mxu0 %v7777_v53  ;;  %v2393_v15 = vadd.f32 %v2322_v33, %v2257_v6  ;;  %v1034_v41 = vpop.f32.mrb[19].mxu1  ;;  %v2025_v63 = vld [vmem:[#allocation2 + $0x71] sm:$0xff]  ;;  %v2327_v1 = vrot.slane %v7921_v22, 1 }
 0x120   : > { %v2256_v16 = vld [vmem:[#allocation2 + $0x28] sm:$0x7f]  ;;  %7095 = vmatprep.mubr.bf16.mxu0 %v7554_v35  ;;  %1778 = vst [vmem:[#allocation4 + $0x2a0] sm:$0xff] %v1034_v41  ;;  %v7294_v22 = vld [vmem:[%s9276_s3 + $0x90] ss:$36 sps:$4 sm:$0xff]  }
 0x121   : > { %2198 = vst [vmem:[#allocation2 + $0x38] sm:$0xff] %v2168_v5  ;;  %v2392_v59 = vadd.f32 %v2318_v7, %v2256_v16  ;;  %2423 = vst [vmem:[#allocation2 + $0x30] sm:$0xff] %v2393_v15  ;;  %1523 = vmatmul.mubr.bf16.gmra.mrb[124].mxu1 %v7777_v53  ;;  %v2325_v7 = vsel %vm2313_vm0, %v2323_v17, %v2324_v19 }
 0x122   : > { %v2484_v27 = vld [vmem:[#allocation2 + $0x19] sm:$0x7f]  ;;  %v845_v30 = vpop.f32.mrb[20].mxu0  ;;  %v2483_v35 = vld [vmem:[#allocation2 + $0x11] sm:$0xff]  ;;  %4106 = vmatprep.mubr.bf16.mxu1 %v7401_v2 }
 0x123   : > { %v2516_v31 = vadd.f32 %v2484_v27, %v2452_v11  ;;  %2422 = vst [vmem:[#allocation2 + $0x28] sm:$0x7f] %v2392_v59  ;;  %v2053_v37 = vadd.f32 %v2023_v18, %v845_v30  ;;  %v847_v39 = vpop.f32.mrb[21].mxu0  ;;  %v2515_v38 = vadd.f32 %v2483_v35, %v7864_v34  ;;  %v2454_v34 = vld [vmem:[#allocation4 + $0x180] sm:$0x7f] }
 0x124   : > { %v2141_v42 = vld [vmem:[#allocation2 + $0x50] sm:$0xff]  ;;  %v1991_v45 = vld [vmem:[#allocation4 + $0x288] sm:$0x7f]  ;;  %v849_v25 = vpop.f32.mrb[22].mxu0  ;;  %v1038_v10 = vpop.f32.mrb[20].mxu1 }
 0x125   : > { %2548 = vst [vmem:[#allocation2 + $0x19] sm:$0x7f] %v2516_v31  ;;  %v2171_v51 = vadd.f32 %v2141_v42, %v837_v57  ;;  %v2052_v52 = vadd.f32 %v2022_v28, %v1991_v45  ;;  %2083 = vst [vmem:[#allocation2 + $0x61] sm:$0xff] %v2053_v37  ;;  %v7928_v55 = vpop.f32.mrb[23].mxu0  ;;  %v2231_v61 = vld [vmem:[#allocation4 + $0x250] sm:$0xfe] }
 0x126   : > { %1793 = vst [vmem:[#allocation4 + $0x318] sm:$0xff] %v849_v25  ;;  %v2140_v56 = vld [vmem:[#allocation2 + $0x48] sm:$0xff]  ;;  %2547 = vst [vmem:[#allocation2 + $0x11] sm:$0xff] %v2515_v38  ;;  %v2259_v58 = vld [vmem:[#allocation2 + $0x40] sm:$0xff]  ;;  %v2326_v62 = vrot.slane %v2231_v61, 1  ;;  %v7935_v4 = vpop.f32.mrb[21].mxu1 }
 0x127   : > { %v2170_v60 = vadd.f32 %v2140_v56, %v7887_v24  ;;  %2201 = vst [vmem:[#allocation2 + $0x50] sm:$0xff] %v2171_v51  ;;  %2082 = vst [vmem:[#allocation2 + $0x59] sm:$0x7f] %v2052_v52  ;;  %7096 = vmatmul.mubr.bf16.vlgmr.msra.gmra.mrb[128].mxu0 %v7575_v43  ;;  %v2395_v57 = vadd.f32 %v2325_v7, %v2259_v58  ;;  %v2024_v24 = vld [vmem:[#allocation2 + $0x69] sm:$0x7f]  ;;  %v7939_v5 = vpop.f32.mrb[22].mxu1 }
 0x128   : > { %v2258_v33 = vld [vmem:[#allocation2 + $0x38] sm:$0x7f]  ;;  %7099 = vmatprep.mubr.bf16.mxu0 %v7607_v54  ;;  %1786 = vst [vmem:[#allocation4 + $0x2e0] sm:$0xff] %v1038_v10  ;;  %v1044_v12 = vpop.f32.mrb[23].mxu1  ;;  %v2456_v42 = vld [vmem:[#allocation4 + $0x210] sm:$0x7f] }
 0x129   : > { %2200 = vst [vmem:[#allocation2 + $0x48] sm:$0xff] %v2170_v60  ;;  %v2394_v6 = vadd.f32 %v2321_v46, %v2258_v33  ;;  %2425 = vst [vmem:[#allocation2 + $0x40] sm:$0xff] %v2395_v57  ;;  %v2328_v46 = vsel %vm2313_vm0, %v2326_v62, %v2327_v1  ;;  %v2027_v51 = vld [vmem:[#allocation2 + $0x81] sm:$0xff]  ;;  %v2330_v52 = vrot.slane %v7939_v5, 1  ;;  %v2026_v60 = vld [vmem:[#allocation2 + $0x79] sm:$0x7f] }
 0x12a   : > { %v2486_v43 = vld [vmem:[#allocation2 + $0x29] sm:$0x7f]  ;;  %v855_v11 = vpop.f32.mrb[24].mxu0  ;;  %v2485_v13 = vld [vmem:[#allocation2 + $0x21] sm:$0xff]  ;;  %1796 = vst [vmem:[#allocation4 + $0x330] sm:$0xff] %v1044_v12 }
 0x12b   : > { %v2518_v15 = vadd.f32 %v2486_v43, %v2454_v34  ;;  %2424 = vst [vmem:[#allocation2 + $0x38] sm:$0x7f] %v2394_v6  ;;  %v2055_v16 = vadd.f32 %v2025_v63, %v855_v11  ;;  %v857_v17 = vpop.f32.mrb[25].mxu0  ;;  %v2517_v54 = vadd.f32 %v2485_v13, %v7879_v8  ;;  %v7293_v8 = vld [vmem:[%s9276_s3 + $0x4c] ss:$36 sps:$4 sm:$0xff]  }
 0x12c   : > { %v2143_v18 = vld [vmem:[#allocation2 + $0x60] sm:$0xff]  ;;  %v859_v27 = vpop.f32.mrb[26].mxu0  ;;  %v1048_v45 = vpop.f32.mrb[24].mxu1  ;;  %4076 = vmatprep.subr.bf16.mxu1 %v7293_v8 }
 0x12d   : > { %v1993_v59 = vld [vmem:[#allocation4 + $0x318] sm:$0x7f]  ;;  %2550 = vst [vmem:[#allocation2 + $0x29] sm:$0x7f] %v2518_v15  ;;  %v2173_v28 = vadd.f32 %v2143_v18, %v847_v39  ;;  %2085 = vst [vmem:[#allocation2 + $0x71] sm:$0xff] %v2055_v16  ;;  %v7948_v31 = vpop.f32.mrb[27].mxu0  ;;  %4077 = vmatpush1.bf16.msra.mxu1 %v7291_v9 }
 0x12e   : > { %v2054_v30 = vadd.f32 %v2024_v24, %v1993_v59  ;;  %1811 = vst [vmem:[#allocation4 + $0x3a8] sm:$0xff] %v859_v27  ;;  %2549 = vst [vmem:[#allocation2 + $0x21] sm:$0xff] %v2517_v54  ;;  %v2142_v37 = vld [vmem:[#allocation2 + $0x58] sm:$0xff]  ;;  %v2261_v41 = vld [vmem:[#allocation2 + $0x50] sm:$0xff]  ;;  %v7957_v56 = vpop.f32.mrb[25].mxu1 }
 0x12f   : > { %v2172_v35 = vadd.f32 %v2142_v37, %v7907_v0  ;;  %2203 = vst [vmem:[#allocation2 + $0x60] sm:$0xff] %v2173_v28  ;;  %7100 = vmatmul.mubr.bf16.gmra.mrb[132].mxu0 %v7642_v3  ;;  %v2233_v39 = vld [vmem:[#allocation4 + $0x2e0] sm:$0xfe]  ;;  %v2397_v25 = vadd.f32 %v2328_v46, %v2261_v41  ;;  %1804 = vst [vmem:[#allocation4 + $0x370] sm:$0xff] %v1048_v45  ;;  %v7961_v3 = vpop.f32.mrb[26].mxu1  ;;  %v2029_v27 = vld [vmem:[#allocation2 + $0x91] sm:$0xff] }
 0x130   : > { %2084 = vst [vmem:[#allocation2 + $0x69] sm:$0x7f] %v2054_v30  ;;  %v2260_v38 = vld [vmem:[#allocation2 + $0x48] sm:$0x7f]  ;;  %v2329_v7 = vrot.slane %v2233_v39, 1  ;;  %7103 = vmatprep.mubr.bf16.mxu0 %v7676_v14  ;;  %v1054_v33 = vpop.f32.mrb[27].mxu1 }
 0x131   : > { %2202 = vst [vmem:[#allocation2 + $0x58] sm:$0xff] %v2172_v35  ;;  %v2396_v0 = vadd.f32 %v2324_v19, %v2260_v38  ;;  %2427 = vst [vmem:[#allocation2 + $0x50] sm:$0xff] %v2397_v25  ;;  %v2458_v16 = vld [vmem:[#allocation4 + $0x2a0] sm:$0x7f]  ;;  %v2333_v9 = vrot.slane %v7961_v3, 1 }
 0x132   : > { %v2488_v58 = vld [vmem:[#allocation2 + $0x39] sm:$0x7f]  ;;  %v865_v34 = vpop.f32.mrb[28].mxu0  ;;  %v2487_v14 = vld [vmem:[#allocation2 + $0x31] sm:$0xff]  ;;  %1814 = vst [vmem:[#allocation4 + $0x3c0] sm:$0xff] %v1054_v33  ;;  %v2331_v49 = vsel %vm2313_vm0, %v2329_v7, %v2330_v52 }
 0x133   : > { %v2520_v61 = vadd.f32 %v2488_v58, %v2456_v42  ;;  %2426 = vst [vmem:[#allocation2 + $0x48] sm:$0x7f] %v2396_v0  ;;  %v2057_v10 = vadd.f32 %v2027_v51, %v865_v34  ;;  %v867_v57 = vpop.f32.mrb[29].mxu0  ;;  %v2519_v6 = vadd.f32 %v2487_v14, %v7894_v48  ;;  %v7297_v3 = vld [vmem:[%s9276_s3 + $0xd8] ss:$36 sps:$4 sm:$0xff]  }
 0x134   : > { %v2145_v62 = vld [vmem:[#allocation2 + $0x70] sm:$0xff]  ;;  %v869_v24 = vpop.f32.mrb[30].mxu0  ;;  %v1058_v54 = vpop.f32.mrb[28].mxu1 }
 0x135   : > { %v1995_v63 = vld [vmem:[#allocation4 + $0x3a8] sm:$0x7f]  ;;  %2552 = vst [vmem:[#allocation2 + $0x39] sm:$0x7f] %v2520_v61  ;;  %v2175_v19 = vadd.f32 %v2145_v62, %v857_v17  ;;  %2087 = vst [vmem:[#allocation2 + $0x81] sm:$0xff] %v2057_v10  ;;  %v7967_v11 = vpop.f32.mrb[31].mxu0 }
 0x136   : > { %v2056_v43 = vadd.f32 %v2026_v60, %v1995_v63  ;;  %1829 = vst [vmem:[#allocation4 + $0x438] sm:$0xff] %v869_v24  ;;  %2551 = vst [vmem:[#allocation2 + $0x31] sm:$0xff] %v2519_v6  ;;  %v2263_v13 = vld [vmem:[#allocation2 + $0x60] sm:$0xff]  ;;  %v2235_v48 = vld [vmem:[#allocation4 + $0x370] sm:$0xfe]  ;;  %v7973_v46 = vpop.f32.mrb[29].mxu1 }
 0x137   : > { %v2144_v12 = vld [vmem:[#allocation2 + $0x68] sm:$0xff]  ;;  %2205 = vst [vmem:[#allocation2 + $0x70] sm:$0xff] %v2175_v19  ;;  %7104 = vmatmul.mubr.bf16.gmra.mrb[136].mxu0 %v7694_v20  ;;  %v2399_v18 = vadd.f32 %v2331_v49, %v2263_v13  ;;  %v2332_v17 = vrot.slane %v2235_v48, 1  ;;  %1822 = vst [vmem:[#allocation4 + $0x400] sm:$0xff] %v1058_v54  ;;  %v7977_v30 = vpop.f32.mrb[30].mxu1 }
 0x138   : > { %v2174_v15 = vadd.f32 %v2144_v12, %v7928_v55  ;;  %2086 = vst [vmem:[#allocation2 + $0x79] sm:$0x7f] %v2056_v43  ;;  %v2262_v59 = vld [vmem:[#allocation2 + $0x58] sm:$0x7f]  ;;  %7107 = vmatprep.mubr.bf16.mxu0 %v7702_v23  ;;  %v2028_v55 = vld [vmem:[#allocation2 + $0x89] sm:$0x7f] }
 0x139   : > { %v2398_v28 = vadd.f32 %v2327_v1, %v2262_v59  ;;  %2429 = vst [vmem:[#allocation2 + $0x60] sm:$0xff] %v2399_v18  ;;  %v1064_v37 = vpop.f32.mrb[31].mxu1  ;;  %v2334_v1 = vsel %vm2313_vm0, %v2332_v17, %v2333_v9  ;;  %v2460_v61 = vld [vmem:[#allocation4 + $0x330] sm:$0x7f]  ;;  %v2031_v63 = vld [vmem:[#allocation2 + $0xa1] sm:$0xff]  ;;  %v2336_v24 = vrot.slane %v7977_v30, 1 }
 0x13a   : > { %2204 = vst [vmem:[#allocation2 + $0x68] sm:$0xff] %v2174_v15  ;;  %v2490_v20 = vld [vmem:[#allocation2 + $0x49] sm:$0x7f]  ;;  %v875_v8 = vpop.f32.mrb[32].mxu0  ;;  %v2489_v41 = vld [vmem:[#allocation2 + $0x41] sm:$0xff]  ;;  %1832 = vst [vmem:[#allocation4 + $0x450] sm:$0xff] %v1064_v37 }
 0x13b   : > { %v2522_v35 = vadd.f32 %v2490_v20, %v2458_v16  ;;  %2428 = vst [vmem:[#allocation2 + $0x58] sm:$0x7f] %v2398_v28  ;;  %v2059_v42 = vadd.f32 %v2029_v27, %v875_v8  ;;  %v877_v39 = vpop.f32.mrb[33].mxu0  ;;  %v2521_v23 = vadd.f32 %v2489_v41, %v7917_v21  ;;  %v7296_v21 = vld [vmem:[%s9276_s3 + $0x94] ss:$36 sps:$4 sm:$0xff]  }
 0x13c   : > { %v2147_v45 = vld [vmem:[#allocation2 + $0x80] sm:$0xff]  ;;  %v879_v38 = vpop.f32.mrb[34].mxu0  ;;  %4078 = vmatprep.subr.bf16.mxu1 %v7296_v21  ;;  %v2030_v19 = vld [vmem:[#allocation2 + $0x99] sm:$0x7f] }
 0x13d   : > { %v1997_v25 = vld [vmem:[#allocation4 + $0x438] sm:$0x7f]  ;;  %2554 = vst [vmem:[#allocation2 + $0x49] sm:$0x7f] %v2522_v35  ;;  %v2177_v7 = vadd.f32 %v2147_v45, %v867_v57  ;;  %2089 = vst [vmem:[#allocation2 + $0x91] sm:$0xff] %v2059_v42  ;;  %v7986_v0 = vpop.f32.mrb[35].mxu0  ;;  %4079 = vmatpush1.bf16.msra.mxu1 %v7294_v22 }
 0x13e   : > { %v2058_v51 = vadd.f32 %v2028_v55, %v1997_v25  ;;  %1847 = vst [vmem:[#allocation4 + $0x4c8] sm:$0xff] %v879_v38  ;;  %2553 = vst [vmem:[#allocation2 + $0x41] sm:$0xff] %v2521_v23  ;;  %v2265_v60 = vld [vmem:[#allocation2 + $0x70] sm:$0xff]  ;;  %v2237_v10 = vld [vmem:[#allocation4 + $0x400] sm:$0xfe]  ;;  %v1068_v57 = vpop.f32.mrb[32].mxu1 }
 0x13f   : > { %v2146_v58 = vld [vmem:[#allocation2 + $0x78] sm:$0xff]  ;;  %2207 = vst [vmem:[#allocation2 + $0x80] sm:$0xff] %v2177_v7  ;;  %7108 = vmatmul.mubr.bf16.gmra.mrb[140].mxu0 %v7710_v26  ;;  %v2401_v33 = vadd.f32 %v2334_v1, %v2265_v60  ;;  %v2335_v62 = vrot.slane %v2237_v10, 1  ;;  %1840 = vst [vmem:[#allocation4 + $0x490] sm:$0xff] %v1068_v57  ;;  %v7995_v6 = vpop.f32.mrb[33].mxu1 }
 0x140   : > { %v2176_v34 = vadd.f32 %v2146_v58, %v7948_v31  ;;  %2088 = vst [vmem:[#allocation2 + $0x89] sm:$0x7f] %v2058_v51  ;;  %7111 = vmatprep.mubr.bf16.mxu0 %v7718_v29  ;;  %v7999_v26 = vpop.f32.mrb[34].mxu1  ;;  %v2462_v8 = vld [vmem:[#allocation4 + $0x3c0] sm:$0x7f] }
 0x141   : > { %v2264_v14 = vld [vmem:[#allocation2 + $0x68] sm:$0x7f]  ;;  %2431 = vst [vmem:[#allocation2 + $0x70] sm:$0xff] %v2401_v33  ;;  %v1074_v16 = vpop.f32.mrb[35].mxu1  ;;  %v2337_v5 = vsel %vm2313_vm0, %v2335_v62, %v2336_v24  ;;  %v2339_v23 = vrot.slane %v7999_v26, 1 }
 0x142   : > { %2206 = vst [vmem:[#allocation2 + $0x78] sm:$0xff] %v2176_v34  ;;  %v2400_v31 = vadd.f32 %v2330_v52, %v2264_v14  ;;  %v2492_v49 = vld [vmem:[#allocation2 + $0x59] sm:$0x7f]  ;;  %v885_v43 = vpop.f32.mrb[36].mxu0  ;;  %v2491_v29 = vld [vmem:[#allocation2 + $0x51] sm:$0xff]  ;;  %1850 = vst [vmem:[#allocation4 + $0x4e0] sm:$0xff] %v1074_v16 }
 0x143   : > { %v2524_v12 = vadd.f32 %v2492_v49, %v2460_v61  ;;  %v2061_v13 = vadd.f32 %v2031_v63, %v885_v43  ;;  %v887_v15 = vpop.f32.mrb[37].mxu0  ;;  %v2523_v59 = vadd.f32 %v2491_v29, %v7935_v4  ;;  %v7300_v26 = vld [vmem:[%s9276_s3 + $0x120] ss:$36 sps:$4 sm:$0xff]  }
 0x144   : > { %2430 = vst [vmem:[#allocation2 + $0x68] sm:$0x7f] %v2400_v31  ;;  %v2149_v48 = vld [vmem:[#allocation2 + $0x90] sm:$0xff]  ;;  %v889_v18 = vpop.f32.mrb[38].mxu0  ;;  %v1078_v37 = vpop.f32.mrb[36].mxu1 }
 0x145   : > { %v1999_v54 = vld [vmem:[#allocation4 + $0x4c8] sm:$0x7f]  ;;  %2556 = vst [vmem:[#allocation2 + $0x59] sm:$0x7f] %v2524_v12  ;;  %v2179_v52 = vadd.f32 %v2149_v48, %v877_v39  ;;  %2091 = vst [vmem:[#allocation2 + $0xa1] sm:$0xff] %v2061_v13  ;;  %v8005_v27 = vpop.f32.mrb[39].mxu0 }
 0x146   : > { %v2060_v17 = vadd.f32 %v2030_v19, %v1999_v54  ;;  %1865 = vst [vmem:[#allocation4 + $0x558] sm:$0xff] %v889_v18  ;;  %2555 = vst [vmem:[#allocation2 + $0x51] sm:$0xff] %v2523_v59  ;;  %v2267_v28 = vld [vmem:[#allocation2 + $0x80] sm:$0xff]  ;;  %v2239_v4 = vld [vmem:[#allocation4 + $0x490] sm:$0xfe]  ;;  %v8011_v45 = vpop.f32.mrb[37].mxu1 }
 0x147   : > { %v2148_v55 = vld [vmem:[#allocation2 + $0x88] sm:$0xff]  ;;  %2209 = vst [vmem:[#allocation2 + $0x90] sm:$0xff] %v2179_v52  ;;  %7112 = vmatmul.mubr.bf16.gmra.mrb[144].mxu0 %v7726_v32  ;;  %v2403_v41 = vadd.f32 %v2337_v5, %v2267_v28  ;;  %v2338_v42 = vrot.slane %v2239_v4, 1  ;;  %v2033_v39 = vld [vmem:[#allocation2 + $0xb1] sm:$0xff]  ;;  %1858 = vst [vmem:[#allocation4 + $0x520] sm:$0xff] %v1078_v37  ;;  %v8015_v38 = vpop.f32.mrb[38].mxu1 }
 0x148   : > { %v2178_v20 = vadd.f32 %v2148_v55, %v7967_v11  ;;  %2090 = vst [vmem:[#allocation2 + $0x99] sm:$0x7f] %v2060_v17  ;;  %7115 = vmatprep.mubr.bf16.mxu0 %v7734_v36  ;;  %v2032_v11 = vld [vmem:[#allocation2 + $0xa9] sm:$0x7f]  ;;  %v1084_v1 = vpop.f32.mrb[39].mxu1  ;;  %v2342_v16 = vrot.slane %v8015_v38, 1 }
 0x149   : > { %v2266_v35 = vld [vmem:[#allocation2 + $0x78] sm:$0x7f]  ;;  %2433 = vst [vmem:[#allocation2 + $0x80] sm:$0xff] %v2403_v41  ;;  %1868 = vst [vmem:[#allocation4 + $0x570] sm:$0xff] %v1084_v1  ;;  %v2464_v31 = vld [vmem:[#allocation4 + $0x450] sm:$0x7f] }
 0x14a   : > { %2208 = vst [vmem:[#allocation2 + $0x88] sm:$0xff] %v2178_v20  ;;  %v2402_v25 = vadd.f32 %v2333_v9, %v2266_v35  ;;  %v895_v22 = vpop.f32.mrb[40].mxu0  ;;  %v2340_v9 = vsel %vm2313_vm0, %v2338_v42, %v2339_v23  ;;  %v2034_v54 = vld [vmem:[#allocation2 + $0xb9] sm:$0x7f]  ;;  %v2037_v1 = vld [vmem:[#allocation2 + $0xd1] sm:$0xff] }
 0x14b   : > { %v2494_v32 = vld [vmem:[#allocation2 + $0x69] sm:$0x7f]  ;;  %v2493_v7 = vld [vmem:[#allocation2 + $0x61] sm:$0xff]  ;;  %v2063_v21 = vadd.f32 %v2033_v39, %v895_v22  ;;  %v897_v58 = vpop.f32.mrb[41].mxu0 }
 0x14c   : > { %v2526_v51 = vadd.f32 %v2494_v32, %v2462_v8  ;;  %2432 = vst [vmem:[#allocation2 + $0x78] sm:$0x7f] %v2402_v25  ;;  %v2525_v36 = vadd.f32 %v2493_v7, %v7957_v56  ;;  %v2151_v60 = vld [vmem:[#allocation2 + $0xa0] sm:$0xff]  ;;  %v899_v61 = vpop.f32.mrb[42].mxu0  ;;  %v1088_v19 = vpop.f32.mrb[40].mxu1 }
 0x14d   : > { %v2001_v34 = vld [vmem:[#allocation4 + $0x558] sm:$0x7f]  ;;  %v2181_v10 = vadd.f32 %v2151_v60, %v887_v15  ;;  %2093 = vst [vmem:[#allocation2 + $0xb1] sm:$0xff] %v2063_v21  ;;  %1883 = vst [vmem:[#allocation4 + $0x5e8] sm:$0xff] %v899_v61  ;;  %v8024_v33 = vpop.f32.mrb[43].mxu0  ;;  %v2035_v15 = vld [vmem:[#allocation2 + $0xc1] sm:$0xff] }
 0x14e   : > { %2558 = vst [vmem:[#allocation2 + $0x69] sm:$0x7f] %v2526_v51  ;;  %v2062_v57 = vadd.f32 %v2032_v11, %v2001_v34  ;;  %v7299_v56 = vld [vmem:[%s9276_s3 + $0xdc] ss:$36 sps:$4 sm:$0xff]   ;;  %2557 = vst [vmem:[#allocation2 + $0x61] sm:$0xff] %v2525_v36  ;;  %v2269_v62 = vld [vmem:[#allocation2 + $0x90] sm:$0xff] }
 0x14f   : > { %v2150_v14 = vld [vmem:[#allocation2 + $0x98] sm:$0xff]  ;;  %2211 = vst [vmem:[#allocation2 + $0xa0] sm:$0xff] %v2181_v10  ;;  %7116 = vmatmul.mubr.bf16.gmra.mrb[148].mxu0 %v7745_v40  ;;  %v2241_v49 = vld [vmem:[#allocation4 + $0x520] sm:$0xfe]  ;;  %4080 = vmatprep.subr.bf16.mxu1 %v7299_v56  ;;  %v2405_v43 = vadd.f32 %v2340_v9, %v2269_v62  ;;  %1876 = vst [vmem:[#allocation4 + $0x5b0] sm:$0xff] %v1088_v19  ;;  %v8033_v29 = vpop.f32.mrb[41].mxu1 }
 0x150   : > { %v2180_v63 = vadd.f32 %v2150_v14, %v7986_v0  ;;  %2092 = vst [vmem:[#allocation2 + $0xa9] sm:$0x7f] %v2062_v57  ;;  %v2341_v13 = vrot.slane %v2241_v49, 1  ;;  %7119 = vmatprep.mubr.bf16.mxu0 %v7753_v44  ;;  %4081 = vmatpush1.bf16.msra.mxu1 %v7297_v3  ;;  %v8037_v40 = vpop.f32.mrb[42].mxu1  ;;  %v2466_v39 = vld [vmem:[#allocation4 + $0x4e0] sm:$0x7f] }
 0x151   : > { %v2268_v12 = vld [vmem:[#allocation2 + $0x88] sm:$0x7f]  ;;  %2435 = vst [vmem:[#allocation2 + $0x90] sm:$0xff] %v2405_v43  ;;  %v1094_v17 = vpop.f32.mrb[43].mxu1  ;;  %v2345_v7 = vrot.slane %v8037_v40, 1 }
 0x152   : > { %2210 = vst [vmem:[#allocation2 + $0x98] sm:$0xff] %v2180_v63  ;;  %v2404_v0 = vadd.f32 %v2336_v24, %v2268_v12  ;;  %v905_v18 = vpop.f32.mrb[44].mxu0  ;;  %1886 = vst [vmem:[#allocation4 + $0x600] sm:$0xff] %v1094_v17  ;;  %v2343_v30 = vsel %vm2313_vm0, %v2341_v13, %v2342_v16  ;;  %v2036_v21 = vld [vmem:[#allocation2 + $0xc9] sm:$0x7f] }
 0x153   : > { %v2496_v48 = vld [vmem:[#allocation2 + $0x79] sm:$0x7f]  ;;  %v2065_v5 = vadd.f32 %v2035_v15, %v905_v18  ;;  %v907_v52 = vpop.f32.mrb[45].mxu0  ;;  %v2495_v44 = vld [vmem:[#allocation2 + $0x71] sm:$0xff] }
 0x154   : > { %2434 = vst [vmem:[#allocation2 + $0x88] sm:$0x7f] %v2404_v0  ;;  %v2528_v59 = vadd.f32 %v2496_v48, %v2464_v31  ;;  %v2153_v55 = vld [vmem:[#allocation2 + $0xb0] sm:$0xff]  ;;  %v2003_v28 = vld [vmem:[#allocation4 + $0x5e8] sm:$0x7f]  ;;  %v909_v20 = vpop.f32.mrb[46].mxu0  ;;  %v2527_v8 = vadd.f32 %v2495_v44, %v7973_v46 }
 0x155   : > { %v2183_v24 = vadd.f32 %v2153_v55, %v897_v58  ;;  %v2064_v4 = vadd.f32 %v2034_v54, %v2003_v28  ;;  %2095 = vst [vmem:[#allocation2 + $0xc1] sm:$0xff] %v2065_v5  ;;  %1901 = vst [vmem:[#allocation4 + $0x678] sm:$0xff] %v909_v20  ;;  %v8043_v37 = vpop.f32.mrb[47].mxu0  ;;  %v1098_v11 = vpop.f32.mrb[44].mxu1  ;;  %v2468_v43 = vld [vmem:[#allocation4 + $0x570] sm:$0x7f] }
 0x156   : > { %2560 = vst [vmem:[#allocation2 + $0x79] sm:$0x7f] %v2528_v59  ;;  %2559 = vst [vmem:[#allocation2 + $0x71] sm:$0xff] %v2527_v8  ;;  %v2271_v35 = vld [vmem:[#allocation2 + $0xa0] sm:$0xff]  ;;  %v2243_v46 = vld [vmem:[#allocation4 + $0x5b0] sm:$0xfe] }
 0x157   : > { %v2152_v41 = vld [vmem:[#allocation2 + $0xa8] sm:$0xff]  ;;  %2213 = vst [vmem:[#allocation2 + $0xb0] sm:$0xff] %v2183_v24  ;;  %2094 = vst [vmem:[#allocation2 + $0xb9] sm:$0x7f] %v2064_v4  ;;  %7120 = vmatmul.mubr.bf16.gmra.mrb[152].mxu0 %v7761_v47  ;;  %v2407_v25 = vadd.f32 %v2343_v30, %v2271_v35  ;;  %v2344_v22 = vrot.slane %v2243_v46, 1  ;;  %v8049_v51 = vpop.f32.mrb[45].mxu1 }
 0x158   : > { %v2182_v42 = vadd.f32 %v2152_v41, %v8005_v27  ;;  %7123 = vmatprep.mubr.bf16.mxu0 %v7769_v50  ;;  %1894 = vst [vmem:[#allocation4 + $0x640] sm:$0xff] %v1098_v11  ;;  %v8053_v58 = vpop.f32.mrb[46].mxu1  ;;  %v2039_v54 = vld [vmem:[#allocation2 + $0xe1] sm:$0xff] }
 0x159   : > { %v2270_v32 = vld [vmem:[#allocation2 + $0x98] sm:$0x7f]  ;;  %2437 = vst [vmem:[#allocation2 + $0xa0] sm:$0xff] %v2407_v25  ;;  %v1104_v60 = vpop.f32.mrb[47].mxu1  ;;  %v2348_v18 = vrot.slane %v8053_v58, 1 }
 0x15a   : > { %2212 = vst [vmem:[#allocation2 + $0xa8] sm:$0xff] %v2182_v42  ;;  %v2406_v27 = vadd.f32 %v2339_v23, %v2270_v32  ;;  %v915_v36 = vpop.f32.mrb[48].mxu0  ;;  %1904 = vst [vmem:[#allocation4 + $0x690] sm:$0xff] %v1104_v60  ;;  %v2346_v23 = vsel %vm2313_vm0, %v2344_v22, %v2345_v7  ;;  %v2470_v25 = vld [vmem:[#allocation4 + $0x600] sm:$0x7f] }
 0x15b   : > { %v2498_v47 = vld [vmem:[#allocation2 + $0x89] sm:$0x7f]  ;;  %v2497_v34 = vld [vmem:[#allocation2 + $0x81] sm:$0xff]  ;;  %v2067_v3 = vadd.f32 %v2037_v1, %v915_v36  ;;  %v917_v9 = vpop.f32.mrb[49].mxu0  ;;  %v2041_v36 = vld [vmem:[#allocation2 + $0xf1] sm:$0xff] }
 0x15c   : > { %2436 = vst [vmem:[#allocation2 + $0x98] sm:$0x7f] %v2406_v27  ;;  %v2530_v61 = vadd.f32 %v2498_v47, %v2466_v39  ;;  %v2529_v50 = vadd.f32 %v2497_v34, %v7995_v6  ;;  %v2155_v10 = vld [vmem:[#allocation2 + $0xc0] sm:$0xff]  ;;  %v2005_v57 = vld [vmem:[#allocation4 + $0x678] sm:$0x7f]  ;;  %v919_v56 = vpop.f32.mrb[50].mxu0 }
 0x15d   : > { %v2185_v14 = vadd.f32 %v2155_v10, %v907_v52  ;;  %v2066_v62 = vadd.f32 %v2036_v21, %v2005_v57  ;;  %2097 = vst [vmem:[#allocation2 + $0xd1] sm:$0xff] %v2067_v3  ;;  %1919 = vst [vmem:[#allocation4 + $0x708] sm:$0xff] %v919_v56  ;;  %v8062_v63 = vpop.f32.mrb[51].mxu0  ;;  %v7302_v6 = vld [vmem:[%s9276_s3 + $0x124] ss:$36 sps:$4 sm:$0xff]   ;;  %v1108_v13 = vpop.f32.mrb[48].mxu1 }
 0x15e   : > { %2562 = vst [vmem:[#allocation2 + $0x89] sm:$0x7f] %v2530_v61  ;;  %2561 = vst [vmem:[#allocation2 + $0x81] sm:$0xff] %v2529_v50  ;;  %v2154_v31 = vld [vmem:[#allocation2 + $0xb8] sm:$0xff]  ;;  %v2273_v49 = vld [vmem:[#allocation2 + $0xb0] sm:$0xff]  ;;  %4082 = vmatprep.subr.bf16.mxu1 %v7302_v6  ;;  %v8070_v59 = vpop.f32.mrb[49].mxu1 }
 0x15f   : > { %v2184_v19 = vadd.f32 %v2154_v31, %v8024_v33  ;;  %2215 = vst [vmem:[#allocation2 + $0xc0] sm:$0xff] %v2185_v14  ;;  %2096 = vst [vmem:[#allocation2 + $0xc9] sm:$0x7f] %v2066_v62  ;;  %7124 = vmatmul.mubr.bf16.gmra.mrb[156].mxu0 %v7777_v53  ;;  %v2245_v12 = vld [vmem:[#allocation4 + $0x640] sm:$0xfe]  ;;  %v2409_v15 = vadd.f32 %v2346_v23, %v2273_v49  ;;  %4083 = vmatpush1.bf16.msra.mxu1 %v7300_v26  ;;  %v8075_v53 = vpop.f32.mrb[50].mxu1 }
 0x160   : > { %v2347_v48 = vrot.slane %v2245_v12, 1  ;;  %1912 = vst [vmem:[#allocation4 + $0x6d0] sm:$0xff] %v1108_v13  ;;  %4299 = vmatprep.mubr.bf16.mxu0 %v7401_v2  ;;  %v2038_v52 = vld [vmem:[#allocation2 + $0xd9] sm:$0x7f]  ;;  %v1114_v20 = vpop.f32.mrb[51].mxu1  ;;  %v2351_v21 = vrot.slane %v8075_v53, 1 }
 0x161   : > { %v2272_v0 = vld [vmem:[#allocation2 + $0xa8] sm:$0x7f]  ;;  %2214 = vst [vmem:[#allocation2 + $0xb8] sm:$0xff] %v2184_v19  ;;  %2439 = vst [vmem:[#allocation2 + $0xb0] sm:$0xff] %v2409_v15  ;;  %v7314_v58 = vld [vmem:[%s9276_s3 + $0x54] ss:$36 sps:$4 sm:$0xff]  }
 0x162   : > { %v2408_v33 = vadd.f32 %v2342_v16, %v2272_v0  ;;  %v925_v17 = vpop.f32.mrb[52].mxu0  ;;  %1922 = vst [vmem:[#allocation4 + $0x720] sm:$0xff] %v1114_v20  ;;  %v2349_v38 = vsel %vm2313_vm0, %v2347_v48, %v2348_v18  ;;  %v2040_v34 = vld [vmem:[#allocation2 + $0xe9] sm:$0x7f]  ;;  %v2042_v20 = vld [vmem:[#allocation2 + $0xf9] sm:$0x7f] }
 0x163   : > { %v2500_v5 = vld [vmem:[#allocation2 + $0x99] sm:$0x7f]  ;;  %v2069_v55 = vadd.f32 %v2039_v54, %v925_v17  ;;  %v927_v28 = vpop.f32.mrb[53].mxu0  ;;  %v2499_v8 = vld [vmem:[#allocation2 + $0x91] sm:$0xff]  ;;  %v7320_v53 = vld [vmem:[%s9276_s3 + $0xe4] ss:$36 sps:$4 sm:$0xff]  }
 0x164   : > { %2438 = vst [vmem:[#allocation2 + $0xa8] sm:$0x7f] %v2408_v33  ;;  %v2532_v44 = vadd.f32 %v2500_v5, %v2468_v43  ;;  %v2157_v30 = vld [vmem:[#allocation2 + $0xd0] sm:$0xff]  ;;  %v2007_v24 = vld [vmem:[#allocation4 + $0x708] sm:$0x7f]  ;;  %v929_v4 = vpop.f32.mrb[54].mxu0  ;;  %v2531_v41 = vadd.f32 %v2499_v8, %v8011_v45 }
 0x165   : > { %v2187_v16 = vadd.f32 %v2157_v30, %v917_v9  ;;  %v2068_v35 = vadd.f32 %v2038_v52, %v2007_v24  ;;  %2099 = vst [vmem:[#allocation2 + $0xe1] sm:$0xff] %v2069_v55  ;;  %1937 = vst [vmem:[#allocation4 + $0x798] sm:$0xff] %v929_v4  ;;  %v8081_v42 = vpop.f32.mrb[55].mxu0  ;;  %v1118_v32 = vpop.f32.mrb[52].mxu1  ;;  %v2472_v43 = vld [vmem:[#allocation4 + $0x690] sm:$0x7f] }
 0x166   : > { %2564 = vst [vmem:[#allocation2 + $0x99] sm:$0x7f] %v2532_v44  ;;  %v2156_v39 = vld [vmem:[#allocation2 + $0xc8] sm:$0xff]  ;;  %2563 = vst [vmem:[#allocation2 + $0x91] sm:$0xff] %v2531_v41  ;;  %v2275_v46 = vld [vmem:[#allocation2 + $0xc0] sm:$0xff]  ;;  %v8085_v47 = vpop.f32.mrb[53].mxu1 }
 0x167   : > { %v2186_v11 = vadd.f32 %v2156_v39, %v8043_v37  ;;  %2217 = vst [vmem:[#allocation2 + $0xd0] sm:$0xff] %v2187_v16  ;;  %2098 = vst [vmem:[#allocation2 + $0xd9] sm:$0x7f] %v2068_v35  ;;  %v2247_v45 = vld [vmem:[#allocation4 + $0x6d0] sm:$0xfe]  ;;  %v2411_v22 = vadd.f32 %v2349_v38, %v2275_v46  ;;  %v8089_v37 = vpop.f32.mrb[54].mxu1 }
 0x168   : > { %v2274_v1 = vld [vmem:[#allocation2 + $0xb8] sm:$0x7f]  ;;  %v2350_v27 = vrot.slane %v2247_v45, 1  ;;  %1930 = vst [vmem:[#allocation4 + $0x760] sm:$0xff] %v1118_v32  ;;  %v1124_v9 = vpop.f32.mrb[55].mxu1  ;;  %v2354_v44 = vrot.slane %v8089_v37, 1 }
 0x169   : > { %2216 = vst [vmem:[#allocation2 + $0xc8] sm:$0xff] %v2186_v11  ;;  %v2410_v60 = vadd.f32 %v2345_v7, %v2274_v1  ;;  %2441 = vst [vmem:[#allocation2 + $0xc0] sm:$0xff] %v2411_v22  ;;  %v7303_v7 = vld [vmem:[%s9276_s3 + $0x168] ss:$36 sps:$4 sm:$0xff]   ;;  %v7312_v16 = vld [vmem:[%s9276_s3 + $0x50] ss:$36 sps:$4 sm:$0xff]  }
 0x16a   : > { %v935_v3 = vpop.f32.mrb[56].mxu0  ;;  %1940 = vst [vmem:[#allocation4 + $0x7b0] sm:$0xff] %v1124_v9  ;;  %v2352_v62 = vsel %vm2313_vm0, %v2350_v27, %v2351_v21  ;;  %v7308_v48 = vld [vmem:[%s9276_s3 + $0xc] ss:$36 sps:$4 sm:$0xff]   ;;  %v2474_v32 = vld [vmem:[#allocation4 + $0x720] sm:$0x7f] }
 0x16b   : > { %v2502_v61 = vld [vmem:[#allocation2 + $0xa9] sm:$0x7f]  ;;  %v2501_v50 = vld [vmem:[#allocation2 + $0xa1] sm:$0xff]  ;;  %2440 = vst [vmem:[#allocation2 + $0xb8] sm:$0x7f] %v2410_v60  ;;  %v8091_v57 = vpop.f32.mrb[57].mxu0  ;;  %v2071_v26 = vadd.f32 %v2041_v36, %v935_v3  ;;  %4267 = vmatprep.subr.bf16.mxu0 %v7308_v48 }
 0x16c   : > { %v2534_v10 = vadd.f32 %v2502_v61, %v2470_v25  ;;  %v2533_v56 = vadd.f32 %v2501_v50, %v8033_v29  ;;  %v2159_v23 = vld [vmem:[#allocation2 + $0xe0] sm:$0xff]  ;;  %v2009_v14 = vld [vmem:[#allocation4 + $0x798] sm:$0x7f]  ;;  %v939_v40 = vpop.f32.mrb[58].mxu0  ;;  %v7305_v29 = vld [vmem:[%s9276_s3 + $0x16c] ss:$36 sps:$4 sm:$0xff]  }
 0x16d   : > { %v2189_v6 = vadd.f32 %v2159_v23, %v927_v28  ;;  %v2070_v31 = vadd.f32 %v2040_v34, %v2009_v14  ;;  %1955 = vst [vmem:[#allocation4 + $0x828] sm:$0xff] %v939_v40  ;;  %v8100_v49 = vpop.f32.mrb[59].mxu0  ;;  %2101 = vst [vmem:[#allocation2 + $0xf1] sm:$0xff] %v2071_v26  ;;  %v1128_v0 = vpop.f32.mrb[56].mxu1  ;;  %4084 = vmatprep.subr.bf16.mxu1 %v7305_v29  ;;  %v7306_v52 = vld [vmem:[%s9276_s3 + $0x8] ss:$36 sps:$4 sm:$0xff]  }
 0x16e   : > { %2566 = vst [vmem:[#allocation2 + $0xa9] sm:$0x7f] %v2534_v10  ;;  %2565 = vst [vmem:[#allocation2 + $0xa1] sm:$0xff] %v2533_v56  ;;  %v2158_v19 = vld [vmem:[#allocation2 + $0xd8] sm:$0xff]  ;;  %v2277_v12 = vld [vmem:[#allocation2 + $0xd0] sm:$0xff]  ;;  %v8109_v5 = vpop.f32.mrb[57].mxu1  ;;  %4085 = vmatpush1.bf16.msra.mxu1 %v7303_v7  ;;  %4268 = vmatpush1.bf16.msra.mxu0 %v7306_v52 }
 0x16f   : > { %v2188_v13 = vadd.f32 %v2158_v19, %v8062_v63  ;;  %2219 = vst [vmem:[#allocation2 + $0xe0] sm:$0xff] %v2189_v6  ;;  %2100 = vst [vmem:[#allocation2 + $0xe9] sm:$0x7f] %v2070_v31  ;;  %v2249_v15 = vld [vmem:[#allocation4 + $0x760] sm:$0xfe]  ;;  %v2413_v54 = vadd.f32 %v2352_v62, %v2277_v12  ;;  %v8117_v55 = vpop.f32.mrb[58].mxu1  ;;  %4269 = vmatprep.subr.bf16.mxu0 %v7314_v58 }
 0x170   : > { %v2276_v33 = vld [vmem:[#allocation2 + $0xc8] sm:$0x7f]  ;;  %1948 = vst [vmem:[#allocation4 + $0x7f0] sm:$0xff] %v1128_v0  ;;  %v2353_v17 = vrot.slane %v2249_v15, 1  ;;  %v1134_v4 = vpop.f32.mrb[59].mxu1  ;;  %v2357_v22 = vrot.slane %v8117_v55, 1 }
 0x171   : > { %2218 = vst [vmem:[#allocation2 + $0xd8] sm:$0xff] %v2188_v13  ;;  %v2412_v63 = vadd.f32 %v2348_v18, %v2276_v33  ;;  %2443 = vst [vmem:[#allocation2 + $0xd0] sm:$0xff] %v2413_v54  ;;  %v7309_v1 = vld [vmem:[%s9276_s3 + $0x1b0] ss:$36 sps:$4 sm:$0xff]   ;;  %v7317_v34 = vld [vmem:[%s9276_s3 + $0x9c] ss:$36 sps:$4 sm:$0xff]  }
 0x172   : > { %v2504_v28 = vld [vmem:[#allocation2 + $0xb9] sm:$0x7f]  ;;  %v945_v8 = vpop.f32.mrb[60].mxu0  ;;  %v2503_v18 = vld [vmem:[#allocation2 + $0xb1] sm:$0xff]  ;;  %1958 = vst [vmem:[#allocation4 + $0x840] sm:$0xff] %v1134_v4  ;;  %v2355_v11 = vsel %vm2313_vm0, %v2353_v17, %v2354_v44  ;;  %4270 = vmatpush1.bf16.msra.mxu0 %v7312_v16  ;;  %v2610_v12 = vld [vmem:[#allocation2 + $0x8] sm:$0xff] }
 0x173   : > { %2442 = vst [vmem:[#allocation2 + $0xc8] sm:$0x7f] %v2412_v63  ;;  %v2536_v30 = vadd.f32 %v2504_v28, %v2472_v43  ;;  %v947_v24 = vpop.f32.mrb[61].mxu0  ;;  %v2535_v35 = vadd.f32 %v2503_v18, %v8049_v51  ;;  %v7311_v51 = vld [vmem:[%s9276_s3 + $0x1b4] ss:$36 sps:$4 sm:$0xff]   ;;  %4271 = vmatprep.subr.bf16.mxu0 %v7317_v34  ;;  %v2609_v4 = vld [vmem:[#allocation2] sm:$0xff] }
 0x174   : > { %v2011_v41 = vld [vmem:[#allocation4 + $0x828] sm:$0x7f]  ;;  %v949_v38 = vpop.f32.mrb[62].mxu0  ;;  %v2161_v25 = vld [vmem:[#allocation2 + $0xf0] sm:$0xff]  ;;  %v1138_v60 = vpop.f32.mrb[60].mxu1  ;;  %4086 = vmatprep.subr.bf16.mxu1 %v7311_v51 }
 0x175   : > { %2568 = vst [vmem:[#allocation2 + $0xb9] sm:$0x7f] %v2536_v30  ;;  %v2072_v39 = vadd.f32 %v2042_v20, %v2011_v41  ;;  %v951_v46 = vpop.f32.mrb[63].mxu0  ;;  %2567 = vst [vmem:[#allocation2 + $0xb1] sm:$0xff] %v2535_v35  ;;  %v2191_v3 = vadd.f32 %v2161_v25, %v8091_v57  ;;  %v8141_v10 = vpop.f32.mrb[61].mxu1  ;;  %4087 = vmatpush1.bf16.msra.mxu1 %v7309_v1 }
 0x176   : > { %v2160_v45 = vld [vmem:[#allocation2 + $0xe8] sm:$0xff]  ;;  %v2279_v61 = vld [vmem:[#allocation2 + $0xe0] sm:$0xff]  ;;  %v7315_v56 = vld [vmem:[%s9276_s3 + $0x98] ss:$36 sps:$4 sm:$0xff]   ;;  %v1142_v23 = vpop.f32.mrb[62].mxu1 }
 0x177   : > { %v2190_v27 = vadd.f32 %v2160_v45, %v8081_v42  ;;  %2102 = vst [vmem:[#allocation2 + $0xf9] sm:$0x7f] %v2072_v39  ;;  %v2251_v36 = vld [vmem:[#allocation4 + $0x7f0] sm:$0xfe]  ;;  %v2415_v42 = vadd.f32 %v2355_v11, %v2279_v61  ;;  %v1144_v57 = vpop.f32.mrb[63].mxu1  ;;  %4272 = vmatpush1.bf16.msra.mxu0 %v7315_v56  ;;  %v2612_v39 = vld [vmem:[#allocation2 + $0x18] sm:$0xff] }
 0x178   : > { %v2278_v9 = vld [vmem:[#allocation2 + $0xd8] sm:$0x7f]  ;;  %v2356_v50 = vrot.slane %v2251_v36, 1  ;;  %1976 = vst [vmem:[#allocation4 + $0x8d0] sm:$0xff] %v1144_v57  ;;  %v7318_v43 = vld [vmem:[%s9276_s3 + $0xe0] ss:$36 sps:$4 sm:$0xff]   ;;  %4273 = vmatprep.subr.bf16.mxu0 %v7320_v53 }
 0x179   : > { %2220 = vst [vmem:[#allocation2 + $0xe8] sm:$0xff] %v2190_v27  ;;  %v2414_v26 = vadd.f32 %v2351_v21, %v2278_v9  ;;  %2445 = vst [vmem:[#allocation2 + $0xe0] sm:$0xff] %v2415_v42  ;;  %v2476_v48 = vld [vmem:[#allocation4 + $0x7b0] sm:$0x7f]  ;;  %v7321_v17 = vld [vmem:[%s9276_s3 + $0x128] ss:$36 sps:$4 sm:$0xff]  }
 0x17a   : > { %v2506_v14 = vld [vmem:[#allocation2 + $0xc9] sm:$0x7f]  ;;  %v1181_v40 = vpop.f32.mrb[64].mxu0  ;;  %v2505_v7 = vld [vmem:[#allocation2 + $0xc1] sm:$0xff]  ;;  %v2358_v62 = vsel %vm2313_vm0, %v2356_v50, %v2357_v22  ;;  %v7329_v41 = vld [vmem:[%s9276_s3 + $0x174] ss:$36 sps:$4 sm:$0xff]  }
 0x17b   : > { %2444 = vst [vmem:[#allocation2 + $0xd8] sm:$0x7f] %v2414_v26  ;;  %v2538_v6 = vadd.f32 %v2506_v14, %v2474_v32  ;;  %v1183_v31 = vpop.f32.mrb[65].mxu0  ;;  %v2537_v21 = vadd.f32 %v2505_v7, %v8070_v59  ;;  %v2417_v29 = vadd.f32 %v2358_v62, %v2191_v3  ;;  %4274 = vmatpush1.bf16.msra.mxu0 %v7318_v43  ;;  %v7323_v59 = vld [vmem:[%s9276_s3 + $0x12c] ss:$36 sps:$4 sm:$0xff]  }
 0x17c   : > { %1699 = vst [vmem:[#allocation4 + $0x28] sm:$0xff] %v1183_v31  ;;  %v1185_v19 = vpop.f32.mrb[66].mxu0  ;;  %v1374_v54 = vpop.f32.mrb[64].mxu1  ;;  %4275 = vmatprep.subr.bf16.mxu0 %v7323_v59  ;;  %v7327_v35 = vld [vmem:[%s9276_s3 + $0x170] ss:$36 sps:$4 sm:$0xff]   ;;  %v2641_v32 = vadd.f32 %v2609_v4, %v1181_v40 }
 0x17d   : > { %2570 = vst [vmem:[#allocation2 + $0xc9] sm:$0x7f] %v2538_v6  ;;  %v1187_v13 = vpop.f32.mrb[67].mxu0  ;;  %v2642_v15 = vadd.f32 %v2610_v12, %v1185_v19  ;;  %2569 = vst [vmem:[#allocation2 + $0xc1] sm:$0xff] %v2537_v21  ;;  %v1376_v63 = vpop.f32.mrb[65].mxu1  ;;  %v2611_v31 = vld [vmem:[#allocation2 + $0x10] sm:$0xff] }
 0x17e   : > { %2447 = vst [vmem:[#allocation2 + $0xf0] sm:$0xff] %v2417_v29  ;;  %v2162_v0 = vld [vmem:[#allocation2 + $0xf8] sm:$0xff]  ;;  %v1378_v20 = vpop.f32.mrb[66].mxu1  ;;  %v2478_v36 = vld [vmem:[#allocation4 + $0x840] sm:$0x7f]  ;;  %v2614_v19 = vld [vmem:[#allocation2 + $0x28] sm:$0xff] }
 0x17f   : > { %2674 = vst [vmem:[#allocation2 + $0x8] sm:$0xff] %v2642_v15  ;;  %v2192_v33 = vadd.f32 %v2162_v0, %v8100_v49  ;;  %v1380_v24 = vpop.f32.mrb[67].mxu1  ;;  %4276 = vmatpush1.bf16.msra.mxu0 %v7321_v17  ;;  %v7324_v25 = vld [vmem:[%s9276_s3 + $0x1f8] ss:$36 sps:$4 sm:$0xff]   ;;  %v7335_v6 = vld [vmem:[%s9276_s3 + $0x204] ss:$36 sps:$4 sm:$0xff]  }
 0x180   : > { %v2280_v52 = vld [vmem:[#allocation2 + $0xe8] sm:$0x7f]  ;;  %v7326_v45 = vld [vmem:[%s9276_s3 + $0x1fc] ss:$36 sps:$4 sm:$0xff]   ;;  %4277 = vmatprep.subr.bf16.mxu0 %v7329_v41  ;;  %v2480_v59 = vld [vmem:[#allocation4 + $0x8d0] sm:$0x7f] }
 0x181   : > { %v2416_v28 = vadd.f32 %v2354_v44, %v2280_v52  ;;  %2222 = vst [vmem:[#allocation2 + $0xf8] sm:$0xff] %v2192_v33  ;;  %v2802_v44 = vrot.slane %v1187_v13, 1  ;;  %4088 = vmatprep.subr.bf16.mxu1 %v7326_v45  ;;  %v7332_v60 = vld [vmem:[%s9276_s3 + $0x1bc] ss:$36 sps:$4 sm:$0xff]  }
 0x182   : > { %v2508_v8 = vld [vmem:[#allocation2 + $0xd9] sm:$0x7f]  ;;  %v8167_v30 = vpop.f32.mrb[68].mxu0  ;;  %v2507_v38 = vld [vmem:[#allocation2 + $0xd1] sm:$0xff]  ;;  %4089 = vmatpush1.bf16.msra.mxu1 %v7324_v25  ;;  %v7333_v29 = vld [vmem:[%s9276_s3 + $0x200] ss:$36 sps:$4 sm:$0xff]  }
 0x183   : > { %2446 = vst [vmem:[#allocation2 + $0xe8] sm:$0x7f] %v2416_v28  ;;  %v2540_v49 = vadd.f32 %v2508_v8, %v2476_v48  ;;  %v2705_v58 = vld [vmem:[#allocation4 + $0x28] sm:$0xfe]  ;;  %v1193_v18 = vpop.f32.mrb[69].mxu0  ;;  %v2539_v46 = vadd.f32 %v2507_v38, %v8085_v47  ;;  %4278 = vmatpush1.bf16.msra.mxu0 %v7327_v35  ;;  %v2643_v12 = vadd.f32 %v2611_v31, %v8167_v30  ;;  %v2613_v35 = vld [vmem:[#allocation2 + $0x20] sm:$0xff] }
 0x184   : > { %v2801_v37 = vrot.slane %v2705_v58, 1  ;;  %1717 = vst [vmem:[#allocation4 + $0xb8] sm:$0xff] %v1193_v18  ;;  %v1195_v16 = vpop.f32.mrb[70].mxu0  ;;  %v1384_v47 = vpop.f32.mrb[68].mxu1  ;;  %v7330_v9 = vld [vmem:[%s9276_s3 + $0x1b8] ss:$36 sps:$4 sm:$0xff]   ;;  %4279 = vmatprep.subr.bf16.mxu0 %v7332_v60 }
 0x185   : > { %2572 = vst [vmem:[#allocation2 + $0xd9] sm:$0x7f] %v2540_v49  ;;  %v1197_v11 = vpop.f32.mrb[71].mxu0  ;;  %v2644_v1 = vadd.f32 %v2612_v39, %v1195_v16  ;;  %2571 = vst [vmem:[#allocation2 + $0xd1] sm:$0xff] %v2539_v46  ;;  %v8186_v3 = vpop.f32.mrb[69].mxu1  ;;  %v2616_v39 = vld [vmem:[#allocation2 + $0x38] sm:$0xff] }
 0x186   : > { %v2738_v51 = vld [vmem:[#allocation2 + $0x8] sm:$0x7f]  ;;  %v2803_v27 = vsel %vm2313_vm0, %v2801_v37, %v2802_v44  ;;  %v1388_v56 = vpop.f32.mrb[70].mxu1  ;;  %v8213_v25 = vld [vmem:[%s9277_s4] ss:$0 sm:$0xff] }
 0x187   : > { %v2881_v34 = vadd.f32 %v2803_v27, %v2641_v32  ;;  %v2882_v61 = vadd.f32 %v2802_v44, %v2738_v51  ;;  %2676 = vst [vmem:[#allocation2 + $0x18] sm:$0xff] %v2644_v1  ;;  %1727 = vst [vmem:[#allocation4 + $0x108] sm:$0xff] %v1388_v56  ;;  %v8193_v14 = vpop.f32.mrb[71].mxu1  ;;  %4280 = vmatpush1.bf16.msra.mxu0 %v7330_v9 }
 0x188   : > { %v2282_v50 = vld [vmem:[#allocation2 + $0xf8] sm:$0x7f]  ;;  %4281 = vmatprep.subr.bf16.mxu0 %v7335_v6 }
 0x189   : > { %2913 = vst [vmem:[#allocation2] sm:$0xff] %v2881_v34  ;;  %2914 = vst [vmem:[#allocation2 + $0x8] sm:$0x7f] %v2882_v61  ;;  %v2418_v42 = vadd.f32 %v2357_v22, %v2282_v50  ;;  %v2805_v22 = vrot.slane %v1197_v11, 1  ;;  %v3507_v11 = vld [vmem:[%s7529_s27] sm:$0xff] }
 0x18a   : > { %v2510_v26 = vld [vmem:[#allocation2 + $0xe9] sm:$0x7f]  ;;  %v1201_v23 = vpop.f32.mrb[72].mxu0  ;;  %v2509_v40 = vld [vmem:[#allocation2 + $0xe1] sm:$0xff]  ;;  %v3546_v27 = vadd.f32 %v8213_v25, %v3507_v11 }
 0x18b   : > { %v2542_v57 = vadd.f32 %v2510_v26, %v2478_v36  ;;  %v2707_v7 = vld [vmem:[#allocation4 + $0xb8] sm:$0xfe]  ;;  %v1203_v62 = vpop.f32.mrb[73].mxu0  ;;  %v2541_v53 = vadd.f32 %v2509_v40, %v8109_v5  ;;  %2448 = vst [vmem:[#allocation2 + $0xf8] sm:$0x7f] %v2418_v42  ;;  %4282 = vmatpush1.bf16.msra.mxu0 %v7333_v29  ;;  %v2645_v45 = vadd.f32 %v2613_v35, %v1201_v23  ;;  %v2615_v29 = vld [vmem:[#allocation2 + $0x30] sm:$0xff] }
 0x18c   : > { %v2804_v55 = vrot.slane %v2707_v7, 1  ;;  %1735 = vst [vmem:[#allocation4 + $0x148] sm:$0xff] %v1203_v62  ;;  %v1205_v21 = vpop.f32.mrb[74].mxu0  ;;  %v1394_v0 = vpop.f32.mrb[72].mxu1  ;;  %v2620_v35 = vld [vmem:[#allocation2 + $0x58] sm:$0xff] }
 0x18d   : > { %2574 = vst [vmem:[#allocation2 + $0xe9] sm:$0x7f] %v2542_v57  ;;  %v1207_v43 = vpop.f32.mrb[75].mxu0  ;;  %v2646_v13 = vadd.f32 %v2614_v19, %v1205_v21  ;;  %2573 = vst [vmem:[#allocation2 + $0xe1] sm:$0xff] %v2541_v53  ;;  %v1396_v33 = vpop.f32.mrb[73].mxu1  ;;  %v2618_v19 = vld [vmem:[#allocation2 + $0x48] sm:$0xff] }
 0x18e   : > { %v2740_v15 = vld [vmem:[#allocation2 + $0x18] sm:$0x7f]  ;;  %v2806_v5 = vsel %vm2313_vm0, %v2804_v55, %v2805_v22  ;;  %v2947_v17 = vld [vmem:[#allocation4 + $0x108] sm:$0x7f]  ;;  %1737 = vst [vmem:[#allocation4 + $0x158] sm:$0xff] %v1396_v33  ;;  %v1398_v28 = vpop.f32.mrb[74].mxu1 }
 0x18f   : > { %v2883_v48 = vadd.f32 %v2806_v5, %v2643_v12  ;;  %v2884_v54 = vadd.f32 %v2805_v22, %v2740_v15  ;;  %2678 = vst [vmem:[#allocation2 + $0x28] sm:$0xff] %v2646_v13  ;;  %1745 = vst [vmem:[#allocation4 + $0x198] sm:$0xff] %v1398_v28  ;;  %v8206_v30 = vpop.f32.mrb[75].mxu1  ;;  %v2808_v44 = vrot.slane %v1207_v43, 1  ;;  %v3509_v12 = vld [vmem:[%s7529_s27 + $0x10] sm:$0xff] }
 0x190   : > { %v2976_v52 = vld [vmem:[#allocation2 + $0x1] sm:$0xff]  ;;  %v2977_v63 = vld [vmem:[#allocation2 + $0x9] sm:$0x7f] }
 0x191   : > { %v3006_v20 = vadd.f32 %v2976_v52, %v1384_v47  ;;  %2915 = vst [vmem:[#allocation2 + $0x10] sm:$0xff] %v2883_v48  ;;  %2916 = vst [vmem:[#allocation2 + $0x18] sm:$0x7f] %v2884_v54  ;;  %v3007_v24 = vadd.f32 %v2977_v63, %v2947_v17  ;;  %v3548_v48 = vadd.f32 %v8213_v25, %v3509_v12  ;;  %v3513_v12 = vld [vmem:[%s7529_s27 + $0x30] sm:$0xff] }
 0x192   : > { %v8204_v8 = vpop.f32.mrb[76].mxu0  ;;  %v2511_v4 = vld [vmem:[#allocation2 + $0xf1] sm:$0xff]  ;;  %v2512_v49 = vld [vmem:[#allocation2 + $0xf9] sm:$0x7f] }
 0x193   : > { %v2709_v58 = vld [vmem:[#allocation4 + $0x148] sm:$0xfe]  ;;  %v1213_v18 = vpop.f32.mrb[77].mxu0  ;;  %3036 = vst [vmem:[#allocation2 + $0x1] sm:$0xff] %v3006_v20  ;;  %v2543_v41 = vadd.f32 %v2511_v4, %v8141_v10  ;;  %v2544_v38 = vadd.f32 %v2512_v49, %v2480_v59  ;;  %3037 = vst [vmem:[#allocation2 + $0x9] sm:$0x7f] %v3007_v24  ;;  %v2647_v13 = vadd.f32 %v2615_v29, %v8204_v8 }
 0x194   : > { %v2807_v37 = vrot.slane %v2709_v58, 1  ;;  %1753 = vst [vmem:[#allocation4 + $0x1d8] sm:$0xff] %v1213_v18  ;;  %v1215_v16 = vpop.f32.mrb[78].mxu0  ;;  %v7338_v10 = vld [vmem:[%s9276_s3 + $0x14] ss:$36 sps:$4 sm:$0xff]   ;;  %v1404_v51 = vpop.f32.mrb[76].mxu1 }
 0x195   : > { %v1217_v46 = vpop.f32.mrb[79].mxu0  ;;  %v2648_v32 = vadd.f32 %v2616_v39, %v1215_v16  ;;  %2575 = vst [vmem:[#allocation2 + $0xf1] sm:$0xff] %v2543_v41  ;;  %2576 = vst [vmem:[#allocation2 + $0xf9] sm:$0x7f] %v2544_v38  ;;  %v1406_v60 = vpop.f32.mrb[77].mxu1  ;;  %4460 = vmatprep.subr.bf16.mxu1 %v7338_v10  ;;  %v2617_v16 = vld [vmem:[#allocation2 + $0x40] sm:$0xff] }
 0x196   : > { %v2809_v1 = vsel %vm2313_vm0, %v2807_v37, %v2808_v44  ;;  %v2742_v36 = vld [vmem:[#allocation2 + $0x28] sm:$0x7f]  ;;  %v2949_v50 = vld [vmem:[#allocation4 + $0x198] sm:$0x7f]  ;;  %1755 = vst [vmem:[#allocation4 + $0x1e8] sm:$0xff] %v1406_v60  ;;  %v1408_v56 = vpop.f32.mrb[78].mxu1 }
 0x197   : > { %v2885_v47 = vadd.f32 %v2809_v1, %v2645_v45  ;;  %2680 = vst [vmem:[#allocation2 + $0x38] sm:$0xff] %v2648_v32  ;;  %v2886_v9 = vadd.f32 %v2808_v44, %v2742_v36  ;;  %1763 = vst [vmem:[#allocation4 + $0x228] sm:$0xff] %v1408_v56  ;;  %v8220_v23 = vpop.f32.mrb[79].mxu1  ;;  %v2811_v55 = vrot.slane %v1217_v46, 1  ;;  %v3511_v46 = vld [vmem:[%s7529_s27 + $0x20] sm:$0xff] }
 0x198   : > { %v2978_v34 = vld [vmem:[#allocation2 + $0x11] sm:$0xff]  ;;  %v2979_v61 = vld [vmem:[#allocation2 + $0x19] sm:$0x7f]  ;;  %v3550_v36 = vadd.f32 %v8213_v25, %v3511_v46 }
 0x199   : > { %v3008_v42 = vadd.f32 %v2978_v34, %v1394_v0  ;;  %2917 = vst [vmem:[#allocation2 + $0x20] sm:$0xff] %v2885_v47  ;;  %v3009_v57 = vadd.f32 %v2979_v61, %v2949_v50  ;;  %2918 = vst [vmem:[#allocation2 + $0x28] sm:$0x7f] %v2886_v9 }
 0x19a   : > { %v1221_v26 = vpop.f32.mrb[80].mxu0  ;;  %v3096_v40 = vld [vmem:[#allocation2] sm:$0xff]  ;;  %v3097_v6 = vld [vmem:[#allocation2 + $0x8] sm:$0xff] }
 0x19b   : > { %v2711_v7 = vld [vmem:[#allocation4 + $0x1d8] sm:$0xfe]  ;;  %v1223_v62 = vpop.f32.mrb[81].mxu0  ;;  %v8223_v31 = vadd.f32 %v3096_v40, %v8186_v3  ;;  %3578 = vst [vmem:[#allocation2] sm:$0xff] %v3546_v27  ;;  %3038 = vst [vmem:[#allocation2 + $0x11] sm:$0xff] %v3008_v42  ;;  %v3127_v21 = vadd.f32 %v3097_v6, %v8193_v14  ;;  %v2649_v11 = vadd.f32 %v2617_v16, %v1221_v26 }
 0x19c   : > { %v2810_v53 = vrot.slane %v2711_v7, 1  ;;  %1771 = vst [vmem:[#allocation4 + $0x268] sm:$0xff] %v1223_v62  ;;  %v1225_v22 = vpop.f32.mrb[82].mxu0  ;;  %3039 = vst [vmem:[#allocation2 + $0x19] sm:$0x7f] %v3009_v57  ;;  %v1414_v0 = vpop.f32.mrb[80].mxu1 }
 0x19d   : > { %v1227_v43 = vpop.f32.mrb[83].mxu0  ;;  %v2650_v15 = vadd.f32 %v2618_v19, %v1225_v22  ;;  %3157 = vst [vmem:[#allocation2 + $0x8] sm:$0xff] %v3127_v21  ;;  %v1416_v33 = vpop.f32.mrb[81].mxu1  ;;  %v2619_v22 = vld [vmem:[#allocation2 + $0x50] sm:$0xff]  ;;  %v2622_v21 = vld [vmem:[#allocation2 + $0x68] sm:$0xff]  ;;  %v2624_v16 = vld [vmem:[#allocation2 + $0x78] sm:$0xff] }
 0x19e   : > { %v2744_v5 = vld [vmem:[#allocation2 + $0x38] sm:$0x7f]  ;;  %v2812_v3 = vsel %vm2313_vm0, %v2810_v53, %v2811_v55  ;;  %v2951_v14 = vld [vmem:[#allocation4 + $0x228] sm:$0x7f]  ;;  %1773 = vst [vmem:[#allocation4 + $0x278] sm:$0xff] %v1416_v33  ;;  %v1418_v52 = vpop.f32.mrb[82].mxu1 }
 0x19f   : > { %v2887_v54 = vadd.f32 %v2812_v3, %v2647_v13  ;;  %v2888_v59 = vadd.f32 %v2811_v55, %v2744_v5  ;;  %2682 = vst [vmem:[#allocation2 + $0x48] sm:$0xff] %v2650_v15  ;;  %1781 = vst [vmem:[#allocation4 + $0x2b8] sm:$0xff] %v1418_v52  ;;  %v8230_v20 = vpop.f32.mrb[83].mxu1  ;;  %v2814_v38 = vrot.slane %v1227_v43, 1  ;;  %v3552_v3 = vadd.f32 %v8213_v25, %v3513_v12 }
 0x1a0   : > { %v2980_v63 = vld [vmem:[#allocation2 + $0x21] sm:$0xff]  ;;  %v2981_v17 = vld [vmem:[#allocation2 + $0x29] sm:$0x7f] }
 0x1a1   : > { %2919 = vst [vmem:[#allocation2 + $0x30] sm:$0xff] %v2887_v54  ;;  %2920 = vst [vmem:[#allocation2 + $0x38] sm:$0x7f] %v2888_v59  ;;  %v3010_v24 = vadd.f32 %v2980_v63, %v1404_v51  ;;  %v3011_v4 = vadd.f32 %v2981_v17, %v2951_v14 }
 0x1a2   : > { %v1231_v28 = vpop.f32.mrb[84].mxu0  ;;  %v8232_v8 = vld [vmem:[#allocation2 + $0x10] sm:$0xff] }
 0x1a3   : > { %v2713_v49 = vld [vmem:[#allocation4 + $0x268] sm:$0xfe]  ;;  %v1233_v58 = vpop.f32.mrb[85].mxu0  ;;  %v3099_v18 = vld [vmem:[#allocation2 + $0x18] sm:$0xff]  ;;  %3580 = vst [vmem:[#allocation2 + $0x10] sm:$0xff] %v3548_v48  ;;  %3040 = vst [vmem:[#allocation2 + $0x21] sm:$0xff] %v3010_v24  ;;  %v2651_v19 = vadd.f32 %v2619_v22, %v1231_v28 }
 0x1a4   : > { %v2813_v41 = vrot.slane %v2713_v49, 1  ;;  %1789 = vst [vmem:[#allocation4 + $0x2f8] sm:$0xff] %v1233_v58  ;;  %v1235_v37 = vpop.f32.mrb[86].mxu0  ;;  %v3129_v44 = vadd.f32 %v3099_v18, %v8206_v30  ;;  %3041 = vst [vmem:[#allocation2 + $0x29] sm:$0x7f] %v3011_v4  ;;  %v1424_v10 = vpop.f32.mrb[84].mxu1 }
 0x1a5   : > { %v1237_v39 = vpop.f32.mrb[87].mxu0  ;;  %v2652_v45 = vadd.f32 %v2620_v35, %v1235_v37  ;;  %v1426_v27 = vpop.f32.mrb[85].mxu1  ;;  %v3517_v22 = vld [vmem:[%s7529_s27 + $0x50] sm:$0xff] }
 0x1a6   : > { %3159 = vst [vmem:[#allocation2 + $0x18] sm:$0xff] %v3129_v44  ;;  %v2815_v32 = vsel %vm2313_vm0, %v2813_v41, %v2814_v38  ;;  %v2746_v1 = vld [vmem:[#allocation2 + $0x48] sm:$0x7f]  ;;  %v2953_v34 = vld [vmem:[#allocation4 + $0x2b8] sm:$0x7f]  ;;  %1791 = vst [vmem:[#allocation4 + $0x308] sm:$0xff] %v1426_v27 }
 0x1a7   : > { %v2889_v51 = vadd.f32 %v2815_v32, %v2649_v11  ;;  %2684 = vst [vmem:[#allocation2 + $0x58] sm:$0xff] %v2652_v45  ;;  %v2890_v60 = vadd.f32 %v2814_v38, %v2746_v1  ;;  %v1428_v61 = vpop.f32.mrb[86].mxu1  ;;  %v2817_v6 = vrot.slane %v1237_v39, 1  ;;  %v2621_v44 = vld [vmem:[#allocation2 + $0x60] sm:$0xff] }
 0x1a8   : > { %v2982_v47 = vld [vmem:[#allocation2 + $0x31] sm:$0xff]  ;;  %v2983_v30 = vld [vmem:[#allocation2 + $0x39] sm:$0x7f]  ;;  %1799 = vst [vmem:[#allocation4 + $0x348] sm:$0xff] %v1428_v61  ;;  %v8238_v56 = vpop.f32.mrb[87].mxu1  ;;  %v3515_v11 = vld [vmem:[%s7529_s27 + $0x40] sm:$0xff] }
 0x1a9   : > { %v3012_v9 = vadd.f32 %v2982_v47, %v1414_v0  ;;  %2921 = vst [vmem:[#allocation2 + $0x40] sm:$0xff] %v2889_v51  ;;  %v3013_v42 = vadd.f32 %v2983_v30, %v2953_v34  ;;  %2922 = vst [vmem:[#allocation2 + $0x48] sm:$0x7f] %v2890_v60  ;;  %v3554_v51 = vadd.f32 %v8213_v25, %v3515_v11 }
 0x1aa   : > { %v1241_v50 = vpop.f32.mrb[88].mxu0  ;;  %v8240_v57 = vld [vmem:[#allocation2 + $0x20] sm:$0xff] }
 0x1ab   : > { %v2715_v26 = vld [vmem:[#allocation4 + $0x2f8] sm:$0xfe]  ;;  %v1243_v40 = vpop.f32.mrb[89].mxu0  ;;  %v3101_v7 = vld [vmem:[#allocation2 + $0x28] sm:$0xff]  ;;  %3042 = vst [vmem:[#allocation2 + $0x31] sm:$0xff] %v3012_v9  ;;  %3582 = vst [vmem:[#allocation2 + $0x20] sm:$0xff] %v3550_v36  ;;  %v2653_v39 = vadd.f32 %v2621_v44, %v1241_v50 }
 0x1ac   : > { %v2816_v62 = vrot.slane %v2715_v26, 1  ;;  %1807 = vst [vmem:[#allocation4 + $0x388] sm:$0xff] %v1243_v40  ;;  %v1245_v53 = vpop.f32.mrb[90].mxu0  ;;  %v3131_v55 = vadd.f32 %v3101_v7, %v8220_v23  ;;  %3043 = vst [vmem:[#allocation2 + $0x39] sm:$0x7f] %v3013_v42  ;;  %v1434_v5 = vpop.f32.mrb[88].mxu1 }
 0x1ad   : > { %v8243_v29 = vpop.f32.mrb[91].mxu0  ;;  %v2654_v43 = vadd.f32 %v2622_v21, %v1245_v53  ;;  %v1436_v23 = vpop.f32.mrb[89].mxu1  ;;  %v2623_v21 = vld [vmem:[#allocation2 + $0x70] sm:$0xff] }
 0x1ae   : > { %3161 = vst [vmem:[#allocation2 + $0x28] sm:$0xff] %v3131_v55  ;;  %v2748_v13 = vld [vmem:[#allocation2 + $0x58] sm:$0x7f]  ;;  %v2818_v15 = vsel %vm2313_vm0, %v2816_v62, %v2817_v6  ;;  %1809 = vst [vmem:[#allocation4 + $0x398] sm:$0xff] %v1436_v23  ;;  %v1438_v59 = vpop.f32.mrb[90].mxu1  ;;  %v2820_v41 = vrot.slane %v8243_v29, 1 }
 0x1af   : > { %v2891_v0 = vadd.f32 %v2818_v15, %v2651_v19  ;;  %v2892_v48 = vadd.f32 %v2817_v6, %v2748_v13  ;;  %2686 = vst [vmem:[#allocation2 + $0x68] sm:$0xff] %v2654_v43  ;;  %v2955_v54 = vld [vmem:[#allocation4 + $0x348] sm:$0x7f]  ;;  %1817 = vst [vmem:[#allocation4 + $0x3d8] sm:$0xff] %v1438_v59  ;;  %v8248_v63 = vpop.f32.mrb[91].mxu1 }
 0x1b0   : > { %v2984_v33 = vld [vmem:[#allocation2 + $0x41] sm:$0xff]  ;;  %v2985_v14 = vld [vmem:[#allocation2 + $0x49] sm:$0x7f] }
 0x1b1   : > { %2923 = vst [vmem:[#allocation2 + $0x50] sm:$0xff] %v2891_v0  ;;  %2924 = vst [vmem:[#allocation2 + $0x58] sm:$0x7f] %v2892_v48  ;;  %v3014_v28 = vadd.f32 %v2984_v33, %v1424_v10  ;;  %v3015_v24 = vadd.f32 %v2985_v14, %v2955_v54  ;;  %v2626_v29 = vld [vmem:[#allocation2 + $0x88] sm:$0xff] }
 0x1b2   : > { %v1251_v52 = vpop.f32.mrb[92].mxu0  ;;  %v8250_v17 = vld [vmem:[#allocation2 + $0x30] sm:$0xff] }
 0x1b3   : > { %v2717_v4 = vld [vmem:[#allocation4 + $0x388] sm:$0xfe]  ;;  %v1253_v49 = vpop.f32.mrb[93].mxu0  ;;  %v3103_v58 = vld [vmem:[#allocation2 + $0x38] sm:$0xff]  ;;  %3584 = vst [vmem:[#allocation2 + $0x30] sm:$0xff] %v3552_v3  ;;  %3044 = vst [vmem:[#allocation2 + $0x41] sm:$0xff] %v3014_v28  ;;  %v2655_v43 = vadd.f32 %v2623_v21, %v1251_v52 }
 0x1b4   : > { %v2819_v18 = vrot.slane %v2717_v4, 1  ;;  %1825 = vst [vmem:[#allocation4 + $0x418] sm:$0xff] %v1253_v49  ;;  %v1255_v38 = vpop.f32.mrb[94].mxu0  ;;  %v3133_v37 = vadd.f32 %v3103_v58, %v8230_v20  ;;  %3045 = vst [vmem:[#allocation2 + $0x49] sm:$0x7f] %v3015_v24  ;;  %v8256_v32 = vpop.f32.mrb[92].mxu1 }
 0x1b5   : > { %v1257_v35 = vpop.f32.mrb[95].mxu0  ;;  %v2656_v46 = vadd.f32 %v2624_v16, %v1255_v38  ;;  %v1446_v1 = vpop.f32.mrb[93].mxu1  ;;  %v7350_v3 = vld [vmem:[%s9276_s3 + $0x1c] ss:$36 sps:$4 sm:$0xff]   ;;  %v2630_v21 = vld [vmem:[#allocation2 + $0xa8] sm:$0xff] }
 0x1b6   : > { %3163 = vst [vmem:[#allocation2 + $0x38] sm:$0xff] %v3133_v37  ;;  %v2821_v45 = vsel %vm2313_vm0, %v2819_v18, %v2820_v41  ;;  %v2957_v36 = vld [vmem:[#allocation4 + $0x3d8] sm:$0x7f]  ;;  %1827 = vst [vmem:[#allocation4 + $0x428] sm:$0xff] %v1446_v1  ;;  %v1448_v47 = vpop.f32.mrb[94].mxu1  ;;  %v2823_v6 = vrot.slane %v1257_v35, 1  ;;  %4653 = vmatprep.subr.bf16.mxu0 %v7350_v3 }
 0x1b7   : > { %v2893_v10 = vadd.f32 %v2821_v45, %v2653_v39  ;;  %2688 = vst [vmem:[#allocation2 + $0x78] sm:$0xff] %v2656_v46  ;;  %v2750_v60 = vld [vmem:[#allocation2 + $0x68] sm:$0x7f]  ;;  %1835 = vst [vmem:[#allocation4 + $0x468] sm:$0xff] %v1448_v47  ;;  %v8259_v61 = vpop.f32.mrb[95].mxu1  ;;  %v2625_v28 = vld [vmem:[#allocation2 + $0x80] sm:$0xff] }
 0x1b8   : > { %v2986_v27 = vld [vmem:[#allocation2 + $0x51] sm:$0xff]  ;;  %v2987_v20 = vld [vmem:[#allocation2 + $0x59] sm:$0x7f]  ;;  %v2894_v50 = vadd.f32 %v2820_v41, %v2750_v60 }
 0x1b9   : > { %v3016_v30 = vadd.f32 %v2986_v27, %v1434_v5  ;;  %2925 = vst [vmem:[#allocation2 + $0x60] sm:$0xff] %v2893_v10  ;;  %v3017_v9 = vadd.f32 %v2987_v20, %v2957_v36  ;;  %v3556_v5 = vadd.f32 %v8213_v25, %v3517_v22  ;;  %v2628_v35 = vld [vmem:[#allocation2 + $0x98] sm:$0xff]  ;;  %v3519_v27 = vld [vmem:[%s7529_s27 + $0x60] sm:$0xff]  ;;  %v2627_v22 = vld [vmem:[#allocation2 + $0x90] sm:$0xff] }
 0x1ba   : > { %v1261_v34 = vpop.f32.mrb[96].mxu0  ;;  %v8261_v40 = vld [vmem:[#allocation2 + $0x40] sm:$0xff]  ;;  %2926 = vst [vmem:[#allocation2 + $0x68] sm:$0x7f] %v2894_v50 }
 0x1bb   : > { %v2719_v42 = vld [vmem:[#allocation4 + $0x418] sm:$0xfe]  ;;  %v1263_v26 = vpop.f32.mrb[97].mxu0  ;;  %v3105_v7 = vld [vmem:[#allocation2 + $0x48] sm:$0xff]  ;;  %3046 = vst [vmem:[#allocation2 + $0x51] sm:$0xff] %v3016_v30  ;;  %3586 = vst [vmem:[#allocation2 + $0x40] sm:$0xff] %v3554_v51  ;;  %v2657_v11 = vadd.f32 %v2625_v28, %v1261_v34  ;;  %v3558_v34 = vadd.f32 %v8213_v25, %v3519_v27 }
 0x1bc   : > { %v2822_v62 = vrot.slane %v2719_v42, 1  ;;  %1843 = vst [vmem:[#allocation4 + $0x4a8] sm:$0xff] %v1263_v26  ;;  %v1265_v53 = vpop.f32.mrb[98].mxu0  ;;  %v3135_v55 = vadd.f32 %v3105_v7, %v8238_v56  ;;  %3047 = vst [vmem:[#allocation2 + $0x59] sm:$0x7f] %v3017_v9  ;;  %v1454_v15 = vpop.f32.mrb[96].mxu1 }
 0x1bd   : > { %v1267_v19 = vpop.f32.mrb[99].mxu0  ;;  %v2658_v12 = vadd.f32 %v2626_v29, %v1265_v53  ;;  %v1456_v0 = vpop.f32.mrb[97].mxu1 }
 0x1be   : > { %3165 = vst [vmem:[#allocation2 + $0x48] sm:$0xff] %v3135_v55  ;;  %v2824_v13 = vsel %vm2313_vm0, %v2822_v62, %v2823_v6  ;;  %v2752_v48 = vld [vmem:[#allocation2 + $0x78] sm:$0x7f]  ;;  %1845 = vst [vmem:[#allocation4 + $0x4b8] sm:$0xff] %v1456_v0  ;;  %v1458_v23 = vpop.f32.mrb[98].mxu1  ;;  %v2826_v41 = vrot.slane %v1267_v19, 1 }
 0x1bf   : > { %v2895_v56 = vadd.f32 %v2824_v13, %v2655_v43  ;;  %2690 = vst [vmem:[#allocation2 + $0x88] sm:$0xff] %v2658_v12  ;;  %v2896_v54 = vadd.f32 %v2823_v6, %v2752_v48  ;;  %v2959_v59 = vld [vmem:[#allocation4 + $0x468] sm:$0x7f]  ;;  %1853 = vst [vmem:[#allocation4 + $0x4f8] sm:$0xff] %v1458_v23  ;;  %v8270_v14 = vpop.f32.mrb[99].mxu1 }
 0x1c1   : > { %2927 = vst [vmem:[#allocation2 + $0x70] sm:$0xff] %v2895_v56  ;;  %v2988_v58 = vld [vmem:[#allocation2 + $0x61] sm:$0xff]  ;;  %2928 = vst [vmem:[#allocation2 + $0x78] sm:$0x7f] %v2896_v54  ;;  %v2989_v44 = vld [vmem:[#allocation2 + $0x69] sm:$0x7f] }
 0x1c2   : > { %v1271_v33 = vpop.f32.mrb[100].mxu0  ;;  %v8272_v52 = vld [vmem:[#allocation2 + $0x50] sm:$0xff]  ;;  %v3018_v16 = vadd.f32 %v2988_v58, %v8256_v32  ;;  %v3019_v46 = vadd.f32 %v2989_v44, %v2959_v59  ;;  %v2632_v44 = vld [vmem:[#allocation2 + $0xb8] sm:$0xff] }
 0x1c3   : > { %v2721_v24 = vld [vmem:[#allocation4 + $0x4a8] sm:$0xfe]  ;;  %v1273_v4 = vpop.f32.mrb[101].mxu0  ;;  %v3107_v49 = vld [vmem:[#allocation2 + $0x58] sm:$0xff]  ;;  %3588 = vst [vmem:[#allocation2 + $0x50] sm:$0xff] %v3556_v5  ;;  %v2659_v43 = vadd.f32 %v2627_v22, %v1271_v33  ;;  %v3521_v5 = vld [vmem:[%s7529_s27 + $0x70] sm:$0xff] }
 0x1c4   : > { %v2825_v18 = vrot.slane %v2721_v24, 1  ;;  %1861 = vst [vmem:[#allocation4 + $0x538] sm:$0xff] %v1273_v4  ;;  %v1275_v38 = vpop.f32.mrb[102].mxu0  ;;  %v3137_v37 = vadd.f32 %v3107_v49, %v8248_v63  ;;  %3048 = vst [vmem:[#allocation2 + $0x61] sm:$0xff] %v3018_v16  ;;  %v1464_v51 = vpop.f32.mrb[100].mxu1  ;;  %v3560_v33 = vadd.f32 %v8213_v25, %v3521_v5  ;;  %v2634_v5 = vld [vmem:[#allocation2 + $0xc8] sm:$0xff] }
 0x1c5   : > { %v8276_v39 = vpop.f32.mrb[103].mxu0  ;;  %v2660_v45 = vadd.f32 %v2628_v35, %v1275_v38  ;;  %3049 = vst [vmem:[#allocation2 + $0x69] sm:$0x7f] %v3019_v46  ;;  %v1466_v63 = vpop.f32.mrb[101].mxu1 }
 0x1c6   : > { %3167 = vst [vmem:[#allocation2 + $0x58] sm:$0xff] %v3137_v37  ;;  %v2754_v10 = vld [vmem:[#allocation2 + $0x88] sm:$0x7f]  ;;  %v2827_v1 = vsel %vm2313_vm0, %v2825_v18, %v2826_v41  ;;  %v2961_v47 = vld [vmem:[#allocation4 + $0x4f8] sm:$0x7f]  ;;  %1863 = vst [vmem:[#allocation4 + $0x548] sm:$0xff] %v1466_v63 }
 0x1c7   : > { %v2897_v20 = vadd.f32 %v2827_v1, %v2657_v11  ;;  %v2898_v36 = vadd.f32 %v2826_v41, %v2754_v10  ;;  %2692 = vst [vmem:[#allocation2 + $0x98] sm:$0xff] %v2660_v45  ;;  %v1468_v32 = vpop.f32.mrb[102].mxu1  ;;  %v2829_v53 = vrot.slane %v8276_v39, 1  ;;  %v2629_v37 = vld [vmem:[#allocation2 + $0xa0] sm:$0xff] }
 0x1c8   : > { %1871 = vst [vmem:[#allocation4 + $0x588] sm:$0xff] %v1468_v32  ;;  %v8282_v60 = vpop.f32.mrb[103].mxu1  ;;  %v2990_v9 = vld [vmem:[#allocation2 + $0x71] sm:$0xff]  ;;  %v2991_v50 = vld [vmem:[#allocation2 + $0x79] sm:$0x7f]  ;;  %v3523_v45 = vld [vmem:[%s7529_s27 + $0x80] sm:$0xff] }
 0x1c9   : > { %2929 = vst [vmem:[#allocation2 + $0x80] sm:$0xff] %v2897_v20  ;;  %2930 = vst [vmem:[#allocation2 + $0x88] sm:$0x7f] %v2898_v36  ;;  %v3020_v7 = vadd.f32 %v2990_v9, %v1454_v15  ;;  %v3021_v62 = vadd.f32 %v2991_v50, %v2961_v47  ;;  %v3562_v47 = vadd.f32 %v8213_v25, %v3523_v45 }
 0x1ca   : > { %v8280_v30 = vpop.f32.mrb[104].mxu0 }
 0x1cb   : > { %v2723_v42 = vld [vmem:[#allocation4 + $0x538] sm:$0xfe]  ;;  %v1283_v26 = vpop.f32.mrb[105].mxu0  ;;  %v8286_v19 = vld [vmem:[#allocation2 + $0x60] sm:$0xff]  ;;  %3050 = vst [vmem:[#allocation2 + $0x71] sm:$0xff] %v3020_v7  ;;  %v2631_v7 = vld [vmem:[#allocation2 + $0xb0] sm:$0xff] }
 0x1cc   : > { %v2828_v6 = vrot.slane %v2723_v42, 1  ;;  %1879 = vst [vmem:[#allocation4 + $0x5c8] sm:$0xff] %v1283_v26  ;;  %v1285_v55 = vpop.f32.mrb[106].mxu0  ;;  %3051 = vst [vmem:[#allocation2 + $0x79] sm:$0x7f] %v3021_v62  ;;  %v3109_v13 = vld [vmem:[#allocation2 + $0x68] sm:$0xff] }
 0x1cd   : > { %v1287_v29 = vpop.f32.mrb[107].mxu0  ;;  %v2662_v12 = vadd.f32 %v2630_v21, %v1285_v55  ;;  %3590 = vst [vmem:[#allocation2 + $0x60] sm:$0xff] %v3558_v34  ;;  %v8290_v3 = vpop.f32.mrb[104].mxu1  ;;  %v3139_v56 = vadd.f32 %v3109_v13, %v8259_v61 }
 0x1ce   : > { %v2830_v15 = vsel %vm2313_vm0, %v2828_v6, %v2829_v53  ;;  %v1476_v48 = vpop.f32.mrb[105].mxu1  ;;  %v2756_v4 = vld [vmem:[#allocation2 + $0x98] sm:$0x7f]  ;;  %v2832_v35 = vrot.slane %v1287_v29, 1 }
 0x1cf   : > { %v2899_v0 = vadd.f32 %v2830_v15, %v2659_v43  ;;  %2694 = vst [vmem:[#allocation2 + $0xa8] sm:$0xff] %v2662_v12  ;;  %v2963_v59 = vld [vmem:[#allocation4 + $0x588] sm:$0x7f]  ;;  %1881 = vst [vmem:[#allocation4 + $0x5d8] sm:$0xff] %v1476_v48  ;;  %v1478_v28 = vpop.f32.mrb[106].mxu1  ;;  %v2900_v18 = vadd.f32 %v2829_v53, %v2756_v4 }
 0x1d0   : > { %v2992_v23 = vld [vmem:[#allocation2 + $0x81] sm:$0xff]  ;;  %v2993_v54 = vld [vmem:[#allocation2 + $0x89] sm:$0x7f]  ;;  %3169 = vst [vmem:[#allocation2 + $0x68] sm:$0xff] %v3139_v56  ;;  %1889 = vst [vmem:[#allocation4 + $0x618] sm:$0xff] %v1478_v28  ;;  %v8294_v58 = vpop.f32.mrb[107].mxu1 }
 0x1d1   : > { %v3022_v24 = vadd.f32 %v2992_v23, %v1464_v51  ;;  %2931 = vst [vmem:[#allocation2 + $0x90] sm:$0xff] %v2899_v0  ;;  %v3023_v61 = vadd.f32 %v2993_v54, %v2963_v59  ;;  %2932 = vst [vmem:[#allocation2 + $0x98] sm:$0x7f] %v2900_v18  ;;  %v2661_v51 = vadd.f32 %v2629_v37, %v8280_v30  ;;  %v3525_v59 = vld [vmem:[%s7529_s27 + $0x90] sm:$0xff] }
 0x1d2   : > { %v1291_v49 = vpop.f32.mrb[108].mxu0  ;;  %v8296_v46 = vld [vmem:[#allocation2 + $0x70] sm:$0xff] }
 0x1d3   : > { %v2725_v41 = vld [vmem:[#allocation4 + $0x5c8] sm:$0xfe]  ;;  %v1293_v38 = vpop.f32.mrb[109].mxu0  ;;  %3052 = vst [vmem:[#allocation2 + $0x81] sm:$0xff] %v3022_v24  ;;  %v3111_v11 = vld [vmem:[#allocation2 + $0x78] sm:$0xff]  ;;  %3592 = vst [vmem:[#allocation2 + $0x70] sm:$0xff] %v3560_v33  ;;  %v2663_v0 = vadd.f32 %v2631_v7, %v1291_v49 }
 0x1d4   : > { %v2831_v16 = vrot.slane %v2725_v41, 1  ;;  %1897 = vst [vmem:[#allocation4 + $0x658] sm:$0xff] %v1293_v38  ;;  %v1295_v39 = vpop.f32.mrb[110].mxu0  ;;  %3053 = vst [vmem:[#allocation2 + $0x89] sm:$0x7f] %v3023_v61  ;;  %v3141_v1 = vadd.f32 %v3111_v11, %v8270_v14  ;;  %v1484_v63 = vpop.f32.mrb[108].mxu1  ;;  %v3564_v41 = vadd.f32 %v8213_v25, %v3525_v59 }
 0x1d5   : > { %v8299_v10 = vpop.f32.mrb[111].mxu0  ;;  %v2664_v27 = vadd.f32 %v2632_v44, %v1295_v39  ;;  %v1486_v9 = vpop.f32.mrb[109].mxu1 }
 0x1d6   : > { %v2758_v20 = vld [vmem:[#allocation2 + $0xa8] sm:$0x7f]  ;;  %v2833_v36 = vsel %vm2313_vm0, %v2831_v16, %v2832_v35  ;;  %3171 = vst [vmem:[#allocation2 + $0x78] sm:$0xff] %v3141_v1  ;;  %1899 = vst [vmem:[#allocation4 + $0x668] sm:$0xff] %v1486_v9  ;;  %v1488_v50 = vpop.f32.mrb[110].mxu1  ;;  %v2835_v21 = vrot.slane %v8299_v10, 1 }
 0x1d7   : > { %v2901_v32 = vadd.f32 %v2833_v36, %v2661_v51  ;;  %v2902_v34 = vadd.f32 %v2832_v35, %v2758_v20  ;;  %2696 = vst [vmem:[#allocation2 + $0xb8] sm:$0xff] %v2664_v27  ;;  %v2965_v14 = vld [vmem:[#allocation4 + $0x618] sm:$0x7f]  ;;  %1907 = vst [vmem:[#allocation4 + $0x6a8] sm:$0xff] %v1488_v50  ;;  %v8305_v30 = vpop.f32.mrb[111].mxu1  ;;  %v3527_v10 = vld [vmem:[%s7529_s27 + $0xa0] sm:$0xff] }
 0x1d8   : > { %v2994_v55 = vld [vmem:[#allocation2 + $0x91] sm:$0xff]  ;;  %v2995_v12 = vld [vmem:[#allocation2 + $0x99] sm:$0x7f]  ;;  %v2633_v1 = vld [vmem:[#allocation2 + $0xc0] sm:$0xff] }
 0x1d9   : > { %2933 = vst [vmem:[#allocation2 + $0xa0] sm:$0xff] %v2901_v32  ;;  %2934 = vst [vmem:[#allocation2 + $0xa8] sm:$0x7f] %v2902_v34  ;;  %v3024_v13 = vadd.f32 %v2994_v55, %v8290_v3  ;;  %v3025_v56 = vadd.f32 %v2995_v12, %v2965_v14  ;;  %v2636_v51 = vld [vmem:[#allocation2 + $0xd8] sm:$0xff]  ;;  %v3566_v14 = vadd.f32 %v8213_v25, %v3527_v10 }
 0x1da   : > { %v1301_v42 = vpop.f32.mrb[112].mxu0  ;;  %v8307_v26 = vld [vmem:[#allocation2 + $0x80] sm:$0xff] }
 0x1db   : > { %v2727_v62 = vld [vmem:[#allocation4 + $0x658] sm:$0xfe]  ;;  %v1303_v6 = vpop.f32.mrb[113].mxu0  ;;  %v3113_v53 = vld [vmem:[#allocation2 + $0x88] sm:$0xff]  ;;  %3594 = vst [vmem:[#allocation2 + $0x80] sm:$0xff] %v3562_v47  ;;  %3054 = vst [vmem:[#allocation2 + $0x91] sm:$0xff] %v3024_v13  ;;  %v2665_v36 = vadd.f32 %v2633_v1, %v1301_v42 }
 0x1dc   : > { %v2834_v22 = vrot.slane %v2727_v62, 1  ;;  %1915 = vst [vmem:[#allocation4 + $0x6e8] sm:$0xff] %v1303_v6  ;;  %v1305_v29 = vpop.f32.mrb[114].mxu0  ;;  %v3143_v43 = vadd.f32 %v3113_v53, %v8282_v60  ;;  %v8313_v54 = vpop.f32.mrb[112].mxu1  ;;  %3055 = vst [vmem:[#allocation2 + $0x99] sm:$0x7f] %v3025_v56 }
 0x1dd   : > { %v1307_v15 = vpop.f32.mrb[115].mxu0  ;;  %v2666_v48 = vadd.f32 %v2634_v5, %v1305_v29  ;;  %v1496_v33 = vpop.f32.mrb[113].mxu1  ;;  %v2635_v29 = vld [vmem:[#allocation2 + $0xd0] sm:$0xff]  ;;  %v2638_v13 = vld [vmem:[#allocation2 + $0xe8] sm:$0xff] }
 0x1de   : > { %3173 = vst [vmem:[#allocation2 + $0x88] sm:$0xff] %v3143_v43  ;;  %v2836_v23 = vsel %vm2313_vm0, %v2834_v22, %v2835_v21  ;;  %v2967_v4 = vld [vmem:[#allocation4 + $0x6a8] sm:$0x7f]  ;;  %1917 = vst [vmem:[#allocation4 + $0x6f8] sm:$0xff] %v1496_v33  ;;  %v1498_v3 = vpop.f32.mrb[114].mxu1  ;;  %v2838_v11 = vrot.slane %v1307_v15, 1 }
 0x1df   : > { %v2903_v28 = vadd.f32 %v2836_v23, %v2663_v0  ;;  %2698 = vst [vmem:[#allocation2 + $0xc8] sm:$0xff] %v2666_v48  ;;  %1925 = vst [vmem:[#allocation4 + $0x738] sm:$0xff] %v1498_v3  ;;  %v8316_v18 = vpop.f32.mrb[115].mxu1  ;;  %v2760_v37 = vld [vmem:[#allocation2 + $0xb8] sm:$0x7f] }
 0x1e0   : > { %v2996_v60 = vld [vmem:[#allocation2 + $0xa1] sm:$0xff]  ;;  %v2997_v24 = vld [vmem:[#allocation2 + $0xa9] sm:$0x7f]  ;;  %v2904_v35 = vadd.f32 %v2835_v21, %v2760_v37 }
 0x1e1   : > { %v3026_v61 = vadd.f32 %v2996_v60, %v1484_v63  ;;  %2935 = vst [vmem:[#allocation2 + $0xb0] sm:$0xff] %v2903_v28  ;;  %v3027_v38 = vadd.f32 %v2997_v24, %v2967_v4 }
 0x1e2   : > { %v1311_v49 = vpop.f32.mrb[116].mxu0  ;;  %v8322_v20 = vld [vmem:[#allocation2 + $0x90] sm:$0xff]  ;;  %2936 = vst [vmem:[#allocation2 + $0xb8] sm:$0x7f] %v2904_v35 }
 0x1e3   : > { %v2729_v44 = vld [vmem:[#allocation4 + $0x6e8] sm:$0xfe]  ;;  %v1313_v16 = vpop.f32.mrb[117].mxu0  ;;  %3056 = vst [vmem:[#allocation2 + $0xa1] sm:$0xff] %v3026_v61  ;;  %3057 = vst [vmem:[#allocation2 + $0xa9] sm:$0x7f] %v3027_v38  ;;  %v2667_v60 = vadd.f32 %v2635_v29, %v1311_v49 }
 0x1e4   : > { %v2837_v39 = vrot.slane %v2729_v44, 1  ;;  %1933 = vst [vmem:[#allocation4 + $0x778] sm:$0xff] %v1313_v16  ;;  %v1315_v45 = vpop.f32.mrb[118].mxu0  ;;  %v3115_v47 = vld [vmem:[#allocation2 + $0x98] sm:$0xff]  ;;  %3596 = vst [vmem:[#allocation2 + $0x90] sm:$0xff] %v3564_v41  ;;  %v1504_v9 = vpop.f32.mrb[116].mxu1 }
 0x1e5   : > { %v8320_v27 = vpop.f32.mrb[119].mxu0  ;;  %v2668_v63 = vadd.f32 %v2636_v51, %v1315_v45  ;;  %v3145_v50 = vadd.f32 %v3115_v47, %v8294_v58  ;;  %v1506_v6 = vpop.f32.mrb[117].mxu1  ;;  %v3531_v47 = vld [vmem:[%s7529_s27 + $0xc0] sm:$0xff] }
 0x1e6   : > { %v2762_v32 = vld [vmem:[#allocation2 + $0xc8] sm:$0x7f]  ;;  %v2839_v34 = vsel %vm2313_vm0, %v2837_v39, %v2838_v11  ;;  %1935 = vst [vmem:[#allocation4 + $0x788] sm:$0xff] %v1506_v6  ;;  %v1508_v53 = vpop.f32.mrb[118].mxu1  ;;  %v2969_v42 = vld [vmem:[#allocation4 + $0x738] sm:$0x7f] }
 0x1e7   : > { %v2905_v7 = vadd.f32 %v2839_v34, %v2665_v36  ;;  %v2906_v62 = vadd.f32 %v2838_v11, %v2762_v32  ;;  %2700 = vst [vmem:[#allocation2 + $0xd8] sm:$0xff] %v2668_v63  ;;  %3175 = vst [vmem:[#allocation2 + $0x98] sm:$0xff] %v3145_v50  ;;  %v8327_v22 = vpop.f32.mrb[119].mxu1  ;;  %v2841_v15 = vrot.slane %v8320_v27, 1  ;;  %v2637_v32 = vld [vmem:[#allocation2 + $0xe0] sm:$0xff]  ;;  %v2640_v34 = vld [vmem:[#allocation2 + $0xf8] sm:$0xff] }
 0x1e8   : > { %1943 = vst [vmem:[#allocation4 + $0x7c8] sm:$0xff] %v1508_v53 }
 0x1e9   : > { %2937 = vst [vmem:[#allocation2 + $0xc0] sm:$0xff] %v2905_v7  ;;  %2938 = vst [vmem:[#allocation2 + $0xc8] sm:$0x7f] %v2906_v62  ;;  %v2998_v48 = vld [vmem:[#allocation2 + $0xb1] sm:$0xff]  ;;  %v2999_v23 = vld [vmem:[#allocation2 + $0xb9] sm:$0x7f] }
 0x1ea   : > { %v1321_v55 = vpop.f32.mrb[120].mxu0  ;;  %v8329_v21 = vld [vmem:[#allocation2 + $0xa0] sm:$0xff]  ;;  %v3117_v12 = vld [vmem:[#allocation2 + $0xa8] sm:$0xff]  ;;  %v3028_v28 = vadd.f32 %v2998_v48, %v8313_v54  ;;  %v3029_v33 = vadd.f32 %v2999_v23, %v2969_v42 }
 0x1eb   : > { %v2731_v58 = vld [vmem:[#allocation4 + $0x778] sm:$0xfe]  ;;  %v1323_v43 = vpop.f32.mrb[121].mxu0  ;;  %3598 = vst [vmem:[#allocation2 + $0xa0] sm:$0xff] %v3566_v14  ;;  %v3147_v0 = vadd.f32 %v3117_v12, %v8305_v30  ;;  %v3529_v30 = vld [vmem:[%s7529_s27 + $0xb0] sm:$0xff]  ;;  %v2669_v50 = vadd.f32 %v2637_v32, %v1321_v55 }
 0x1ec   : > { %v2840_v5 = vrot.slane %v2731_v58, 1  ;;  %1951 = vst [vmem:[#allocation4 + $0x808] sm:$0xff] %v1323_v43  ;;  %v1325_v56 = vpop.f32.mrb[122].mxu0  ;;  %v8335_v3 = vpop.f32.mrb[120].mxu1  ;;  %3058 = vst [vmem:[#allocation2 + $0xb1] sm:$0xff] %v3028_v28  ;;  %v3568_v51 = vadd.f32 %v8213_v25, %v3529_v30  ;;  %v3570_v58 = vadd.f32 %v8213_v25, %v3531_v47 }
 0x1ed   : > { %v1327_v59 = vpop.f32.mrb[123].mxu0  ;;  %v2670_v24 = vadd.f32 %v2638_v13, %v1325_v56  ;;  %3177 = vst [vmem:[#allocation2 + $0xa8] sm:$0xff] %v3147_v0  ;;  %3059 = vst [vmem:[#allocation2 + $0xb9] sm:$0x7f] %v3029_v33  ;;  %v1516_v41 = vpop.f32.mrb[121].mxu1 }
 0x1ee   : > { %v2842_v4 = vsel %vm2313_vm0, %v2840_v5, %v2841_v15  ;;  %1953 = vst [vmem:[#allocation4 + $0x818] sm:$0xff] %v1516_v41  ;;  %v1518_v16 = vpop.f32.mrb[122].mxu1  ;;  %v2764_v35 = vld [vmem:[#allocation2 + $0xd8] sm:$0x7f]  ;;  %v2844_v36 = vrot.slane %v1327_v59, 1 }
 0x1ef   : > { %v2907_v61 = vadd.f32 %v2842_v4, %v2667_v60  ;;  %2702 = vst [vmem:[#allocation2 + $0xe8] sm:$0xff] %v2670_v24  ;;  %v2971_v44 = vld [vmem:[#allocation4 + $0x7c8] sm:$0x7f]  ;;  %1961 = vst [vmem:[#allocation4 + $0x858] sm:$0xff] %v1518_v16  ;;  %v8338_v39 = vpop.f32.mrb[123].mxu1  ;;  %v2908_v45 = vadd.f32 %v2841_v15, %v2764_v35  ;;  %v2639_v35 = vld [vmem:[#allocation2 + $0xf0] sm:$0xff] }
 0x1f0   : > { %v3000_v38 = vld [vmem:[#allocation2 + $0xc1] sm:$0xff]  ;;  %v3001_v37 = vld [vmem:[#allocation2 + $0xc9] sm:$0x7f] }
 0x1f1   : > { %v3030_v54 = vadd.f32 %v3000_v38, %v1504_v9  ;;  %2939 = vst [vmem:[#allocation2 + $0xd0] sm:$0xff] %v2907_v61  ;;  %v3031_v11 = vadd.f32 %v3001_v37, %v2971_v44  ;;  %2940 = vst [vmem:[#allocation2 + $0xd8] sm:$0x7f] %v2908_v45  ;;  %v3217_v30 = vld [vmem:[#allocation2 + $0x8] sm:$0x7f]  ;;  %v3533_v44 = vld [vmem:[%s7529_s27 + $0xd0] sm:$0xff] }
 0x1f2   : > { %v1331_v49 = vpop.f32.mrb[124].mxu0 }
 0x1f3   : > { %v2733_v10 = vld [vmem:[#allocation4 + $0x808] sm:$0xfe]  ;;  %1968 = vst [vmem:[#allocation4 + $0x890] sm:$0xff] %v1331_v49  ;;  %v1333_v1 = vpop.f32.mrb[125].mxu0  ;;  %3060 = vst [vmem:[#allocation2 + $0xc1] sm:$0xff] %v3030_v54  ;;  %v8342_v7 = vld [vmem:[#allocation2 + $0xb0] sm:$0xff] }
 0x1f4   : > { %v2843_v27 = vrot.slane %v2733_v10, 1  ;;  %1969 = vst [vmem:[#allocation4 + $0x898] sm:$0xff] %v1333_v1  ;;  %v1335_v63 = vpop.f32.mrb[126].mxu0  ;;  %3061 = vst [vmem:[#allocation2 + $0xc9] sm:$0x7f] %v3031_v11  ;;  %v3119_v62 = vld [vmem:[#allocation2 + $0xb8] sm:$0xff] }
 0x1f5   : > { %v1337_v9 = vpop.f32.mrb[127].mxu0  ;;  %v2672_v14 = vadd.f32 %v2640_v34, %v1335_v63  ;;  %v1524_v42 = vpop.f32.mrb[124].mxu1  ;;  %v3149_v29 = vadd.f32 %v3119_v62, %v8316_v18  ;;  %3600 = vst [vmem:[#allocation2 + $0xb0] sm:$0xff] %v3568_v51 }
 0x1f6   : > { %1978 = vst [vmem:[#allocation4 + $0x8e0] sm:$0xff] %v1337_v9  ;;  %v2766_v6 = vld [vmem:[#allocation2 + $0xe8] sm:$0x7f]  ;;  %v2845_v53 = vsel %vm2313_vm0, %v2843_v27, %v2844_v36  ;;  %v1526_v13 = vpop.f32.mrb[125].mxu1  ;;  %v2973_v5 = vld [vmem:[#allocation4 + $0x858] sm:$0x7f] }
 0x1f7   : > { %v2909_v43 = vadd.f32 %v2845_v53, %v2669_v50  ;;  %v2910_v12 = vadd.f32 %v2844_v36, %v2766_v6  ;;  %2704 = vst [vmem:[#allocation2 + $0xf8] sm:$0xff] %v2672_v14  ;;  %1971 = vst [vmem:[#allocation4 + $0x8a8] sm:$0xff] %v1526_v13  ;;  %v1528_v55 = vpop.f32.mrb[126].mxu1  ;;  %v3508_v27 = vld [vmem:[%s7529_s27 + $0x8] sm:$0xff]  ;;  %v8358_v36 = vld [vmem:[%s9277_s4] ss:$0 sm:$0xff] }
 0x1f8   : > { %3179 = vst [vmem:[#allocation2 + $0xb8] sm:$0xff] %v3149_v29  ;;  %1979 = vst [vmem:[#allocation4 + $0x8e8] sm:$0xff] %v1528_v55  ;;  %v8347_v56 = vpop.f32.mrb[127].mxu1  ;;  %v3002_v25 = vld [vmem:[#allocation2 + $0xd1] sm:$0xff]  ;;  %v3003_v23 = vld [vmem:[#allocation2 + $0xd9] sm:$0x7f]  ;;  %v3572_v63 = vadd.f32 %v8358_v36, %v3533_v44 }
 0x1f9   : > { %2941 = vst [vmem:[#allocation2 + $0xe0] sm:$0xff] %v2909_v43  ;;  %2942 = vst [vmem:[#allocation2 + $0xe8] sm:$0x7f] %v2910_v12  ;;  %v3032_v33 = vadd.f32 %v3002_v25, %v8335_v3  ;;  %v3033_v60 = vadd.f32 %v3003_v23, %v2973_v5  ;;  %v3537_v9 = vld [vmem:[%s7529_s27 + $0xf0] sm:$0xff]  ;;  %v3547_v43 = vadd.f32 %v8358_v36, %v3508_v27  ;;  %v3538_v55 = vld [vmem:[%s7529_s27 + $0xf8] sm:$0xff] }
 0x1fa   : > { %v7097_v15 = vpop.f32.mrb[128].mxu0  ;;  %v8349_v0 = vld [vmem:[#allocation2 + $0xc0] sm:$0xff]  ;;  %v2607_v38 = vld [vmem:[#allocation4 + $0x890] sm:$0xff]  ;;  %v3576_v6 = vadd.f32 %v8358_v36, %v3537_v9  ;;  %v3219_v23 = vld [vmem:[#allocation2 + $0x18] sm:$0x7f] }
 0x1fb   : > { %1720 = vst [vmem:[#allocation4 + $0xd0] sm:$0xff] %v7097_v15  ;;  %v1567_v18 = vpop.f32.mrb[129].mxu0  ;;  %v3121_v48 = vld [vmem:[#allocation2 + $0xc8] sm:$0xff]  ;;  %3602 = vst [vmem:[#allocation2 + $0xc0] sm:$0xff] %v3570_v58  ;;  %v2735_v61 = vld [vmem:[#allocation4 + $0x898] sm:$0xfe]  ;;  %v2671_v45 = vadd.f32 %v2639_v35, %v2607_v38 }
 0x1fc   : > { %v7098_v59 = vpop.f32.mrb[130].mxu0  ;;  %v3151_v28 = vadd.f32 %v3121_v48, %v8327_v22  ;;  %3062 = vst [vmem:[#allocation2 + $0xd1] sm:$0xff] %v3032_v33  ;;  %3063 = vst [vmem:[#allocation2 + $0xd9] sm:$0x7f] %v3033_v60  ;;  %v2846_v22 = vrot.slane %v2735_v61, 1  ;;  %v3070_v61 = vld [vmem:[#allocation4 + $0x1e8] sm:$0xff] }
 0x1fd   : > { %v1570_v24 = vpop.f32.mrb[131].mxu0  ;;  %v3277_v4 = vrot.slane %v7098_v59, 1  ;;  %v2736_v41 = vld [vmem:[#allocation4 + $0x8e0] sm:$0xff]  ;;  %3608 = vst [vmem:[#allocation2 + $0xf0] sm:$0xff] %v3576_v6  ;;  %v3221_v48 = vld [vmem:[#allocation2 + $0x28] sm:$0x7f] }
 0x1fe   : > { %3181 = vst [vmem:[#allocation2 + $0xc8] sm:$0xff] %v3151_v28  ;;  %v2847_v49 = vrot.slane %v2736_v41, 1  ;;  %v2768_v10 = vld [vmem:[#allocation2 + $0xf8] sm:$0x7f]  ;;  %v3577_v41 = vadd.f32 %v8358_v36, %v3538_v55  ;;  %v3512_v38 = vld [vmem:[%s7529_s27 + $0x28] sm:$0xff] }
 0x1ff   : > { %v3352_v37 = vadd.f32 %v3277_v4, %v3217_v30  ;;  %v2975_v3 = vld [vmem:[#allocation4 + $0x8e8] sm:$0x7f]  ;;  %v3068_v30 = vld [vmem:[#allocation4 + $0x158] sm:$0xff] }
 0x200   : > { %v3004_v16 = vld [vmem:[#allocation2 + $0xe1] sm:$0xff]  ;;  %v3005_v54 = vld [vmem:[#allocation2 + $0xe9] sm:$0x7f]  ;;  %v2848_v32 = vsel %vm2313_vm0, %v2846_v22, %v2847_v49  ;;  %v2912_v34 = vadd.f32 %v2847_v49, %v2768_v10 }
 0x201   : > { %3382 = vst [vmem:[#allocation2 + $0x8] sm:$0x7f] %v3352_v37  ;;  %v3034_v11 = vadd.f32 %v3004_v16, %v1524_v42  ;;  %v3035_v47 = vadd.f32 %v3005_v54, %v2975_v3  ;;  %v8363_v62 = vadd.f32 %v2848_v32, %v2671_v45  ;;  %v3535_v42 = vld [vmem:[%s7529_s27 + $0xe0] sm:$0xff] }
 0x202   : > { %v7101_v1 = vpop.f32.mrb[132].mxu0  ;;  %v3186_v51 = vld [vmem:[#allocation4 + $0xd0] sm:$0xfe]  ;;  %2944 = vst [vmem:[#allocation2 + $0xf8] sm:$0x7f] %v2912_v34  ;;  %v3574_v28 = vadd.f32 %v8358_v36, %v3535_v42 }
 0x203   : > { %1756 = vst [vmem:[#allocation4 + $0x1f0] sm:$0xff] %v7101_v1  ;;  %v1583_v50 = vpop.f32.mrb[133].mxu0  ;;  %v3276_v14 = vrot.slane %v3186_v51, 1  ;;  %3064 = vst [vmem:[#allocation2 + $0xe1] sm:$0xff] %v3034_v11  ;;  %v8371_v13 = vld [vmem:[#allocation2 + $0xd0] sm:$0xff]  ;;  %v3123_v5 = vld [vmem:[#allocation2 + $0xd8] sm:$0xff]  ;;  %v3130_v11 = vadd.f32 %v8240_v57, %v3070_v61  ;;  %v3128_v57 = vadd.f32 %v8232_v8, %v3068_v30 }
 0x204   : > { %1738 = vst [vmem:[#allocation4 + $0x160] sm:$0xff] %v1583_v50  ;;  %v7102_v53 = vpop.f32.mrb[134].mxu0  ;;  %3065 = vst [vmem:[#allocation2 + $0xe9] sm:$0x7f] %v3035_v47  ;;  %v3153_v25 = vadd.f32 %v3123_v5, %v8338_v39  ;;  %v7336_v39 = vld [vmem:[%s9276_s3 + $0x10] ss:$36 sps:$4 sm:$0xff]  }
 0x205   : > { %v8367_v29 = vpop.f32.mrb[135].mxu0  ;;  %v3278_v58 = vsel %vm2313_vm0, %v3276_v14, %v3277_v4  ;;  %v3283_v12 = vrot.slane %v7102_v53, 1  ;;  %3604 = vst [vmem:[#allocation2 + $0xd0] sm:$0xff] %v3572_v63  ;;  %v3510_v4 = vld [vmem:[%s7529_s27 + $0x18] sm:$0xff]  ;;  %v3473_v32 = vmax.f32 %v8363_v62, 0.0  ;;  %v3551_v14 = vadd.f32 %v8358_v36, %v3512_v38  ;;  %v3516_v61 = vld [vmem:[%s7529_s27 + $0x48] sm:$0xff] }
 0x206   : > { %v3351_v15 = vadd.f32 %v3278_v58, %v8223_v31  ;;  %v3280_v18 = vrot.slane %v8367_v29, 1  ;;  %3183 = vst [vmem:[#allocation2 + $0xd8] sm:$0xff] %v3153_v25  ;;  %v7341_v16 = vld [vmem:[%s9276_s3 + $0x5c] ss:$36 sps:$4 sm:$0xff]   ;;  %v3549_v3 = vadd.f32 %v8358_v36, %v3510_v4  ;;  %v3225_v29 = vld [vmem:[#allocation2 + $0x48] sm:$0x7f] }
 0x207   : > { %v3356_v59 = vadd.f32 %v3283_v12, %v3221_v48  ;;  %v7348_v63 = vld [vmem:[%s9276_s3 + $0x18] ss:$36 sps:$4 sm:$0xff]   ;;  %v7344_v55 = vld [vmem:[%s9276_s3 + $0xa4] ss:$36 sps:$4 sm:$0xff]  }
 0x208   : > { %v3412_v33 = vld [vmem:[#allocation2 + $0x8] sm:$0xff]  ;;  %v3443_v60 = vmax.f32 %v3351_v15, 0.0  ;;  %v3354_v24 = vadd.f32 %v3280_v18, %v3219_v23  ;;  %v7339_v8 = vld [vmem:[%s9276_s3 + $0x58] ss:$36 sps:$4 sm:$0xff]   ;;  %v7354_v48 = vld [vmem:[%s9276_s3 + $0x60] ss:$36 sps:$4 sm:$0xff]  }
 0x209   : > { %v3444_v31 = vmax.f32 %v3412_v33, 0.0  ;;  %3579 = vst [vmem:[#allocation2 + $0x8] sm:$0xff] %v3547_v43  ;;  %3386 = vst [vmem:[#allocation2 + $0x28] sm:$0x7f] %v3356_v59  ;;  %v3442_v1 = vld [vmem:[#allocation2 + $0xf8] sm:$0xff]  ;;  %v3074_v59 = vld [vmem:[#allocation4 + $0x308] sm:$0xff] }
 0x20a   : > { %v7105_v37 = vpop.f32.mrb[136].mxu0  ;;  %3384 = vst [vmem:[#allocation2 + $0x18] sm:$0x7f] %v3354_v24  ;;  %v3190_v44 = vld [vmem:[#allocation4 + $0x1f0] sm:$0xfe]  ;;  %v8387_v54 = vld [vmem:[#allocation2 + $0xe0] sm:$0xff] }
 0x20b   : > { %1792 = vst [vmem:[#allocation4 + $0x310] sm:$0xff] %v7105_v37  ;;  %v1599_v35 = vpop.f32.mrb[137].mxu0  ;;  %v8389_v22 = vpack.c.bf16 %v3444_v31, %v3443_v60  ;;  %v3188_v49 = vld [vmem:[#allocation4 + $0x160] sm:$0xfe]  ;;  %v3282_v45 = vrot.slane %v3190_v44, 1  ;;  %v3125_v10 = vld [vmem:[#allocation2 + $0xe8] sm:$0xff] }
 0x20c   : > { %3606 = vst [vmem:[#allocation2 + $0xe0] sm:$0xff] %v3574_v28  ;;  %1774 = vst [vmem:[#allocation4 + $0x280] sm:$0xff] %v1599_v35  ;;  %v8393_v51 = vpop.f32.mrb[138].mxu0  ;;  %v3279_v27 = vrot.slane %v3188_v49, 1  ;;  %v3155_v47 = vadd.f32 %v3125_v10, %v8347_v56  ;;  %v3474_v34 = vmax.f32 %v3442_v1, 0.0  ;;  %v3072_v24 = vld [vmem:[#allocation4 + $0x278] sm:$0xff]  ;;  %v3555_v10 = vadd.f32 %v8358_v36, %v3516_v61 }
 0x20d   : > { %3609 = vst [vmem:[#allocation2 + $0xf8] sm:$0xff] %v3577_v41  ;;  %v8400_v9 = vpop.f32.mrb[139].mxu0  ;;  %4107 = vmatmul.mubr.bf16.vlgmr.msra.gmra.mrb[128].mxu1 %v8389_v22  ;;  %4300 = vmatmul.mubr.bf16.vlgmr.msra.gmra.mrb[160].mxu0 %v8389_v22  ;;  %v3284_v50 = vsel %vm2313_vm0, %v3282_v45, %v3283_v12  ;;  %v3289_v6 = vrot.slane %v8393_v51, 1  ;;  %v7356_v56 = vld [vmem:[%s9276_s3 + $0x64] ss:$36 sps:$4 sm:$0xff]  }
 0x20e   : > { %4461 = vmatpush1.bf16.msra.mxu1 %v7336_v39  ;;  %4116 = vmatprep.mubr.bf16.mxu1 %v7401_v2  ;;  %v3281_v62 = vsel %vm2313_vm0, %v3279_v27, %v3280_v18  ;;  %v8413_v53 = vadd.f32 %v3284_v50, %v3130_v11  ;;  %v3286_v42 = vrot.slane %v8400_v9, 1  ;;  %3185 = vst [vmem:[#allocation2 + $0xe8] sm:$0xff] %v3155_v47  ;;  %v3223_v12 = vld [vmem:[#allocation2 + $0x38] sm:$0x7f]  ;;  %v7362_v28 = vld [vmem:[%s9276_s3 + $0xac] ss:$36 sps:$4 sm:$0xff]  }
 0x20f   : > { %v8419_v58 = vpack.c.bf16 %v3474_v34, %v3473_v32  ;;  %4309 = vmatprep.mubr.bf16.mxu0 %v7401_v2  ;;  %v3353_v43 = vadd.f32 %v3281_v62, %v3128_v57  ;;  %4462 = vmatprep.subr.bf16.mxu1 %v7341_v16  ;;  %v3360_v5 = vadd.f32 %v3289_v6, %v3225_v29  ;;  %v3514_v39 = vld [vmem:[%s7529_s27 + $0x38] sm:$0xff]  ;;  %v7342_v35 = vld [vmem:[%s9276_s3 + $0xa0] ss:$36 sps:$4 sm:$0xff]   ;;  %v7360_v49 = vld [vmem:[%s9276_s3 + $0xa8] ss:$36 sps:$4 sm:$0xff]  }
 0x210   : > { %v8425_v15 = vld [vmem:[#allocation2 + $0x28] sm:$0xff]  ;;  %v3358_v18 = vadd.f32 %v3286_v42, %v3223_v12  ;;  %4654 = vmatpush1.bf16.msra.mxu0 %v7348_v63  ;;  %v3134_v16 = vadd.f32 %v8261_v40, %v3074_v59  ;;  %v3132_v11 = vadd.f32 %v8250_v17, %v3072_v24  ;;  %v7368_v51 = vld [vmem:[%s9276_s3 + $0xf4] ss:$36 sps:$4 sm:$0xff]   ;;  %v3553_v27 = vadd.f32 %v8358_v36, %v3514_v39 }
 0x211   : > { %v3414_v25 = vld [vmem:[#allocation2 + $0x18] sm:$0xff]  ;;  %v3445_v23 = vmax.f32 %v3353_v43, 0.0  ;;  %3583 = vst [vmem:[#allocation2 + $0x28] sm:$0xff] %v3551_v14  ;;  %3390 = vst [vmem:[#allocation2 + $0x48] sm:$0x7f] %v3360_v5  ;;  %4655 = vmatprep.subr.bf16.mxu0 %v7356_v56  ;;  %v3447_v14 = vmax.f32 %v8413_v53, 0.0 }
 0x212   : > { %v7109_v33 = vpop.f32.mrb[140].mxu0  ;;  %v3446_v60 = vmax.f32 %v3414_v25, 0.0  ;;  %3581 = vst [vmem:[#allocation2 + $0x18] sm:$0xff] %v3549_v3  ;;  %4463 = vmatpush1.bf16.msra.mxu1 %v7339_v8  ;;  %3388 = vst [vmem:[#allocation2 + $0x38] sm:$0x7f] %v3358_v18  ;;  %v3078_v8 = vld [vmem:[#allocation4 + $0x428] sm:$0xff] }
 0x213   : > { %v3194_v4 = vld [vmem:[#allocation4 + $0x310] sm:$0xfe]  ;;  %1828 = vst [vmem:[#allocation4 + $0x430] sm:$0xff] %v7109_v33  ;;  %v1615_v41 = vpop.f32.mrb[141].mxu0  ;;  %v3192_v31 = vld [vmem:[#allocation4 + $0x280] sm:$0xfe]  ;;  %4464 = vmatprep.subr.bf16.mxu1 %v7344_v55 }
 0x214   : > { %v3288_v30 = vrot.slane %v3194_v4, 1  ;;  %1810 = vst [vmem:[#allocation4 + $0x3a0] sm:$0xff] %v1615_v41  ;;  %v8435_v38 = vpop.f32.mrb[142].mxu0  ;;  %v8437_v37 = vpack.c.bf16 %v3446_v60, %v3445_v23  ;;  %v3285_v44 = vrot.slane %v3192_v31, 1  ;;  %4656 = vmatpush1.bf16.msra.mxu0 %v7354_v48  ;;  %v7347_v40 = vld [vmem:[%s9276_s3 + $0xec] ss:$36 sps:$4 sm:$0xff]   ;;  %v3138_v60 = vadd.f32 %v8286_v19, %v3078_v8 }
 0x215   : > { %v8446_v3 = vpop.f32.mrb[143].mxu0  ;;  %v3295_v1 = vrot.slane %v8435_v38, 1  ;;  %4657 = vmatprep.subr.bf16.mxu0 %v7362_v28  ;;  %v3229_v32 = vld [vmem:[#allocation2 + $0x68] sm:$0x7f]  ;;  %v3227_v9 = vld [vmem:[#allocation2 + $0x58] sm:$0x7f] }
 0x216   : > { %v3290_v45 = vsel %vm2313_vm0, %v3288_v30, %v3289_v6  ;;  %4117 = vmatmul.mubr.bf16.gmra.mrb[132].mxu1 %v8437_v37  ;;  %4310 = vmatmul.mubr.bf16.gmra.mrb[164].mxu0 %v8437_v37  ;;  %v3287_v17 = vsel %vm2313_vm0, %v3285_v44, %v3286_v42  ;;  %v3292_v47 = vrot.slane %v8446_v3, 1  ;;  %v7345_v50 = vld [vmem:[%s9276_s3 + $0xe8] ss:$36 sps:$4 sm:$0xff]   ;;  %v3448_v6 = vmax.f32 %v8425_v15, 0.0  ;;  %v7366_v42 = vld [vmem:[%s9276_s3 + $0xf0] ss:$36 sps:$4 sm:$0xff]  }
 0x217   : > { %v8462_v63 = vadd.f32 %v3290_v45, %v3134_v16  ;;  %4126 = vmatprep.mubr.bf16.mxu1 %v7401_v2  ;;  %4319 = vmatprep.mubr.bf16.mxu0 %v7401_v2  ;;  %v8467_v34 = vadd.f32 %v3287_v17, %v3132_v11  ;;  %v3364_v57 = vadd.f32 %v3295_v1, %v3229_v32  ;;  %v7353_v53 = vld [vmem:[%s9276_s3 + $0x134] ss:$36 sps:$4 sm:$0xff]   ;;  %v7374_v43 = vld [vmem:[%s9276_s3 + $0x13c] ss:$36 sps:$4 sm:$0xff]   ;;  %v3520_v15 = vld [vmem:[%s7529_s27 + $0x68] sm:$0xff] }
 0x218   : > { %v8474_v56 = vld [vmem:[#allocation2 + $0x48] sm:$0xff]  ;;  %4465 = vmatpush1.bf16.msra.mxu1 %v7342_v35  ;;  %v3362_v62 = vadd.f32 %v3292_v47, %v3227_v9  ;;  %4658 = vmatpush1.bf16.msra.mxu0 %v7360_v49  ;;  %v3076_v5 = vld [vmem:[#allocation4 + $0x398] sm:$0xff]  ;;  %v8491_v28 = vpack.c.bf16 %v3448_v6, %v3447_v14  ;;  %v7351_v24 = vld [vmem:[%s9276_s3 + $0x130] ss:$36 sps:$4 sm:$0xff]   ;;  %v3559_v39 = vadd.f32 %v8358_v36, %v3520_v15 }
 0x219   : > { %v8479_v29 = vld [vmem:[#allocation2 + $0x38] sm:$0xff]  ;;  %3587 = vst [vmem:[#allocation2 + $0x48] sm:$0xff] %v3555_v10  ;;  %3394 = vst [vmem:[#allocation2 + $0x68] sm:$0x7f] %v3364_v57  ;;  %4466 = vmatprep.subr.bf16.mxu1 %v7347_v40  ;;  %4659 = vmatprep.subr.bf16.mxu0 %v7368_v51  ;;  %v3136_v41 = vadd.f32 %v8272_v52, %v3076_v5  ;;  %v7377_v38 = vld [vmem:[%s9276_s3 + $0x184] ss:$36 sps:$4 sm:$0xff]  }
 0x21a   : > { %v7113_v12 = vpop.f32.mrb[144].mxu0  ;;  %3585 = vst [vmem:[#allocation2 + $0x38] sm:$0xff] %v3553_v27  ;;  %3392 = vst [vmem:[#allocation2 + $0x58] sm:$0x7f] %v3362_v62  ;;  %v3198_v55 = vld [vmem:[#allocation4 + $0x430] sm:$0xfe] }
 0x21b   : > { %1864 = vst [vmem:[#allocation4 + $0x550] sm:$0xff] %v7113_v12  ;;  %v1631_v18 = vpop.f32.mrb[145].mxu0  ;;  %v3196_v48 = vld [vmem:[#allocation4 + $0x3a0] sm:$0xfe]  ;;  %v3518_v25 = vld [vmem:[%s7529_s27 + $0x58] sm:$0xff]  ;;  %v3294_v23 = vrot.slane %v3198_v55, 1 }
 0x21c   : > { %1846 = vst [vmem:[#allocation4 + $0x4c0] sm:$0xff] %v1631_v18  ;;  %v8489_v59 = vpop.f32.mrb[146].mxu0  ;;  %v3291_v33 = vrot.slane %v3196_v48, 1  ;;  %4467 = vmatpush1.bf16.msra.mxu1 %v7345_v50  ;;  %4660 = vmatpush1.bf16.msra.mxu0 %v7366_v42  ;;  %v7372_v4 = vld [vmem:[%s9276_s3 + $0x138] ss:$36 sps:$4 sm:$0xff]   ;;  %v3557_v44 = vadd.f32 %v8358_v36, %v3518_v25  ;;  %v3450_v40 = vmax.f32 %v8479_v29, 0.0 }
 0x21d   : > { %v8500_v61 = vpop.f32.mrb[147].mxu0  ;;  %v3296_v31 = vsel %vm2313_vm0, %v3294_v23, %v3295_v1  ;;  %v3301_v19 = vrot.slane %v8489_v59, 1  ;;  %4468 = vmatprep.subr.bf16.mxu1 %v7353_v53  ;;  %v7359_v30 = vld [vmem:[%s9276_s3 + $0x17c] ss:$36 sps:$4 sm:$0xff]   ;;  %4661 = vmatprep.subr.bf16.mxu0 %v7374_v43  ;;  %v3233_v49 = vld [vmem:[#allocation2 + $0x88] sm:$0x7f] }
 0x21e   : > { %4127 = vmatmul.mubr.bf16.gmra.mrb[136].mxu1 %v8491_v28  ;;  %4320 = vmatmul.mubr.bf16.gmra.mrb[168].mxu0 %v8491_v28  ;;  %v3293_v52 = vsel %vm2313_vm0, %v3291_v33, %v3292_v47  ;;  %v8516_v16 = vadd.f32 %v3296_v31, %v3138_v60  ;;  %v3298_v35 = vrot.slane %v8500_v61, 1  ;;  %v3231_v11 = vld [vmem:[#allocation2 + $0x78] sm:$0x7f]  ;;  %v3449_v1 = vmax.f32 %v8467_v34, 0.0  ;;  %v3082_v27 = vld [vmem:[#allocation4 + $0x548] sm:$0xff] }
 0x21f   : > { %4136 = vmatprep.mubr.bf16.mxu1 %v7401_v2  ;;  %4329 = vmatprep.mubr.bf16.mxu0 %v7401_v2  ;;  %v8521_v3 = vadd.f32 %v3293_v52, %v3136_v41  ;;  %v3368_v45 = vadd.f32 %v3301_v19, %v3233_v49  ;;  %v7357_v10 = vld [vmem:[%s9276_s3 + $0x178] ss:$36 sps:$4 sm:$0xff]   ;;  %v7375_v47 = vld [vmem:[%s9276_s3 + $0x180] ss:$36 sps:$4 sm:$0xff]   ;;  %v7380_v9 = vld [vmem:[%s9276_s3 + $0x1cc] ss:$36 sps:$4 sm:$0xff]   ;;  %v3142_v5 = vadd.f32 %v8307_v26, %v3082_v27 }
 0x220   : > { %v8528_v51 = vld [vmem:[#allocation2 + $0x68] sm:$0xff]  ;;  %v3366_v17 = vadd.f32 %v3298_v35, %v3231_v11  ;;  %4469 = vmatpush1.bf16.msra.mxu1 %v7351_v24  ;;  %4662 = vmatpush1.bf16.msra.mxu0 %v7372_v4  ;;  %v3080_v50 = vld [vmem:[#allocation4 + $0x4b8] sm:$0xff]  ;;  %v8543_v43 = vpack.c.bf16 %v3450_v40, %v3449_v1  ;;  %v7363_v55 = vld [vmem:[%s9276_s3 + $0x1c0] ss:$36 sps:$4 sm:$0xff]   ;;  %v3451_v31 = vmax.f32 %v8462_v63, 0.0 }
 0x221   : > { %v8533_v32 = vld [vmem:[#allocation2 + $0x58] sm:$0xff]  ;;  %3591 = vst [vmem:[#allocation2 + $0x68] sm:$0xff] %v3559_v39  ;;  %3398 = vst [vmem:[#allocation2 + $0x88] sm:$0x7f] %v3368_v45  ;;  %4470 = vmatprep.subr.bf16.mxu1 %v7359_v30  ;;  %v7365_v34 = vld [vmem:[%s9276_s3 + $0x1c4] ss:$36 sps:$4 sm:$0xff]   ;;  %4663 = vmatprep.subr.bf16.mxu0 %v7377_v38  ;;  %v3140_v48 = vadd.f32 %v8296_v46, %v3080_v50 }
 0x222   : > { %v7117_v57 = vpop.f32.mrb[148].mxu0  ;;  %3589 = vst [vmem:[#allocation2 + $0x58] sm:$0xff] %v3557_v44  ;;  %3396 = vst [vmem:[#allocation2 + $0x78] sm:$0x7f] %v3366_v17  ;;  %v3202_v14 = vld [vmem:[#allocation4 + $0x550] sm:$0xfe] }
 0x223   : > { %v3524_v6 = vld [vmem:[%s7529_s27 + $0x88] sm:$0xff]  ;;  %1900 = vst [vmem:[#allocation4 + $0x670] sm:$0xff] %v7117_v57  ;;  %v1647_v62 = vpop.f32.mrb[149].mxu0  ;;  %v3200_v8 = vld [vmem:[#allocation4 + $0x4c0] sm:$0xfe]  ;;  %v3522_v42 = vld [vmem:[%s7529_s27 + $0x78] sm:$0xff] }
 0x224   : > { %v3300_v29 = vrot.slane %v3202_v14, 1  ;;  %1882 = vst [vmem:[#allocation4 + $0x5e0] sm:$0xff] %v1647_v62  ;;  %v7118_v53 = vpop.f32.mrb[150].mxu0  ;;  %v3297_v12 = vrot.slane %v3200_v8, 1  ;;  %4471 = vmatpush1.bf16.msra.mxu1 %v7357_v10  ;;  %4664 = vmatpush1.bf16.msra.mxu0 %v7375_v47  ;;  %v7378_v15 = vld [vmem:[%s9276_s3 + $0x1c8] ss:$36 sps:$4 sm:$0xff]   ;;  %v3563_v23 = vadd.f32 %v8358_v36, %v3524_v6  ;;  %v3561_v33 = vadd.f32 %v8358_v36, %v3522_v42 }
 0x225   : > { %1909 = vst [vmem:[#allocation4 + $0x6b8] sm:$0xff] %v7118_v53  ;;  %v1650_v18 = vpop.f32.mrb[151].mxu0  ;;  %4472 = vmatprep.subr.bf16.mxu1 %v7365_v34  ;;  %v7371_v26 = vld [vmem:[%s9276_s3 + $0x20c] ss:$36 sps:$4 sm:$0xff]   ;;  %4665 = vmatprep.subr.bf16.mxu0 %v7380_v9  ;;  %v7383_v59 = vld [vmem:[%s9276_s3 + $0x214] ss:$36 sps:$4 sm:$0xff]  }
 0x226   : > { %v3302_v25 = vsel %vm2313_vm0, %v3300_v29, %v3301_v19  ;;  %4137 = vmatmul.mubr.bf16.gmra.mrb[140].mxu1 %v8543_v43  ;;  %4330 = vmatmul.mubr.bf16.gmra.mrb[172].mxu0 %v8543_v43  ;;  %v3299_v46 = vsel %vm2313_vm0, %v3297_v12, %v3298_v35  ;;  %v3304_v24 = vrot.slane %v1650_v18, 1  ;;  %v3235_v61 = vld [vmem:[#allocation2 + $0x98] sm:$0x7f]  ;;  %v7369_v41 = vld [vmem:[%s9276_s3 + $0x208] ss:$36 sps:$4 sm:$0xff]   ;;  %v3452_v39 = vmax.f32 %v8474_v56, 0.0 }
 0x227   : > { %v8565_v60 = vadd.f32 %v3302_v25, %v3142_v5  ;;  %4146 = vmatprep.mubr.bf16.mxu1 %v7401_v2  ;;  %4339 = vmatprep.mubr.bf16.mxu0 %v7401_v2  ;;  %v8569_v4 = vadd.f32 %v3299_v46, %v3140_v48  ;;  %v7381_v38 = vld [vmem:[%s9276_s3 + $0x210] ss:$36 sps:$4 sm:$0xff]   ;;  %v8586_v63 = vld [vmem:[%s9276_s3 + $0x20] ss:$36 sps:$4 sm:$0xff]   ;;  %v3084_v44 = vld [vmem:[#allocation4 + $0x5d8] sm:$0xff]  ;;  %v3453_v14 = vmax.f32 %v8521_v3, 0.0 }
 0x228   : > { %v8576_v19 = vld [vmem:[#allocation2 + $0x88] sm:$0xff]  ;;  %v3370_v30 = vadd.f32 %v3304_v24, %v3235_v61  ;;  %4473 = vmatpush1.bf16.msra.mxu1 %v7363_v55  ;;  %4666 = vmatpush1.bf16.msra.mxu0 %v7378_v15  ;;  %v3526_v11 = vld [vmem:[%s7529_s27 + $0x98] sm:$0xff]  ;;  %v8589_v10 = vpack.c.bf16 %v3452_v39, %v3451_v31  ;;  %v3144_v27 = vadd.f32 %v8322_v20, %v3084_v44  ;;  %v3454_v6 = vmax.f32 %v8533_v32, 0.0 }
 0x229   : > { %v8581_v52 = vld [vmem:[#allocation2 + $0x78] sm:$0xff]  ;;  %3595 = vst [vmem:[#allocation2 + $0x88] sm:$0xff] %v3563_v23  ;;  %4474 = vmatprep.subr.bf16.mxu1 %v7371_v26  ;;  %4667 = vmatprep.subr.bf16.mxu0 %v7383_v59  ;;  %v3565_v9 = vadd.f32 %v8358_v36, %v3526_v11  ;;  %v3237_v57 = vld [vmem:[#allocation2 + $0xa8] sm:$0x7f]  ;;  %v3455_v26 = vmax.f32 %v8516_v16, 0.0  ;;  %v3456_v59 = vmax.f32 %v8528_v51, 0.0 }
 0x22a   : > { %v7121_v56 = vpop.f32.mrb[152].mxu0  ;;  %3593 = vst [vmem:[#allocation2 + $0x78] sm:$0xff] %v3561_v33  ;;  %3400 = vst [vmem:[#allocation2 + $0x98] sm:$0x7f] %v3370_v30  ;;  %v3528_v42 = vld [vmem:[%s7529_s27 + $0xa8] sm:$0xff]  ;;  %v8611_v12 = vpack.c.bf16 %v3454_v6, %v3453_v14  ;;  %v3530_v61 = vld [vmem:[%s7529_s27 + $0xb8] sm:$0xff] }
 0x22b   : > { %1936 = vst [vmem:[#allocation4 + $0x790] sm:$0xff] %v7121_v56  ;;  %v1663_v35 = vpop.f32.mrb[153].mxu0  ;;  %v3204_v49 = vld [vmem:[#allocation4 + $0x5e0] sm:$0xfe]  ;;  %v3567_v3 = vadd.f32 %v8358_v36, %v3528_v42  ;;  %v3241_v48 = vld [vmem:[#allocation2 + $0xc8] sm:$0x7f]  ;;  %v3569_v51 = vadd.f32 %v8358_v36, %v3530_v61 }
 0x22c   : > { %1918 = vst [vmem:[#allocation4 + $0x700] sm:$0xff] %v1663_v35  ;;  %v7122_v45 = vpop.f32.mrb[154].mxu0  ;;  %v3303_v1 = vrot.slane %v3204_v49, 1  ;;  %v8591_v40 = vld [vmem:[#allocation4 + $0x6b8] sm:$0xff]  ;;  %4475 = vmatpush1.bf16.msra.mxu1 %v7369_v41  ;;  %4668 = vmatpush1.bf16.msra.mxu0 %v7381_v38  ;;  %v8634_v41 = vpack.c.bf16 %v3456_v59, %v3455_v26  ;;  %v3245_v56 = vld [vmem:[#allocation2 + $0xe8] sm:$0x7f] }
 0x22d   : > { %1945 = vst [vmem:[#allocation4 + $0x7d8] sm:$0xff] %v7122_v45  ;;  %v1666_v17 = vpop.f32.mrb[155].mxu0  ;;  %v3307_v47 = vrot.slane %v8591_v40, 1  ;;  %7127 = vmatprep.subr.bf16.mxu1 %v8586_v63  ;;  %v3239_v25 = vld [vmem:[#allocation2 + $0xb8] sm:$0x7f]  ;;  %v3457_v49 = vmax.f32 %v8569_v4, 0.0 }
 0x22e   : > { %1927 = vst [vmem:[#allocation4 + $0x748] sm:$0xff] %v1666_v17  ;;  %4147 = vmatmul.mubr.bf16.gmra.mrb[144].mxu1 %v8589_v10  ;;  %4340 = vmatmul.mubr.bf16.gmra.mrb[176].mxu0 %v8589_v10  ;;  %v3305_v34 = vsel %vm2313_vm0, %v3303_v1, %v3304_v24  ;;  %v3532_v24 = vld [vmem:[%s7529_s27 + $0xc8] sm:$0xff]  ;;  %v3243_v44 = vld [vmem:[#allocation2 + $0xd8] sm:$0x7f]  ;;  %v3458_v11 = vmax.f32 %v8581_v52, 0.0  ;;  %v3459_v52 = vmax.f32 %v8565_v60, 0.0 }
 0x22f   : > { %4156 = vmatprep.mubr.bf16.mxu1 %v7401_v2  ;;  %4349 = vmatprep.mubr.bf16.mxu0 %v7401_v2  ;;  %v8602_v20 = vadd.f32 %v3305_v34, %v3144_v27  ;;  %v3372_v50 = vadd.f32 %v3307_v47, %v3237_v57  ;;  %v3571_v39 = vadd.f32 %v8358_v36, %v3532_v24  ;;  %v3536_v27 = vld [vmem:[%s7529_s27 + $0xe8] sm:$0xff]  ;;  %v3534_v34 = vld [vmem:[%s7529_s27 + $0xd8] sm:$0xff]  ;;  %v3206_v42 = vld [vmem:[#allocation4 + $0x670] sm:$0xfe] }
 0x230   : > { %v3575_v57 = vadd.f32 %v8358_v36, %v3536_v27  ;;  %v3573_v4 = vadd.f32 %v8358_v36, %v3534_v34  ;;  %v3306_v36 = vrot.slane %v3206_v42, 1  ;;  %v3088_v40 = vld [vmem:[#allocation4 + $0x6f8] sm:$0xff]  ;;  %v3090_v61 = vld [vmem:[#allocation4 + $0x788] sm:$0xff]  ;;  %v7390_v42 = vld [vmem:[%s9276_s3 + $0x1d0] ss:$36 sps:$4 sm:$0xff]  }
 0x231   : > { %v8608_v62 = vld [vmem:[#allocation2 + $0x98] sm:$0xff]  ;;  %3402 = vst [vmem:[#allocation2 + $0xa8] sm:$0x7f] %v3372_v50  ;;  %v3460_v50 = vmax.f32 %v8576_v19, 0.0  ;;  %v3461_v60 = vmax.f32 %v8602_v20, 0.0  ;;  %v3148_v26 = vadd.f32 %v8342_v7, %v3088_v40  ;;  %v3150_v7 = vadd.f32 %v8349_v0, %v3090_v61 }
 0x232   : > { %v7125_v8 = vpop.f32.mrb[156].mxu0  ;;  %3597 = vst [vmem:[#allocation2 + $0x98] sm:$0xff] %v3565_v9  ;;  %v8658_v9 = vpack.c.bf16 %v3458_v11, %v3457_v49  ;;  %v3462_v19 = vmax.f32 %v8608_v62, 0.0  ;;  %v3210_v59 = vld [vmem:[#allocation4 + $0x790] sm:$0xfe] }
 0x233   : > { %1972 = vst [vmem:[#allocation4 + $0x8b0] sm:$0xff] %v7125_v8  ;;  %v1679_v29 = vpop.f32.mrb[157].mxu0  ;;  %v8672_v8 = vpack.c.bf16 %v3460_v50, %v3459_v52  ;;  %v5793_v61 = vld [vmem:[#allocation2 + $0x9] sm:$0x7f] }
 0x234   : > { %1954 = vst [vmem:[#allocation4 + $0x820] sm:$0xff] %v1679_v29  ;;  %v7126_v53 = vpop.f32.mrb[158].mxu0  ;;  %v8613_v5 = vld [vmem:[#allocation4 + $0x7d8] sm:$0xff]  ;;  %v3086_v29 = vld [vmem:[#allocation4 + $0x668] sm:$0xff] }
 0x235   : > { %1981 = vst [vmem:[#allocation4 + $0x8f8] sm:$0xff] %v7126_v53  ;;  %v1682_v55 = vpop.f32.mrb[159].mxu0  ;;  %v8616_v15 = vld [vmem:[#allocation4 + $0x748] sm:$0xff]  ;;  %v3313_v32 = vrot.slane %v8613_v5, 1  ;;  %v3308_v53 = vsel %vm2313_vm0, %v3306_v36, %v3307_v47  ;;  %v3092_v5 = vld [vmem:[#allocation4 + $0x818] sm:$0xff] }
 0x236   : > { %1963 = vst [vmem:[#allocation4 + $0x868] sm:$0xff] %v1682_v55  ;;  %4157 = vmatmul.mubr.bf16.gmra.mrb[148].mxu1 %v8611_v12  ;;  %4350 = vmatmul.mubr.bf16.gmra.mrb[180].mxu0 %v8611_v12  ;;  %v3310_v18 = vrot.slane %v8616_v15, 1  ;;  %v8683_v55 = vpack.c.bf16 %v3462_v19, %v3461_v60  ;;  %v3152_v11 = vadd.f32 %v8371_v13, %v3092_v5  ;;  %v7391_v36 = vld [vmem:[%s9276_s3 + $0x218] ss:$36 sps:$4 sm:$0xff]   ;;  %v5792_v19 = vld [vmem:[#allocation2 + $0x1] sm:$0xff] }
 0x237   : > { %4166 = vmatprep.mubr.bf16.mxu1 %v7401_v2  ;;  %4359 = vmatprep.mubr.bf16.mxu0 %v7401_v2  ;;  %v3376_v23 = vadd.f32 %v3313_v32, %v3241_v48  ;;  %v3208_v48 = vld [vmem:[#allocation4 + $0x700] sm:$0xfe]  ;;  %v5325_v60 = vld [vmem:[#allocation2 + $0x11] sm:$0xff] }
 0x238   : > { %v8628_v46 = vld [vmem:[#allocation2 + $0xa8] sm:$0xff]  ;;  %v3374_v33 = vadd.f32 %v3310_v18, %v3239_v25  ;;  %v3309_v20 = vrot.slane %v3208_v48, 1 }
 0x239   : > { %3599 = vst [vmem:[#allocation2 + $0xa8] sm:$0xff] %v3567_v3  ;;  %3406 = vst [vmem:[#allocation2 + $0xc8] sm:$0x7f] %v3376_v23  ;;  %v3146_v3 = vadd.f32 %v8329_v21, %v3086_v29  ;;  %v3464_v62 = vmax.f32 %v8628_v46, 0.0  ;;  %v3312_v46 = vrot.slane %v3210_v59, 1 }
 0x23a   : > { %3404 = vst [vmem:[#allocation2 + $0xb8] sm:$0x7f] %v3374_v33  ;;  %v3311_v47 = vsel %vm2313_vm0, %v3309_v20, %v3310_v18 }
 0x23b   : > { %v3371_v25 = vadd.f32 %v3308_v53, %v3146_v3  ;;  %v3373_v33 = vadd.f32 %v3311_v47, %v3148_v26  ;;  %v3314_v18 = vsel %vm2313_vm0, %v3312_v46, %v3313_v32  ;;  %v5327_v26 = vld [vmem:[#allocation2 + $0x21] sm:$0xff] }
 0x23c   : > { %v8636_v31 = vld [vmem:[#allocation4 + $0x8f8] sm:$0xff] }
 0x23d   : > { %v8639_v30 = vld [vmem:[#allocation4 + $0x868] sm:$0xff]  ;;  %v3319_v16 = vrot.slane %v8636_v31, 1  ;;  %v3463_v23 = vmax.f32 %v3371_v25, 0.0  ;;  %v3465_v15 = vmax.f32 %v3373_v33, 0.0  ;;  %v7386_v31 = vld [vmem:[%s9276_s3 + $0xb0] ss:$36 sps:$4 sm:$0xff]  }
 0x23e   : > { %4167 = vmatmul.mubr.bf16.gmra.mrb[152].mxu1 %v8634_v41  ;;  %4360 = vmatmul.mubr.bf16.gmra.mrb[184].mxu0 %v8634_v41  ;;  %v3316_v38 = vrot.slane %v8639_v30, 1  ;;  %v3094_v30 = vld [vmem:[#allocation4 + $0x8a8] sm:$0xff]  ;;  %v5326_v33 = vld [vmem:[#allocation2 + $0x19] sm:$0x7f] }
 0x23f   : > { %4176 = vmatprep.mubr.bf16.mxu1 %v7401_v2  ;;  %4369 = vmatprep.mubr.bf16.mxu0 %v7401_v2  ;;  %v3380_v35 = vadd.f32 %v3319_v16, %v3245_v56  ;;  %v8694_v21 = vpack.c.bf16 %v3464_v62, %v3463_v23  ;;  %v3375_v56 = vadd.f32 %v3314_v18, %v3150_v7 }
 0x240   : > { %v8652_v45 = vld [vmem:[#allocation2 + $0xc8] sm:$0xff]  ;;  %v3378_v1 = vadd.f32 %v3316_v38, %v3243_v44 }
 0x241   : > { %v3434_v17 = vld [vmem:[#allocation2 + $0xb8] sm:$0xff]  ;;  %3603 = vst [vmem:[#allocation2 + $0xc8] sm:$0xff] %v3571_v39  ;;  %3410 = vst [vmem:[#allocation2 + $0xe8] sm:$0x7f] %v3380_v35  ;;  %v3468_v35 = vmax.f32 %v8652_v45, 0.0  ;;  %v3467_v49 = vmax.f32 %v3375_v56, 0.0 }
 0x242   : > { %3601 = vst [vmem:[#allocation2 + $0xb8] sm:$0xff] %v3569_v51  ;;  %3408 = vst [vmem:[#allocation2 + $0xd8] sm:$0x7f] %v3378_v1  ;;  %v3466_v24 = vmax.f32 %v3434_v17, 0.0  ;;  %v3212_v51 = vld [vmem:[#allocation4 + $0x820] sm:$0xfe] }
 0x243   : > { %v3315_v44 = vrot.slane %v3212_v51, 1  ;;  %v8715_v0 = vpack.c.bf16 %v3468_v35, %v3467_v49  ;;  %v3214_v1 = vld [vmem:[#allocation4 + $0x8b0] sm:$0xfe] }
 0x244   : > { %v8704_v39 = vpack.c.bf16 %v3466_v24, %v3465_v15  ;;  %v3318_v45 = vrot.slane %v3214_v1, 1 }
 0x245   : > { %v3317_v32 = vsel %vm2313_vm0, %v3315_v44, %v3316_v38 }
 0x246   : > { %4177 = vmatmul.mubr.bf16.gmra.mrb[156].mxu1 %v8658_v9  ;;  %4370 = vmatmul.mubr.bf16.gmra.mrb[188].mxu0 %v8658_v9  ;;  %v3377_v17 = vadd.f32 %v3317_v32, %v3152_v11  ;;  %v3320_v38 = vsel %vm2313_vm0, %v3318_v45, %v3319_v16  ;;  %v7387_v16 = vld [vmem:[%s9276_s3 + $0xf8] ss:$36 sps:$4 sm:$0xff]  }
 0x247   : > { %4186 = vmatprep.mubr.bf16.mxu1 %v7401_v2  ;;  %4379 = vmatprep.mubr.bf16.mxu0 %v7401_v2 }
 0x248   : > { %v8668_v14 = vld [vmem:[#allocation2 + $0xe8] sm:$0xff]  ;;  %v3469_v34 = vmax.f32 %v3377_v17, 0.0 }
 0x249   : > { %v8670_v6 = vld [vmem:[#allocation2 + $0xd8] sm:$0xff]  ;;  %3607 = vst [vmem:[#allocation2 + $0xe8] sm:$0xff] %v3575_v57  ;;  %v3154_v57 = vadd.f32 %v8387_v54, %v3094_v30  ;;  %v3472_v52 = vmax.f32 %v8668_v14, 0.0  ;;  %v7385_v54 = vld [vmem:[%s9276_s3 + $0x68] ss:$36 sps:$4 sm:$0xff]  }
 0x24a   : > { %3605 = vst [vmem:[#allocation2 + $0xd8] sm:$0xff] %v3573_v4  ;;  %v3470_v27 = vmax.f32 %v8670_v6, 0.0  ;;  %v7389_v14 = vld [vmem:[%s9276_s3 + $0x188] ss:$36 sps:$4 sm:$0xff]  }
 0x24b   : > { %v3379_v4 = vadd.f32 %v3320_v38, %v3154_v57  ;;  %v5329_v38 = vld [vmem:[#allocation2 + $0x31] sm:$0xff] }
 0x24c   : > { %v8726_v13 = vpack.c.bf16 %v3470_v27, %v3469_v34 }
 0x24d   : > { %v3471_v50 = vmax.f32 %v3379_v4, 0.0  ;;  %v5328_v4 = vld [vmem:[#allocation2 + $0x29] sm:$0x7f] }
 0x24e   : > { %4187 = vmatmul.mubr.bf16.gmra.mrb[160].mxu1 %v8672_v8  ;;  %4380 = vmatmul.mubr.bf16.gmra.mrb[192].mxu0 %v8672_v8 }
 0x24f   : > { %4196 = vmatprep.mubr.bf16.mxu1 %v7401_v2  ;;  %4389 = vmatprep.mubr.bf16.mxu0 %v7401_v2  ;;  %v8734_v6 = vpack.c.bf16 %v3472_v52, %v3471_v50 }
 0x256   : > { %4197 = vmatmul.mubr.bf16.gmra.mrb[164].mxu1 %v8683_v55  ;;  %4390 = vmatmul.mubr.bf16.gmra.mrb[196].mxu0 %v8683_v55 }
 0x257   : > { %4206 = vmatprep.mubr.bf16.mxu1 %v7401_v2  ;;  %4399 = vmatprep.mubr.bf16.mxu0 %v7401_v2 }
 0x25e   : > { %4207 = vmatmul.mubr.bf16.gmra.mrb[168].mxu1 %v8694_v21  ;;  %4400 = vmatmul.mubr.bf16.gmra.mrb[200].mxu0 %v8694_v21 }
 0x25f   : > { %4216 = vmatprep.mubr.bf16.mxu1 %v7401_v2  ;;  %4409 = vmatprep.mubr.bf16.mxu0 %v7401_v2 }
 0x266   : > { %4217 = vmatmul.mubr.bf16.gmra.mrb[172].mxu1 %v8704_v39  ;;  %4410 = vmatmul.mubr.bf16.gmra.mrb[204].mxu0 %v8704_v39 }
 0x267   : > { %4226 = vmatprep.mubr.bf16.mxu1 %v7401_v2  ;;  %4419 = vmatprep.mubr.bf16.mxu0 %v7401_v2 }
 0x26e   : > { %4227 = vmatmul.mubr.bf16.gmra.mrb[176].mxu1 %v8715_v0  ;;  %4420 = vmatmul.mubr.bf16.gmra.mrb[208].mxu0 %v8715_v0 }
 0x26f   : > { %4236 = vmatprep.mubr.bf16.mxu1 %v7401_v2  ;;  %4429 = vmatprep.mubr.bf16.mxu0 %v7401_v2 }
 0x276   : > { %4237 = vmatmul.mubr.bf16.gmra.mrb[180].mxu1 %v8726_v13  ;;  %4430 = vmatmul.mubr.bf16.gmra.mrb[212].mxu0 %v8726_v13 }
 0x277   : > { %4246 = vmatprep.mubr.bf16.mxu1 %v7401_v2  ;;  %4439 = vmatprep.mubr.bf16.mxu0 %v7401_v2 }
 0x27e   : > { %4247 = vmatmul.mubr.bf16.gmra.mrb[184].mxu1 %v8734_v6  ;;  %4440 = vmatmul.mubr.bf16.gmra.mrb[216].mxu0 %v8734_v6 }
 0x27f   : > { %4256 = vmatprep.mubr.bf16.mxu1 %v7401_v2  ;;  %4449 = vmatprep.mubr.bf16.mxu0 %v7401_v2 }
 0x286   : > { %4257 = vmatmul.mubr.bf16.gmra.mrb[188].mxu1 %v8419_v58  ;;  %4450 = vmatmul.mubr.bf16.gmra.mrb[220].mxu0 %v8419_v58 }
 0x287   : > { %4492 = vmatprep.mubr.bf16.mxu1 %v7401_v2  ;;  %4685 = vmatprep.mubr.bf16.mxu0 %v7401_v2 }
 0x28e   : > { %4493 = vmatmul.mubr.bf16.vlgmr.msra.gmra.mrb[192].mxu1 %v8389_v22  ;;  %4686 = vmatmul.mubr.bf16.vlgmr.msra.gmra.mrb[224].mxu0 %v8389_v22 }
 0x28f   : > { %7128 = vmatpush3.bf16.msra.mxu1 %v8586_v63  ;;  %4502 = vmatprep.mubr.bf16.mxu1 %v7401_v2  ;;  %v7388_v63 = vld [vmem:[%s9276_s3 + $0x140] ss:$36 sps:$4 sm:$0xff]  }
 0x290   : > { %4695 = vmatprep.mubr.bf16.mxu0 %v7401_v2  ;;  %7129 = vmatprep.subr.bf16.mxu1 %v7385_v54 }
 0x293   : > { %7130 = vmatpush3.bf16.msra.mxu1 %v7385_v54 }
 0x294   : > { %7131 = vmatprep.subr.bf16.mxu1 %v7386_v31 }
 0x296   : > { %4503 = vmatmul.mubr.bf16.gmra.mrb[196].mxu1 %v8437_v37  ;;  %4696 = vmatmul.mubr.bf16.gmra.mrb[228].mxu0 %v8437_v37 }
 0x297   : > { %4512 = vmatprep.mubr.bf16.mxu1 %v7401_v2  ;;  %4705 = vmatprep.mubr.bf16.mxu0 %v7401_v2 }
 0x298   : > { %7132 = vmatpush3.bf16.msra.mxu1 %v7386_v31 }
 0x299   : > { %7133 = vmatprep.subr.bf16.mxu1 %v7387_v16 }
 0x29c   : > { %7134 = vmatpush3.bf16.msra.mxu1 %v7387_v16 }
 0x29d   : > { %7135 = vmatprep.subr.bf16.mxu1 %v7388_v63 }
 0x29e   : > { %4513 = vmatmul.mubr.bf16.gmra.mrb[200].mxu1 %v8491_v28  ;;  %4706 = vmatmul.mubr.bf16.gmra.mrb[232].mxu0 %v8491_v28 }
 0x29f   : > { %4522 = vmatprep.mubr.bf16.mxu1 %v7401_v2  ;;  %4715 = vmatprep.mubr.bf16.mxu0 %v7401_v2 }
 0x2a0   : > { %7136 = vmatpush3.bf16.msra.mxu1 %v7388_v63 }
 0x2a1   : > { %7137 = vmatprep.subr.bf16.mxu1 %v7389_v14 }
 0x2a4   : > { %7138 = vmatpush3.bf16.msra.mxu1 %v7389_v14 }
 0x2a5   : > { %7139 = vmatprep.subr.bf16.mxu1 %v7390_v42 }
 0x2a6   : > { %4523 = vmatmul.mubr.bf16.gmra.mrb[204].mxu1 %v8543_v43  ;;  %4716 = vmatmul.mubr.bf16.gmra.mrb[236].mxu0 %v8543_v43 }
 0x2a7   : > { %4532 = vmatprep.mubr.bf16.mxu1 %v7401_v2  ;;  %4725 = vmatprep.mubr.bf16.mxu0 %v7401_v2 }
 0x2a8   : > { %7140 = vmatpush3.bf16.msra.mxu1 %v7390_v42 }
 0x2a9   : > { %7141 = vmatprep.subr.bf16.mxu1 %v7391_v36 }
 0x2ac   : > { %7142 = vmatpush3.bf16.msra.mxu1 %v7391_v36 }
 0x2ae   : > { %4533 = vmatmul.mubr.bf16.gmra.mrb[208].mxu1 %v8589_v10  ;;  %4726 = vmatmul.mubr.bf16.gmra.mrb[240].mxu0 %v8589_v10 }
 0x2af   : > { %4542 = vmatprep.mubr.bf16.mxu1 %v7401_v2  ;;  %4735 = vmatprep.mubr.bf16.mxu0 %v7401_v2 }
 0x2b6   : > { %4543 = vmatmul.mubr.bf16.gmra.mrb[212].mxu1 %v8611_v12  ;;  %4736 = vmatmul.mubr.bf16.gmra.mrb[244].mxu0 %v8611_v12 }
 0x2b7   : > { %4552 = vmatprep.mubr.bf16.mxu1 %v7401_v2  ;;  %4745 = vmatprep.mubr.bf16.mxu0 %v7401_v2 }
 0x2be   : > { %4553 = vmatmul.mubr.bf16.gmra.mrb[216].mxu1 %v8634_v41  ;;  %4746 = vmatmul.mubr.bf16.gmra.mrb[248].mxu0 %v8634_v41 }
 0x2bf   : > { %4562 = vmatprep.mubr.bf16.mxu1 %v7401_v2  ;;  %4755 = vmatprep.mubr.bf16.mxu0 %v7401_v2 }
 0x2c6   : > { %4563 = vmatmul.mubr.bf16.gmra.mrb[220].mxu1 %v8658_v9  ;;  %4756 = vmatmul.mubr.bf16.gmra.mrb[252].mxu0 %v8658_v9 }
 0x2c7   : > { %4572 = vmatprep.mubr.bf16.mxu1 %v7401_v2  ;;  %4765 = vmatprep.mubr.bf16.mxu0 %v7401_v2 }
 0x2ce   : > { %4573 = vmatmul.mubr.bf16.gmra.mrb[224].mxu1 %v8672_v8  ;;  %4766 = vmatmul.mubr.bf16.gmra.mrb[0].mxu0 %v8672_v8 }
 0x2cf   : > { %4582 = vmatprep.mubr.bf16.mxu1 %v7401_v2  ;;  %4775 = vmatprep.mubr.bf16.mxu0 %v7401_v2 }
 0x2d6   : > { %4583 = vmatmul.mubr.bf16.gmra.mrb[228].mxu1 %v8683_v55  ;;  %4776 = vmatmul.mubr.bf16.gmra.mrb[4].mxu0 %v8683_v55 }
 0x2d7   : > { %4592 = vmatprep.mubr.bf16.mxu1 %v7401_v2  ;;  %4785 = vmatprep.mubr.bf16.mxu0 %v7401_v2 }
 0x2de   : > { %4593 = vmatmul.mubr.bf16.gmra.mrb[232].mxu1 %v8694_v21  ;;  %4786 = vmatmul.mubr.bf16.gmra.mrb[8].mxu0 %v8694_v21 }
 0x2df   : > { %4602 = vmatprep.mubr.bf16.mxu1 %v7401_v2  ;;  %4795 = vmatprep.mubr.bf16.mxu0 %v7401_v2 }
 0x2e0   : > { %v4108_v29 = vpop.f32.mrb[128].mxu1  ;;  %v4301_v53 = vpop.f32.mrb[160].mxu0 }
 0x2e1   : > { %v5355_v3 = vadd.f32 %v5325_v60, %v4108_v29  ;;  %5009 = vst [vmem:[#allocation4 + $0x10] sm:$0xff] %v4301_v53  ;;  %v4110_v48 = vpop.f32.mrb[129].mxu1  ;;  %v4303_v25 = vpop.f32.mrb[161].mxu0 }
 0x2e2   : > { %v5824_v20 = vadd.f32 %v5792_v19, %v4303_v25  ;;  %v4112_v62 = vpop.f32.mrb[130].mxu1  ;;  %v8810_v40 = vpop.f32.mrb[162].mxu0 }
 0x2e3   : > { %5385 = vst [vmem:[#allocation2 + $0x11] sm:$0xff] %v5355_v3  ;;  %5016 = vst [vmem:[#allocation4 + $0x48] sm:$0xff] %v4112_v62  ;;  %v8812_v23 = vpop.f32.mrb[131].mxu1  ;;  %v4307_v47 = vpop.f32.mrb[163].mxu0  ;;  %v5626_v24 = vrot.slane %v8810_v40, 1 }
 0x2e4   : > { %5856 = vst [vmem:[#allocation2 + $0x1] sm:$0xff] %v5824_v20  ;;  %5019 = vst [vmem:[#allocation4 + $0x60] sm:$0xff] %v4307_v47 }
 0x2e6   : > { %4603 = vmatmul.mubr.bf16.gmra.mrb[236].mxu1 %v8704_v39  ;;  %4796 = vmatmul.mubr.bf16.gmra.mrb[12].mxu0 %v8704_v39 }
 0x2e7   : > { %4612 = vmatprep.mubr.bf16.mxu1 %v7401_v2  ;;  %4805 = vmatprep.mubr.bf16.mxu0 %v7401_v2 }
 0x2e8   : > { %v5535_v59 = vld [vmem:[#allocation4 + $0x10] sm:$0xfe] }
 0x2e9   : > { %v5625_v46 = vrot.slane %v5535_v59, 1  ;;  %v4118_v15 = vpop.f32.mrb[132].mxu1  ;;  %v4311_v18 = vpop.f32.mrb[164].mxu0 }
 0x2ea   : > { %v5445_v7 = vld [vmem:[#allocation2 + $0x10] sm:$0xff]  ;;  %v5296_v51 = vld [vmem:[#allocation4 + $0x48] sm:$0x7f]  ;;  %v5357_v56 = vadd.f32 %v5327_v26, %v4118_v15  ;;  %5027 = vst [vmem:[#allocation4 + $0xa0] sm:$0xff] %v4311_v18  ;;  %v4120_v44 = vpop.f32.mrb[133].mxu1  ;;  %v8819_v35 = vpop.f32.mrb[165].mxu0 }
 0x2eb   : > { %v5475_v5 = vadd.f32 %v5445_v7, %v4110_v48  ;;  %v5356_v49 = vadd.f32 %v5326_v33, %v5296_v51  ;;  %v5627_v32 = vsel %vm2313_vm0, %v5625_v46, %v5626_v24  ;;  %v5761_v11 = vld [vmem:[#allocation4 + $0x60] sm:$0x7f]  ;;  %v4122_v1 = vpop.f32.mrb[134].mxu1  ;;  %v8824_v17 = vpop.f32.mrb[166].mxu0  ;;  %v5330_v33 = vld [vmem:[#allocation2 + $0x39] sm:$0x7f] }
 0x2ec   : > { %v5825_v45 = vadd.f32 %v5793_v61, %v5761_v11  ;;  %5387 = vst [vmem:[#allocation2 + $0x21] sm:$0xff] %v5357_v56  ;;  %5034 = vst [vmem:[#allocation4 + $0xd8] sm:$0xff] %v4122_v1  ;;  %v8826_v27 = vpop.f32.mrb[135].mxu1  ;;  %v4317_v30 = vpop.f32.mrb[167].mxu0  ;;  %v5629_v31 = vrot.slane %v8824_v17, 1  ;;  %v5331_v26 = vld [vmem:[#allocation2 + $0x41] sm:$0xff] }
 0x2ed   : > { %5386 = vst [vmem:[#allocation2 + $0x19] sm:$0x7f] %v5356_v49  ;;  %v5700_v34 = vadd.f32 %v5627_v32, %v5475_v5  ;;  %5037 = vst [vmem:[#allocation4 + $0xf0] sm:$0xff] %v4317_v30 }
 0x2ee   : > { %5857 = vst [vmem:[#allocation2 + $0x9] sm:$0x7f] %v5825_v45  ;;  %4613 = vmatmul.mubr.bf16.gmra.mrb[240].mxu1 %v8715_v0  ;;  %4806 = vmatmul.mubr.bf16.gmra.mrb[16].mxu0 %v8715_v0 }
 0x2ef   : > { %5730 = vst [vmem:[#allocation2 + $0x10] sm:$0xff] %v5700_v34  ;;  %4622 = vmatprep.mubr.bf16.mxu1 %v7401_v2  ;;  %4815 = vmatprep.mubr.bf16.mxu0 %v7401_v2 }
 0x2f1   : > { %v5537_v57 = vld [vmem:[#allocation4 + $0xa0] sm:$0xfe]  ;;  %v4128_v52 = vpop.f32.mrb[136].mxu1  ;;  %v4321_v50 = vpop.f32.mrb[168].mxu0 }
 0x2f2   : > { %v5628_v54 = vrot.slane %v5537_v57, 1  ;;  %v5359_v16 = vadd.f32 %v5329_v38, %v4128_v52  ;;  %5045 = vst [vmem:[#allocation4 + $0x130] sm:$0xff] %v4321_v50  ;;  %v4130_v63 = vpop.f32.mrb[137].mxu1  ;;  %v8833_v14 = vpop.f32.mrb[169].mxu0  ;;  %v5333_v50 = vld [vmem:[#allocation2 + $0x51] sm:$0xff] }
 0x2f3   : > { %v5447_v42 = vld [vmem:[#allocation2 + $0x20] sm:$0xff]  ;;  %v5298_v36 = vld [vmem:[#allocation4 + $0xd8] sm:$0x7f]  ;;  %v4132_v60 = vpop.f32.mrb[138].mxu1  ;;  %v8835_v19 = vpop.f32.mrb[170].mxu0 }
 0x2f4   : > { %v5446_v29 = vld [vmem:[#allocation2 + $0x18] sm:$0xff]  ;;  %v5477_v53 = vadd.f32 %v5447_v42, %v4120_v44  ;;  %v5358_v3 = vadd.f32 %v5328_v4, %v5298_v36  ;;  %v5630_v48 = vsel %vm2313_vm0, %v5628_v54, %v5629_v31  ;;  %5389 = vst [vmem:[#allocation2 + $0x31] sm:$0xff] %v5359_v16  ;;  %5052 = vst [vmem:[#allocation4 + $0x168] sm:$0xff] %v4132_v60  ;;  %v8840_v25 = vpop.f32.mrb[139].mxu1  ;;  %v4327_v20 = vpop.f32.mrb[171].mxu0 }
 0x2f5   : > { %v5476_v62 = vadd.f32 %v5446_v29, %v8812_v23  ;;  %5055 = vst [vmem:[#allocation4 + $0x180] sm:$0xff] %v4327_v20  ;;  %v5632_v23 = vrot.slane %v8835_v19, 1  ;;  %v5332_v16 = vld [vmem:[#allocation2 + $0x49] sm:$0x7f] }
 0x2f6   : > { %5388 = vst [vmem:[#allocation2 + $0x29] sm:$0x7f] %v5358_v3  ;;  %v5702_v47 = vadd.f32 %v5630_v48, %v5477_v53  ;;  %4623 = vmatmul.mubr.bf16.gmra.mrb[244].mxu1 %v8726_v13  ;;  %4816 = vmatmul.mubr.bf16.gmra.mrb[20].mxu0 %v8726_v13 }
 0x2f7   : > { %5506 = vst [vmem:[#allocation2 + $0x18] sm:$0xff] %v5476_v62  ;;  %4632 = vmatprep.mubr.bf16.mxu1 %v7401_v2  ;;  %4825 = vmatprep.mubr.bf16.mxu0 %v7401_v2 }
 0x2f8   : > { %5732 = vst [vmem:[#allocation2 + $0x20] sm:$0xff] %v5702_v47 }
 0x2f9   : > { %v5539_v59 = vld [vmem:[#allocation4 + $0x130] sm:$0xfe]  ;;  %v4138_v46 = vpop.f32.mrb[140].mxu1  ;;  %v4331_v61 = vpop.f32.mrb[172].mxu0 }
 0x2fa   : > { %v5631_v15 = vrot.slane %v5539_v59, 1  ;;  %v5361_v18 = vadd.f32 %v5331_v26, %v4138_v46  ;;  %5063 = vst [vmem:[#allocation4 + $0x1c0] sm:$0xff] %v4331_v61  ;;  %v4140_v7 = vpop.f32.mrb[141].mxu1  ;;  %v8848_v51 = vpop.f32.mrb[173].mxu0 }
 0x2fb   : > { %v5449_v56 = vld [vmem:[#allocation2 + $0x30] sm:$0xff]  ;;  %v5300_v44 = vld [vmem:[#allocation4 + $0x168] sm:$0x7f]  ;;  %v4142_v5 = vpop.f32.mrb[142].mxu1  ;;  %v8850_v49 = vpop.f32.mrb[174].mxu0 }
 0x2fc   : > { %v5479_v32 = vadd.f32 %v5449_v56, %v4130_v63  ;;  %v5360_v11 = vadd.f32 %v5330_v33, %v5300_v44  ;;  %v5633_v1 = vsel %vm2313_vm0, %v5631_v15, %v5632_v23  ;;  %5391 = vst [vmem:[#allocation2 + $0x41] sm:$0xff] %v5361_v18  ;;  %5070 = vst [vmem:[#allocation4 + $0x1f8] sm:$0xff] %v4142_v5  ;;  %v8855_v45 = vpop.f32.mrb[143].mxu1  ;;  %v4337_v30 = vpop.f32.mrb[175].mxu0  ;;  %v5635_v36 = vrot.slane %v8850_v49, 1  ;;  %v5335_v15 = vld [vmem:[#allocation2 + $0x61] sm:$0xff] }
 0x2fd   : > { %v5448_v34 = vld [vmem:[#allocation2 + $0x28] sm:$0xff]  ;;  %5073 = vst [vmem:[#allocation4 + $0x210] sm:$0xff] %v4337_v30 }
 0x2fe   : > { %v5566_v38 = vld [vmem:[#allocation2 + $0x18] sm:$0x7f]  ;;  %v5478_v57 = vadd.f32 %v5448_v34, %v8826_v27  ;;  %5390 = vst [vmem:[#allocation2 + $0x39] sm:$0x7f] %v5360_v11  ;;  %v5704_v4 = vadd.f32 %v5633_v1, %v5479_v32  ;;  %4633 = vmatmul.mubr.bf16.gmra.mrb[248].mxu1 %v8734_v6  ;;  %4826 = vmatmul.mubr.bf16.gmra.mrb[24].mxu0 %v8734_v6 }
 0x2ff   : > { %v5701_v52 = vadd.f32 %v5626_v24, %v5566_v38  ;;  %4642 = vmatprep.mubr.bf16.mxu1 %v7401_v2  ;;  %4835 = vmatprep.mubr.bf16.mxu0 %v7401_v2  ;;  %v5334_v11 = vld [vmem:[#allocation2 + $0x59] sm:$0x7f] }
 0x300   : > { %5508 = vst [vmem:[#allocation2 + $0x28] sm:$0xff] %v5478_v57  ;;  %5734 = vst [vmem:[#allocation2 + $0x30] sm:$0xff] %v5704_v4 }
 0x301   : > { %5731 = vst [vmem:[#allocation2 + $0x18] sm:$0x7f] %v5701_v52  ;;  %v5541_v54 = vld [vmem:[#allocation4 + $0x1c0] sm:$0xfe]  ;;  %v4148_v27 = vpop.f32.mrb[144].mxu1  ;;  %v4341_v63 = vpop.f32.mrb[176].mxu0 }
 0x302   : > { %v5634_v42 = vrot.slane %v5541_v54, 1  ;;  %v5363_v60 = vadd.f32 %v5333_v50, %v4148_v27  ;;  %5081 = vst [vmem:[#allocation4 + $0x250] sm:$0xff] %v4341_v63  ;;  %v4150_v29 = vpop.f32.mrb[145].mxu1  ;;  %v8865_v40 = vpop.f32.mrb[177].mxu0 }
 0x303   : > { %v5451_v24 = vld [vmem:[#allocation2 + $0x40] sm:$0xff]  ;;  %v5302_v53 = vld [vmem:[#allocation4 + $0x1f8] sm:$0x7f]  ;;  %v4152_v3 = vpop.f32.mrb[146].mxu1  ;;  %v8867_v48 = vpop.f32.mrb[178].mxu0 }
 0x304   : > { %v5481_v2 = vadd.f32 %v5451_v24, %v4140_v7  ;;  %v5362_v20 = vadd.f32 %v5332_v16, %v5302_v53  ;;  %v5636_v62 = vsel %vm2313_vm0, %v5634_v42, %v5635_v36  ;;  %5393 = vst [vmem:[#allocation2 + $0x51] sm:$0xff] %v5363_v60  ;;  %5088 = vst [vmem:[#allocation4 + $0x288] sm:$0xff] %v4152_v3  ;;  %v8872_v47 = vpop.f32.mrb[147].mxu1  ;;  %v4347_v26 = vpop.f32.mrb[179].mxu0  ;;  %v5763_v7 = vld [vmem:[#allocation4 + $0xf0] sm:$0x7f] }
 0x305   : > { %v5450_v59 = vld [vmem:[#allocation2 + $0x38] sm:$0xff]  ;;  %5091 = vst [vmem:[#allocation4 + $0x2a0] sm:$0xff] %v4347_v26  ;;  %v5765_v3 = vld [vmem:[#allocation4 + $0x180] sm:$0x7f] }
 0x306   : > { %v5480_v33 = vadd.f32 %v5450_v59, %v8840_v25  ;;  %5392 = vst [vmem:[#allocation2 + $0x49] sm:$0x7f] %v5362_v20  ;;  %v5706_v46 = vadd.f32 %v5636_v62, %v5481_v2  ;;  %4643 = vmatmul.mubr.bf16.gmra.mrb[252].mxu1 %v8419_v58  ;;  %4836 = vmatmul.mubr.bf16.gmra.mrb[28].mxu0 %v8419_v58  ;;  %v5336_v20 = vld [vmem:[#allocation2 + $0x69] sm:$0x7f] }
 0x307   : > { %v5568_v61 = vld [vmem:[#allocation2 + $0x28] sm:$0x7f]  ;;  %7143 = vmatprep.mubr.bf16.mxu1 %v8389_v22  ;;  %v5638_v22 = vrot.slane %v8867_v48, 1 }
 0x308   : > { %v5794_v18 = vld [vmem:[#allocation2 + $0x11] sm:$0xff]  ;;  %v5795_v56 = vld [vmem:[#allocation2 + $0x19] sm:$0x7f]  ;;  %v5703_v44 = vadd.f32 %v5629_v31, %v5568_v61  ;;  %5510 = vst [vmem:[#allocation2 + $0x38] sm:$0xff] %v5480_v33  ;;  %5736 = vst [vmem:[#allocation2 + $0x40] sm:$0xff] %v5706_v46 }
 0x309   : > { %v5826_v25 = vadd.f32 %v5794_v18, %v8819_v35  ;;  %v5827_v5 = vadd.f32 %v5795_v56, %v5763_v7  ;;  %v5543_v32 = vld [vmem:[#allocation4 + $0x250] sm:$0xfe]  ;;  %v4158_v1 = vpop.f32.mrb[148].mxu1  ;;  %v4351_v30 = vpop.f32.mrb[180].mxu0 }
 0x30a   : > { %5733 = vst [vmem:[#allocation2 + $0x28] sm:$0x7f] %v5703_v44  ;;  %v5637_v34 = vrot.slane %v5543_v32, 1  ;;  %v5365_v38 = vadd.f32 %v5335_v15, %v4158_v1  ;;  %5099 = vst [vmem:[#allocation4 + $0x2e0] sm:$0xff] %v4351_v30  ;;  %v4160_v57 = vpop.f32.mrb[149].mxu1  ;;  %v8882_v4 = vpop.f32.mrb[181].mxu0 }
 0x30b   : > { %5858 = vst [vmem:[#allocation2 + $0x11] sm:$0xff] %v5826_v25  ;;  %5859 = vst [vmem:[#allocation2 + $0x19] sm:$0x7f] %v5827_v5  ;;  %v5453_v17 = vld [vmem:[#allocation2 + $0x50] sm:$0xff]  ;;  %v5304_v31 = vld [vmem:[#allocation4 + $0x288] sm:$0x7f] }
 0x30c   : > { %v4162_v52 = vpop.f32.mrb[150].mxu1  ;;  %v8884_v35 = vpop.f32.mrb[182].mxu0  ;;  %v5483_v50 = vadd.f32 %v5453_v17, %v4150_v29  ;;  %v5364_v54 = vadd.f32 %v5334_v11, %v5304_v31  ;;  %v5639_v16 = vsel %vm2313_vm0, %v5637_v34, %v5638_v22  ;;  %5395 = vst [vmem:[#allocation2 + $0x61] sm:$0xff] %v5365_v38  ;;  %v5337_v29 = vld [vmem:[#allocation2 + $0x71] sm:$0xff] }
 0x30d   : > { %5106 = vst [vmem:[#allocation4 + $0x318] sm:$0xff] %v4162_v52  ;;  %v8889_v27 = vpop.f32.mrb[151].mxu1  ;;  %v4357_v63 = vpop.f32.mrb[183].mxu0  ;;  %v5452_v42 = vld [vmem:[#allocation2 + $0x48] sm:$0xff]  ;;  %v5641_v62 = vrot.slane %v8884_v35, 1 }
 0x30e   : > { %5109 = vst [vmem:[#allocation4 + $0x330] sm:$0xff] %v4357_v63  ;;  %v5482_v60 = vadd.f32 %v5452_v42, %v8855_v45  ;;  %5394 = vst [vmem:[#allocation2 + $0x59] sm:$0x7f] %v5364_v54  ;;  %v5708_v24 = vadd.f32 %v5639_v16, %v5483_v50  ;;  %7144 = vmatmul.mubr.bf16.vlgmr.msra.gmra.mrb[0].mxu1 %v8437_v37  ;;  %v5767_v17 = vld [vmem:[#allocation4 + $0x210] sm:$0x7f] }
 0x30f   : > { %v5570_v53 = vld [vmem:[#allocation2 + $0x38] sm:$0x7f]  ;;  %7147 = vmatprep.mubr.bf16.mxu1 %v8491_v28 }
 0x310   : > { %v5705_v2 = vadd.f32 %v5632_v23, %v5570_v53  ;;  %5512 = vst [vmem:[#allocation2 + $0x48] sm:$0xff] %v5482_v60  ;;  %5738 = vst [vmem:[#allocation2 + $0x50] sm:$0xff] %v5708_v24  ;;  %v5338_v52 = vld [vmem:[#allocation2 + $0x79] sm:$0x7f] }
 0x311   : > { %v5796_v26 = vld [vmem:[#allocation2 + $0x21] sm:$0xff]  ;;  %v5797_v59 = vld [vmem:[#allocation2 + $0x29] sm:$0x7f]  ;;  %v4168_v33 = vpop.f32.mrb[152].mxu1  ;;  %v4361_v15 = vpop.f32.mrb[184].mxu0 }
 0x312   : > { %v5545_v45 = vld [vmem:[#allocation4 + $0x2e0] sm:$0xfe]  ;;  %v5828_v46 = vadd.f32 %v5796_v26, %v8833_v14  ;;  %v5829_v37 = vadd.f32 %v5797_v59, %v5765_v3  ;;  %5735 = vst [vmem:[#allocation2 + $0x38] sm:$0x7f] %v5705_v2  ;;  %v5367_v28 = vadd.f32 %v5337_v29, %v4168_v33  ;;  %v4170_v18 = vpop.f32.mrb[153].mxu1  ;;  %5117 = vst [vmem:[#allocation4 + $0x370] sm:$0xff] %v4361_v15 }
 0x313   : > { %v5640_v61 = vrot.slane %v5545_v45, 1  ;;  %v5455_v7 = vld [vmem:[#allocation2 + $0x60] sm:$0xff]  ;;  %v8898_v23 = vpop.f32.mrb[185].mxu0  ;;  %v4172_v56 = vpop.f32.mrb[154].mxu1 }
 0x314   : > { %v5306_v19 = vld [vmem:[#allocation4 + $0x318] sm:$0x7f]  ;;  %5860 = vst [vmem:[#allocation2 + $0x21] sm:$0xff] %v5828_v46  ;;  %5861 = vst [vmem:[#allocation2 + $0x29] sm:$0x7f] %v5829_v37  ;;  %v5485_v44 = vadd.f32 %v5455_v7, %v4160_v57  ;;  %v8903_v5 = vpop.f32.mrb[186].mxu0 }
 0x315   : > { %v5366_v25 = vadd.f32 %v5336_v20, %v5306_v19  ;;  %v5642_v14 = vsel %vm2313_vm0, %v5640_v61, %v5641_v62  ;;  %5397 = vst [vmem:[#allocation2 + $0x71] sm:$0xff] %v5367_v28  ;;  %5124 = vst [vmem:[#allocation4 + $0x3a8] sm:$0xff] %v4172_v56  ;;  %v8905_v32 = vpop.f32.mrb[155].mxu1  ;;  %v5454_v11 = vld [vmem:[#allocation2 + $0x58] sm:$0xff]  ;;  %v4367_v1 = vpop.f32.mrb[187].mxu0  ;;  %v5339_v57 = vld [vmem:[#allocation2 + $0x81] sm:$0xff] }
 0x316   : > { %v5484_v30 = vadd.f32 %v5454_v11, %v8872_v47  ;;  %v5710_v34 = vadd.f32 %v5642_v14, %v5485_v44  ;;  %5127 = vst [vmem:[#allocation4 + $0x3c0] sm:$0xff] %v4367_v1  ;;  %7148 = vmatmul.mubr.bf16.gmra.mrb[4].mxu1 %v8543_v43  ;;  %v5644_v60 = vrot.slane %v8903_v5, 1  ;;  %v5341_v28 = vld [vmem:[#allocation2 + $0x91] sm:$0xff]  ;;  %v5769_v15 = vld [vmem:[#allocation4 + $0x2a0] sm:$0x7f] }
 0x317   : > { %5396 = vst [vmem:[#allocation2 + $0x69] sm:$0x7f] %v5366_v25  ;;  %v5572_v38 = vld [vmem:[#allocation2 + $0x48] sm:$0x7f]  ;;  %7151 = vmatprep.mubr.bf16.mxu1 %v8589_v10 }
 0x318   : > { %v5707_v31 = vadd.f32 %v5635_v36, %v5572_v38  ;;  %5514 = vst [vmem:[#allocation2 + $0x58] sm:$0xff] %v5484_v30  ;;  %5740 = vst [vmem:[#allocation2 + $0x60] sm:$0xff] %v5710_v34  ;;  %v5340_v7 = vld [vmem:[#allocation2 + $0x89] sm:$0x7f] }
 0x319   : > { %v5798_v50 = vld [vmem:[#allocation2 + $0x31] sm:$0xff]  ;;  %v5799_v54 = vld [vmem:[#allocation2 + $0x39] sm:$0x7f]  ;;  %v4178_v16 = vpop.f32.mrb[156].mxu1  ;;  %v4371_v47 = vpop.f32.mrb[188].mxu0 }
 0x31a   : > { %v5830_v63 = vadd.f32 %v5798_v50, %v8848_v51  ;;  %v5831_v42 = vadd.f32 %v5799_v54, %v5767_v17  ;;  %5737 = vst [vmem:[#allocation2 + $0x48] sm:$0x7f] %v5707_v31  ;;  %v5547_v43 = vld [vmem:[#allocation4 + $0x370] sm:$0xfe]  ;;  %v5369_v10 = vadd.f32 %v5339_v57, %v4178_v16  ;;  %5135 = vst [vmem:[#allocation4 + $0x400] sm:$0xff] %v4371_v47  ;;  %v4180_v24 = vpop.f32.mrb[157].mxu1 }
 0x31b   : > { %v8914_v53 = vpop.f32.mrb[189].mxu0  ;;  %v5643_v49 = vrot.slane %v5547_v43, 1  ;;  %v4182_v3 = vpop.f32.mrb[158].mxu1  ;;  %v5771_v43 = vld [vmem:[#allocation4 + $0x330] sm:$0x7f] }
 0x31c   : > { %v5457_v36 = vld [vmem:[#allocation2 + $0x70] sm:$0xff]  ;;  %v5308_v29 = vld [vmem:[#allocation4 + $0x3a8] sm:$0x7f]  ;;  %v8916_v2 = vpop.f32.mrb[190].mxu0  ;;  %5862 = vst [vmem:[#allocation2 + $0x31] sm:$0xff] %v5830_v63  ;;  %5399 = vst [vmem:[#allocation2 + $0x81] sm:$0xff] %v5369_v10 }
 0x31d   : > { %5863 = vst [vmem:[#allocation2 + $0x39] sm:$0x7f] %v5831_v42  ;;  %v5487_v20 = vadd.f32 %v5457_v36, %v4170_v18  ;;  %v5368_v51 = vadd.f32 %v5338_v52, %v5308_v29  ;;  %5142 = vst [vmem:[#allocation4 + $0x438] sm:$0xff] %v4182_v3  ;;  %v8918_v26 = vpop.f32.mrb[159].mxu1  ;;  %v4377_v59 = vpop.f32.mrb[191].mxu0  ;;  %v5645_v33 = vsel %vm2313_vm0, %v5643_v49, %v5644_v60  ;;  %v5647_v19 = vrot.slane %v8916_v2, 1 }
 0x31e   : > { %v5456_v45 = vld [vmem:[#allocation2 + $0x68] sm:$0xff]  ;;  %5145 = vst [vmem:[#allocation4 + $0x450] sm:$0xff] %v4377_v59  ;;  %7152 = vmatmul.mubr.bf16.gmra.mrb[8].mxu1 %v8611_v12 }
 0x31f   : > { %v5486_v46 = vadd.f32 %v5456_v45, %v8889_v27  ;;  %5398 = vst [vmem:[#allocation2 + $0x79] sm:$0x7f] %v5368_v51  ;;  %v5712_v37 = vadd.f32 %v5645_v33, %v5487_v20  ;;  %v5574_v61 = vld [vmem:[#allocation2 + $0x58] sm:$0x7f]  ;;  %7155 = vmatprep.mubr.bf16.mxu1 %v8634_v41  ;;  %v5343_v42 = vld [vmem:[#allocation2 + $0xa1] sm:$0xff] }
 0x320   : > { %v5709_v18 = vadd.f32 %v5638_v22, %v5574_v61 }
 0x321   : > { %5516 = vst [vmem:[#allocation2 + $0x68] sm:$0xff] %v5486_v46  ;;  %5742 = vst [vmem:[#allocation2 + $0x70] sm:$0xff] %v5712_v37  ;;  %v5800_v56 = vld [vmem:[#allocation2 + $0x41] sm:$0xff]  ;;  %v5801_v44 = vld [vmem:[#allocation2 + $0x49] sm:$0x7f]  ;;  %v4188_v25 = vpop.f32.mrb[160].mxu1 }
 0x322   : > { %v5549_v27 = vld [vmem:[#allocation4 + $0x400] sm:$0xfe]  ;;  %v5832_v14 = vadd.f32 %v5800_v56, %v8865_v40  ;;  %v5833_v12 = vadd.f32 %v5801_v44, %v5769_v15  ;;  %5739 = vst [vmem:[#allocation2 + $0x58] sm:$0x7f] %v5709_v18  ;;  %v5371_v41 = vadd.f32 %v5341_v28, %v4188_v25  ;;  %v4381_v1 = vpop.f32.mrb[192].mxu0  ;;  %v4190_v30 = vpop.f32.mrb[161].mxu1 }
 0x323   : > { %v5646_v11 = vrot.slane %v5549_v27, 1  ;;  %v5459_v34 = vld [vmem:[#allocation2 + $0x80] sm:$0xff]  ;;  %5153 = vst [vmem:[#allocation4 + $0x490] sm:$0xff] %v4381_v1  ;;  %v8930_v22 = vpop.f32.mrb[193].mxu0  ;;  %v4192_v38 = vpop.f32.mrb[162].mxu1  ;;  %v5345_v25 = vld [vmem:[#allocation2 + $0xb1] sm:$0xff] }
 0x324   : > { %v5310_v48 = vld [vmem:[#allocation4 + $0x438] sm:$0x7f]  ;;  %5864 = vst [vmem:[#allocation2 + $0x41] sm:$0xff] %v5832_v14  ;;  %5865 = vst [vmem:[#allocation2 + $0x49] sm:$0x7f] %v5833_v12  ;;  %v5489_v57 = vadd.f32 %v5459_v34, %v4180_v24  ;;  %v8935_v31 = vpop.f32.mrb[194].mxu0 }
 0x325   : > { %v5370_v17 = vadd.f32 %v5340_v7, %v5310_v48  ;;  %v5648_v40 = vsel %vm2313_vm0, %v5646_v11, %v5647_v19  ;;  %5401 = vst [vmem:[#allocation2 + $0x91] sm:$0xff] %v5371_v41  ;;  %5160 = vst [vmem:[#allocation4 + $0x4c8] sm:$0xff] %v4192_v38  ;;  %v8937_v52 = vpop.f32.mrb[163].mxu1  ;;  %v4387_v54 = vpop.f32.mrb[195].mxu0  ;;  %v5342_v24 = vld [vmem:[#allocation2 + $0x99] sm:$0x7f] }
 0x326   : > { %v5458_v50 = vld [vmem:[#allocation2 + $0x78] sm:$0xff]  ;;  %v5714_v47 = vadd.f32 %v5648_v40, %v5489_v57  ;;  %5163 = vst [vmem:[#allocation4 + $0x4e0] sm:$0xff] %v4387_v54  ;;  %7156 = vmatmul.mubr.bf16.gmra.mrb[12].mxu1 %v8658_v9  ;;  %v5650_v51 = vrot.slane %v8935_v31, 1  ;;  %v5773_v14 = vld [vmem:[#allocation4 + $0x3c0] sm:$0x7f] }
 0x327   : > { %v5488_v16 = vadd.f32 %v5458_v50, %v8905_v32  ;;  %5400 = vst [vmem:[#allocation2 + $0x89] sm:$0x7f] %v5370_v17  ;;  %7159 = vmatprep.mubr.bf16.mxu1 %v8672_v8  ;;  %v5344_v11 = vld [vmem:[#allocation2 + $0xa9] sm:$0x7f] }
 0x328   : > { %v5576_v63 = vld [vmem:[#allocation2 + $0x68] sm:$0x7f]  ;;  %5744 = vst [vmem:[#allocation2 + $0x80] sm:$0xff] %v5714_v47 }
 0x329   : > { %v5711_v10 = vadd.f32 %v5641_v62, %v5576_v63  ;;  %5518 = vst [vmem:[#allocation2 + $0x78] sm:$0xff] %v5488_v16  ;;  %v5802_v49 = vld [vmem:[#allocation2 + $0x51] sm:$0xff]  ;;  %v5803_v36 = vld [vmem:[#allocation2 + $0x59] sm:$0x7f]  ;;  %v4198_v29 = vpop.f32.mrb[164].mxu1  ;;  %v4391_v32 = vpop.f32.mrb[196].mxu0 }
 0x32a   : > { %v5834_v3 = vadd.f32 %v5802_v49, %v8882_v4  ;;  %v5835_v20 = vadd.f32 %v5803_v36, %v5771_v43  ;;  %v5551_v9 = vld [vmem:[#allocation4 + $0x490] sm:$0xfe]  ;;  %v5373_v8 = vadd.f32 %v5343_v42, %v4198_v29  ;;  %5171 = vst [vmem:[#allocation4 + $0x520] sm:$0xff] %v4391_v32  ;;  %v4200_v59 = vpop.f32.mrb[165].mxu1  ;;  %v8946_v45 = vpop.f32.mrb[197].mxu0  ;;  %v5347_v36 = vld [vmem:[#allocation2 + $0xc1] sm:$0xff] }
 0x32b   : > { %5741 = vst [vmem:[#allocation2 + $0x68] sm:$0x7f] %v5711_v10  ;;  %v5649_v35 = vrot.slane %v5551_v9, 1  ;;  %v4202_v46 = vpop.f32.mrb[166].mxu1  ;;  %v8948_v37 = vpop.f32.mrb[198].mxu0 }
 0x32c   : > { %v5461_v62 = vld [vmem:[#allocation2 + $0x90] sm:$0xff]  ;;  %v5312_v33 = vld [vmem:[#allocation4 + $0x4c8] sm:$0x7f]  ;;  %5866 = vst [vmem:[#allocation2 + $0x51] sm:$0xff] %v5834_v3  ;;  %5867 = vst [vmem:[#allocation2 + $0x59] sm:$0x7f] %v5835_v20 }
 0x32d   : > { %v5491_v61 = vadd.f32 %v5461_v62, %v4190_v30  ;;  %v5372_v4 = vadd.f32 %v5342_v24, %v5312_v33  ;;  %5403 = vst [vmem:[#allocation2 + $0xa1] sm:$0xff] %v5373_v8  ;;  %5178 = vst [vmem:[#allocation4 + $0x558] sm:$0xff] %v4202_v46  ;;  %v8950_v28 = vpop.f32.mrb[167].mxu1  ;;  %v4397_v15 = vpop.f32.mrb[199].mxu0  ;;  %v5651_v7 = vsel %vm2313_vm0, %v5649_v35, %v5650_v51  ;;  %v5653_v41 = vrot.slane %v8948_v37, 1 }
 0x32e   : > { %v5460_v18 = vld [vmem:[#allocation2 + $0x88] sm:$0xff]  ;;  %5181 = vst [vmem:[#allocation4 + $0x570] sm:$0xff] %v4397_v15  ;;  %7160 = vmatmul.mubr.bf16.gmra.mrb[16].mxu1 %v8683_v55  ;;  %v5775_v29 = vld [vmem:[#allocation4 + $0x450] sm:$0x7f]  ;;  %v5346_v3 = vld [vmem:[#allocation2 + $0xb9] sm:$0x7f] }
 0x32f   : > { %v5490_v56 = vadd.f32 %v5460_v18, %v8918_v26  ;;  %5402 = vst [vmem:[#allocation2 + $0x99] sm:$0x7f] %v5372_v4  ;;  %v5716_v44 = vadd.f32 %v5651_v7, %v5491_v61  ;;  %7163 = vmatprep.mubr.bf16.mxu1 %v8694_v21 }
 0x330   : > { %v5578_v27 = vld [vmem:[#allocation2 + $0x78] sm:$0x7f] }
 0x331   : > { %v5713_v12 = vadd.f32 %v5644_v60, %v5578_v27  ;;  %5520 = vst [vmem:[#allocation2 + $0x88] sm:$0xff] %v5490_v56  ;;  %5746 = vst [vmem:[#allocation2 + $0x90] sm:$0xff] %v5716_v44  ;;  %v5553_v26 = vld [vmem:[#allocation4 + $0x520] sm:$0xfe]  ;;  %v4208_v34 = vpop.f32.mrb[168].mxu1  ;;  %v4401_v57 = vpop.f32.mrb[200].mxu0 }
 0x332   : > { %v5804_v1 = vld [vmem:[#allocation2 + $0x61] sm:$0xff]  ;;  %v5805_v30 = vld [vmem:[#allocation2 + $0x69] sm:$0x7f]  ;;  %v5652_v38 = vrot.slane %v5553_v26, 1  ;;  %v5375_v21 = vadd.f32 %v5345_v25, %v4208_v34  ;;  %v4210_v17 = vpop.f32.mrb[169].mxu1  ;;  %5189 = vst [vmem:[#allocation4 + $0x5b0] sm:$0xff] %v4401_v57 }
 0x333   : > { %v5836_v48 = vadd.f32 %v5804_v1, %v8898_v23  ;;  %v5837_v55 = vadd.f32 %v5805_v30, %v5773_v14  ;;  %5743 = vst [vmem:[#allocation2 + $0x78] sm:$0x7f] %v5713_v12  ;;  %v8962_v60 = vpop.f32.mrb[201].mxu0  ;;  %v4212_v50 = vpop.f32.mrb[170].mxu1  ;;  %v5777_v1 = vld [vmem:[#allocation4 + $0x4e0] sm:$0x7f] }
 0x334   : > { %v5463_v40 = vld [vmem:[#allocation2 + $0xa0] sm:$0xff]  ;;  %v5314_v5 = vld [vmem:[#allocation4 + $0x558] sm:$0x7f]  ;;  %v5654_v23 = vsel %vm2313_vm0, %v5652_v38, %v5653_v41  ;;  %5405 = vst [vmem:[#allocation2 + $0xb1] sm:$0xff] %v5375_v21  ;;  %5196 = vst [vmem:[#allocation4 + $0x5e8] sm:$0xff] %v4212_v50  ;;  %v8967_v47 = vpop.f32.mrb[202].mxu0 }
 0x335   : > { %5868 = vst [vmem:[#allocation2 + $0x61] sm:$0xff] %v5836_v48  ;;  %5869 = vst [vmem:[#allocation2 + $0x69] sm:$0x7f] %v5837_v55  ;;  %v5493_v54 = vadd.f32 %v5463_v40, %v4200_v59  ;;  %v5374_v16 = vadd.f32 %v5344_v11, %v5314_v5  ;;  %v8969_v63 = vpop.f32.mrb[171].mxu1  ;;  %v4407_v43 = vpop.f32.mrb[203].mxu0  ;;  %v5656_v62 = vrot.slane %v8967_v47, 1 }
 0x336   : > { %v5462_v42 = vld [vmem:[#allocation2 + $0x98] sm:$0xff]  ;;  %5199 = vst [vmem:[#allocation4 + $0x600] sm:$0xff] %v4407_v43  ;;  %7164 = vmatmul.mubr.bf16.gmra.mrb[20].mxu1 %v8704_v39  ;;  %v5348_v26 = vld [vmem:[#allocation2 + $0xc9] sm:$0x7f] }
 0x337   : > { %v5492_v10 = vadd.f32 %v5462_v42, %v8937_v52  ;;  %5404 = vst [vmem:[#allocation2 + $0xa9] sm:$0x7f] %v5374_v16  ;;  %v5718_v24 = vadd.f32 %v5654_v23, %v5493_v54  ;;  %7167 = vmatprep.mubr.bf16.mxu1 %v8715_v0  ;;  %v5349_v11 = vld [vmem:[#allocation2 + $0xd1] sm:$0xff] }
 0x338   : > { %v5580_v49 = vld [vmem:[#allocation2 + $0x88] sm:$0x7f] }
 0x339   : > { %v5715_v32 = vadd.f32 %v5647_v19, %v5580_v49  ;;  %5522 = vst [vmem:[#allocation2 + $0x98] sm:$0xff] %v5492_v10  ;;  %5748 = vst [vmem:[#allocation2 + $0xa0] sm:$0xff] %v5718_v24  ;;  %v4218_v8 = vpop.f32.mrb[172].mxu1  ;;  %v4411_v52 = vpop.f32.mrb[204].mxu0  ;;  %v5555_v39 = vld [vmem:[#allocation4 + $0x5b0] sm:$0xfe] }
 0x33a   : > { %v5806_v20 = vld [vmem:[#allocation2 + $0x71] sm:$0xff]  ;;  %v5807_v9 = vld [vmem:[#allocation2 + $0x79] sm:$0x7f]  ;;  %v5377_v0 = vadd.f32 %v5347_v36, %v4218_v8  ;;  %5207 = vst [vmem:[#allocation4 + $0x640] sm:$0xff] %v4411_v52  ;;  %v4220_v33 = vpop.f32.mrb[173].mxu1  ;;  %v8978_v46 = vpop.f32.mrb[205].mxu0 }
 0x33b   : > { %v5838_v59 = vadd.f32 %v5806_v20, %v8914_v53  ;;  %v5839_v35 = vadd.f32 %v5807_v9, %v5775_v29  ;;  %5745 = vst [vmem:[#allocation2 + $0x88] sm:$0x7f] %v5715_v32  ;;  %v5655_v2 = vrot.slane %v5555_v39, 1  ;;  %v5465_v19 = vld [vmem:[#allocation2 + $0xb0] sm:$0xff]  ;;  %v5316_v61 = vld [vmem:[#allocation4 + $0x5e8] sm:$0x7f] }
 0x33c   : > { %v4222_v4 = vpop.f32.mrb[174].mxu1  ;;  %v8980_v15 = vpop.f32.mrb[206].mxu0  ;;  %v5495_v18 = vadd.f32 %v5465_v19, %v4210_v17  ;;  %v5376_v53 = vadd.f32 %v5346_v3, %v5316_v61  ;;  %5407 = vst [vmem:[#allocation2 + $0xc1] sm:$0xff] %v5377_v0  ;;  %v5351_v29 = vld [vmem:[#allocation2 + $0xe1] sm:$0xff]  ;;  %v5779_v32 = vld [vmem:[#allocation4 + $0x570] sm:$0x7f] }
 0x33d   : > { %5870 = vst [vmem:[#allocation2 + $0x71] sm:$0xff] %v5838_v59  ;;  %5871 = vst [vmem:[#allocation2 + $0x79] sm:$0x7f] %v5839_v35  ;;  %v8982_v7 = vpop.f32.mrb[175].mxu1  ;;  %v4417_v56 = vpop.f32.mrb[207].mxu0  ;;  %v5657_v27 = vsel %vm2313_vm0, %v5655_v2, %v5656_v62  ;;  %v5659_v34 = vrot.slane %v8980_v15, 1 }
 0x33e   : > { %5214 = vst [vmem:[#allocation4 + $0x678] sm:$0xff] %v4222_v4  ;;  %v5464_v44 = vld [vmem:[#allocation2 + $0xa8] sm:$0xff]  ;;  %5217 = vst [vmem:[#allocation4 + $0x690] sm:$0xff] %v4417_v56  ;;  %v5720_v14 = vadd.f32 %v5657_v27, %v5495_v18  ;;  %7168 = vmatmul.mubr.bf16.gmra.mrb[24].mxu1 %v8726_v13  ;;  %v5350_v20 = vld [vmem:[#allocation2 + $0xd9] sm:$0x7f] }
 0x33f   : > { %v5494_v25 = vadd.f32 %v5464_v44, %v8950_v28  ;;  %5406 = vst [vmem:[#allocation2 + $0xb9] sm:$0x7f] %v5376_v53  ;;  %7171 = vmatprep.mubr.bf16.mxu1 %v8734_v6 }
 0x340   : > { %v5582_v12 = vld [vmem:[#allocation2 + $0x98] sm:$0x7f]  ;;  %5750 = vst [vmem:[#allocation2 + $0xb0] sm:$0xff] %v5720_v14 }
 0x341   : > { %v5717_v30 = vadd.f32 %v5650_v51, %v5582_v12  ;;  %5524 = vst [vmem:[#allocation2 + $0xa8] sm:$0xff] %v5494_v25  ;;  %v5557_v28 = vld [vmem:[#allocation4 + $0x640] sm:$0xfe]  ;;  %v4228_v38 = vpop.f32.mrb[176].mxu1  ;;  %v4421_v17 = vpop.f32.mrb[208].mxu0 }
 0x342   : > { %v5808_v48 = vld [vmem:[#allocation2 + $0x81] sm:$0xff]  ;;  %v5809_v55 = vld [vmem:[#allocation2 + $0x89] sm:$0x7f]  ;;  %v5658_v57 = vrot.slane %v5557_v28, 1  ;;  %v5379_v6 = vadd.f32 %v5349_v11, %v4228_v38  ;;  %v4230_v40 = vpop.f32.mrb[177].mxu1  ;;  %5225 = vst [vmem:[#allocation4 + $0x6d0] sm:$0xff] %v4421_v17 }
 0x343   : > { %v5840_v21 = vadd.f32 %v5808_v48, %v8930_v22  ;;  %v5841_v13 = vadd.f32 %v5809_v55, %v5777_v1  ;;  %5747 = vst [vmem:[#allocation2 + $0x98] sm:$0x7f] %v5717_v30  ;;  %v5467_v5 = vld [vmem:[#allocation2 + $0xc0] sm:$0xff]  ;;  %v8994_v51 = vpop.f32.mrb[209].mxu0  ;;  %v4232_v50 = vpop.f32.mrb[178].mxu1  ;;  %v5353_v11 = vld [vmem:[#allocation2 + $0xf1] sm:$0xff] }
 0x344   : > { %v5497_v54 = vadd.f32 %v5467_v5, %v4220_v33  ;;  %v5660_v22 = vsel %vm2313_vm0, %v5658_v57, %v5659_v34  ;;  %5409 = vst [vmem:[#allocation2 + $0xd1] sm:$0xff] %v5379_v6  ;;  %5232 = vst [vmem:[#allocation4 + $0x708] sm:$0xff] %v4232_v50  ;;  %v8999_v23 = vpop.f32.mrb[210].mxu0  ;;  %v9001_v42 = vpop.f32.mrb[179].mxu1  ;;  %v5781_v1 = vld [vmem:[#allocation4 + $0x600] sm:$0x7f] }
 0x345   : > { %v5318_v31 = vld [vmem:[#allocation4 + $0x678] sm:$0x7f]  ;;  %5872 = vst [vmem:[#allocation2 + $0x81] sm:$0xff] %v5840_v21  ;;  %5873 = vst [vmem:[#allocation2 + $0x89] sm:$0x7f] %v5841_v13  ;;  %v4427_v10 = vpop.f32.mrb[211].mxu0 }
 0x346   : > { %v5378_v16 = vadd.f32 %v5348_v26, %v5318_v31  ;;  %v5466_v43 = vld [vmem:[#allocation2 + $0xb8] sm:$0xff]  ;;  %v5722_v49 = vadd.f32 %v5660_v22, %v5497_v54  ;;  %5235 = vst [vmem:[#allocation4 + $0x720] sm:$0xff] %v4427_v10  ;;  %7172 = vmatmul.mubr.bf16.gmra.mrb[28].mxu1 %v8419_v58  ;;  %v5662_v58 = vrot.slane %v8999_v23, 1  ;;  %v5352_v26 = vld [vmem:[#allocation2 + $0xe9] sm:$0x7f] }
 0x347   : > { %v5496_v24 = vadd.f32 %v5466_v43, %v8969_v63 }
 0x348   : > { %5408 = vst [vmem:[#allocation2 + $0xc9] sm:$0x7f] %v5378_v16  ;;  %v5584_v36 = vld [vmem:[#allocation2 + $0xa8] sm:$0x7f]  ;;  %5752 = vst [vmem:[#allocation2 + $0xc0] sm:$0xff] %v5722_v49 }
 0x349   : > { %v5719_v3 = vadd.f32 %v5653_v41, %v5584_v36  ;;  %5526 = vst [vmem:[#allocation2 + $0xb8] sm:$0xff] %v5496_v24  ;;  %v4238_v52 = vpop.f32.mrb[180].mxu1  ;;  %v4431_v59 = vpop.f32.mrb[212].mxu0  ;;  %v5559_v39 = vld [vmem:[#allocation4 + $0x6d0] sm:$0xfe] }
 0x34a   : > { %v5810_v9 = vld [vmem:[#allocation2 + $0x91] sm:$0xff]  ;;  %v5811_v8 = vld [vmem:[#allocation2 + $0x99] sm:$0x7f]  ;;  %v5381_v0 = vadd.f32 %v5351_v29, %v4238_v52  ;;  %5243 = vst [vmem:[#allocation4 + $0x760] sm:$0xff] %v4431_v59  ;;  %v4240_v33 = vpop.f32.mrb[181].mxu1  ;;  %v9009_v2 = vpop.f32.mrb[213].mxu0 }
 0x34b   : > { %v5842_v63 = vadd.f32 %v5810_v9, %v8946_v45  ;;  %v5843_v35 = vadd.f32 %v5811_v8, %v5779_v32  ;;  %5749 = vst [vmem:[#allocation2 + $0xa8] sm:$0x7f] %v5719_v3  ;;  %v5661_v37 = vrot.slane %v5559_v39, 1  ;;  %v5469_v41 = vld [vmem:[#allocation2 + $0xd0] sm:$0xff]  ;;  %v5320_v19 = vld [vmem:[#allocation4 + $0x708] sm:$0x7f] }
 0x34c   : > { %v4242_v61 = vpop.f32.mrb[182].mxu1  ;;  %v9011_v4 = vpop.f32.mrb[214].mxu0  ;;  %v5499_v18 = vadd.f32 %v5469_v41, %v4230_v40  ;;  %v5380_v45 = vadd.f32 %v5350_v20, %v5320_v19  ;;  %5411 = vst [vmem:[#allocation2 + $0xe1] sm:$0xff] %v5381_v0  ;;  %v5783_v29 = vld [vmem:[#allocation4 + $0x690] sm:$0x7f] }
 0x34d   : > { %5874 = vst [vmem:[#allocation2 + $0x91] sm:$0xff] %v5842_v63  ;;  %5875 = vst [vmem:[#allocation2 + $0x99] sm:$0x7f] %v5843_v35  ;;  %v9013_v53 = vpop.f32.mrb[183].mxu1  ;;  %v4437_v56 = vpop.f32.mrb[215].mxu0  ;;  %v5663_v27 = vsel %vm2313_vm0, %v5661_v37, %v5662_v58  ;;  %v5665_v48 = vrot.slane %v9011_v4, 1 }
 0x34e   : > { %5250 = vst [vmem:[#allocation4 + $0x798] sm:$0xff] %v4242_v61  ;;  %5253 = vst [vmem:[#allocation4 + $0x7b0] sm:$0xff] %v4437_v56  ;;  %v5724_v14 = vadd.f32 %v5663_v27, %v5499_v18  ;;  %v5354_v3 = vld [vmem:[#allocation2 + $0xf9] sm:$0x7f] }
 0x34f   : > { %v5468_v44 = vld [vmem:[#allocation2 + $0xc8] sm:$0xff]  ;;  %5410 = vst [vmem:[#allocation2 + $0xd9] sm:$0x7f] %v5380_v45 }
 0x350   : > { %v5498_v25 = vadd.f32 %v5468_v44, %v8982_v7  ;;  %v5586_v12 = vld [vmem:[#allocation2 + $0xb8] sm:$0x7f]  ;;  %5754 = vst [vmem:[#allocation2 + $0xd0] sm:$0xff] %v5724_v14  ;;  %v5785_v14 = vld [vmem:[#allocation4 + $0x720] sm:$0x7f] }
 0x351   : > { %v5721_v30 = vadd.f32 %v5656_v62, %v5586_v12  ;;  %v5561_v38 = vld [vmem:[#allocation4 + $0x760] sm:$0xfe]  ;;  %v4248_v21 = vpop.f32.mrb[184].mxu1  ;;  %v4441_v17 = vpop.f32.mrb[216].mxu0 }
 0x352   : > { %5528 = vst [vmem:[#allocation2 + $0xc8] sm:$0xff] %v5498_v25  ;;  %v5812_v55 = vld [vmem:[#allocation2 + $0xa1] sm:$0xff]  ;;  %v5813_v28 = vld [vmem:[#allocation2 + $0xa9] sm:$0x7f]  ;;  %v5664_v57 = vrot.slane %v5561_v38, 1  ;;  %v5383_v6 = vadd.f32 %v5353_v11, %v4248_v21  ;;  %v4250_v40 = vpop.f32.mrb[185].mxu1 }
 0x353   : > { %v5844_v13 = vadd.f32 %v5812_v55, %v8962_v60  ;;  %v5845_v7 = vadd.f32 %v5813_v28, %v5781_v1  ;;  %5751 = vst [vmem:[#allocation2 + $0xb8] sm:$0x7f] %v5721_v30  ;;  %v5471_v5 = vld [vmem:[#allocation2 + $0xe0] sm:$0xff]  ;;  %5261 = vst [vmem:[#allocation4 + $0x7f0] sm:$0xff] %v4441_v17  ;;  %v9023_v62 = vpop.f32.mrb[217].mxu0  ;;  %v4252_v31 = vpop.f32.mrb[186].mxu1 }
 0x354   : > { %v5501_v50 = vadd.f32 %v5471_v5, %v4240_v33  ;;  %v5666_v60 = vsel %vm2313_vm0, %v5664_v57, %v5665_v48  ;;  %5413 = vst [vmem:[#allocation2 + $0xf1] sm:$0xff] %v5383_v6  ;;  %5268 = vst [vmem:[#allocation4 + $0x828] sm:$0xff] %v4252_v31  ;;  %v9028_v16 = vpop.f32.mrb[218].mxu0  ;;  %v9030_v22 = vpop.f32.mrb[187].mxu1 }
 0x355   : > { %v5322_v47 = vld [vmem:[#allocation4 + $0x798] sm:$0x7f]  ;;  %5876 = vst [vmem:[#allocation2 + $0xa1] sm:$0xff] %v5844_v13  ;;  %5877 = vst [vmem:[#allocation2 + $0xa9] sm:$0x7f] %v5845_v7  ;;  %v4447_v10 = vpop.f32.mrb[219].mxu0 }
 0x356   : > { %v5382_v54 = vadd.f32 %v5352_v26, %v5322_v47  ;;  %v5470_v43 = vld [vmem:[#allocation2 + $0xd8] sm:$0xff]  ;;  %v5726_v49 = vadd.f32 %v5666_v60, %v5501_v50  ;;  %5271 = vst [vmem:[#allocation4 + $0x840] sm:$0xff] %v4447_v10  ;;  %v5668_v35 = vrot.slane %v9028_v16, 1  ;;  %v5921_v13 = vld [vmem:[#allocation2 + $0x8] sm:$0xff]  ;;  %v5787_v5 = vld [vmem:[#allocation4 + $0x7b0] sm:$0x7f] }
 0x357   : > { %v5500_v24 = vadd.f32 %v5470_v43, %v9001_v42 }
 0x358   : > { %5412 = vst [vmem:[#allocation2 + $0xe9] sm:$0x7f] %v5382_v54  ;;  %5756 = vst [vmem:[#allocation2 + $0xe0] sm:$0xff] %v5726_v49 }
 0x359   : > { %v5588_v36 = vld [vmem:[#allocation2 + $0xc8] sm:$0x7f]  ;;  %5530 = vst [vmem:[#allocation2 + $0xd8] sm:$0xff] %v5500_v24  ;;  %v4258_v8 = vpop.f32.mrb[188].mxu1  ;;  %v4451_v52 = vpop.f32.mrb[220].mxu0 }
 0x35a   : > { %v5723_v32 = vadd.f32 %v5659_v34, %v5588_v36  ;;  %v5814_v20 = vld [vmem:[#allocation2 + $0xb1] sm:$0xff]  ;;  %v5815_v9 = vld [vmem:[#allocation2 + $0xb9] sm:$0x7f]  ;;  %v4260_v39 = vpop.f32.mrb[189].mxu1  ;;  %v9037_v0 = vpop.f32.mrb[221].mxu0 }
 0x35b   : > { %v5846_v59 = vadd.f32 %v5814_v20, %v8978_v46  ;;  %v5847_v63 = vadd.f32 %v5815_v9, %v5783_v29  ;;  %v5563_v42 = vld [vmem:[#allocation4 + $0x7f0] sm:$0xfe]  ;;  %v5324_v34 = vld [vmem:[#allocation4 + $0x828] sm:$0x7f]  ;;  %v4262_v37 = vpop.f32.mrb[190].mxu1  ;;  %v4455_v41 = vpop.f32.mrb[222].mxu0 }
 0x35c   : > { %5753 = vst [vmem:[#allocation2 + $0xc8] sm:$0x7f] %v5723_v32  ;;  %v5667_v33 = vrot.slane %v5563_v42, 1  ;;  %v5473_v15 = vld [vmem:[#allocation2 + $0xf0] sm:$0xff]  ;;  %v5384_v61 = vadd.f32 %v5354_v3, %v5324_v34  ;;  %v4264_v18 = vpop.f32.mrb[191].mxu1  ;;  %v4457_v45 = vpop.f32.mrb[223].mxu0 }
 0x35d   : > { %5878 = vst [vmem:[#allocation2 + $0xb1] sm:$0xff] %v5846_v59  ;;  %5879 = vst [vmem:[#allocation2 + $0xb9] sm:$0x7f] %v5847_v63  ;;  %v5503_v19 = vadd.f32 %v5473_v15, %v4250_v40  ;;  %v5789_v39 = vld [vmem:[#allocation4 + $0x840] sm:$0x7f] }
 0x35e   : > { %v5669_v56 = vsel %vm2313_vm0, %v5667_v33, %v5668_v35  ;;  %5289 = vst [vmem:[#allocation4 + $0x8d0] sm:$0xff] %v4457_v45  ;;  %5414 = vst [vmem:[#allocation2 + $0xf9] sm:$0x7f] %v5384_v61 }
 0x35f   : > { %v5472_v46 = vld [vmem:[#allocation2 + $0xe8] sm:$0xff]  ;;  %v5728_v27 = vadd.f32 %v5669_v56, %v5503_v19  ;;  %v5922_v56 = vld [vmem:[#allocation2 + $0x10] sm:$0xff] }
 0x360   : > { %v5502_v44 = vadd.f32 %v5472_v46, %v9013_v53  ;;  %v5590_v25 = vld [vmem:[#allocation2 + $0xd8] sm:$0x7f] }
 0x361   : > { %v5725_v12 = vadd.f32 %v5662_v58, %v5590_v25  ;;  %5758 = vst [vmem:[#allocation2 + $0xf0] sm:$0xff] %v5728_v27  ;;  %v4494_v30 = vpop.f32.mrb[192].mxu1  ;;  %v4687_v26 = vpop.f32.mrb[224].mxu0 }
 0x362   : > { %5532 = vst [vmem:[#allocation2 + $0xe8] sm:$0xff] %v5502_v44  ;;  %v4496_v38 = vpop.f32.mrb[193].mxu1  ;;  %v4689_v21 = vpop.f32.mrb[225].mxu0 }
 0x363   : > { %v5816_v11 = vld [vmem:[#allocation2 + $0xc1] sm:$0xff]  ;;  %v5817_v1 = vld [vmem:[#allocation2 + $0xc9] sm:$0x7f]  ;;  %5755 = vst [vmem:[#allocation2 + $0xd8] sm:$0x7f] %v5725_v12  ;;  %5012 = vst [vmem:[#allocation4 + $0x28] sm:$0xff] %v4496_v38 }
 0x364   : > { %v5848_v55 = vadd.f32 %v5816_v11, %v8994_v51  ;;  %v5849_v28 = vadd.f32 %v5817_v1, %v5785_v14  ;;  %v4498_v53 = vpop.f32.mrb[194].mxu1  ;;  %v4691_v7 = vpop.f32.mrb[226].mxu0 }
 0x365   : > { %v5953_v23 = vadd.f32 %v5921_v13, %v4498_v53  ;;  %v4500_v58 = vpop.f32.mrb[195].mxu1  ;;  %v4693_v57 = vpop.f32.mrb[227].mxu0  ;;  %v5474_v6 = vld [vmem:[#allocation2 + $0xf8] sm:$0xff]  ;;  %v5791_v53 = vld [vmem:[#allocation4 + $0x8d0] sm:$0x7f] }
 0x366   : > { %5880 = vst [vmem:[#allocation2 + $0xc1] sm:$0xff] %v5848_v55  ;;  %5881 = vst [vmem:[#allocation2 + $0xc9] sm:$0x7f] %v5849_v28  ;;  %v5504_v17 = vadd.f32 %v5474_v6, %v9030_v22  ;;  %v5920_v22 = vld [vmem:[#allocation2] sm:$0xff]  ;;  %v6113_v29 = vrot.slane %v4500_v58, 1 }
 0x367   : > { %5985 = vst [vmem:[#allocation2 + $0x8] sm:$0xff] %v5953_v23  ;;  %v5952_v3 = vadd.f32 %v5920_v22, %v4494_v30 }
 0x368   : > { %5534 = vst [vmem:[#allocation2 + $0xf8] sm:$0xff] %v5504_v17 }
 0x369   : > { %v5592_v40 = vld [vmem:[#allocation2 + $0xe8] sm:$0x7f]  ;;  %v4504_v50 = vpop.f32.mrb[196].mxu1  ;;  %v9049_v54 = vpop.f32.mrb[228].mxu0 }
 0x36a   : > { %v5727_v51 = vadd.f32 %v5665_v48, %v5592_v40  ;;  %v5818_v47 = vld [vmem:[#allocation2 + $0xd1] sm:$0xff]  ;;  %v5819_v31 = vld [vmem:[#allocation2 + $0xd9] sm:$0x7f]  ;;  %v6016_v10 = vld [vmem:[#allocation4 + $0x28] sm:$0xfe]  ;;  %v4506_v24 = vpop.f32.mrb[197].mxu1  ;;  %v5954_v14 = vadd.f32 %v5922_v56, %v4504_v50 }
 0x36b   : > { %v5850_v60 = vadd.f32 %v5818_v47, %v9009_v2  ;;  %v5851_v43 = vadd.f32 %v5819_v31, %v5787_v5  ;;  %v9052_v49 = vpop.f32.mrb[229].mxu0  ;;  %v6112_v36 = vrot.slane %v6016_v10, 1  ;;  %5030 = vst [vmem:[#allocation4 + $0xb8] sm:$0xff] %v4506_v24  ;;  %v4508_v4 = vpop.f32.mrb[198].mxu1  ;;  %v5923_v48 = vld [vmem:[#allocation2 + $0x18] sm:$0xff]  ;;  %v5924_v31 = vld [vmem:[#allocation2 + $0x20] sm:$0xff] }
 0x36c   : > { %5757 = vst [vmem:[#allocation2 + $0xe8] sm:$0x7f] %v5727_v51  ;;  %v4701_v32 = vpop.f32.mrb[230].mxu0  ;;  %v5955_v20 = vadd.f32 %v5923_v48, %v4508_v4  ;;  %v4510_v9 = vpop.f32.mrb[199].mxu1  ;;  %v5929_v56 = vld [vmem:[#allocation2 + $0x48] sm:$0xff] }
 0x36d   : > { %5882 = vst [vmem:[#allocation2 + $0xd1] sm:$0xff] %v5850_v60  ;;  %5883 = vst [vmem:[#allocation2 + $0xd9] sm:$0x7f] %v5851_v43  ;;  %v9054_v2 = vpop.f32.mrb[231].mxu0  ;;  %v6114_v52 = vsel %vm2313_vm0, %v6112_v36, %v6113_v29  ;;  %v6116_v27 = vrot.slane %v4510_v9, 1  ;;  %v5927_v43 = vld [vmem:[#allocation2 + $0x38] sm:$0xff] }
 0x36e   : > { %5040 = vst [vmem:[#allocation4 + $0x108] sm:$0xff] %v4701_v32  ;;  %v6049_v8 = vld [vmem:[#allocation2 + $0x8] sm:$0x7f]  ;;  %v6192_v59 = vadd.f32 %v6114_v52, %v5952_v3  ;;  %5987 = vst [vmem:[#allocation2 + $0x18] sm:$0xff] %v5955_v20 }
 0x36f   : > { %v6193_v63 = vadd.f32 %v6113_v29, %v6049_v8  ;;  %v5594_v42 = vld [vmem:[#allocation2 + $0xf8] sm:$0x7f] }
 0x370   : > { %v5729_v33 = vadd.f32 %v5668_v35, %v5594_v42  ;;  %6224 = vst [vmem:[#allocation2] sm:$0xff] %v6192_v59  ;;  %v5925_v35 = vld [vmem:[#allocation2 + $0x28] sm:$0xff] }
 0x371   : > { %6225 = vst [vmem:[#allocation2 + $0x8] sm:$0x7f] %v6193_v63  ;;  %v4514_v37 = vpop.f32.mrb[200].mxu1  ;;  %v9059_v41 = vpop.f32.mrb[232].mxu0 }
 0x372   : > { %5759 = vst [vmem:[#allocation2 + $0xf8] sm:$0x7f] %v5729_v33  ;;  %v6018_v18 = vld [vmem:[#allocation4 + $0xb8] sm:$0xfe]  ;;  %v4516_v45 = vpop.f32.mrb[201].mxu1  ;;  %v9062_v46 = vpop.f32.mrb[233].mxu0  ;;  %v5956_v24 = vadd.f32 %v5924_v31, %v4514_v37 }
 0x373   : > { %v5820_v15 = vld [vmem:[#allocation2 + $0xe1] sm:$0xff]  ;;  %v5821_v34 = vld [vmem:[#allocation2 + $0xe9] sm:$0x7f]  ;;  %v6115_v44 = vrot.slane %v6018_v18, 1  ;;  %5048 = vst [vmem:[#allocation4 + $0x148] sm:$0xff] %v4516_v45  ;;  %5050 = vst [vmem:[#allocation4 + $0x158] sm:$0xff] %v9062_v46 }
 0x374   : > { %v5852_v19 = vadd.f32 %v5820_v15, %v9023_v62  ;;  %v5853_v61 = vadd.f32 %v5821_v34, %v5789_v39  ;;  %v4518_v16 = vpop.f32.mrb[202].mxu1  ;;  %v4711_v25 = vpop.f32.mrb[234].mxu0 }
 0x375   : > { %v5957_v12 = vadd.f32 %v5925_v35, %v4518_v16  ;;  %5058 = vst [vmem:[#allocation4 + $0x198] sm:$0xff] %v4711_v25  ;;  %v4520_v62 = vpop.f32.mrb[203].mxu1  ;;  %v9065_v11 = vpop.f32.mrb[235].mxu0  ;;  %v6051_v1 = vld [vmem:[#allocation2 + $0x18] sm:$0x7f]  ;;  %v6117_v30 = vsel %vm2313_vm0, %v6115_v44, %v6116_v27 }
 0x376   : > { %5884 = vst [vmem:[#allocation2 + $0xe1] sm:$0xff] %v5852_v19  ;;  %5885 = vst [vmem:[#allocation2 + $0xe9] sm:$0x7f] %v5853_v61  ;;  %v6194_v26 = vadd.f32 %v6117_v30, %v5954_v14  ;;  %v6195_v55 = vadd.f32 %v6116_v27, %v6051_v1  ;;  %v6257_v38 = vld [vmem:[#allocation4 + $0x108] sm:$0x7f]  ;;  %v5926_v61 = vld [vmem:[#allocation2 + $0x30] sm:$0xff] }
 0x377   : > { %5989 = vst [vmem:[#allocation2 + $0x28] sm:$0xff] %v5957_v12 }
 0x378   : > { %v6286_v28 = vld [vmem:[#allocation2 + $0x1] sm:$0xff]  ;;  %v6287_v21 = vld [vmem:[#allocation2 + $0x9] sm:$0x7f]  ;;  %6226 = vst [vmem:[#allocation2 + $0x10] sm:$0xff] %v6194_v26  ;;  %6227 = vst [vmem:[#allocation2 + $0x18] sm:$0x7f] %v6195_v55 }
 0x379   : > { %v6316_v13 = vadd.f32 %v6286_v28, %v9049_v54  ;;  %v6317_v7 = vadd.f32 %v6287_v21, %v6257_v38  ;;  %v5822_v23 = vld [vmem:[#allocation2 + $0xf1] sm:$0xff]  ;;  %v5823_v58 = vld [vmem:[#allocation2 + $0xf9] sm:$0x7f]  ;;  %v4524_v57 = vpop.f32.mrb[204].mxu1  ;;  %v9069_v6 = vpop.f32.mrb[236].mxu0  ;;  %v6119_v54 = vrot.slane %v4520_v62, 1 }
 0x37a   : > { %v5854_v17 = vadd.f32 %v5822_v23, %v9037_v0  ;;  %v5855_v40 = vadd.f32 %v5823_v58, %v5791_v53  ;;  %v6020_v5 = vld [vmem:[#allocation4 + $0x148] sm:$0xfe]  ;;  %v4526_v51 = vpop.f32.mrb[205].mxu1  ;;  %v9072_v47 = vpop.f32.mrb[237].mxu0 }
 0x37b   : > { %6346 = vst [vmem:[#allocation2 + $0x1] sm:$0xff] %v6316_v13  ;;  %6347 = vst [vmem:[#allocation2 + $0x9] sm:$0x7f] %v6317_v7  ;;  %v6118_v50 = vrot.slane %v6020_v5, 1  ;;  %v4528_v60 = vpop.f32.mrb[206].mxu1  ;;  %v4721_v10 = vpop.f32.mrb[238].mxu0 }
 0x37c   : > { %5066 = vst [vmem:[#allocation4 + $0x1d8] sm:$0xff] %v4526_v51  ;;  %5068 = vst [vmem:[#allocation4 + $0x1e8] sm:$0xff] %v9072_v47  ;;  %v5959_v0 = vadd.f32 %v5927_v43, %v4528_v60  ;;  %v4530_v22 = vpop.f32.mrb[207].mxu1  ;;  %v9075_v36 = vpop.f32.mrb[239].mxu0  ;;  %v6259_v20 = vld [vmem:[#allocation4 + $0x198] sm:$0x7f] }
 0x37d   : > { %5886 = vst [vmem:[#allocation2 + $0xf1] sm:$0xff] %v5854_v17  ;;  %5887 = vst [vmem:[#allocation2 + $0xf9] sm:$0x7f] %v5855_v40  ;;  %v6120_v4 = vsel %vm2313_vm0, %v6118_v50, %v6119_v54  ;;  %v6122_v18 = vrot.slane %v4530_v22, 1  ;;  %v5928_v17 = vld [vmem:[#allocation2 + $0x40] sm:$0xff]  ;;  %v5931_v51 = vld [vmem:[#allocation2 + $0x58] sm:$0xff] }
 0x37e   : > { %5076 = vst [vmem:[#allocation4 + $0x228] sm:$0xff] %v4721_v10  ;;  %v6053_v29 = vld [vmem:[#allocation2 + $0x28] sm:$0x7f]  ;;  %v6196_v48 = vadd.f32 %v6120_v4, %v5956_v24  ;;  %5991 = vst [vmem:[#allocation2 + $0x38] sm:$0xff] %v5959_v0 }
 0x37f   : > { %v6197_v32 = vadd.f32 %v6119_v54, %v6053_v29  ;;  %v6288_v3 = vld [vmem:[#allocation2 + $0x11] sm:$0xff]  ;;  %v6289_v9 = vld [vmem:[#allocation2 + $0x19] sm:$0x7f] }
 0x380   : > { %v6318_v8 = vadd.f32 %v6288_v3, %v9059_v41  ;;  %v6319_v52 = vadd.f32 %v6289_v9, %v6259_v20  ;;  %6228 = vst [vmem:[#allocation2 + $0x20] sm:$0xff] %v6196_v48 }
 0x381   : > { %6229 = vst [vmem:[#allocation2 + $0x28] sm:$0x7f] %v6197_v32  ;;  %v4534_v42 = vpop.f32.mrb[208].mxu1  ;;  %v9079_v39 = vpop.f32.mrb[240].mxu0 }
 0x382   : > { %v6406_v59 = vld [vmem:[#allocation2] sm:$0xff]  ;;  %v6407_v63 = vld [vmem:[#allocation2 + $0x8] sm:$0xff]  ;;  %6348 = vst [vmem:[#allocation2 + $0x11] sm:$0xff] %v6318_v8  ;;  %6349 = vst [vmem:[#allocation2 + $0x19] sm:$0x7f] %v6319_v52  ;;  %v4536_v37 = vpop.f32.mrb[209].mxu1 }
 0x383   : > { %v6436_v33 = vadd.f32 %v6406_v59, %v9052_v49  ;;  %v6437_v15 = vadd.f32 %v6407_v63, %v9054_v2  ;;  %v6022_v34 = vld [vmem:[#allocation4 + $0x1d8] sm:$0xfe]  ;;  %v9083_v19 = vpop.f32.mrb[241].mxu0  ;;  %5084 = vst [vmem:[#allocation4 + $0x268] sm:$0xff] %v4536_v37  ;;  %v4538_v45 = vpop.f32.mrb[210].mxu1  ;;  %v5958_v49 = vadd.f32 %v5926_v61, %v4524_v57  ;;  %v5933_v37 = vld [vmem:[#allocation2 + $0x68] sm:$0xff] }
 0x384   : > { %v6121_v41 = vrot.slane %v6022_v34, 1  ;;  %5086 = vst [vmem:[#allocation4 + $0x278] sm:$0xff] %v9083_v19  ;;  %v4731_v44 = vpop.f32.mrb[242].mxu0  ;;  %v5961_v27 = vadd.f32 %v5929_v56, %v4538_v45  ;;  %v4540_v2 = vpop.f32.mrb[211].mxu1 }
 0x385   : > { %6466 = vst [vmem:[#allocation2] sm:$0xff] %v6436_v33  ;;  %6467 = vst [vmem:[#allocation2 + $0x8] sm:$0xff] %v6437_v15  ;;  %v9086_v16 = vpop.f32.mrb[243].mxu0  ;;  %v6055_v35 = vld [vmem:[#allocation2 + $0x38] sm:$0x7f]  ;;  %v6125_v40 = vrot.slane %v4540_v2, 1 }
 0x386   : > { %5094 = vst [vmem:[#allocation4 + $0x2b8] sm:$0xff] %v4731_v44  ;;  %v6123_v25 = vsel %vm2313_vm0, %v6121_v41, %v6122_v18  ;;  %v6199_v12 = vadd.f32 %v6122_v18, %v6055_v35  ;;  %5993 = vst [vmem:[#allocation2 + $0x48] sm:$0xff] %v5961_v27  ;;  %v6261_v1 = vld [vmem:[#allocation4 + $0x228] sm:$0x7f]  ;;  %v5930_v33 = vld [vmem:[#allocation2 + $0x50] sm:$0xff] }
 0x387   : > { %v6198_v14 = vadd.f32 %v6123_v25, %v5958_v49 }
 0x388   : > { %v6290_v62 = vld [vmem:[#allocation2 + $0x21] sm:$0xff]  ;;  %v6291_v30 = vld [vmem:[#allocation2 + $0x29] sm:$0x7f]  ;;  %6231 = vst [vmem:[#allocation2 + $0x38] sm:$0x7f] %v6199_v12 }
 0x389   : > { %v6320_v26 = vadd.f32 %v6290_v62, %v9069_v6  ;;  %v6321_v55 = vadd.f32 %v6291_v30, %v6261_v1  ;;  %6230 = vst [vmem:[#allocation2 + $0x30] sm:$0xff] %v6198_v14  ;;  %v6408_v28 = vld [vmem:[#allocation2 + $0x10] sm:$0xff]  ;;  %v6409_v38 = vld [vmem:[#allocation2 + $0x18] sm:$0xff]  ;;  %v4544_v21 = vpop.f32.mrb[212].mxu1  ;;  %v9090_v53 = vpop.f32.mrb[244].mxu0 }
 0x38a   : > { %v6438_v13 = vadd.f32 %v6408_v28, %v9062_v46  ;;  %v6439_v7 = vadd.f32 %v6409_v38, %v9065_v11  ;;  %v6024_v23 = vld [vmem:[#allocation4 + $0x268] sm:$0xfe]  ;;  %v4546_v58 = vpop.f32.mrb[213].mxu1  ;;  %v9094_v57 = vpop.f32.mrb[245].mxu0  ;;  %v5960_v46 = vadd.f32 %v5928_v17, %v4534_v42 }
 0x38b   : > { %6350 = vst [vmem:[#allocation2 + $0x21] sm:$0xff] %v6320_v26  ;;  %6351 = vst [vmem:[#allocation2 + $0x29] sm:$0x7f] %v6321_v55  ;;  %v6124_v6 = vrot.slane %v6024_v23, 1  ;;  %v4548_v5 = vpop.f32.mrb[214].mxu1  ;;  %v4741_v31 = vpop.f32.mrb[246].mxu0 }
 0x38c   : > { %5102 = vst [vmem:[#allocation4 + $0x2f8] sm:$0xff] %v4546_v58  ;;  %5104 = vst [vmem:[#allocation4 + $0x308] sm:$0xff] %v9094_v57  ;;  %v5963_v50 = vadd.f32 %v5931_v51, %v4548_v5  ;;  %v4550_v11 = vpop.f32.mrb[215].mxu1  ;;  %v9097_v54 = vpop.f32.mrb[247].mxu0  ;;  %v5935_v58 = vld [vmem:[#allocation2 + $0x78] sm:$0xff] }
 0x38d   : > { %6468 = vst [vmem:[#allocation2 + $0x10] sm:$0xff] %v6438_v13  ;;  %6469 = vst [vmem:[#allocation2 + $0x18] sm:$0xff] %v6439_v7  ;;  %v6057_v60 = vld [vmem:[#allocation2 + $0x48] sm:$0x7f]  ;;  %v6126_v43 = vsel %vm2313_vm0, %v6124_v6, %v6125_v40  ;;  %v6263_v22 = vld [vmem:[#allocation4 + $0x2b8] sm:$0x7f] }
 0x38e   : > { %5112 = vst [vmem:[#allocation4 + $0x348] sm:$0xff] %v4741_v31  ;;  %v6200_v10 = vadd.f32 %v6126_v43, %v5960_v46  ;;  %v6201_v24 = vadd.f32 %v6125_v40, %v6057_v60  ;;  %5995 = vst [vmem:[#allocation2 + $0x58] sm:$0xff] %v5963_v50  ;;  %v6128_v15 = vrot.slane %v4550_v11, 1  ;;  %v5932_v13 = vld [vmem:[#allocation2 + $0x60] sm:$0xff] }
 0x38f   : > { %v6293_v29 = vld [vmem:[#allocation2 + $0x39] sm:$0x7f] }
 0x390   : > { %v6292_v0 = vld [vmem:[#allocation2 + $0x31] sm:$0xff]  ;;  %v6323_v48 = vadd.f32 %v6293_v29, %v6263_v22  ;;  %6232 = vst [vmem:[#allocation2 + $0x40] sm:$0xff] %v6200_v10  ;;  %6233 = vst [vmem:[#allocation2 + $0x48] sm:$0x7f] %v6201_v24 }
 0x391   : > { %v6322_v4 = vadd.f32 %v6292_v0, %v9079_v39  ;;  %v4554_v20 = vpop.f32.mrb[216].mxu1  ;;  %v9101_v9 = vpop.f32.mrb[248].mxu0 }
 0x392   : > { %v6410_v32 = vld [vmem:[#allocation2 + $0x20] sm:$0xff]  ;;  %v6411_v3 = vld [vmem:[#allocation2 + $0x28] sm:$0xff]  ;;  %6353 = vst [vmem:[#allocation2 + $0x39] sm:$0x7f] %v6323_v48  ;;  %v4556_v63 = vpop.f32.mrb[217].mxu1  ;;  %v9105_v42 = vpop.f32.mrb[249].mxu0 }
 0x393   : > { %v6440_v8 = vadd.f32 %v6410_v32, %v9072_v47  ;;  %v6441_v52 = vadd.f32 %v6411_v3, %v9075_v36  ;;  %6352 = vst [vmem:[#allocation2 + $0x31] sm:$0xff] %v6322_v4  ;;  %v6026_v59 = vld [vmem:[#allocation4 + $0x2f8] sm:$0xfe]  ;;  %5120 = vst [vmem:[#allocation4 + $0x388] sm:$0xff] %v4556_v63  ;;  %v4558_v34 = vpop.f32.mrb[218].mxu1  ;;  %v4751_v61 = vpop.f32.mrb[250].mxu0  ;;  %v5962_v47 = vadd.f32 %v5930_v33, %v4544_v21 }
 0x394   : > { %v6127_v39 = vrot.slane %v6026_v59, 1  ;;  %5122 = vst [vmem:[#allocation4 + $0x398] sm:$0xff] %v9105_v42  ;;  %v5965_v41 = vadd.f32 %v5933_v37, %v4558_v34  ;;  %5130 = vst [vmem:[#allocation4 + $0x3d8] sm:$0xff] %v4751_v61  ;;  %v4560_v36 = vpop.f32.mrb[219].mxu1  ;;  %v9108_v18 = vpop.f32.mrb[251].mxu0  ;;  %v5937_v63 = vld [vmem:[#allocation2 + $0x88] sm:$0xff] }
 0x395   : > { %6470 = vst [vmem:[#allocation2 + $0x20] sm:$0xff] %v6440_v8  ;;  %6471 = vst [vmem:[#allocation2 + $0x28] sm:$0xff] %v6441_v52  ;;  %v6059_v45 = vld [vmem:[#allocation2 + $0x58] sm:$0x7f]  ;;  %v6265_v2 = vld [vmem:[#allocation4 + $0x348] sm:$0x7f] }
 0x396   : > { %v6129_v56 = vsel %vm2313_vm0, %v6127_v39, %v6128_v15  ;;  %v6203_v49 = vadd.f32 %v6128_v15, %v6059_v45  ;;  %5997 = vst [vmem:[#allocation2 + $0x68] sm:$0xff] %v5965_v41  ;;  %v6131_v7 = vrot.slane %v4560_v36, 1  ;;  %v5934_v8 = vld [vmem:[#allocation2 + $0x70] sm:$0xff] }
 0x397   : > { %v6202_v44 = vadd.f32 %v6129_v56, %v5962_v47  ;;  %v6294_v27 = vld [vmem:[#allocation2 + $0x41] sm:$0xff]  ;;  %v6295_v35 = vld [vmem:[#allocation2 + $0x49] sm:$0x7f] }
 0x398   : > { %v6324_v25 = vadd.f32 %v6294_v27, %v9090_v53  ;;  %v6325_v14 = vadd.f32 %v6295_v35, %v6265_v2  ;;  %6235 = vst [vmem:[#allocation2 + $0x58] sm:$0x7f] %v6203_v49 }
 0x399   : > { %6234 = vst [vmem:[#allocation2 + $0x50] sm:$0xff] %v6202_v44  ;;  %v4564_v1 = vpop.f32.mrb[220].mxu1  ;;  %v9112_v30 = vpop.f32.mrb[252].mxu0 }
 0x39a   : > { %v6412_v12 = vld [vmem:[#allocation2 + $0x30] sm:$0xff]  ;;  %v6413_v62 = vld [vmem:[#allocation2 + $0x38] sm:$0xff]  ;;  %6354 = vst [vmem:[#allocation2 + $0x41] sm:$0xff] %v6324_v25  ;;  %6355 = vst [vmem:[#allocation2 + $0x49] sm:$0x7f] %v6325_v14  ;;  %v4566_v38 = vpop.f32.mrb[221].mxu1 }
 0x39b   : > { %v6442_v26 = vadd.f32 %v6412_v12, %v9083_v19  ;;  %v6443_v55 = vadd.f32 %v6413_v62, %v9086_v16  ;;  %v6028_v28 = vld [vmem:[#allocation4 + $0x388] sm:$0xfe]  ;;  %v9116_v21 = vpop.f32.mrb[253].mxu0  ;;  %5138 = vst [vmem:[#allocation4 + $0x418] sm:$0xff] %v4566_v38  ;;  %v4568_v23 = vpop.f32.mrb[222].mxu1  ;;  %v5964_v19 = vadd.f32 %v5932_v13, %v4554_v20  ;;  %v5939_v38 = vld [vmem:[#allocation2 + $0x98] sm:$0xff] }
 0x39c   : > { %v6130_v53 = vrot.slane %v6028_v28, 1  ;;  %5140 = vst [vmem:[#allocation4 + $0x428] sm:$0xff] %v9116_v21  ;;  %v4761_v17 = vpop.f32.mrb[254].mxu0  ;;  %v5967_v6 = vadd.f32 %v5935_v58, %v4568_v23  ;;  %v4570_v16 = vpop.f32.mrb[223].mxu1  ;;  %v6267_v11 = vld [vmem:[#allocation4 + $0x3d8] sm:$0x7f] }
 0x39d   : > { %6472 = vst [vmem:[#allocation2 + $0x30] sm:$0xff] %v6442_v26  ;;  %6473 = vst [vmem:[#allocation2 + $0x38] sm:$0xff] %v6443_v55  ;;  %v9119_v40 = vpop.f32.mrb[255].mxu0  ;;  %v6061_v5 = vld [vmem:[#allocation2 + $0x68] sm:$0x7f]  ;;  %v6134_v52 = vrot.slane %v4570_v16, 1 }
 0x39e   : > { %5148 = vst [vmem:[#allocation4 + $0x468] sm:$0xff] %v4761_v17  ;;  %v6132_v51 = vsel %vm2313_vm0, %v6130_v53, %v6131_v7  ;;  %v6205_v46 = vadd.f32 %v6131_v7, %v6061_v5  ;;  %5999 = vst [vmem:[#allocation2 + $0x78] sm:$0xff] %v5967_v6  ;;  %v5936_v26 = vld [vmem:[#allocation2 + $0x80] sm:$0xff] }
 0x39f   : > { %v6204_v31 = vadd.f32 %v6132_v51, %v5964_v19  ;;  %v6297_v60 = vld [vmem:[#allocation2 + $0x59] sm:$0x7f] }
 0x3a0   : > { %v6296_v50 = vld [vmem:[#allocation2 + $0x51] sm:$0xff]  ;;  %v6327_v10 = vadd.f32 %v6297_v60, %v6267_v11  ;;  %6237 = vst [vmem:[#allocation2 + $0x68] sm:$0x7f] %v6205_v46 }
 0x3a1   : > { %v6326_v43 = vadd.f32 %v6296_v50, %v9101_v9  ;;  %6236 = vst [vmem:[#allocation2 + $0x60] sm:$0xff] %v6204_v31  ;;  %v6414_v24 = vld [vmem:[#allocation2 + $0x40] sm:$0xff]  ;;  %v6415_v0 = vld [vmem:[#allocation2 + $0x48] sm:$0xff]  ;;  %v4574_v22 = vpop.f32.mrb[224].mxu1  ;;  %v9123_v29 = vpop.f32.mrb[0].mxu0 }
 0x3a2   : > { %v6444_v4 = vadd.f32 %v6414_v24, %v9094_v57  ;;  %v6445_v48 = vadd.f32 %v6415_v0, %v9097_v54  ;;  %6357 = vst [vmem:[#allocation2 + $0x59] sm:$0x7f] %v6327_v10  ;;  %v6030_v32 = vld [vmem:[#allocation4 + $0x418] sm:$0xfe]  ;;  %v4576_v3 = vpop.f32.mrb[225].mxu1  ;;  %v9127_v20 = vpop.f32.mrb[1].mxu0  ;;  %v5966_v57 = vadd.f32 %v5934_v8, %v4564_v1 }
 0x3a3   : > { %6356 = vst [vmem:[#allocation2 + $0x51] sm:$0xff] %v6326_v43  ;;  %v6133_v9 = vrot.slane %v6030_v32, 1  ;;  %5156 = vst [vmem:[#allocation4 + $0x4a8] sm:$0xff] %v4576_v3  ;;  %v4578_v59 = vpop.f32.mrb[226].mxu1  ;;  %v4771_v33 = vpop.f32.mrb[2].mxu0  ;;  %v5941_v3 = vld [vmem:[#allocation2 + $0xa8] sm:$0xff] }
 0x3a4   : > { %5158 = vst [vmem:[#allocation4 + $0x4b8] sm:$0xff] %v9127_v20  ;;  %6474 = vst [vmem:[#allocation2 + $0x40] sm:$0xff] %v6444_v4  ;;  %v5969_v39 = vadd.f32 %v5937_v63, %v4578_v59  ;;  %v4580_v54 = vpop.f32.mrb[227].mxu1  ;;  %v9130_v15 = vpop.f32.mrb[3].mxu0  ;;  %v5938_v4 = vld [vmem:[#allocation2 + $0x90] sm:$0xff] }
 0x3a5   : > { %6475 = vst [vmem:[#allocation2 + $0x48] sm:$0xff] %v6445_v48  ;;  %5166 = vst [vmem:[#allocation4 + $0x4f8] sm:$0xff] %v4771_v33  ;;  %v6063_v34 = vld [vmem:[#allocation2 + $0x78] sm:$0x7f]  ;;  %v6135_v37 = vsel %vm2313_vm0, %v6133_v9, %v6134_v52  ;;  %v6269_v36 = vld [vmem:[#allocation4 + $0x468] sm:$0x7f] }
 0x3a6   : > { %v6206_v61 = vadd.f32 %v6135_v37, %v5966_v57  ;;  %v6207_v47 = vadd.f32 %v6134_v52, %v6063_v34  ;;  %6001 = vst [vmem:[#allocation2 + $0x88] sm:$0xff] %v5969_v39  ;;  %v6137_v55 = vrot.slane %v4580_v54, 1 }
 0x3a7   : > { %v6299_v45 = vld [vmem:[#allocation2 + $0x69] sm:$0x7f] }
 0x3a8   : > { %v6298_v41 = vld [vmem:[#allocation2 + $0x61] sm:$0xff]  ;;  %v6329_v44 = vadd.f32 %v6299_v45, %v6269_v36  ;;  %6238 = vst [vmem:[#allocation2 + $0x70] sm:$0xff] %v6206_v61  ;;  %6239 = vst [vmem:[#allocation2 + $0x78] sm:$0x7f] %v6207_v47 }
 0x3a9   : > { %v6328_v56 = vadd.f32 %v6298_v41, %v9112_v30  ;;  %v4584_v2 = vpop.f32.mrb[228].mxu1  ;;  %v9134_v35 = vpop.f32.mrb[4].mxu0 }
 0x3aa   : > { %v6416_v49 = vld [vmem:[#allocation2 + $0x50] sm:$0xff]  ;;  %v6417_v27 = vld [vmem:[#allocation2 + $0x58] sm:$0xff]  ;;  %6359 = vst [vmem:[#allocation2 + $0x69] sm:$0x7f] %v6329_v44  ;;  %v6032_v12 = vld [vmem:[#allocation4 + $0x4a8] sm:$0xfe] }
 0x3ab   : > { %v6446_v25 = vadd.f32 %v6416_v49, %v9105_v42  ;;  %v6447_v14 = vadd.f32 %v6417_v27, %v9108_v18  ;;  %6358 = vst [vmem:[#allocation2 + $0x61] sm:$0xff] %v6328_v56  ;;  %v4586_v62 = vpop.f32.mrb[229].mxu1  ;;  %v9138_v1 = vpop.f32.mrb[5].mxu0  ;;  %v6136_v30 = vrot.slane %v6032_v12, 1  ;;  %v5968_v42 = vadd.f32 %v5936_v26, %v4574_v22 }
 0x3ac   : > { %5174 = vst [vmem:[#allocation4 + $0x538] sm:$0xff] %v4586_v62  ;;  %5176 = vst [vmem:[#allocation4 + $0x548] sm:$0xff] %v9138_v1  ;;  %v4588_v28 = vpop.f32.mrb[230].mxu1  ;;  %v4781_v13 = vpop.f32.mrb[6].mxu0  ;;  %v6271_v16 = vld [vmem:[#allocation4 + $0x4f8] sm:$0x7f] }
 0x3ad   : > { %6476 = vst [vmem:[#allocation2 + $0x50] sm:$0xff] %v6446_v25  ;;  %6477 = vst [vmem:[#allocation2 + $0x58] sm:$0xff] %v6447_v14  ;;  %v5971_v53 = vadd.f32 %v5939_v38, %v4588_v28  ;;  %v4590_v18 = vpop.f32.mrb[231].mxu1  ;;  %v9141_v7 = vpop.f32.mrb[7].mxu0  ;;  %v6065_v23 = vld [vmem:[#allocation2 + $0x88] sm:$0x7f]  ;;  %v6138_v58 = vsel %vm2313_vm0, %v6136_v30, %v6137_v55 }
 0x3ae   : > { %5184 = vst [vmem:[#allocation4 + $0x588] sm:$0xff] %v4781_v13  ;;  %v6208_v17 = vadd.f32 %v6138_v58, %v5968_v42  ;;  %v6209_v19 = vadd.f32 %v6137_v55, %v6065_v23  ;;  %v6140_v48 = vrot.slane %v4590_v18, 1  ;;  %v5940_v25 = vld [vmem:[#allocation2 + $0xa0] sm:$0xff]  ;;  %v5943_v62 = vld [vmem:[#allocation2 + $0xb8] sm:$0xff] }
 0x3af   : > { %6003 = vst [vmem:[#allocation2 + $0x98] sm:$0xff] %v5971_v53  ;;  %v6300_v6 = vld [vmem:[#allocation2 + $0x71] sm:$0xff]  ;;  %v6301_v5 = vld [vmem:[#allocation2 + $0x79] sm:$0x7f] }
 0x3b0   : > { %v6330_v51 = vadd.f32 %v6300_v6, %v9123_v29  ;;  %v6331_v31 = vadd.f32 %v6301_v5, %v6271_v16  ;;  %6240 = vst [vmem:[#allocation2 + $0x80] sm:$0xff] %v6208_v17  ;;  %6241 = vst [vmem:[#allocation2 + $0x88] sm:$0x7f] %v6209_v19 }
 0x3b1   : > { %v4594_v11 = vpop.f32.mrb[232].mxu1  ;;  %v9145_v60 = vpop.f32.mrb[8].mxu0 }
 0x3b2   : > { %v6418_v46 = vld [vmem:[#allocation2 + $0x60] sm:$0xff]  ;;  %v6419_v50 = vld [vmem:[#allocation2 + $0x68] sm:$0xff]  ;;  %6360 = vst [vmem:[#allocation2 + $0x71] sm:$0xff] %v6330_v51  ;;  %6361 = vst [vmem:[#allocation2 + $0x79] sm:$0x7f] %v6331_v31  ;;  %v4596_v0 = vpop.f32.mrb[233].mxu1 }
 0x3b3   : > { %v6448_v43 = vadd.f32 %v6418_v46, %v9116_v21  ;;  %v6449_v10 = vadd.f32 %v6419_v50, %v9119_v40  ;;  %v6034_v24 = vld [vmem:[#allocation4 + $0x538] sm:$0xfe]  ;;  %v9149_v22 = vpop.f32.mrb[9].mxu0  ;;  %5192 = vst [vmem:[#allocation4 + $0x5c8] sm:$0xff] %v4596_v0  ;;  %v4598_v32 = vpop.f32.mrb[234].mxu1  ;;  %v5970_v21 = vadd.f32 %v5938_v4, %v4584_v2  ;;  %v5942_v50 = vld [vmem:[#allocation2 + $0xb0] sm:$0xff] }
 0x3b4   : > { %v6139_v29 = vrot.slane %v6034_v24, 1  ;;  %5194 = vst [vmem:[#allocation4 + $0x5d8] sm:$0xff] %v9149_v22  ;;  %v4791_v8 = vpop.f32.mrb[10].mxu0  ;;  %v5973_v9 = vadd.f32 %v5941_v3, %v4598_v32  ;;  %v4600_v40 = vpop.f32.mrb[235].mxu1 }
 0x3b5   : > { %6478 = vst [vmem:[#allocation2 + $0x60] sm:$0xff] %v6448_v43  ;;  %6479 = vst [vmem:[#allocation2 + $0x68] sm:$0xff] %v6449_v10  ;;  %v9152_v52 = vpop.f32.mrb[11].mxu0  ;;  %v6273_v54 = vld [vmem:[#allocation4 + $0x588] sm:$0x7f]  ;;  %v6143_v14 = vrot.slane %v4600_v40, 1 }
 0x3b6   : > { %5202 = vst [vmem:[#allocation4 + $0x618] sm:$0xff] %v4791_v8  ;;  %v6067_v59 = vld [vmem:[#allocation2 + $0x98] sm:$0x7f]  ;;  %v6141_v63 = vsel %vm2313_vm0, %v6139_v29, %v6140_v48  ;;  %6005 = vst [vmem:[#allocation2 + $0xa8] sm:$0xff] %v5973_v9  ;;  %v5945_v10 = vld [vmem:[#allocation2 + $0xc8] sm:$0xff] }
 0x3b7   : > { %v6210_v33 = vadd.f32 %v6141_v63, %v5970_v21  ;;  %v6211_v57 = vadd.f32 %v6140_v48, %v6067_v59  ;;  %v6302_v39 = vld [vmem:[#allocation2 + $0x81] sm:$0xff]  ;;  %v6303_v34 = vld [vmem:[#allocation2 + $0x89] sm:$0x7f] }
 0x3b8   : > { %v6332_v37 = vadd.f32 %v6302_v39, %v9134_v35  ;;  %v6333_v61 = vadd.f32 %v6303_v34, %v6273_v54 }
 0x3b9   : > { %6242 = vst [vmem:[#allocation2 + $0x90] sm:$0xff] %v6210_v33  ;;  %6243 = vst [vmem:[#allocation2 + $0x98] sm:$0x7f] %v6211_v57  ;;  %v6420_v47 = vld [vmem:[#allocation2 + $0x70] sm:$0xff]  ;;  %v6421_v41 = vld [vmem:[#allocation2 + $0x78] sm:$0xff]  ;;  %v4604_v36 = vpop.f32.mrb[236].mxu1 }
 0x3ba   : > { %v9156_v45 = vpop.f32.mrb[12].mxu0  ;;  %v6450_v56 = vadd.f32 %v6420_v47, %v9127_v20  ;;  %v6451_v44 = vadd.f32 %v6421_v41, %v9130_v15  ;;  %6362 = vst [vmem:[#allocation2 + $0x81] sm:$0xff] %v6332_v37  ;;  %6363 = vst [vmem:[#allocation2 + $0x89] sm:$0x7f] %v6333_v61  ;;  %v6036_v49 = vld [vmem:[#allocation4 + $0x5c8] sm:$0xfe]  ;;  %v5972_v20 = vadd.f32 %v5940_v25, %v4594_v11 }
 0x3bb   : > { %v4606_v27 = vpop.f32.mrb[237].mxu1  ;;  %v9160_v2 = vpop.f32.mrb[13].mxu0  ;;  %v6142_v35 = vrot.slane %v6036_v49, 1  ;;  %v5974_v0 = vadd.f32 %v5942_v50, %v4604_v36  ;;  %v5944_v36 = vld [vmem:[#allocation2 + $0xc0] sm:$0xff]  ;;  %v5947_v49 = vld [vmem:[#allocation2 + $0xd8] sm:$0xff] }
 0x3bc   : > { %5210 = vst [vmem:[#allocation4 + $0x658] sm:$0xff] %v4606_v27  ;;  %5212 = vst [vmem:[#allocation4 + $0x668] sm:$0xff] %v9160_v2  ;;  %v4608_v12 = vpop.f32.mrb[238].mxu1  ;;  %v4801_v26 = vpop.f32.mrb[14].mxu0 }
 0x3bd   : > { %6480 = vst [vmem:[#allocation2 + $0x70] sm:$0xff] %v6450_v56  ;;  %6481 = vst [vmem:[#allocation2 + $0x78] sm:$0xff] %v6451_v44  ;;  %v5975_v30 = vadd.f32 %v5943_v62, %v4608_v12  ;;  %v4610_v15 = vpop.f32.mrb[239].mxu1  ;;  %v9163_v55 = vpop.f32.mrb[15].mxu0  ;;  %v6069_v28 = vld [vmem:[#allocation2 + $0xa8] sm:$0x7f]  ;;  %v6144_v38 = vsel %vm2313_vm0, %v6142_v35, %v6143_v14 }
 0x3be   : > { %5220 = vst [vmem:[#allocation4 + $0x6a8] sm:$0xff] %v4801_v26  ;;  %v6212_v13 = vadd.f32 %v6144_v38, %v5972_v20  ;;  %v6213_v42 = vadd.f32 %v6143_v14, %v6069_v28  ;;  %v6275_v18 = vld [vmem:[#allocation4 + $0x618] sm:$0x7f]  ;;  %v6146_v43 = vrot.slane %v4610_v15, 1 }
 0x3bf   : > { %6007 = vst [vmem:[#allocation2 + $0xb8] sm:$0xff] %v5975_v30 }
 0x3c0   : > { %v6304_v53 = vld [vmem:[#allocation2 + $0x91] sm:$0xff]  ;;  %v6305_v23 = vld [vmem:[#allocation2 + $0x99] sm:$0x7f]  ;;  %6244 = vst [vmem:[#allocation2 + $0xa0] sm:$0xff] %v6212_v13  ;;  %6245 = vst [vmem:[#allocation2 + $0xa8] sm:$0x7f] %v6213_v42 }
 0x3c1   : > { %v6334_v58 = vadd.f32 %v6304_v53, %v9145_v60  ;;  %v6335_v17 = vadd.f32 %v6305_v23, %v6275_v18  ;;  %v6423_v19 = vld [vmem:[#allocation2 + $0x88] sm:$0xff]  ;;  %v4614_v6 = vpop.f32.mrb[240].mxu1  ;;  %v9167_v16 = vpop.f32.mrb[16].mxu0 }
 0x3c2   : > { %v6453_v5 = vadd.f32 %v6423_v19, %v9141_v7  ;;  %v4616_v31 = vpop.f32.mrb[241].mxu1  ;;  %v9170_v46 = vpop.f32.mrb[17].mxu0  ;;  %v5946_v19 = vld [vmem:[#allocation2 + $0xd0] sm:$0xff] }
 0x3c3   : > { %6364 = vst [vmem:[#allocation2 + $0x91] sm:$0xff] %v6334_v58  ;;  %6365 = vst [vmem:[#allocation2 + $0x99] sm:$0x7f] %v6335_v17  ;;  %v6038_v51 = vld [vmem:[#allocation4 + $0x658] sm:$0xfe]  ;;  %v4618_v60 = vpop.f32.mrb[242].mxu1 }
 0x3c4   : > { %v6145_v11 = vrot.slane %v6038_v51, 1  ;;  %5228 = vst [vmem:[#allocation4 + $0x6e8] sm:$0xff] %v4616_v31  ;;  %5230 = vst [vmem:[#allocation4 + $0x6f8] sm:$0xff] %v9170_v46  ;;  %v4811_v24 = vpop.f32.mrb[18].mxu0  ;;  %v5977_v4 = vadd.f32 %v5945_v10, %v4618_v60  ;;  %v4620_v7 = vpop.f32.mrb[243].mxu1  ;;  %v5949_v51 = vld [vmem:[#allocation2 + $0xe8] sm:$0xff] }
 0x3c5   : > { %6483 = vst [vmem:[#allocation2 + $0x88] sm:$0xff] %v6453_v5  ;;  %5238 = vst [vmem:[#allocation4 + $0x738] sm:$0xff] %v4811_v24  ;;  %v9173_v29 = vpop.f32.mrb[19].mxu0  ;;  %v6277_v9 = vld [vmem:[#allocation4 + $0x6a8] sm:$0x7f]  ;;  %v6149_v56 = vrot.slane %v4620_v7, 1 }
 0x3c6   : > { %v6071_v48 = vld [vmem:[#allocation2 + $0xb8] sm:$0x7f]  ;;  %v6147_v32 = vsel %vm2313_vm0, %v6145_v11, %v6146_v43  ;;  %6009 = vst [vmem:[#allocation2 + $0xc8] sm:$0xff] %v5977_v4 }
 0x3c7   : > { %v6214_v3 = vadd.f32 %v6147_v32, %v5974_v0  ;;  %v6215_v8 = vadd.f32 %v6146_v43, %v6071_v48  ;;  %v6306_v21 = vld [vmem:[#allocation2 + $0xa1] sm:$0xff]  ;;  %v6307_v40 = vld [vmem:[#allocation2 + $0xa9] sm:$0x7f] }
 0x3c8   : > { %v6336_v59 = vadd.f32 %v6306_v21, %v9156_v45  ;;  %v6337_v63 = vadd.f32 %v6307_v40, %v6277_v9 }
 0x3c9   : > { %6246 = vst [vmem:[#allocation2 + $0xb0] sm:$0xff] %v6214_v3  ;;  %6247 = vst [vmem:[#allocation2 + $0xb8] sm:$0x7f] %v6215_v8  ;;  %v4624_v39 = vpop.f32.mrb[244].mxu1  ;;  %v9177_v54 = vpop.f32.mrb[20].mxu0 }
 0x3ca   : > { %v6424_v33 = vld [vmem:[#allocation2 + $0x90] sm:$0xff]  ;;  %v6425_v57 = vld [vmem:[#allocation2 + $0x98] sm:$0xff]  ;;  %6366 = vst [vmem:[#allocation2 + $0xa1] sm:$0xff] %v6336_v59  ;;  %6367 = vst [vmem:[#allocation2 + $0xa9] sm:$0x7f] %v6337_v63  ;;  %v4626_v47 = vpop.f32.mrb[245].mxu1  ;;  %v5978_v50 = vadd.f32 %v5946_v19, %v4624_v39 }
 0x3cb   : > { %v6454_v34 = vadd.f32 %v6424_v33, %v9149_v22  ;;  %v6455_v37 = vadd.f32 %v6425_v57, %v9152_v52  ;;  %v6040_v61 = vld [vmem:[#allocation4 + $0x6e8] sm:$0xfe]  ;;  %v9181_v41 = vpop.f32.mrb[21].mxu0  ;;  %5246 = vst [vmem:[#allocation4 + $0x778] sm:$0xff] %v4626_v47  ;;  %v4628_v44 = vpop.f32.mrb[246].mxu1  ;;  %v5976_v22 = vadd.f32 %v5944_v36, %v4614_v6  ;;  %v5948_v57 = vld [vmem:[#allocation2 + $0xe0] sm:$0xff] }
 0x3cc   : > { %v6148_v45 = vrot.slane %v6040_v61, 1  ;;  %5248 = vst [vmem:[#allocation4 + $0x788] sm:$0xff] %v9181_v41  ;;  %v4821_v27 = vpop.f32.mrb[22].mxu0  ;;  %v5979_v25 = vadd.f32 %v5947_v49, %v4628_v44  ;;  %v4630_v52 = vpop.f32.mrb[247].mxu1  ;;  %v6279_v30 = vld [vmem:[#allocation4 + $0x738] sm:$0x7f] }
 0x3cd   : > { %6484 = vst [vmem:[#allocation2 + $0x90] sm:$0xff] %v6454_v34  ;;  %6485 = vst [vmem:[#allocation2 + $0x98] sm:$0xff] %v6455_v37  ;;  %v9184_v35 = vpop.f32.mrb[23].mxu0  ;;  %v6073_v14 = vld [vmem:[#allocation2 + $0xc8] sm:$0x7f]  ;;  %v6152_v5 = vrot.slane %v4630_v52, 1 }
 0x3ce   : > { %5256 = vst [vmem:[#allocation4 + $0x7c8] sm:$0xff] %v4821_v27  ;;  %v6150_v12 = vsel %vm2313_vm0, %v6148_v45, %v6149_v56  ;;  %v6217_v26 = vadd.f32 %v6149_v56, %v6073_v14  ;;  %6011 = vst [vmem:[#allocation2 + $0xd8] sm:$0xff] %v5979_v25  ;;  %v5951_v37 = vld [vmem:[#allocation2 + $0xf8] sm:$0xff] }
 0x3cf   : > { %v6216_v62 = vadd.f32 %v6150_v12, %v5976_v22 }
 0x3d0   : > { %v6308_v20 = vld [vmem:[#allocation2 + $0xb1] sm:$0xff]  ;;  %v6309_v15 = vld [vmem:[#allocation2 + $0xb9] sm:$0x7f]  ;;  %6249 = vst [vmem:[#allocation2 + $0xc8] sm:$0x7f] %v6217_v26 }
 0x3d1   : > { %v6338_v28 = vadd.f32 %v6308_v20, %v9167_v16  ;;  %v6339_v38 = vadd.f32 %v6309_v15, %v6279_v30  ;;  %6248 = vst [vmem:[#allocation2 + $0xc0] sm:$0xff] %v6216_v62  ;;  %v6427_v13 = vld [vmem:[#allocation2 + $0xa8] sm:$0xff]  ;;  %v4634_v42 = vpop.f32.mrb[248].mxu1  ;;  %v9188_v53 = vpop.f32.mrb[24].mxu0 }
 0x3d2   : > { %v6457_v18 = vadd.f32 %v6427_v13, %v9163_v55  ;;  %v6042_v23 = vld [vmem:[#allocation4 + $0x778] sm:$0xfe]  ;;  %v4636_v58 = vpop.f32.mrb[249].mxu1  ;;  %v9191_v17 = vpop.f32.mrb[25].mxu0  ;;  %v5980_v47 = vadd.f32 %v5948_v57, %v4634_v42 }
 0x3d3   : > { %6368 = vst [vmem:[#allocation2 + $0xb1] sm:$0xff] %v6338_v28  ;;  %6369 = vst [vmem:[#allocation2 + $0xb9] sm:$0x7f] %v6339_v38  ;;  %v6151_v6 = vrot.slane %v6042_v23, 1  ;;  %v4638_v16 = vpop.f32.mrb[250].mxu1  ;;  %v4831_v31 = vpop.f32.mrb[26].mxu0 }
 0x3d4   : > { %5264 = vst [vmem:[#allocation4 + $0x808] sm:$0xff] %v4636_v58  ;;  %5266 = vst [vmem:[#allocation4 + $0x818] sm:$0xff] %v9191_v17  ;;  %v5981_v11 = vadd.f32 %v5949_v51, %v4638_v16  ;;  %v4640_v55 = vpop.f32.mrb[251].mxu1  ;;  %v9194_v43 = vpop.f32.mrb[27].mxu0  ;;  %v5950_v28 = vld [vmem:[#allocation2 + $0xf0] sm:$0xff] }
 0x3d5   : > { %6487 = vst [vmem:[#allocation2 + $0xa8] sm:$0xff] %v6457_v18  ;;  %5274 = vst [vmem:[#allocation4 + $0x858] sm:$0xff] %v4831_v31  ;;  %v6075_v60 = vld [vmem:[#allocation2 + $0xd8] sm:$0x7f]  ;;  %v6153_v10 = vsel %vm2313_vm0, %v6151_v6, %v6152_v5  ;;  %v6281_v7 = vld [vmem:[#allocation4 + $0x7c8] sm:$0x7f] }
 0x3d6   : > { %v6218_v24 = vadd.f32 %v6153_v10, %v5978_v50  ;;  %v6219_v0 = vadd.f32 %v6152_v5, %v6075_v60  ;;  %6013 = vst [vmem:[#allocation2 + $0xe8] sm:$0xff] %v5981_v11  ;;  %v6155_v34 = vrot.slane %v4640_v55, 1  ;;  %v6527_v6 = vld [vmem:[#allocation2 + $0x8] sm:$0x7f]  ;;  %v6529_v57 = vld [vmem:[#allocation2 + $0x18] sm:$0x7f] }
 0x3d7   : > { %v6311_v48 = vld [vmem:[#allocation2 + $0xc9] sm:$0x7f] }
 0x3d8   : > { %v6310_v4 = vld [vmem:[#allocation2 + $0xc1] sm:$0xff]  ;;  %v6341_v3 = vadd.f32 %v6311_v48, %v6281_v7  ;;  %6250 = vst [vmem:[#allocation2 + $0xd0] sm:$0xff] %v6218_v24  ;;  %6251 = vst [vmem:[#allocation2 + $0xd8] sm:$0x7f] %v6219_v0 }
 0x3d9   : > { %v6340_v32 = vadd.f32 %v6310_v4, %v9177_v54  ;;  %v4644_v21 = vpop.f32.mrb[252].mxu1  ;;  %v4837_v9 = vpop.f32.mrb[28].mxu0 }
 0x3da   : > { %v6429_v8 = vld [vmem:[#allocation2 + $0xb8] sm:$0xff]  ;;  %6371 = vst [vmem:[#allocation2 + $0xc9] sm:$0x7f] %v6341_v3  ;;  %5281 = vst [vmem:[#allocation4 + $0x890] sm:$0xff] %v4644_v21  ;;  %v4646_v63 = vpop.f32.mrb[253].mxu1  ;;  %v9199_v33 = vpop.f32.mrb[29].mxu0  ;;  %v5982_v18 = vadd.f32 %v5950_v28, %v4644_v21 }
 0x3db   : > { %v6459_v40 = vadd.f32 %v6429_v8, %v9173_v29  ;;  %6370 = vst [vmem:[#allocation2 + $0xc1] sm:$0xff] %v6340_v32  ;;  %v6044_v59 = vld [vmem:[#allocation4 + $0x808] sm:$0xfe]  ;;  %5282 = vst [vmem:[#allocation4 + $0x898] sm:$0xff] %v4646_v63  ;;  %v4648_v54 = vpop.f32.mrb[254].mxu1  ;;  %v4841_v61 = vpop.f32.mrb[30].mxu0 }
 0x3dc   : > { %v6154_v39 = vrot.slane %v6044_v59, 1  ;;  %5284 = vst [vmem:[#allocation4 + $0x8a8] sm:$0xff] %v9199_v33  ;;  %v5983_v36 = vadd.f32 %v5951_v37, %v4648_v54  ;;  %5292 = vst [vmem:[#allocation4 + $0x8e8] sm:$0xff] %v4841_v61  ;;  %v4650_v29 = vpop.f32.mrb[255].mxu1  ;;  %v9202_v45 = vpop.f32.mrb[31].mxu0  ;;  %v6526_v3 = vld [vmem:[#allocation2] sm:$0xff] }
 0x3dd   : > { %6489 = vst [vmem:[#allocation2 + $0xb8] sm:$0xff] %v6459_v40  ;;  %v6077_v56 = vld [vmem:[#allocation2 + $0xe8] sm:$0x7f]  ;;  %5291 = vst [vmem:[#allocation4 + $0x8e0] sm:$0xff] %v4650_v29  ;;  %v6283_v25 = vld [vmem:[#allocation4 + $0x858] sm:$0x7f] }
 0x3de   : > { %v6156_v44 = vsel %vm2313_vm0, %v6154_v39, %v6155_v34  ;;  %v6221_v27 = vadd.f32 %v6155_v34, %v6077_v56  ;;  %6015 = vst [vmem:[#allocation2 + $0xf8] sm:$0xff] %v5983_v36  ;;  %v6158_v13 = vrot.slane %v4650_v29, 1  ;;  %v6531_v59 = vld [vmem:[#allocation2 + $0x28] sm:$0x7f] }
 0x3df   : > { %v6220_v49 = vadd.f32 %v6156_v44, %v5980_v47  ;;  %v6312_v22 = vld [vmem:[#allocation2 + $0xd1] sm:$0xff]  ;;  %v6313_v52 = vld [vmem:[#allocation2 + $0xd9] sm:$0x7f] }
 0x3e0   : > { %v6342_v14 = vadd.f32 %v6312_v22, %v9188_v53  ;;  %v6343_v12 = vadd.f32 %v6313_v52, %v6283_v25  ;;  %6253 = vst [vmem:[#allocation2 + $0xe8] sm:$0x7f] %v6221_v27 }
 0x3e1   : > { %6252 = vst [vmem:[#allocation2 + $0xe0] sm:$0xff] %v6220_v49  ;;  %v7145_v26 = vpop.f32.mrb[0].mxu1 }
 0x3e2   : > { %v6431_v62 = vld [vmem:[#allocation2 + $0xc8] sm:$0xff]  ;;  %6372 = vst [vmem:[#allocation2 + $0xd1] sm:$0xff] %v6342_v14  ;;  %6373 = vst [vmem:[#allocation2 + $0xd9] sm:$0x7f] %v6343_v12  ;;  %v6046_v30 = vld [vmem:[#allocation4 + $0x898] sm:$0xfe] }
 0x3e3   : > { %v6461_v20 = vadd.f32 %v6431_v62, %v9184_v35  ;;  %5033 = vst [vmem:[#allocation4 + $0xd0] sm:$0xff] %v7145_v26  ;;  %v4880_v15 = vpop.f32.mrb[1].mxu1  ;;  %v6157_v38 = vrot.slane %v6046_v30, 1  ;;  %v6285_v31 = vld [vmem:[#allocation4 + $0x8e8] sm:$0x7f]  ;;  %v6530_v14 = vld [vmem:[#allocation2 + $0x20] sm:$0xff] }
 0x3e4   : > { %v7146_v42 = vpop.f32.mrb[2].mxu1  ;;  %v6528_v30 = vld [vmem:[#allocation2 + $0x10] sm:$0xff] }
 0x3e5   : > { %6491 = vst [vmem:[#allocation2 + $0xc8] sm:$0xff] %v6461_v20  ;;  %v6587_v53 = vrot.slane %v7146_v42, 1  ;;  %v4883_v23 = vpop.f32.mrb[3].mxu1  ;;  %v6079_v58 = vld [vmem:[#allocation2 + $0xf8] sm:$0x7f]  ;;  %v6159_v19 = vsel %vm2313_vm0, %v6157_v38, %v6158_v13 }
 0x3e6   : > { %v6222_v5 = vadd.f32 %v6159_v19, %v5982_v18  ;;  %v6223_v35 = vadd.f32 %v6158_v13, %v6079_v58  ;;  %v6533_v42 = vld [vmem:[#allocation2 + $0x38] sm:$0x7f] }
 0x3e7   : > { %v6662_v16 = vadd.f32 %v6587_v53, %v6527_v6  ;;  %v6315_v50 = vld [vmem:[#allocation2 + $0xe9] sm:$0x7f] }
 0x3e8   : > { %v6314_v51 = vld [vmem:[#allocation2 + $0xe1] sm:$0xff]  ;;  %v6345_v55 = vadd.f32 %v6315_v50, %v6285_v31  ;;  %6254 = vst [vmem:[#allocation2 + $0xf0] sm:$0xff] %v6222_v5  ;;  %6255 = vst [vmem:[#allocation2 + $0xf8] sm:$0x7f] %v6223_v35  ;;  %v6783_v60 = vmax.f32 %v6222_v5, 0.0 }
 0x3e9   : > { %v6344_v11 = vadd.f32 %v6314_v51, %v4837_v9  ;;  %6692 = vst [vmem:[#allocation2 + $0x8] sm:$0x7f] %v6662_v16  ;;  %v6433_v10 = vld [vmem:[#allocation2 + $0xd8] sm:$0xff]  ;;  %v7149_v0 = vpop.f32.mrb[4].mxu1 }
 0x3ea   : > { %v6496_v24 = vld [vmem:[#allocation4 + $0xd0] sm:$0xfe]  ;;  %v6463_v4 = vadd.f32 %v6433_v10, %v9194_v43  ;;  %6375 = vst [vmem:[#allocation2 + $0xe9] sm:$0x7f] %v6345_v55  ;;  %6815 = vst [vmem:[%s9213_s17 + $0xf0] sm:$0xff] %v6783_v60  ;;  %v4896_v48 = vpop.f32.mrb[5].mxu1 }
 0x3eb   : > { %6374 = vst [vmem:[#allocation2 + $0xe1] sm:$0xff] %v6344_v11  ;;  %v6586_v7 = vrot.slane %v6496_v24, 1  ;;  %5069 = vst [vmem:[#allocation4 + $0x1f0] sm:$0xff] %v7149_v0  ;;  %v7150_v32 = vpop.f32.mrb[6].mxu1  ;;  %v6534_v60 = vld [vmem:[#allocation2 + $0x40] sm:$0xff] }
 0x3ec   : > { %5051 = vst [vmem:[#allocation4 + $0x160] sm:$0xff] %v4896_v48  ;;  %6493 = vst [vmem:[#allocation2 + $0xd8] sm:$0xff] %v6463_v4  ;;  %v6593_v21 = vrot.slane %v7150_v32, 1  ;;  %v4899_v9 = vpop.f32.mrb[7].mxu1  ;;  %v6539_v32 = vld [vmem:[#allocation2 + $0x68] sm:$0x7f] }
 0x3ed   : > { %v6588_v8 = vsel %vm2313_vm0, %v6586_v7, %v6587_v53  ;;  %v6590_v63 = vrot.slane %v4899_v9, 1  ;;  %v6532_v7 = vld [vmem:[#allocation2 + $0x30] sm:$0xff]  ;;  %v6537_v9 = vld [vmem:[#allocation2 + $0x58] sm:$0x7f] }
 0x3ee   : > { %v6661_v40 = vadd.f32 %v6588_v8, %v6526_v3  ;;  %v6666_v43 = vadd.f32 %v6593_v21, %v6531_v59 }
 0x3ef   : > { %v6752_v39 = vld [vmem:[#allocation2 + $0xf8] sm:$0xff]  ;;  %v6664_v37 = vadd.f32 %v6590_v63, %v6529_v57 }
 0x3f0   : > { %6691 = vst [vmem:[#allocation2] sm:$0xff] %v6661_v40  ;;  %v6722_v34 = vld [vmem:[#allocation2 + $0x8] sm:$0xff]  ;;  %v6753_v54 = vmax.f32 %v6661_v40, 0.0  ;;  %v6784_v61 = vmax.f32 %v6752_v39, 0.0  ;;  %6696 = vst [vmem:[#allocation2 + $0x28] sm:$0x7f] %v6666_v43 }
 0x3f1   : > { %v6754_v47 = vmax.f32 %v6722_v34, 0.0  ;;  %6694 = vst [vmem:[#allocation2 + $0x18] sm:$0x7f] %v6664_v37  ;;  %v7153_v56 = vpop.f32.mrb[8].mxu1 }
 0x3f2   : > { %v6435_v36 = vld [vmem:[#allocation2 + $0xe8] sm:$0xff]  ;;  %6785 = vst [vmem:[%s9213_s17] sm:$0xff] %v6753_v54  ;;  %v6500_v29 = vld [vmem:[#allocation4 + $0x1f0] sm:$0xfe]  ;;  %6816 = vst [vmem:[%s9213_s17 + $0xf8] sm:$0xff] %v6784_v61  ;;  %v4912_v22 = vpop.f32.mrb[9].mxu1 }
 0x3f3   : > { %v6465_v44 = vadd.f32 %v6435_v36, %v9202_v45  ;;  %6786 = vst [vmem:[%s9213_s17 + $0x8] sm:$0xff] %v6754_v47  ;;  %v6592_v49 = vrot.slane %v6500_v29, 1  ;;  %v6498_v27 = vld [vmem:[#allocation4 + $0x160] sm:$0xfe]  ;;  %5105 = vst [vmem:[#allocation4 + $0x310] sm:$0xff] %v7153_v56  ;;  %v7154_v52 = vpop.f32.mrb[10].mxu1 }
 0x3f4   : > { %v6589_v25 = vrot.slane %v6498_v27, 1  ;;  %5087 = vst [vmem:[#allocation4 + $0x280] sm:$0xff] %v4912_v22  ;;  %v6599_v62 = vrot.slane %v7154_v52, 1  ;;  %v4915_v26 = vpop.f32.mrb[11].mxu1  ;;  %v6535_v45 = vld [vmem:[#allocation2 + $0x48] sm:$0x7f] }
 0x3f5   : > { %6495 = vst [vmem:[#allocation2 + $0xe8] sm:$0xff] %v6465_v44  ;;  %v6594_v12 = vsel %vm2313_vm0, %v6592_v49, %v6593_v21  ;;  %v6596_v28 = vrot.slane %v4915_v26, 1  ;;  %v6538_v44 = vld [vmem:[#allocation2 + $0x60] sm:$0xff]  ;;  %v6536_v52 = vld [vmem:[#allocation2 + $0x50] sm:$0xff] }
 0x3f6   : > { %v6665_v20 = vadd.f32 %v6594_v12, %v6530_v14  ;;  %v6591_v15 = vsel %vm2313_vm0, %v6589_v25, %v6590_v63  ;;  %v6670_v13 = vadd.f32 %v6599_v62, %v6535_v45  ;;  %v6543_v12 = vld [vmem:[#allocation2 + $0x88] sm:$0x7f] }
 0x3f7   : > { %v6663_v38 = vadd.f32 %v6591_v15, %v6528_v30  ;;  %v6726_v18 = vld [vmem:[#allocation2 + $0x28] sm:$0xff]  ;;  %v6668_v23 = vadd.f32 %v6596_v28, %v6533_v42  ;;  %v6541_v30 = vld [vmem:[#allocation2 + $0x78] sm:$0x7f] }
 0x3f8   : > { %6695 = vst [vmem:[#allocation2 + $0x20] sm:$0xff] %v6665_v20  ;;  %v6757_v53 = vmax.f32 %v6665_v20, 0.0  ;;  %v6758_v58 = vmax.f32 %v6726_v18, 0.0  ;;  %v6724_v19 = vld [vmem:[#allocation2 + $0x18] sm:$0xff]  ;;  %6700 = vst [vmem:[#allocation2 + $0x48] sm:$0x7f] %v6670_v13 }
 0x3f9   : > { %6693 = vst [vmem:[#allocation2 + $0x10] sm:$0xff] %v6663_v38  ;;  %v6755_v6 = vmax.f32 %v6663_v38, 0.0  ;;  %v6756_v5 = vmax.f32 %v6724_v19, 0.0  ;;  %6698 = vst [vmem:[#allocation2 + $0x38] sm:$0x7f] %v6668_v23  ;;  %v7157_v16 = vpop.f32.mrb[12].mxu1 }
 0x3fa   : > { %6789 = vst [vmem:[%s9213_s17 + $0x20] sm:$0xff] %v6757_v53  ;;  %v6504_v35 = vld [vmem:[#allocation4 + $0x310] sm:$0xfe]  ;;  %6790 = vst [vmem:[%s9213_s17 + $0x28] sm:$0xff] %v6758_v58  ;;  %v4928_v50 = vpop.f32.mrb[13].mxu1  ;;  %v6422_v38 = vld [vmem:[#allocation2 + $0x80] sm:$0xff] }
 0x3fb   : > { %6787 = vst [vmem:[%s9213_s17 + $0x10] sm:$0xff] %v6755_v6  ;;  %v6598_v51 = vrot.slane %v6504_v35, 1  ;;  %v6502_v31 = vld [vmem:[#allocation4 + $0x280] sm:$0xfe]  ;;  %5141 = vst [vmem:[#allocation4 + $0x430] sm:$0xff] %v7157_v16  ;;  %v7158_v55 = vpop.f32.mrb[14].mxu1  ;;  %v6452_v35 = vadd.f32 %v6422_v38, %v9138_v1 }
 0x3fc   : > { %6788 = vst [vmem:[%s9213_s17 + $0x18] sm:$0xff] %v6756_v5  ;;  %v6595_v11 = vrot.slane %v6502_v31, 1  ;;  %5123 = vst [vmem:[#allocation4 + $0x3a0] sm:$0xff] %v4928_v50  ;;  %v6605_v24 = vrot.slane %v7158_v55, 1  ;;  %v4931_v0 = vpop.f32.mrb[15].mxu1 }
 0x3fd   : > { %v6600_v10 = vsel %vm2313_vm0, %v6598_v51, %v6599_v62  ;;  %v6602_v3 = vrot.slane %v4931_v0, 1 }
 0x3fe   : > { %v6669_v4 = vadd.f32 %v6600_v10, %v6534_v60  ;;  %v6597_v48 = vsel %vm2313_vm0, %v6595_v11, %v6596_v28  ;;  %v6674_v21 = vadd.f32 %v6605_v24, %v6539_v32  ;;  %v6540_v60 = vld [vmem:[#allocation2 + $0x70] sm:$0xff] }
 0x3ff   : > { %v6667_v8 = vadd.f32 %v6597_v48, %v6532_v7  ;;  %v6730_v40 = vld [vmem:[#allocation2 + $0x48] sm:$0xff]  ;;  %v6672_v63 = vadd.f32 %v6602_v3, %v6537_v9  ;;  %v6545_v48 = vld [vmem:[#allocation2 + $0x98] sm:$0x7f] }
 0x400   : > { %6699 = vst [vmem:[#allocation2 + $0x40] sm:$0xff] %v6669_v4  ;;  %v6761_v59 = vmax.f32 %v6669_v4, 0.0  ;;  %v6762_v43 = vmax.f32 %v6730_v40, 0.0  ;;  %v6728_v57 = vld [vmem:[#allocation2 + $0x38] sm:$0xff]  ;;  %6704 = vst [vmem:[#allocation2 + $0x68] sm:$0x7f] %v6674_v21 }
 0x401   : > { %6697 = vst [vmem:[#allocation2 + $0x30] sm:$0xff] %v6667_v8  ;;  %v6759_v39 = vmax.f32 %v6667_v8, 0.0  ;;  %v6760_v34 = vmax.f32 %v6728_v57, 0.0  ;;  %6702 = vst [vmem:[#allocation2 + $0x58] sm:$0x7f] %v6672_v63  ;;  %v7161_v37 = vpop.f32.mrb[16].mxu1 }
 0x402   : > { %6793 = vst [vmem:[%s9213_s17 + $0x40] sm:$0xff] %v6761_v59  ;;  %v6508_v54 = vld [vmem:[#allocation4 + $0x430] sm:$0xfe]  ;;  %6794 = vst [vmem:[%s9213_s17 + $0x48] sm:$0xff] %v6762_v43  ;;  %v4944_v36 = vpop.f32.mrb[17].mxu1  ;;  %v6426_v8 = vld [vmem:[#allocation2 + $0xa0] sm:$0xff] }
 0x403   : > { %6791 = vst [vmem:[%s9213_s17 + $0x30] sm:$0xff] %v6759_v39  ;;  %v6604_v61 = vrot.slane %v6508_v54, 1  ;;  %v6506_v47 = vld [vmem:[#allocation4 + $0x3a0] sm:$0xfe]  ;;  %5177 = vst [vmem:[#allocation4 + $0x550] sm:$0xff] %v7161_v37  ;;  %v7162_v56 = vpop.f32.mrb[18].mxu1  ;;  %v6456_v54 = vadd.f32 %v6426_v8, %v9160_v2 }
 0x404   : > { %6792 = vst [vmem:[%s9213_s17 + $0x38] sm:$0xff] %v6760_v34  ;;  %v6601_v29 = vrot.slane %v6506_v47, 1  ;;  %5159 = vst [vmem:[#allocation4 + $0x4c0] sm:$0xff] %v4944_v36  ;;  %v6611_v27 = vrot.slane %v7162_v56, 1  ;;  %v4947_v22 = vpop.f32.mrb[19].mxu1 }
 0x405   : > { %v6606_v49 = vsel %vm2313_vm0, %v6604_v61, %v6605_v24  ;;  %v6608_v62 = vrot.slane %v4947_v22, 1  ;;  %v6547_v24 = vld [vmem:[#allocation2 + $0xa8] sm:$0x7f]  ;;  %v6549_v2 = vld [vmem:[#allocation2 + $0xb8] sm:$0x7f] }
 0x406   : > { %v6673_v25 = vadd.f32 %v6606_v49, %v6538_v44  ;;  %v6603_v14 = vsel %vm2313_vm0, %v6601_v29, %v6602_v3  ;;  %v6678_v20 = vadd.f32 %v6611_v27, %v6543_v12  ;;  %v6544_v44 = vld [vmem:[#allocation2 + $0x90] sm:$0xff] }
 0x407   : > { %v6671_v26 = vadd.f32 %v6603_v14, %v6536_v52  ;;  %v6734_v15 = vld [vmem:[#allocation2 + $0x68] sm:$0xff]  ;;  %v6676_v28 = vadd.f32 %v6608_v62, %v6541_v30 }
 0x408   : > { %6703 = vst [vmem:[#allocation2 + $0x60] sm:$0xff] %v6673_v25  ;;  %v6765_v45 = vmax.f32 %v6673_v25, 0.0  ;;  %v6766_v13 = vmax.f32 %v6734_v15, 0.0  ;;  %v6732_v42 = vld [vmem:[#allocation2 + $0x58] sm:$0xff]  ;;  %6708 = vst [vmem:[#allocation2 + $0x88] sm:$0x7f] %v6678_v20 }
 0x409   : > { %6701 = vst [vmem:[#allocation2 + $0x50] sm:$0xff] %v6671_v26  ;;  %v6763_v18 = vmax.f32 %v6671_v26, 0.0  ;;  %v6764_v53 = vmax.f32 %v6732_v42, 0.0  ;;  %6706 = vst [vmem:[#allocation2 + $0x78] sm:$0x7f] %v6676_v28  ;;  %v7165_v58 = vpop.f32.mrb[20].mxu1 }
 0x40a   : > { %6797 = vst [vmem:[%s9213_s17 + $0x60] sm:$0xff] %v6765_v45  ;;  %v6512_v23 = vld [vmem:[#allocation4 + $0x550] sm:$0xfe]  ;;  %6798 = vst [vmem:[%s9213_s17 + $0x68] sm:$0xff] %v6766_v13  ;;  %v4960_v5 = vpop.f32.mrb[21].mxu1  ;;  %v6430_v26 = vld [vmem:[#allocation2 + $0xc0] sm:$0xff] }
 0x40b   : > { %6795 = vst [vmem:[%s9213_s17 + $0x50] sm:$0xff] %v6763_v18  ;;  %v6610_v19 = vrot.slane %v6512_v23, 1  ;;  %v6510_v6 = vld [vmem:[#allocation4 + $0x4c0] sm:$0xfe]  ;;  %5213 = vst [vmem:[#allocation4 + $0x670] sm:$0xff] %v7165_v58  ;;  %v7166_v51 = vpop.f32.mrb[22].mxu1  ;;  %v6460_v23 = vadd.f32 %v6430_v26, %v9181_v41 }
 0x40c   : > { %6796 = vst [vmem:[%s9213_s17 + $0x58] sm:$0xff] %v6764_v53  ;;  %v6607_v16 = vrot.slane %v6510_v6, 1  ;;  %5195 = vst [vmem:[#allocation4 + $0x5e0] sm:$0xff] %v4960_v5  ;;  %v6617_v50 = vrot.slane %v7166_v51, 1  ;;  %v4963_v11 = vpop.f32.mrb[23].mxu1  ;;  %v6428_v45 = vld [vmem:[#allocation2 + $0xb0] sm:$0xff] }
 0x40d   : > { %v6612_v31 = vsel %vm2313_vm0, %v6610_v19, %v6611_v27  ;;  %5222 = vst [vmem:[#allocation4 + $0x6b8] sm:$0xff] %v7166_v51  ;;  %v6614_v0 = vrot.slane %v4963_v11, 1  ;;  %v6551_v27 = vld [vmem:[#allocation2 + $0xc8] sm:$0x7f]  ;;  %v6458_v6 = vadd.f32 %v6428_v45, %v9170_v46 }
 0x40e   : > { %v6677_v55 = vadd.f32 %v6612_v31, %v6452_v35  ;;  %v6609_v10 = vsel %vm2313_vm0, %v6607_v16, %v6608_v62  ;;  %v6682_v7 = vadd.f32 %v6617_v50, %v6547_v24 }
 0x40f   : > { %v6675_v4 = vadd.f32 %v6609_v10, %v6540_v60  ;;  %v6738_v1 = vld [vmem:[#allocation2 + $0x88] sm:$0xff]  ;;  %v6680_v3 = vadd.f32 %v6614_v0, %v6545_v48  ;;  %v6553_v60 = vld [vmem:[#allocation2 + $0xd8] sm:$0x7f] }
 0x410   : > { %6707 = vst [vmem:[#allocation2 + $0x80] sm:$0xff] %v6677_v55  ;;  %v6769_v32 = vmax.f32 %v6677_v55, 0.0  ;;  %v6770_v21 = vmax.f32 %v6738_v1, 0.0  ;;  %v6736_v9 = vld [vmem:[#allocation2 + $0x78] sm:$0xff]  ;;  %6712 = vst [vmem:[#allocation2 + $0xa8] sm:$0x7f] %v6682_v7 }
 0x411   : > { %6705 = vst [vmem:[#allocation2 + $0x70] sm:$0xff] %v6675_v4  ;;  %v6767_v40 = vmax.f32 %v6675_v4, 0.0  ;;  %v6768_v59 = vmax.f32 %v6736_v9, 0.0  ;;  %6710 = vst [vmem:[#allocation2 + $0x98] sm:$0x7f] %v6680_v3  ;;  %v7169_v43 = vpop.f32.mrb[24].mxu1 }
 0x412   : > { %6801 = vst [vmem:[%s9213_s17 + $0x80] sm:$0xff] %v6769_v32  ;;  %v6516_v63 = vld [vmem:[#allocation4 + $0x670] sm:$0xfe]  ;;  %6802 = vst [vmem:[%s9213_s17 + $0x88] sm:$0xff] %v6770_v21  ;;  %v4976_v34 = vpop.f32.mrb[25].mxu1 }
 0x413   : > { %6799 = vst [vmem:[%s9213_s17 + $0x70] sm:$0xff] %v6767_v40  ;;  %v6616_v57 = vrot.slane %v6516_v63, 1  ;;  %v6514_v39 = vld [vmem:[#allocation4 + $0x5e0] sm:$0xfe]  ;;  %5249 = vst [vmem:[#allocation4 + $0x790] sm:$0xff] %v7169_v43  ;;  %v7170_v61 = vpop.f32.mrb[26].mxu1 }
 0x414   : > { %6800 = vst [vmem:[%s9213_s17 + $0x78] sm:$0xff] %v6768_v59  ;;  %v6613_v37 = vrot.slane %v6514_v39, 1  ;;  %5231 = vst [vmem:[#allocation4 + $0x700] sm:$0xff] %v4976_v34  ;;  %v6623_v36 = vrot.slane %v7170_v61, 1  ;;  %v4979_v29 = vpop.f32.mrb[27].mxu1  ;;  %v6432_v1 = vld [vmem:[#allocation2 + $0xd0] sm:$0xff] }
 0x415   : > { %v6618_v47 = vsel %vm2313_vm0, %v6616_v57, %v6617_v50  ;;  %5258 = vst [vmem:[#allocation4 + $0x7d8] sm:$0xff] %v7170_v61  ;;  %5240 = vst [vmem:[#allocation4 + $0x748] sm:$0xff] %v4979_v29  ;;  %v6620_v22 = vrot.slane %v4979_v29, 1  ;;  %v6555_v50 = vld [vmem:[#allocation2 + $0xe8] sm:$0x7f]  ;;  %v6462_v59 = vadd.f32 %v6432_v1, %v9191_v17 }
 0x416   : > { %v6681_v56 = vadd.f32 %v6618_v47, %v6456_v54  ;;  %v6615_v49 = vsel %vm2313_vm0, %v6613_v37, %v6614_v0  ;;  %v6686_v52 = vadd.f32 %v6623_v36, %v6551_v27  ;;  %v6434_v0 = vld [vmem:[#allocation2 + $0xe0] sm:$0xff] }
 0x417   : > { %v6679_v25 = vadd.f32 %v6615_v49, %v6544_v44  ;;  %v6742_v14 = vld [vmem:[#allocation2 + $0xa8] sm:$0xff]  ;;  %v6684_v62 = vadd.f32 %v6620_v22, %v6549_v2  ;;  %v6464_v9 = vadd.f32 %v6434_v0, %v9199_v33 }
 0x418   : > { %6711 = vst [vmem:[#allocation2 + $0xa0] sm:$0xff] %v6681_v56  ;;  %v6773_v12 = vmax.f32 %v6681_v56, 0.0  ;;  %v6774_v20 = vmax.f32 %v6742_v14, 0.0  ;;  %v6740_v30 = vld [vmem:[#allocation2 + $0x98] sm:$0xff]  ;;  %6716 = vst [vmem:[#allocation2 + $0xc8] sm:$0x7f] %v6686_v52 }
 0x419   : > { %6709 = vst [vmem:[#allocation2 + $0x90] sm:$0xff] %v6679_v25  ;;  %v6771_v15 = vmax.f32 %v6679_v25, 0.0  ;;  %v6772_v28 = vmax.f32 %v6740_v30, 0.0  ;;  %6714 = vst [vmem:[#allocation2 + $0xb8] sm:$0x7f] %v6684_v62  ;;  %v7173_v13 = vpop.f32.mrb[28].mxu1 }
 0x41a   : > { %6805 = vst [vmem:[%s9213_s17 + $0xa0] sm:$0xff] %v6773_v12  ;;  %v6520_v38 = vld [vmem:[#allocation4 + $0x790] sm:$0xfe]  ;;  %6806 = vst [vmem:[%s9213_s17 + $0xa8] sm:$0xff] %v6774_v20  ;;  %v4992_v53 = vpop.f32.mrb[29].mxu1 }
 0x41b   : > { %6803 = vst [vmem:[%s9213_s17 + $0x90] sm:$0xff] %v6771_v15  ;;  %v6622_v42 = vrot.slane %v6520_v38, 1  ;;  %v6518_v18 = vld [vmem:[#allocation4 + $0x700] sm:$0xfe]  ;;  %5285 = vst [vmem:[#allocation4 + $0x8b0] sm:$0xff] %v7173_v13  ;;  %v7174_v19 = vpop.f32.mrb[30].mxu1 }
 0x41c   : > { %6804 = vst [vmem:[%s9213_s17 + $0x98] sm:$0xff] %v6772_v28  ;;  %v6619_v58 = vrot.slane %v6518_v18, 1  ;;  %5267 = vst [vmem:[#allocation4 + $0x820] sm:$0xff] %v4992_v53  ;;  %v6629_v35 = vrot.slane %v7174_v19, 1  ;;  %v4995_v16 = vpop.f32.mrb[31].mxu1 }
 0x41d   : > { %v6624_v5 = vsel %vm2313_vm0, %v6622_v42, %v6623_v36  ;;  %5294 = vst [vmem:[#allocation4 + $0x8f8] sm:$0xff] %v7174_v19  ;;  %5276 = vst [vmem:[#allocation4 + $0x868] sm:$0xff] %v4995_v16  ;;  %v6626_v11 = vrot.slane %v4995_v16, 1 }
 0x41e   : > { %v6685_v51 = vadd.f32 %v6624_v5, %v6460_v23  ;;  %v6621_v31 = vsel %vm2313_vm0, %v6619_v58, %v6620_v22  ;;  %v6690_v41 = vadd.f32 %v6629_v35, %v6555_v50 }
 0x41f   : > { %v6683_v55 = vadd.f32 %v6621_v31, %v6458_v6  ;;  %v6746_v10 = vld [vmem:[#allocation2 + $0xc8] sm:$0xff]  ;;  %v6688_v24 = vadd.f32 %v6626_v11, %v6553_v60 }
 0x420   : > { %6715 = vst [vmem:[#allocation2 + $0xc0] sm:$0xff] %v6685_v51  ;;  %v6777_v46 = vmax.f32 %v6685_v51, 0.0  ;;  %v6778_v4 = vmax.f32 %v6746_v10, 0.0  ;;  %v6744_v7 = vld [vmem:[#allocation2 + $0xb8] sm:$0xff]  ;;  %6720 = vst [vmem:[#allocation2 + $0xe8] sm:$0x7f] %v6690_v41 }
 0x421   : > { %6713 = vst [vmem:[#allocation2 + $0xb0] sm:$0xff] %v6683_v55  ;;  %v6775_v48 = vmax.f32 %v6683_v55, 0.0  ;;  %v6776_v32 = vmax.f32 %v6744_v7, 0.0  ;;  %6718 = vst [vmem:[#allocation2 + $0xd8] sm:$0x7f] %v6688_v24 }
 0x422   : > { %6809 = vst [vmem:[%s9213_s17 + $0xc0] sm:$0xff] %v6777_v46  ;;  %v6524_v3 = vld [vmem:[#allocation4 + $0x8b0] sm:$0xfe]  ;;  %6810 = vst [vmem:[%s9213_s17 + $0xc8] sm:$0xff] %v6778_v4 }
 0x423   : > { %6807 = vst [vmem:[%s9213_s17 + $0xb0] sm:$0xff] %v6775_v48  ;;  %v6628_v8 = vrot.slane %v6524_v3, 1  ;;  %v6522_v21 = vld [vmem:[#allocation4 + $0x820] sm:$0xfe]  ;;  %6808 = vst [vmem:[%s9213_s17 + $0xb8] sm:$0xff] %v6776_v32 }
 0x424   : > { %v6625_v40 = vrot.slane %v6522_v21, 1 }
 0x425   : > { %v6630_v63 = vsel %vm2313_vm0, %v6628_v8, %v6629_v35 }
 0x426   : > { %v6689_v43 = vadd.f32 %v6630_v63, %v6464_v9  ;;  %v6627_v57 = vsel %vm2313_vm0, %v6625_v40, %v6626_v11 }
 0x427   : > { %v6687_v39 = vadd.f32 %v6627_v57, %v6462_v59  ;;  %v6750_v34 = vld [vmem:[#allocation2 + $0xe8] sm:$0xff] }
 0x428   : > { %6719 = vst [vmem:[#allocation2 + $0xe0] sm:$0xff] %v6689_v43  ;;  %v6781_v54 = vmax.f32 %v6689_v43, 0.0  ;;  %v6782_v37 = vmax.f32 %v6750_v34, 0.0  ;;  %v6748_v61 = vld [vmem:[#allocation2 + $0xd8] sm:$0xff] }
 0x429   : > { %6717 = vst [vmem:[#allocation2 + $0xd0] sm:$0xff] %v6687_v39  ;;  %v6779_v33 = vmax.f32 %v6687_v39, 0.0  ;;  %v6780_v47 = vmax.f32 %v6748_v61, 0.0 }
 0x42a   : > { %6813 = vst [vmem:[%s9213_s17 + $0xe0] sm:$0xff] %v6781_v54  ;;  %6814 = vst [vmem:[%s9213_s17 + $0xe8] sm:$0xff] %v6782_v37 }
 0x42b   : > { %6811 = vst [vmem:[%s9213_s17 + $0xd0] sm:$0xff] %v6779_v33  ;;  %6812 = vst [vmem:[%s9213_s17 + $0xd8] sm:$0xff] %v6780_v47 }
 0x42c PF: > { %s15_s18 = sadd.s32 1, %s7399_s18  }
 0x42d   : > { %p12_p4 = scmp.ge.s32.totalorder %s15_s18, 4  }
 0x42f   :  { %14 = sbr.rel (!%p12_p4) target bundleno = 1 (0x1), region = 72 }

</bundles_post_ra>
